<compile_context>
chip_gen: v7x
topology: tpu7x:2x2x1
jax: 0.10.0
libtpu: 0.0.40
codegen_flags: <defaults>
</compile_context>

<pallas_src>
import functools

import jax
import jax.numpy as jnp
from jax.experimental import pallas as pl
from jax.experimental.pallas import tpu as pltpu

OUT_SLAB_W = 128   # lane-dense fused output slab width
IN_MLP_L = 2       # depth of MLPs inside the interaction networks (assumed)

# contract dim 0 of lhs with dim 0 of rhs  =>  lhs^T @ rhs (TN matmul)
_TN_DIMS = (((0,), (0,)), ((), ()))


def _round_up(v, m):
    return ((v + m - 1) // m) * m


# ------------------------------ parameters ------------------------------
def _init_linear(key, fan_in, fan_out, bias=True):
    kw, kb = jax.random.split(key)
    bound = 1.0 / (fan_in ** 0.5)
    w = jax.random.uniform(kw, (fan_in, fan_out), jnp.float32, -bound, bound)
    b = (jax.random.uniform(kb, (1, fan_out), jnp.float32, -bound, bound)
         if bias else None)
    return {"w": w, "b": b}


def _init_mlp(key, dims, bias=True):
    """dims = [in, hidden, ..., out]; ReLU between layers, none after last."""
    keys = jax.random.split(key, len(dims) - 1)
    return [_init_linear(keys[i], dims[i], dims[i + 1], bias)
            for i in range(len(dims) - 1)]


def _init_split_mlp(key, in_dims, hidden, out_dim, L, bias=True):
    """MLP whose input is a concatenation of segments of widths `in_dims`.
    First-layer weight is stored pre-split so the kernel computes
    sum_i x_i @ W_i (no lane-axis concatenation inside the kernel)."""
    dims = [sum(in_dims)] + [hidden] * (L - 1) + [out_dim]
    keys = jax.random.split(key, L)
    kw, kb = jax.random.split(keys[0])
    bound = 1.0 / (dims[0] ** 0.5)
    w_full = jax.random.uniform(kw, (dims[0], dims[1]), jnp.float32, -bound, bound)
    first_ws, off = [], 0
    for d in in_dims:
        first_ws.append(w_full[off:off + d])
        off += d
    first_b = (jax.random.uniform(kb, (1, dims[1]), jnp.float32, -bound, bound)
               if bias else None)
    rest = [_init_linear(keys[i], dims[i], dims[i + 1], bias) for i in range(1, L)]
    return {"first_ws": first_ws, "first_b": first_b, "rest": rest}


def build_params(key, *, node_indim, edge_indim, h_dim, e_dim, h_outdim,
                 hidden_dim, L_hc):
    keys = jax.random.split(key, 6 + 2 * L_hc)
    k = iter(keys)
    return {
        # hc_node_encoder / hc_edge_encoder: MLP(..., L=2, bias=False)
        "node_enc": _init_mlp(next(k), [node_indim, hidden_dim, h_dim], bias=False),
        "edge_enc": _init_mlp(next(k), [edge_indim, hidden_dim, e_dim], bias=False),
        # p_beta / p_cluster: MLP(h_dim, ., hidden_dim, L=3)
        "p_beta": _init_mlp(next(k), [h_dim, hidden_dim, hidden_dim, 1]),
        "p_cluster": _init_mlp(next(k), [h_dim, hidden_dim, hidden_dim, h_outdim]),
        # p_track_param: IN(h_dim, (L_hc+1)*e_dim, node_outdim=1, edge_outdim=1)
        "tp_rel": _init_split_mlp(next(k), [h_dim, h_dim] + [e_dim] * (L_hc + 1),
                                  hidden_dim, 1, IN_MLP_L),
        "tp_obj": _init_split_mlp(next(k), [h_dim, 1], hidden_dim, 1, IN_MLP_L),
        # ResIN.identical_in_layers: L_hc residual IN layers (h_dim->h_dim, e_dim->e_dim)
        "resin": [
            {"rel": _init_split_mlp(next(k), [h_dim, h_dim, e_dim],
                                    hidden_dim, e_dim, IN_MLP_L),
             "obj": _init_split_mlp(next(k), [h_dim, e_dim],
                                    hidden_dim, h_dim, IN_MLP_L)}
            for _ in range(L_hc)],
    }


# --------------------------- in-kernel helpers ---------------------------
def _dense(x, w, b):
    y = jnp.dot(x, w, preferred_element_type=jnp.float32)
    return y if b is None else y + b


def _apply_mlp(x, layers):
    h = x
    for i, lyr in enumerate(layers):
        h = _dense(h, lyr["w"], lyr["b"])
        if i < len(layers) - 1:
            h = jnp.maximum(h, 0.0)
    return h


def _first_fold_tail(pre, p):
    """Finish a split-input MLP whose first-layer segment matmuls were already
    summed into `pre` (bias + ReLU + remaining layers)."""
    if p["first_b"] is not None:
        pre = pre + p["first_b"]
    if p["rest"]:
        pre = jnp.maximum(pre, 0.0)
        pre = _apply_mlp(pre, p["rest"])
    return pre


# ------------------------------ fused kernel ------------------------------
def _fused_tcn_kernel(x_ref, ea_ref, idx_ref, *rest, treedef, alpha, h_outdim):
    param_refs, out_ref = rest[:-1], rest[-1]
    p = jax.tree_util.tree_unflatten(treedef, [r[...] for r in param_refs])

    x = x_ref[...]                  # [N_pad, node_indim] f32
    ea = ea_ref[...]                # [E_pad, edge_indim] f32
    idx = idx_ref[...]              # [2, E_pad] int32 lane-major; -1 = dropped edge
    src = idx[0:1, :]               # [1, E_pad]
    dst = idx[1:2, :]               # [1, E_pad]

    n_pad = x.shape[0]
    e_pad = idx.shape[1]

    # One-hot incidence matrices [N_pad, E_pad] in bf16 (exact 0/1 values).
    # Dropped / padded edges (index -1) give an all-zero column.
    node_ids = jax.lax.broadcasted_iota(jnp.int32, (n_pad, e_pad), 0)
    g_src = (node_ids == src).astype(jnp.bfloat16)   # G_src[n,e]=1 iff src[e]==n
    g_dst = (node_ids == dst).astype(jnp.bfloat16)   # G_dst[n,e]=1 iff dst[e]==n

    def gather(g, node_feats):
        # edge_feats[e,:] = node_feats[idx[e],:]   (zero row for dropped edges)
        return jax.lax.dot_general(g, node_feats.astype(jnp.bfloat16), _TN_DIMS,
                                   preferred_element_type=jnp.float32)

    def scatter_add(edge_feats):
        # node_feats[n,:] = sum_{e: dst[e]==n} edge_feats[e,:]
        return jnp.dot(g_dst, edge_feats.astype(jnp.bfloat16),
                       preferred_element_type=jnp.float32)

    # Encoders (ReLU inside the MLP + the outer ReLU from ModularGraphTCN).
    h = jnp.maximum(_apply_mlp(x, p["node_enc"]), 0.0)
    e = jnp.maximum(_apply_mlp(ea, p["edge_enc"]), 0.0)

    # Incremental accumulator for p_track_param's rel first layer over
    # cat(edge_attrs) -- no list of [E,*] buffers kept alive.
    tp_rel = p["tp_rel"]
    tp_e_acc = jnp.dot(e, tp_rel["first_ws"][2], preferred_element_type=jnp.float32)

    # ResIN: residual interaction-network stack (first-layer weights folded
    # through the gathers/scatter).
    for li, lyr in enumerate(p["resin"]):
        rel, obj = lyr["rel"], lyr["obj"]
        ph_i = jnp.dot(h, rel["first_ws"][0], preferred_element_type=jnp.float32)
        ph_j = jnp.dot(h, rel["first_ws"][1], preferred_element_type=jnp.float32)
        pre_e = (gather(g_dst, ph_i) + gather(g_src, ph_j)
                 + jnp.dot(e, rel["first_ws"][2], preferred_element_type=jnp.float32))
        e_t = _first_fold_tail(pre_e, rel)                       # [E_pad, e_dim]

        pe = jnp.dot(e_t, obj["first_ws"][1], preferred_element_type=jnp.float32)
        pre_n = (jnp.dot(h, obj["first_ws"][0], preferred_element_type=jnp.float32)
                 + scatter_add(pe))
        dh = _first_fold_tail(pre_n, obj)                        # [N_pad, h_dim]

        h = alpha * h + (1.0 - alpha) * dh
        e = e_t
        tp_e_acc = tp_e_acc + jnp.dot(e_t, tp_rel["first_ws"][3 + li],
                                      preferred_element_type=jnp.float32)

    # Heads (share the VMEM-resident h).  Exact sigmoid (parity with torch).
    z = _apply_mlp(h, p["p_beta"])
    beta = 1.0 / (1.0 + jnp.exp(-z)) + 1e-8                      # [N_pad, 1]
    hout = _apply_mlp(h, p["p_cluster"])                         # [N_pad, h_outdim]

    # p_track_param: one more IN over cat(edge_attrs) (never concatenated --
    # its first-layer edge contribution was accumulated incrementally above).
    tp_ph_i = jnp.dot(h, tp_rel["first_ws"][0], preferred_element_type=jnp.float32)
    tp_ph_j = jnp.dot(h, tp_rel["first_ws"][1], preferred_element_type=jnp.float32)
    pre_e = gather(g_dst, tp_ph_i) + gather(g_src, tp_ph_j) + tp_e_acc
    e_tp = _first_fold_tail(pre_e, tp_rel)                       # [E_pad, 1]

    tp_obj = p["tp_obj"]
    pe = jnp.dot(e_tp, tp_obj["first_ws"][1], preferred_element_type=jnp.float32)
    pre_n = (jnp.dot(h, tp_obj["first_ws"][0], preferred_element_type=jnp.float32)
             + scatter_add(pe))
    track = _first_fold_tail(pre_n, tp_obj)                      # [N_pad, 1]

    # Register-assembled lane-dense output slab [beta | H | P | 0...], written
    # with ONE unmasked full-width store (no zero-fill pass, no masked stores).
    lane = jax.lax.broadcasted_iota(jnp.int32, (1, OUT_SLAB_W), 1)
    slab = beta * (lane == 0).astype(jnp.float32)
    for c in range(h_outdim):
        slab = slab + hout[:, c:c + 1] * (lane == (1 + c)).astype(jnp.float32)
    slab = slab + track * (lane == (1 + h_outdim)).astype(jnp.float32)
    out_ref[...] = slab


# ------------------------------ model wrapper ------------------------------
def perfect_ec_graph_tcn(params, x, edge_index, edge_attr, edge_labels, *,
                         alpha=0.5, threshold=0.5, h_outdim=2):
    n = x.shape[0]
    e = edge_index.shape[1]

    # Perfect edge classifier (tpr = tnr = 1.0): weights are the truth labels.
    edge_weights = edge_labels.astype(jnp.float32).reshape(e, 1)
    edge_mask = edge_weights[:, 0] > threshold
    hit_mask = jnp.ones((n,), jnp.bool_)            # mask_orphan_nodes=False

    # Pad rows ONCE (lane-dense incidence / no per-kernel re-padding).
    n_pad = max(_round_up(n, 128), 128)
    e_pad = max(_round_up(e, 128), 128)
    x_p = jnp.pad(x.astype(jnp.float32), ((0, n_pad - n), (0, 0)))
    ea_p = jnp.pad(edge_attr.astype(jnp.float32), ((0, e_pad - e), (0, 0)))

    # edge_subgraph: drop masked edges by pointing them at node -1
    # (all-zero one-hot column -> zero contribution everywhere).
    src = jnp.where(edge_mask, edge_index[0].astype(jnp.int32), -1)
    dst = jnp.where(edge_mask, edge_index[1].astype(jnp.int32), -1)
    src_p = jnp.pad(src, (0, e_pad - e), constant_values=-1)
    dst_p = jnp.pad(dst, (0, e_pad - e), constant_values=-1)
    idx = jnp.stack([src_p, dst_p], axis=0)          # (2, E_pad) lane-major int32

    flat, treedef = jax.tree_util.tree_flatten(params)
    kernel = functools.partial(_fused_tcn_kernel, treedef=treedef,
                               alpha=float(alpha), h_outdim=int(h_outdim))
    n_in = 3 + len(flat)

    # Explicit VMEM budget: incidence build temporaries + lane-padded
    # activations + inputs + (double-buffered) params.  Dense-incidence design
    # must fit a v7x TensorCore (64 MiB VMEM, keep <= ~56 MiB).
    param_bytes = sum(int(a.size) * 4 for a in flat)
    vmem_est = (3 * n_pad * e_pad * 4            # int32 iota + 2 bf16 one-hots
                + 8 * e_pad * 128 * 4            # edge-level activations
                + 12 * n_pad * 128 * 4           # node-level activations + slab
                + 2 * (x_p.size + ea_p.size + idx.size) * 4
                + 2 * param_bytes)
    if vmem_est > (56 << 20):
        raise ValueError(
            "graph too large for the dense-incidence fused kernel under the "
            "v7x 64 MiB VMEM budget; use the edge-tiled path (see TODO).")
    vmem_limit = int(min(max(vmem_est + (4 << 20), 32 << 20), 56 << 20))

    slab = pl.pallas_call(
        kernel,
        out_shape=jax.ShapeDtypeStruct((n_pad, OUT_SLAB_W), jnp.float32),
        in_specs=[pl.BlockSpec(memory_space=pltpu.MemorySpace.VMEM)] * n_in,
        out_specs=pl.BlockSpec(memory_space=pltpu.MemorySpace.VMEM),
        compiler_params=pltpu.CompilerParams(vmem_limit_bytes=vmem_limit),
    )(x_p, ea_p, idx, *flat)

    return {
        "W": edge_weights,
        "H": slab[:n, 1:1 + h_outdim],
        "B": slab[:n, 0:1],
        "P": slab[:n, 1 + h_outdim:2 + h_outdim],
        "ec_hit_mask": hit_mask,
        "ec_edge_mask": edge_mask,
    }


if __name__ == "__main__":
    key = jax.random.PRNGKey(0)
    k_par, k_x, k_ea, k_ei, k_y = jax.random.split(key, 5)

    # Small graph consistent with the module defaults.
    N, E = 96, 256
    node_indim, edge_indim = 6, 4
    h_dim, e_dim, h_outdim, hidden_dim = 5, 4, 2, 40
    L_hc, alpha_hc = 3, 0.5

    params = build_params(k_par, node_indim=node_indim, edge_indim=edge_indim,
                          h_dim=h_dim, e_dim=e_dim, h_outdim=h_outdim,
                          hidden_dim=hidden_dim, L_hc=L_hc)
    x = jax.random.normal(k_x, (N, node_indim), jnp.float32)
    edge_attr = jax.random.normal(k_ea, (E, edge_indim), jnp.float32)
    edge_index = jax.random.randint(k_ei, (2, E), 0, N, dtype=jnp.int32)
    edge_labels = jax.random.bernoulli(k_y, 0.7, (E,))   # truth for the perfect EC

    fwd = jax.jit(functools.partial(perfect_ec_graph_tcn, alpha=alpha_hc,
                                    threshold=0.5, h_outdim=h_outdim))
    out = fwd(params, x, edge_index, edge_attr, edge_labels)
    jax.block_until_ready(out)

    assert out["H"].shape == (N, h_outdim)
    assert out["B"].shape == (N, 1)
    assert out["P"].shape == (N, 1)
    assert out["W"].shape == (E, 1)
    assert out["ec_edge_mask"].shape == (E,)
    assert out["ec_hit_mask"].shape == (N,)
    assert bool(jnp.all(jnp.isfinite(out["H"])))
    assert bool(jnp.all(jnp.isfinite(out["P"])))
    assert bool(jnp.all(out["B"] > 0.0))
    print("KERNEL_OK")
</pallas_src>

<mosaic_0001>
module attributes {stable_mosaic.version = 11 : i64} {
  func.func @_fused_tcn_kernel(%arg0: memref<128x6xf32, #tpu.memory_space<vmem>>, %arg1: memref<256x4xf32, #tpu.memory_space<vmem>>, %arg2: memref<2x256xi32, #tpu.memory_space<vmem>>, %arg3: memref<4x40xf32, #tpu.memory_space<vmem>>, %arg4: memref<40x4xf32, #tpu.memory_space<vmem>>, %arg5: memref<6x40xf32, #tpu.memory_space<vmem>>, %arg6: memref<40x5xf32, #tpu.memory_space<vmem>>, %arg7: memref<1x40xf32, #tpu.memory_space<vmem>>, %arg8: memref<5x40xf32, #tpu.memory_space<vmem>>, %arg9: memref<1x40xf32, #tpu.memory_space<vmem>>, %arg10: memref<40x40xf32, #tpu.memory_space<vmem>>, %arg11: memref<1x1xf32, #tpu.memory_space<vmem>>, %arg12: memref<40x1xf32, #tpu.memory_space<vmem>>, %arg13: memref<1x40xf32, #tpu.memory_space<vmem>>, %arg14: memref<5x40xf32, #tpu.memory_space<vmem>>, %arg15: memref<1x40xf32, #tpu.memory_space<vmem>>, %arg16: memref<40x40xf32, #tpu.memory_space<vmem>>, %arg17: memref<1x2xf32, #tpu.memory_space<vmem>>, %arg18: memref<40x2xf32, #tpu.memory_space<vmem>>, %arg19: memref<1x40xf32, #tpu.memory_space<vmem>>, %arg20: memref<5x40xf32, #tpu.memory_space<vmem>>, %arg21: memref<4x40xf32, #tpu.memory_space<vmem>>, %arg22: memref<1x5xf32, #tpu.memory_space<vmem>>, %arg23: memref<40x5xf32, #tpu.memory_space<vmem>>, %arg24: memref<1x40xf32, #tpu.memory_space<vmem>>, %arg25: memref<5x40xf32, #tpu.memory_space<vmem>>, %arg26: memref<5x40xf32, #tpu.memory_space<vmem>>, %arg27: memref<4x40xf32, #tpu.memory_space<vmem>>, %arg28: memref<1x4xf32, #tpu.memory_space<vmem>>, %arg29: memref<40x4xf32, #tpu.memory_space<vmem>>, %arg30: memref<1x40xf32, #tpu.memory_space<vmem>>, %arg31: memref<5x40xf32, #tpu.memory_space<vmem>>, %arg32: memref<4x40xf32, #tpu.memory_space<vmem>>, %arg33: memref<1x5xf32, #tpu.memory_space<vmem>>, %arg34: memref<40x5xf32, #tpu.memory_space<vmem>>, %arg35: memref<1x40xf32, #tpu.memory_space<vmem>>, %arg36: memref<5x40xf32, #tpu.memory_space<vmem>>, %arg37: memref<5x40xf32, #tpu.memory_space<vmem>>, %arg38: memref<4x40xf32, #tpu.memory_space<vmem>>, %arg39: memref<1x4xf32, #tpu.memory_space<vmem>>, %arg40: memref<40x4xf32, #tpu.memory_space<vmem>>, %arg41: memref<1x40xf32, #tpu.memory_space<vmem>>, %arg42: memref<5x40xf32, #tpu.memory_space<vmem>>, %arg43: memref<4x40xf32, #tpu.memory_space<vmem>>, %arg44: memref<1x5xf32, #tpu.memory_space<vmem>>, %arg45: memref<40x5xf32, #tpu.memory_space<vmem>>, %arg46: memref<1x40xf32, #tpu.memory_space<vmem>>, %arg47: memref<5x40xf32, #tpu.memory_space<vmem>>, %arg48: memref<5x40xf32, #tpu.memory_space<vmem>>, %arg49: memref<4x40xf32, #tpu.memory_space<vmem>>, %arg50: memref<1x4xf32, #tpu.memory_space<vmem>>, %arg51: memref<40x4xf32, #tpu.memory_space<vmem>>, %arg52: memref<1x40xf32, #tpu.memory_space<vmem>>, %arg53: memref<5x40xf32, #tpu.memory_space<vmem>>, %arg54: memref<1x40xf32, #tpu.memory_space<vmem>>, %arg55: memref<1x1xf32, #tpu.memory_space<vmem>>, %arg56: memref<40x1xf32, #tpu.memory_space<vmem>>, %arg57: memref<1x40xf32, #tpu.memory_space<vmem>>, %arg58: memref<5x40xf32, #tpu.memory_space<vmem>>, %arg59: memref<5x40xf32, #tpu.memory_space<vmem>>, %arg60: memref<4x40xf32, #tpu.memory_space<vmem>>, %arg61: memref<4x40xf32, #tpu.memory_space<vmem>>, %arg62: memref<4x40xf32, #tpu.memory_space<vmem>>, %arg63: memref<4x40xf32, #tpu.memory_space<vmem>>, %arg64: memref<1x1xf32, #tpu.memory_space<vmem>>, %arg65: memref<40x1xf32, #tpu.memory_space<vmem>>, %arg66: memref<128x128xf32, #tpu.memory_space<vmem>>) attributes {dimension_semantics = [], scalar_prefetch = 0 : i64, scratch_operands = 0 : i64, tpu.core_type = #tpu.core_type<tc>} {
    %c0 = arith.constant 0 : index
    %c0_0 = arith.constant 0 : index
    %0 = vector.load %arg3[%c0, %c0_0] : memref<4x40xf32, #tpu.memory_space<vmem>>, vector<4x40xf32>
    %c0_1 = arith.constant 0 : index
    %c0_2 = arith.constant 0 : index
    %1 = vector.load %arg4[%c0_1, %c0_2] : memref<40x4xf32, #tpu.memory_space<vmem>>, vector<40x4xf32>
    %c0_3 = arith.constant 0 : index
    %c0_4 = arith.constant 0 : index
    %2 = vector.load %arg5[%c0_3, %c0_4] : memref<6x40xf32, #tpu.memory_space<vmem>>, vector<6x40xf32>
    %c0_5 = arith.constant 0 : index
    %c0_6 = arith.constant 0 : index
    %3 = vector.load %arg6[%c0_5, %c0_6] : memref<40x5xf32, #tpu.memory_space<vmem>>, vector<40x5xf32>
    %c0_7 = arith.constant 0 : index
    %c0_8 = arith.constant 0 : index
    %4 = vector.load %arg7[%c0_7, %c0_8] : memref<1x40xf32, #tpu.memory_space<vmem>>, vector<1x40xf32>
    %c0_9 = arith.constant 0 : index
    %c0_10 = arith.constant 0 : index
    %5 = vector.load %arg8[%c0_9, %c0_10] : memref<5x40xf32, #tpu.memory_space<vmem>>, vector<5x40xf32>
    %c0_11 = arith.constant 0 : index
    %c0_12 = arith.constant 0 : index
    %6 = vector.load %arg9[%c0_11, %c0_12] : memref<1x40xf32, #tpu.memory_space<vmem>>, vector<1x40xf32>
    %c0_13 = arith.constant 0 : index
    %c0_14 = arith.constant 0 : index
    %7 = vector.load %arg10[%c0_13, %c0_14] : memref<40x40xf32, #tpu.memory_space<vmem>>, vector<40x40xf32>
    %c0_15 = arith.constant 0 : index
    %c0_16 = arith.constant 0 : index
    %8 = vector.load %arg11[%c0_15, %c0_16] : memref<1x1xf32, #tpu.memory_space<vmem>>, vector<1x1xf32>
    %c0_17 = arith.constant 0 : index
    %c0_18 = arith.constant 0 : index
    %9 = vector.load %arg12[%c0_17, %c0_18] : memref<40x1xf32, #tpu.memory_space<vmem>>, vector<40x1xf32>
    %c0_19 = arith.constant 0 : index
    %c0_20 = arith.constant 0 : index
    %10 = vector.load %arg13[%c0_19, %c0_20] : memref<1x40xf32, #tpu.memory_space<vmem>>, vector<1x40xf32>
    %c0_21 = arith.constant 0 : index
    %c0_22 = arith.constant 0 : index
    %11 = vector.load %arg14[%c0_21, %c0_22] : memref<5x40xf32, #tpu.memory_space<vmem>>, vector<5x40xf32>
    %c0_23 = arith.constant 0 : index
    %c0_24 = arith.constant 0 : index
    %12 = vector.load %arg15[%c0_23, %c0_24] : memref<1x40xf32, #tpu.memory_space<vmem>>, vector<1x40xf32>
    %c0_25 = arith.constant 0 : index
    %c0_26 = arith.constant 0 : index
    %13 = vector.load %arg16[%c0_25, %c0_26] : memref<40x40xf32, #tpu.memory_space<vmem>>, vector<40x40xf32>
    %c0_27 = arith.constant 0 : index
    %c0_28 = arith.constant 0 : index
    %14 = vector.load %arg17[%c0_27, %c0_28] : memref<1x2xf32, #tpu.memory_space<vmem>>, vector<1x2xf32>
    %c0_29 = arith.constant 0 : index
    %c0_30 = arith.constant 0 : index
    %15 = vector.load %arg18[%c0_29, %c0_30] : memref<40x2xf32, #tpu.memory_space<vmem>>, vector<40x2xf32>
    %c0_31 = arith.constant 0 : index
    %c0_32 = arith.constant 0 : index
    %16 = vector.load %arg19[%c0_31, %c0_32] : memref<1x40xf32, #tpu.memory_space<vmem>>, vector<1x40xf32>
    %c0_33 = arith.constant 0 : index
    %c0_34 = arith.constant 0 : index
    %17 = vector.load %arg20[%c0_33, %c0_34] : memref<5x40xf32, #tpu.memory_space<vmem>>, vector<5x40xf32>
    %c0_35 = arith.constant 0 : index
    %c0_36 = arith.constant 0 : index
    %18 = vector.load %arg21[%c0_35, %c0_36] : memref<4x40xf32, #tpu.memory_space<vmem>>, vector<4x40xf32>
    %c0_37 = arith.constant 0 : index
    %c0_38 = arith.constant 0 : index
    %19 = vector.load %arg22[%c0_37, %c0_38] : memref<1x5xf32, #tpu.memory_space<vmem>>, vector<1x5xf32>
    %c0_39 = arith.constant 0 : index
    %c0_40 = arith.constant 0 : index
    %20 = vector.load %arg23[%c0_39, %c0_40] : memref<40x5xf32, #tpu.memory_space<vmem>>, vector<40x5xf32>
    %c0_41 = arith.constant 0 : index
    %c0_42 = arith.constant 0 : index
    %21 = vector.load %arg24[%c0_41, %c0_42] : memref<1x40xf32, #tpu.memory_space<vmem>>, vector<1x40xf32>
    %c0_43 = arith.constant 0 : index
    %c0_44 = arith.constant 0 : index
    %22 = vector.load %arg25[%c0_43, %c0_44] : memref<5x40xf32, #tpu.memory_space<vmem>>, vector<5x40xf32>
    %c0_45 = arith.constant 0 : index
    %c0_46 = arith.constant 0 : index
    %23 = vector.load %arg26[%c0_45, %c0_46] : memref<5x40xf32, #tpu.memory_space<vmem>>, vector<5x40xf32>
    %c0_47 = arith.constant 0 : index
    %c0_48 = arith.constant 0 : index
    %24 = vector.load %arg27[%c0_47, %c0_48] : memref<4x40xf32, #tpu.memory_space<vmem>>, vector<4x40xf32>
    %c0_49 = arith.constant 0 : index
    %c0_50 = arith.constant 0 : index
    %25 = vector.load %arg28[%c0_49, %c0_50] : memref<1x4xf32, #tpu.memory_space<vmem>>, vector<1x4xf32>
    %c0_51 = arith.constant 0 : index
    %c0_52 = arith.constant 0 : index
    %26 = vector.load %arg29[%c0_51, %c0_52] : memref<40x4xf32, #tpu.memory_space<vmem>>, vector<40x4xf32>
    %c0_53 = arith.constant 0 : index
    %c0_54 = arith.constant 0 : index
    %27 = vector.load %arg30[%c0_53, %c0_54] : memref<1x40xf32, #tpu.memory_space<vmem>>, vector<1x40xf32>
    %c0_55 = arith.constant 0 : index
    %c0_56 = arith.constant 0 : index
    %28 = vector.load %arg31[%c0_55, %c0_56] : memref<5x40xf32, #tpu.memory_space<vmem>>, vector<5x40xf32>
    %c0_57 = arith.constant 0 : index
    %c0_58 = arith.constant 0 : index
    %29 = vector.load %arg32[%c0_57, %c0_58] : memref<4x40xf32, #tpu.memory_space<vmem>>, vector<4x40xf32>
    %c0_59 = arith.constant 0 : index
    %c0_60 = arith.constant 0 : index
    %30 = vector.load %arg33[%c0_59, %c0_60] : memref<1x5xf32, #tpu.memory_space<vmem>>, vector<1x5xf32>
    %c0_61 = arith.constant 0 : index
    %c0_62 = arith.constant 0 : index
    %31 = vector.load %arg34[%c0_61, %c0_62] : memref<40x5xf32, #tpu.memory_space<vmem>>, vector<40x5xf32>
    %c0_63 = arith.constant 0 : index
    %c0_64 = arith.constant 0 : index
    %32 = vector.load %arg35[%c0_63, %c0_64] : memref<1x40xf32, #tpu.memory_space<vmem>>, vector<1x40xf32>
    %c0_65 = arith.constant 0 : index
    %c0_66 = arith.constant 0 : index
    %33 = vector.load %arg36[%c0_65, %c0_66] : memref<5x40xf32, #tpu.memory_space<vmem>>, vector<5x40xf32>
    %c0_67 = arith.constant 0 : index
    %c0_68 = arith.constant 0 : index
    %34 = vector.load %arg37[%c0_67, %c0_68] : memref<5x40xf32, #tpu.memory_space<vmem>>, vector<5x40xf32>
    %c0_69 = arith.constant 0 : index
    %c0_70 = arith.constant 0 : index
    %35 = vector.load %arg38[%c0_69, %c0_70] : memref<4x40xf32, #tpu.memory_space<vmem>>, vector<4x40xf32>
    %c0_71 = arith.constant 0 : index
    %c0_72 = arith.constant 0 : index
    %36 = vector.load %arg39[%c0_71, %c0_72] : memref<1x4xf32, #tpu.memory_space<vmem>>, vector<1x4xf32>
    %c0_73 = arith.constant 0 : index
    %c0_74 = arith.constant 0 : index
    %37 = vector.load %arg40[%c0_73, %c0_74] : memref<40x4xf32, #tpu.memory_space<vmem>>, vector<40x4xf32>
    %c0_75 = arith.constant 0 : index
    %c0_76 = arith.constant 0 : index
    %38 = vector.load %arg41[%c0_75, %c0_76] : memref<1x40xf32, #tpu.memory_space<vmem>>, vector<1x40xf32>
    %c0_77 = arith.constant 0 : index
    %c0_78 = arith.constant 0 : index
    %39 = vector.load %arg42[%c0_77, %c0_78] : memref<5x40xf32, #tpu.memory_space<vmem>>, vector<5x40xf32>
    %c0_79 = arith.constant 0 : index
    %c0_80 = arith.constant 0 : index
    %40 = vector.load %arg43[%c0_79, %c0_80] : memref<4x40xf32, #tpu.memory_space<vmem>>, vector<4x40xf32>
    %c0_81 = arith.constant 0 : index
    %c0_82 = arith.constant 0 : index
    %41 = vector.load %arg44[%c0_81, %c0_82] : memref<1x5xf32, #tpu.memory_space<vmem>>, vector<1x5xf32>
    %c0_83 = arith.constant 0 : index
    %c0_84 = arith.constant 0 : index
    %42 = vector.load %arg45[%c0_83, %c0_84] : memref<40x5xf32, #tpu.memory_space<vmem>>, vector<40x5xf32>
    %c0_85 = arith.constant 0 : index
    %c0_86 = arith.constant 0 : index
    %43 = vector.load %arg46[%c0_85, %c0_86] : memref<1x40xf32, #tpu.memory_space<vmem>>, vector<1x40xf32>
    %c0_87 = arith.constant 0 : index
    %c0_88 = arith.constant 0 : index
    %44 = vector.load %arg47[%c0_87, %c0_88] : memref<5x40xf32, #tpu.memory_space<vmem>>, vector<5x40xf32>
    %c0_89 = arith.constant 0 : index
    %c0_90 = arith.constant 0 : index
    %45 = vector.load %arg48[%c0_89, %c0_90] : memref<5x40xf32, #tpu.memory_space<vmem>>, vector<5x40xf32>
    %c0_91 = arith.constant 0 : index
    %c0_92 = arith.constant 0 : index
    %46 = vector.load %arg49[%c0_91, %c0_92] : memref<4x40xf32, #tpu.memory_space<vmem>>, vector<4x40xf32>
    %c0_93 = arith.constant 0 : index
    %c0_94 = arith.constant 0 : index
    %47 = vector.load %arg50[%c0_93, %c0_94] : memref<1x4xf32, #tpu.memory_space<vmem>>, vector<1x4xf32>
    %c0_95 = arith.constant 0 : index
    %c0_96 = arith.constant 0 : index
    %48 = vector.load %arg51[%c0_95, %c0_96] : memref<40x4xf32, #tpu.memory_space<vmem>>, vector<40x4xf32>
    %c0_97 = arith.constant 0 : index
    %c0_98 = arith.constant 0 : index
    %49 = vector.load %arg52[%c0_97, %c0_98] : memref<1x40xf32, #tpu.memory_space<vmem>>, vector<1x40xf32>
    %c0_99 = arith.constant 0 : index
    %c0_100 = arith.constant 0 : index
    %50 = vector.load %arg53[%c0_99, %c0_100] : memref<5x40xf32, #tpu.memory_space<vmem>>, vector<5x40xf32>
    %c0_101 = arith.constant 0 : index
    %c0_102 = arith.constant 0 : index
    %51 = vector.load %arg54[%c0_101, %c0_102] : memref<1x40xf32, #tpu.memory_space<vmem>>, vector<1x40xf32>
    %c0_103 = arith.constant 0 : index
    %c0_104 = arith.constant 0 : index
    %52 = vector.load %arg55[%c0_103, %c0_104] : memref<1x1xf32, #tpu.memory_space<vmem>>, vector<1x1xf32>
    %c0_105 = arith.constant 0 : index
    %c0_106 = arith.constant 0 : index
    %53 = vector.load %arg56[%c0_105, %c0_106] : memref<40x1xf32, #tpu.memory_space<vmem>>, vector<40x1xf32>
    %c0_107 = arith.constant 0 : index
    %c0_108 = arith.constant 0 : index
    %54 = vector.load %arg57[%c0_107, %c0_108] : memref<1x40xf32, #tpu.memory_space<vmem>>, vector<1x40xf32>
    %c0_109 = arith.constant 0 : index
    %c0_110 = arith.constant 0 : index
    %55 = vector.load %arg58[%c0_109, %c0_110] : memref<5x40xf32, #tpu.memory_space<vmem>>, vector<5x40xf32>
    %c0_111 = arith.constant 0 : index
    %c0_112 = arith.constant 0 : index
    %56 = vector.load %arg59[%c0_111, %c0_112] : memref<5x40xf32, #tpu.memory_space<vmem>>, vector<5x40xf32>
    %c0_113 = arith.constant 0 : index
    %c0_114 = arith.constant 0 : index
    %57 = vector.load %arg60[%c0_113, %c0_114] : memref<4x40xf32, #tpu.memory_space<vmem>>, vector<4x40xf32>
    %c0_115 = arith.constant 0 : index
    %c0_116 = arith.constant 0 : index
    %58 = vector.load %arg61[%c0_115, %c0_116] : memref<4x40xf32, #tpu.memory_space<vmem>>, vector<4x40xf32>
    %c0_117 = arith.constant 0 : index
    %c0_118 = arith.constant 0 : index
    %59 = vector.load %arg62[%c0_117, %c0_118] : memref<4x40xf32, #tpu.memory_space<vmem>>, vector<4x40xf32>
    %c0_119 = arith.constant 0 : index
    %c0_120 = arith.constant 0 : index
    %60 = vector.load %arg63[%c0_119, %c0_120] : memref<4x40xf32, #tpu.memory_space<vmem>>, vector<4x40xf32>
    %c0_121 = arith.constant 0 : index
    %c0_122 = arith.constant 0 : index
    %61 = vector.load %arg64[%c0_121, %c0_122] : memref<1x1xf32, #tpu.memory_space<vmem>>, vector<1x1xf32>
    %c0_123 = arith.constant 0 : index
    %c0_124 = arith.constant 0 : index
    %62 = vector.load %arg65[%c0_123, %c0_124] : memref<40x1xf32, #tpu.memory_space<vmem>>, vector<40x1xf32>
    %c0_125 = arith.constant 0 : index
    %c0_126 = arith.constant 0 : index
    %63 = vector.load %arg0[%c0_125, %c0_126] : memref<128x6xf32, #tpu.memory_space<vmem>>, vector<128x6xf32>
    %c0_127 = arith.constant 0 : index
    %c0_128 = arith.constant 0 : index
    %64 = vector.load %arg1[%c0_127, %c0_128] : memref<256x4xf32, #tpu.memory_space<vmem>>, vector<256x4xf32>
    %c0_129 = arith.constant 0 : index
    %c0_130 = arith.constant 0 : index
    %65 = vector.load %arg2[%c0_129, %c0_130] : memref<2x256xi32, #tpu.memory_space<vmem>>, vector<2x256xi32>
    %66 = vector.extract_strided_slice %65 {offsets = [0, 0], sizes = [1, 256], strides = [1, 1]} : vector<2x256xi32> to vector<1x256xi32>
    %67 = vector.extract_strided_slice %65 {offsets = [1, 0], sizes = [1, 256], strides = [1, 1]} : vector<2x256xi32> to vector<1x256xi32>
    %68 = tpu.iota {dimensions = array<i32: 0>} : vector<128x256xi32>
    %69 = vector.broadcast %66 : vector<1x256xi32> to vector<128x256xi32>
    %70 = arith.cmpi eq, %68, %69 : vector<128x256xi32>
    %71 = arith.extui %70 : vector<128x256xi1> to vector<128x256xi32>
    %72 = arith.sitofp %71 : vector<128x256xi32> to vector<128x256xf32>
    %73 = arith.truncf %72 : vector<128x256xf32> to vector<128x256xbf16>
    %74 = vector.broadcast %67 : vector<1x256xi32> to vector<128x256xi32>
    %75 = arith.cmpi eq, %68, %74 : vector<128x256xi32>
    %76 = arith.extui %75 : vector<128x256xi1> to vector<128x256xi32>
    %77 = arith.sitofp %76 : vector<128x256xi32> to vector<128x256xf32>
    %78 = arith.truncf %77 : vector<128x256xf32> to vector<128x256xbf16>
    %cst = arith.constant dense<0.000000e+00> : vector<128x40xf32>
    %79 = tpu.matmul %63, %2, %cst {dimension_numbers = #tpu.dot_dimension_numbers<[1], [0], [0], [1], [0, 0, 1, 1], [], []>} : vector<128x6xf32>, vector<6x40xf32>, vector<128x40xf32> -> vector<128x40xf32>
    %cst_131 = arith.constant 0.000000e+00 : f32
    %80 = vector.broadcast %cst_131 : f32 to vector<128x40xf32>
    %81 = arith.maximumf %79, %80 : vector<128x40xf32>
    %cst_132 = arith.constant dense<0.000000e+00> : vector<128x5xf32>
    %82 = tpu.matmul %81, %3, %cst_132 {dimension_numbers = #tpu.dot_dimension_numbers<[1], [0], [0], [1], [0, 0, 1, 1], [], []>} : vector<128x40xf32>, vector<40x5xf32>, vector<128x5xf32> -> vector<128x5xf32>
    %cst_133 = arith.constant 0.000000e+00 : f32
    %83 = vector.broadcast %cst_133 : f32 to vector<128x5xf32>
    %84 = arith.maximumf %82, %83 : vector<128x5xf32>
    %cst_134 = arith.constant dense<0.000000e+00> : vector<256x40xf32>
    %85 = tpu.matmul %64, %0, %cst_134 {dimension_numbers = #tpu.dot_dimension_numbers<[1], [0], [0], [1], [0, 0, 1, 1], [], []>} : vector<256x4xf32>, vector<4x40xf32>, vector<256x40xf32> -> vector<256x40xf32>
    %cst_135 = arith.constant 0.000000e+00 : f32
    %86 = vector.broadcast %cst_135 : f32 to vector<256x40xf32>
    %87 = arith.maximumf %85, %86 : vector<256x40xf32>
    %cst_136 = arith.constant dense<0.000000e+00> : vector<256x4xf32>
    %88 = tpu.matmul %87, %1, %cst_136 {dimension_numbers = #tpu.dot_dimension_numbers<[1], [0], [0], [1], [0, 0, 1, 1], [], []>} : vector<256x40xf32>, vector<40x4xf32>, vector<256x4xf32> -> vector<256x4xf32>
    %cst_137 = arith.constant 0.000000e+00 : f32
    %89 = vector.broadcast %cst_137 : f32 to vector<256x4xf32>
    %90 = arith.maximumf %88, %89 : vector<256x4xf32>
    %cst_138 = arith.constant dense<0.000000e+00> : vector<256x40xf32>
    %91 = tpu.matmul %90, %57, %cst_138 {dimension_numbers = #tpu.dot_dimension_numbers<[1], [0], [0], [1], [0, 0, 1, 1], [], []>} : vector<256x4xf32>, vector<4x40xf32>, vector<256x40xf32> -> vector<256x40xf32>
    %cst_139 = arith.constant dense<0.000000e+00> : vector<128x40xf32>
    %92 = tpu.matmul %84, %22, %cst_139 {dimension_numbers = #tpu.dot_dimension_numbers<[1], [0], [0], [1], [0, 0, 1, 1], [], []>} : vector<128x5xf32>, vector<5x40xf32>, vector<128x40xf32> -> vector<128x40xf32>
    %cst_140 = arith.constant dense<0.000000e+00> : vector<128x40xf32>
    %93 = tpu.matmul %84, %23, %cst_140 {dimension_numbers = #tpu.dot_dimension_numbers<[1], [0], [0], [1], [0, 0, 1, 1], [], []>} : vector<128x5xf32>, vector<5x40xf32>, vector<128x40xf32> -> vector<128x40xf32>
    %94 = arith.truncf %92 : vector<128x40xf32> to vector<128x40xbf16>
    %cst_141 = arith.constant dense<0.000000e+00> : vector<256x40xf32>
    %95 = tpu.matmul %78, %94, %cst_141 {dimension_numbers = #tpu.dot_dimension_numbers<[0], [0], [1], [1], [0, 1, 1, 1], [], []>} : vector<128x256xbf16>, vector<128x40xbf16>, vector<256x40xf32> -> vector<256x40xf32>
    %96 = arith.truncf %93 : vector<128x40xf32> to vector<128x40xbf16>
    %cst_142 = arith.constant dense<0.000000e+00> : vector<256x40xf32>
    %97 = tpu.matmul %73, %96, %cst_142 {dimension_numbers = #tpu.dot_dimension_numbers<[0], [0], [1], [1], [0, 1, 1, 1], [], []>} : vector<128x256xbf16>, vector<128x40xbf16>, vector<256x40xf32> -> vector<256x40xf32>
    %98 = arith.addf %95, %97 : vector<256x40xf32>
    %cst_143 = arith.constant dense<0.000000e+00> : vector<256x40xf32>
    %99 = tpu.matmul %90, %24, %cst_143 {dimension_numbers = #tpu.dot_dimension_numbers<[1], [0], [0], [1], [0, 0, 1, 1], [], []>} : vector<256x4xf32>, vector<4x40xf32>, vector<256x40xf32> -> vector<256x40xf32>
    %100 = arith.addf %98, %99 : vector<256x40xf32>
    %101 = vector.broadcast %21 : vector<1x40xf32> to vector<256x40xf32>
    %102 = arith.addf %100, %101 : vector<256x40xf32>
    %cst_144 = arith.constant 0.000000e+00 : f32
    %103 = vector.broadcast %cst_144 : f32 to vector<256x40xf32>
    %104 = arith.maximumf %102, %103 : vector<256x40xf32>
    %cst_145 = arith.constant dense<0.000000e+00> : vector<256x4xf32>
    %105 = tpu.matmul %104, %26, %cst_145 {dimension_numbers = #tpu.dot_dimension_numbers<[1], [0], [0], [1], [0, 0, 1, 1], [], []>} : vector<256x40xf32>, vector<40x4xf32>, vector<256x4xf32> -> vector<256x4xf32>
    %106 = vector.broadcast %25 : vector<1x4xf32> to vector<256x4xf32>
    %107 = arith.addf %105, %106 : vector<256x4xf32>
    %cst_146 = arith.constant dense<0.000000e+00> : vector<256x40xf32>
    %108 = tpu.matmul %107, %18, %cst_146 {dimension_numbers = #tpu.dot_dimension_numbers<[1], [0], [0], [1], [0, 0, 1, 1], [], []>} : vector<256x4xf32>, vector<4x40xf32>, vector<256x40xf32> -> vector<256x40xf32>
    %cst_147 = arith.constant dense<0.000000e+00> : vector<128x40xf32>
    %109 = tpu.matmul %84, %17, %cst_147 {dimension_numbers = #tpu.dot_dimension_numbers<[1], [0], [0], [1], [0, 0, 1, 1], [], []>} : vector<128x5xf32>, vector<5x40xf32>, vector<128x40xf32> -> vector<128x40xf32>
    %110 = arith.truncf %108 : vector<256x40xf32> to vector<256x40xbf16>
    %cst_148 = arith.constant dense<0.000000e+00> : vector<128x40xf32>
    %111 = tpu.matmul %78, %110, %cst_148 {dimension_numbers = #tpu.dot_dimension_numbers<[1], [0], [0], [1], [0, 0, 1, 1], [], []>} : vector<128x256xbf16>, vector<256x40xbf16>, vector<128x40xf32> -> vector<128x40xf32>
    %112 = arith.addf %109, %111 : vector<128x40xf32>
    %113 = vector.broadcast %16 : vector<1x40xf32> to vector<128x40xf32>
    %114 = arith.addf %112, %113 : vector<128x40xf32>
    %cst_149 = arith.constant 0.000000e+00 : f32
    %115 = vector.broadcast %cst_149 : f32 to vector<128x40xf32>
    %116 = arith.maximumf %114, %115 : vector<128x40xf32>
    %cst_150 = arith.constant dense<0.000000e+00> : vector<128x5xf32>
    %117 = tpu.matmul %116, %20, %cst_150 {dimension_numbers = #tpu.dot_dimension_numbers<[1], [0], [0], [1], [0, 0, 1, 1], [], []>} : vector<128x40xf32>, vector<40x5xf32>, vector<128x5xf32> -> vector<128x5xf32>
    %118 = vector.broadcast %19 : vector<1x5xf32> to vector<128x5xf32>
    %119 = arith.addf %117, %118 : vector<128x5xf32>
    %cst_151 = arith.constant 5.000000e-01 : f32
    %120 = vector.broadcast %cst_151 : f32 to vector<128x5xf32>
    %121 = arith.mulf %120, %84 : vector<128x5xf32>
    %cst_152 = arith.constant 5.000000e-01 : f32
    %122 = vector.broadcast %cst_152 : f32 to vector<128x5xf32>
    %123 = arith.mulf %122, %119 : vector<128x5xf32>
    %124 = arith.addf %121, %123 : vector<128x5xf32>
    %cst_153 = arith.constant dense<0.000000e+00> : vector<256x40xf32>
    %125 = tpu.matmul %107, %58, %cst_153 {dimension_numbers = #tpu.dot_dimension_numbers<[1], [0], [0], [1], [0, 0, 1, 1], [], []>} : vector<256x4xf32>, vector<4x40xf32>, vector<256x40xf32> -> vector<256x40xf32>
    %126 = arith.addf %91, %125 : vector<256x40xf32>
    %cst_154 = arith.constant dense<0.000000e+00> : vector<128x40xf32>
    %127 = tpu.matmul %124, %33, %cst_154 {dimension_numbers = #tpu.dot_dimension_numbers<[1], [0], [0], [1], [0, 0, 1, 1], [], []>} : vector<128x5xf32>, vector<5x40xf32>, vector<128x40xf32> -> vector<128x40xf32>
    %cst_155 = arith.constant dense<0.000000e+00> : vector<128x40xf32>
    %128 = tpu.matmul %124, %34, %cst_155 {dimension_numbers = #tpu.dot_dimension_numbers<[1], [0], [0], [1], [0, 0, 1, 1], [], []>} : vector<128x5xf32>, vector<5x40xf32>, vector<128x40xf32> -> vector<128x40xf32>
    %129 = arith.truncf %127 : vector<128x40xf32> to vector<128x40xbf16>
    %cst_156 = arith.constant dense<0.000000e+00> : vector<256x40xf32>
    %130 = tpu.matmul %78, %129, %cst_156 {dimension_numbers = #tpu.dot_dimension_numbers<[0], [0], [1], [1], [0, 1, 1, 1], [], []>} : vector<128x256xbf16>, vector<128x40xbf16>, vector<256x40xf32> -> vector<256x40xf32>
    %131 = arith.truncf %128 : vector<128x40xf32> to vector<128x40xbf16>
    %cst_157 = arith.constant dense<0.000000e+00> : vector<256x40xf32>
    %132 = tpu.matmul %73, %131, %cst_157 {dimension_numbers = #tpu.dot_dimension_numbers<[0], [0], [1], [1], [0, 1, 1, 1], [], []>} : vector<128x256xbf16>, vector<128x40xbf16>, vector<256x40xf32> -> vector<256x40xf32>
    %133 = arith.addf %130, %132 : vector<256x40xf32>
    %cst_158 = arith.constant dense<0.000000e+00> : vector<256x40xf32>
    %134 = tpu.matmul %107, %35, %cst_158 {dimension_numbers = #tpu.dot_dimension_numbers<[1], [0], [0], [1], [0, 0, 1, 1], [], []>} : vector<256x4xf32>, vector<4x40xf32>, vector<256x40xf32> -> vector<256x40xf32>
    %135 = arith.addf %133, %134 : vector<256x40xf32>
    %136 = vector.broadcast %32 : vector<1x40xf32> to vector<256x40xf32>
    %137 = arith.addf %135, %136 : vector<256x40xf32>
    %cst_159 = arith.constant 0.000000e+00 : f32
    %138 = vector.broadcast %cst_159 : f32 to vector<256x40xf32>
    %139 = arith.maximumf %137, %138 : vector<256x40xf32>
    %cst_160 = arith.constant dense<0.000000e+00> : vector<256x4xf32>
    %140 = tpu.matmul %139, %37, %cst_160 {dimension_numbers = #tpu.dot_dimension_numbers<[1], [0], [0], [1], [0, 0, 1, 1], [], []>} : vector<256x40xf32>, vector<40x4xf32>, vector<256x4xf32> -> vector<256x4xf32>
    %141 = vector.broadcast %36 : vector<1x4xf32> to vector<256x4xf32>
    %142 = arith.addf %140, %141 : vector<256x4xf32>
    %cst_161 = arith.constant dense<0.000000e+00> : vector<256x40xf32>
    %143 = tpu.matmul %142, %29, %cst_161 {dimension_numbers = #tpu.dot_dimension_numbers<[1], [0], [0], [1], [0, 0, 1, 1], [], []>} : vector<256x4xf32>, vector<4x40xf32>, vector<256x40xf32> -> vector<256x40xf32>
    %cst_162 = arith.constant dense<0.000000e+00> : vector<128x40xf32>
    %144 = tpu.matmul %124, %28, %cst_162 {dimension_numbers = #tpu.dot_dimension_numbers<[1], [0], [0], [1], [0, 0, 1, 1], [], []>} : vector<128x5xf32>, vector<5x40xf32>, vector<128x40xf32> -> vector<128x40xf32>
    %145 = arith.truncf %143 : vector<256x40xf32> to vector<256x40xbf16>
    %cst_163 = arith.constant dense<0.000000e+00> : vector<128x40xf32>
    %146 = tpu.matmul %78, %145, %cst_163 {dimension_numbers = #tpu.dot_dimension_numbers<[1], [0], [0], [1], [0, 0, 1, 1], [], []>} : vector<128x256xbf16>, vector<256x40xbf16>, vector<128x40xf32> -> vector<128x40xf32>
    %147 = arith.addf %144, %146 : vector<128x40xf32>
    %148 = vector.broadcast %27 : vector<1x40xf32> to vector<128x40xf32>
    %149 = arith.addf %147, %148 : vector<128x40xf32>
    %cst_164 = arith.constant 0.000000e+00 : f32
    %150 = vector.broadcast %cst_164 : f32 to vector<128x40xf32>
    %151 = arith.maximumf %149, %150 : vector<128x40xf32>
    %cst_165 = arith.constant dense<0.000000e+00> : vector<128x5xf32>
    %152 = tpu.matmul %151, %31, %cst_165 {dimension_numbers = #tpu.dot_dimension_numbers<[1], [0], [0], [1], [0, 0, 1, 1], [], []>} : vector<128x40xf32>, vector<40x5xf32>, vector<128x5xf32> -> vector<128x5xf32>
    %153 = vector.broadcast %30 : vector<1x5xf32> to vector<128x5xf32>
    %154 = arith.addf %152, %153 : vector<128x5xf32>
    %cst_166 = arith.constant 5.000000e-01 : f32
    %155 = vector.broadcast %cst_166 : f32 to vector<128x5xf32>
    %156 = arith.mulf %155, %124 : vector<128x5xf32>
    %cst_167 = arith.constant 5.000000e-01 : f32
    %157 = vector.broadcast %cst_167 : f32 to vector<128x5xf32>
    %158 = arith.mulf %157, %154 : vector<128x5xf32>
    %159 = arith.addf %156, %158 : vector<128x5xf32>
    %cst_168 = arith.constant dense<0.000000e+00> : vector<256x40xf32>
    %160 = tpu.matmul %142, %59, %cst_168 {dimension_numbers = #tpu.dot_dimension_numbers<[1], [0], [0], [1], [0, 0, 1, 1], [], []>} : vector<256x4xf32>, vector<4x40xf32>, vector<256x40xf32> -> vector<256x40xf32>
    %161 = arith.addf %126, %160 : vector<256x40xf32>
    %cst_169 = arith.constant dense<0.000000e+00> : vector<128x40xf32>
    %162 = tpu.matmul %159, %44, %cst_169 {dimension_numbers = #tpu.dot_dimension_numbers<[1], [0], [0], [1], [0, 0, 1, 1], [], []>} : vector<128x5xf32>, vector<5x40xf32>, vector<128x40xf32> -> vector<128x40xf32>
    %cst_170 = arith.constant dense<0.000000e+00> : vector<128x40xf32>
    %163 = tpu.matmul %159, %45, %cst_170 {dimension_numbers = #tpu.dot_dimension_numbers<[1], [0], [0], [1], [0, 0, 1, 1], [], []>} : vector<128x5xf32>, vector<5x40xf32>, vector<128x40xf32> -> vector<128x40xf32>
    %164 = arith.truncf %162 : vector<128x40xf32> to vector<128x40xbf16>
    %cst_171 = arith.constant dense<0.000000e+00> : vector<256x40xf32>
    %165 = tpu.matmul %78, %164, %cst_171 {dimension_numbers = #tpu.dot_dimension_numbers<[0], [0], [1], [1], [0, 1, 1, 1], [], []>} : vector<128x256xbf16>, vector<128x40xbf16>, vector<256x40xf32> -> vector<256x40xf32>
    %166 = arith.truncf %163 : vector<128x40xf32> to vector<128x40xbf16>
    %cst_172 = arith.constant dense<0.000000e+00> : vector<256x40xf32>
    %167 = tpu.matmul %73, %166, %cst_172 {dimension_numbers = #tpu.dot_dimension_numbers<[0], [0], [1], [1], [0, 1, 1, 1], [], []>} : vector<128x256xbf16>, vector<128x40xbf16>, vector<256x40xf32> -> vector<256x40xf32>
    %168 = arith.addf %165, %167 : vector<256x40xf32>
    %cst_173 = arith.constant dense<0.000000e+00> : vector<256x40xf32>
    %169 = tpu.matmul %142, %46, %cst_173 {dimension_numbers = #tpu.dot_dimension_numbers<[1], [0], [0], [1], [0, 0, 1, 1], [], []>} : vector<256x4xf32>, vector<4x40xf32>, vector<256x40xf32> -> vector<256x40xf32>
    %170 = arith.addf %168, %169 : vector<256x40xf32>
    %171 = vector.broadcast %43 : vector<1x40xf32> to vector<256x40xf32>
    %172 = arith.addf %170, %171 : vector<256x40xf32>
    %cst_174 = arith.constant 0.000000e+00 : f32
    %173 = vector.broadcast %cst_174 : f32 to vector<256x40xf32>
    %174 = arith.maximumf %172, %173 : vector<256x40xf32>
    %cst_175 = arith.constant dense<0.000000e+00> : vector<256x4xf32>
    %175 = tpu.matmul %174, %48, %cst_175 {dimension_numbers = #tpu.dot_dimension_numbers<[1], [0], [0], [1], [0, 0, 1, 1], [], []>} : vector<256x40xf32>, vector<40x4xf32>, vector<256x4xf32> -> vector<256x4xf32>
    %176 = vector.broadcast %47 : vector<1x4xf32> to vector<256x4xf32>
    %177 = arith.addf %175, %176 : vector<256x4xf32>
    %cst_176 = arith.constant dense<0.000000e+00> : vector<256x40xf32>
    %178 = tpu.matmul %177, %40, %cst_176 {dimension_numbers = #tpu.dot_dimension_numbers<[1], [0], [0], [1], [0, 0, 1, 1], [], []>} : vector<256x4xf32>, vector<4x40xf32>, vector<256x40xf32> -> vector<256x40xf32>
    %cst_177 = arith.constant dense<0.000000e+00> : vector<128x40xf32>
    %179 = tpu.matmul %159, %39, %cst_177 {dimension_numbers = #tpu.dot_dimension_numbers<[1], [0], [0], [1], [0, 0, 1, 1], [], []>} : vector<128x5xf32>, vector<5x40xf32>, vector<128x40xf32> -> vector<128x40xf32>
    %180 = arith.truncf %178 : vector<256x40xf32> to vector<256x40xbf16>
    %cst_178 = arith.constant dense<0.000000e+00> : vector<128x40xf32>
    %181 = tpu.matmul %78, %180, %cst_178 {dimension_numbers = #tpu.dot_dimension_numbers<[1], [0], [0], [1], [0, 0, 1, 1], [], []>} : vector<128x256xbf16>, vector<256x40xbf16>, vector<128x40xf32> -> vector<128x40xf32>
    %182 = arith.addf %179, %181 : vector<128x40xf32>
    %183 = vector.broadcast %38 : vector<1x40xf32> to vector<128x40xf32>
    %184 = arith.addf %182, %183 : vector<128x40xf32>
    %cst_179 = arith.constant 0.000000e+00 : f32
    %185 = vector.broadcast %cst_179 : f32 to vector<128x40xf32>
    %186 = arith.maximumf %184, %185 : vector<128x40xf32>
    %cst_180 = arith.constant dense<0.000000e+00> : vector<128x5xf32>
    %187 = tpu.matmul %186, %42, %cst_180 {dimension_numbers = #tpu.dot_dimension_numbers<[1], [0], [0], [1], [0, 0, 1, 1], [], []>} : vector<128x40xf32>, vector<40x5xf32>, vector<128x5xf32> -> vector<128x5xf32>
    %188 = vector.broadcast %41 : vector<1x5xf32> to vector<128x5xf32>
    %189 = arith.addf %187, %188 : vector<128x5xf32>
    %cst_181 = arith.constant 5.000000e-01 : f32
    %190 = vector.broadcast %cst_181 : f32 to vector<128x5xf32>
    %191 = arith.mulf %190, %159 : vector<128x5xf32>
    %cst_182 = arith.constant 5.000000e-01 : f32
    %192 = vector.broadcast %cst_182 : f32 to vector<128x5xf32>
    %193 = arith.mulf %192, %189 : vector<128x5xf32>
    %194 = arith.addf %191, %193 : vector<128x5xf32>
    %cst_183 = arith.constant dense<0.000000e+00> : vector<256x40xf32>
    %195 = tpu.matmul %177, %60, %cst_183 {dimension_numbers = #tpu.dot_dimension_numbers<[1], [0], [0], [1], [0, 0, 1, 1], [], []>} : vector<256x4xf32>, vector<4x40xf32>, vector<256x40xf32> -> vector<256x40xf32>
    %196 = arith.addf %161, %195 : vector<256x40xf32>
    %cst_184 = arith.constant dense<0.000000e+00> : vector<128x40xf32>
    %197 = tpu.matmul %194, %5, %cst_184 {dimension_numbers = #tpu.dot_dimension_numbers<[1], [0], [0], [1], [0, 0, 1, 1], [], []>} : vector<128x5xf32>, vector<5x40xf32>, vector<128x40xf32> -> vector<128x40xf32>
    %198 = vector.broadcast %4 : vector<1x40xf32> to vector<128x40xf32>
    %199 = arith.addf %197, %198 : vector<128x40xf32>
    %cst_185 = arith.constant 0.000000e+00 : f32
    %200 = vector.broadcast %cst_185 : f32 to vector<128x40xf32>
    %201 = arith.maximumf %199, %200 : vector<128x40xf32>
    %cst_186 = arith.constant dense<0.000000e+00> : vector<128x40xf32>
    %202 = tpu.matmul %201, %7, %cst_186 {dimension_numbers = #tpu.dot_dimension_numbers<[1], [0], [0], [1], [0, 0, 1, 1], [], []>} : vector<128x40xf32>, vector<40x40xf32>, vector<128x40xf32> -> vector<128x40xf32>
    %203 = vector.broadcast %6 : vector<1x40xf32> to vector<128x40xf32>
    %204 = arith.addf %202, %203 : vector<128x40xf32>
    %cst_187 = arith.constant 0.000000e+00 : f32
    %205 = vector.broadcast %cst_187 : f32 to vector<128x40xf32>
    %206 = arith.maximumf %204, %205 : vector<128x40xf32>
    %cst_188 = arith.constant dense<0.000000e+00> : vector<128x1xf32>
    %207 = tpu.matmul %206, %9, %cst_188 {dimension_numbers = #tpu.dot_dimension_numbers<[1], [0], [0], [1], [0, 0, 1, 1], [], []>} : vector<128x40xf32>, vector<40x1xf32>, vector<128x1xf32> -> vector<128x1xf32>
    %208 = vector.broadcast %8 : vector<1x1xf32> to vector<128x1xf32>
    %209 = arith.addf %207, %208 : vector<128x1xf32>
    %cst_189 = arith.constant 0.000000e+00 : f32
    %210 = vector.broadcast %cst_189 : f32 to vector<128x1xf32>
    %211 = arith.subf %210, %209 : vector<128x1xf32>
    %212 = math.exp %211 : vector<128x1xf32>
    %cst_190 = arith.constant 1.000000e+00 : f32
    %213 = vector.broadcast %cst_190 : f32 to vector<128x1xf32>
    %214 = arith.addf %213, %212 : vector<128x1xf32>
    %cst_191 = arith.constant 1.000000e+00 : f32
    %215 = vector.broadcast %cst_191 : f32 to vector<128x1xf32>
    %216 = arith.divf %215, %214 : vector<128x1xf32>
    %cst_192 = arith.constant 9.99999993E-9 : f32
    %217 = vector.broadcast %cst_192 : f32 to vector<128x1xf32>
    %218 = arith.addf %216, %217 : vector<128x1xf32>
    %cst_193 = arith.constant dense<0.000000e+00> : vector<128x40xf32>
    %219 = tpu.matmul %194, %11, %cst_193 {dimension_numbers = #tpu.dot_dimension_numbers<[1], [0], [0], [1], [0, 0, 1, 1], [], []>} : vector<128x5xf32>, vector<5x40xf32>, vector<128x40xf32> -> vector<128x40xf32>
    %220 = vector.broadcast %10 : vector<1x40xf32> to vector<128x40xf32>
    %221 = arith.addf %219, %220 : vector<128x40xf32>
    %cst_194 = arith.constant 0.000000e+00 : f32
    %222 = vector.broadcast %cst_194 : f32 to vector<128x40xf32>
    %223 = arith.maximumf %221, %222 : vector<128x40xf32>
    %cst_195 = arith.constant dense<0.000000e+00> : vector<128x40xf32>
    %224 = tpu.matmul %223, %13, %cst_195 {dimension_numbers = #tpu.dot_dimension_numbers<[1], [0], [0], [1], [0, 0, 1, 1], [], []>} : vector<128x40xf32>, vector<40x40xf32>, vector<128x40xf32> -> vector<128x40xf32>
    %225 = vector.broadcast %12 : vector<1x40xf32> to vector<128x40xf32>
    %226 = arith.addf %224, %225 : vector<128x40xf32>
    %cst_196 = arith.constant 0.000000e+00 : f32
    %227 = vector.broadcast %cst_196 : f32 to vector<128x40xf32>
    %228 = arith.maximumf %226, %227 : vector<128x40xf32>
    %cst_197 = arith.constant dense<0.000000e+00> : vector<128x2xf32>
    %229 = tpu.matmul %228, %15, %cst_197 {dimension_numbers = #tpu.dot_dimension_numbers<[1], [0], [0], [1], [0, 0, 1, 1], [], []>} : vector<128x40xf32>, vector<40x2xf32>, vector<128x2xf32> -> vector<128x2xf32>
    %230 = vector.broadcast %14 : vector<1x2xf32> to vector<128x2xf32>
    %231 = arith.addf %229, %230 : vector<128x2xf32>
    %cst_198 = arith.constant dense<0.000000e+00> : vector<128x40xf32>
    %232 = tpu.matmul %194, %55, %cst_198 {dimension_numbers = #tpu.dot_dimension_numbers<[1], [0], [0], [1], [0, 0, 1, 1], [], []>} : vector<128x5xf32>, vector<5x40xf32>, vector<128x40xf32> -> vector<128x40xf32>
    %cst_199 = arith.constant dense<0.000000e+00> : vector<128x40xf32>
    %233 = tpu.matmul %194, %56, %cst_199 {dimension_numbers = #tpu.dot_dimension_numbers<[1], [0], [0], [1], [0, 0, 1, 1], [], []>} : vector<128x5xf32>, vector<5x40xf32>, vector<128x40xf32> -> vector<128x40xf32>
    %234 = arith.truncf %232 : vector<128x40xf32> to vector<128x40xbf16>
    %cst_200 = arith.constant dense<0.000000e+00> : vector<256x40xf32>
    %235 = tpu.matmul %78, %234, %cst_200 {dimension_numbers = #tpu.dot_dimension_numbers<[0], [0], [1], [1], [0, 1, 1, 1], [], []>} : vector<128x256xbf16>, vector<128x40xbf16>, vector<256x40xf32> -> vector<256x40xf32>
    %236 = arith.truncf %233 : vector<128x40xf32> to vector<128x40xbf16>
    %cst_201 = arith.constant dense<0.000000e+00> : vector<256x40xf32>
    %237 = tpu.matmul %73, %236, %cst_201 {dimension_numbers = #tpu.dot_dimension_numbers<[0], [0], [1], [1], [0, 1, 1, 1], [], []>} : vector<128x256xbf16>, vector<128x40xbf16>, vector<256x40xf32> -> vector<256x40xf32>
    %238 = arith.addf %235, %237 : vector<256x40xf32>
    %239 = arith.addf %238, %196 : vector<256x40xf32>
    %240 = vector.broadcast %54 : vector<1x40xf32> to vector<256x40xf32>
    %241 = arith.addf %239, %240 : vector<256x40xf32>
    %cst_202 = arith.constant 0.000000e+00 : f32
    %242 = vector.broadcast %cst_202 : f32 to vector<256x40xf32>
    %243 = arith.maximumf %241, %242 : vector<256x40xf32>
    %cst_203 = arith.constant dense<0.000000e+00> : vector<256x1xf32>
    %244 = tpu.matmul %243, %62, %cst_203 {dimension_numbers = #tpu.dot_dimension_numbers<[1], [0], [0], [1], [0, 0, 1, 1], [], []>} : vector<256x40xf32>, vector<40x1xf32>, vector<256x1xf32> -> vector<256x1xf32>
    %245 = vector.broadcast %61 : vector<1x1xf32> to vector<256x1xf32>
    %246 = arith.addf %244, %245 : vector<256x1xf32>
    %cst_204 = arith.constant dense<0.000000e+00> : vector<256x40xf32>
    %247 = tpu.matmul %246, %51, %cst_204 {dimension_numbers = #tpu.dot_dimension_numbers<[1], [0], [0], [1], [0, 0, 1, 1], [], []>} : vector<256x1xf32>, vector<1x40xf32>, vector<256x40xf32> -> vector<256x40xf32>
    %cst_205 = arith.constant dense<0.000000e+00> : vector<128x40xf32>
    %248 = tpu.matmul %194, %50, %cst_205 {dimension_numbers = #tpu.dot_dimension_numbers<[1], [0], [0], [1], [0, 0, 1, 1], [], []>} : vector<128x5xf32>, vector<5x40xf32>, vector<128x40xf32> -> vector<128x40xf32>
    %249 = arith.truncf %247 : vector<256x40xf32> to vector<256x40xbf16>
    %cst_206 = arith.constant dense<0.000000e+00> : vector<128x40xf32>
    %250 = tpu.matmul %78, %249, %cst_206 {dimension_numbers = #tpu.dot_dimension_numbers<[1], [0], [0], [1], [0, 0, 1, 1], [], []>} : vector<128x256xbf16>, vector<256x40xbf16>, vector<128x40xf32> -> vector<128x40xf32>
    %251 = arith.addf %248, %250 : vector<128x40xf32>
    %252 = vector.broadcast %49 : vector<1x40xf32> to vector<128x40xf32>
    %253 = arith.addf %251, %252 : vector<128x40xf32>
    %cst_207 = arith.constant 0.000000e+00 : f32
    %254 = vector.broadcast %cst_207 : f32 to vector<128x40xf32>
    %255 = arith.maximumf %253, %254 : vector<128x40xf32>
    %cst_208 = arith.constant dense<0.000000e+00> : vector<128x1xf32>
    %256 = tpu.matmul %255, %53, %cst_208 {dimension_numbers = #tpu.dot_dimension_numbers<[1], [0], [0], [1], [0, 0, 1, 1], [], []>} : vector<128x40xf32>, vector<40x1xf32>, vector<128x1xf32> -> vector<128x1xf32>
    %257 = vector.broadcast %52 : vector<1x1xf32> to vector<128x1xf32>
    %258 = arith.addf %256, %257 : vector<128x1xf32>
    %259 = tpu.iota {dimensions = array<i32: 1>} : vector<1x128xi32>
    %c0_i32 = arith.constant 0 : i32
    %260 = vector.broadcast %c0_i32 : i32 to vector<1x128xi32>
    %261 = arith.cmpi eq, %259, %260 : vector<1x128xi32>
    %262 = arith.extui %261 : vector<1x128xi1> to vector<1x128xi32>
    %263 = arith.sitofp %262 : vector<1x128xi32> to vector<1x128xf32>
    %264 = vector.broadcast %218 : vector<128x1xf32> to vector<128x128xf32>
    %265 = vector.broadcast %263 : vector<1x128xf32> to vector<128x128xf32>
    %266 = arith.mulf %264, %265 : vector<128x128xf32>
    %267 = vector.extract_strided_slice %231 {offsets = [0, 0], sizes = [128, 1], strides = [1, 1]} : vector<128x2xf32> to vector<128x1xf32>
    %c1_i32 = arith.constant 1 : i32
    %268 = vector.broadcast %c1_i32 : i32 to vector<1x128xi32>
    %269 = arith.cmpi eq, %259, %268 : vector<1x128xi32>
    %270 = arith.extui %269 : vector<1x128xi1> to vector<1x128xi32>
    %271 = arith.sitofp %270 : vector<1x128xi32> to vector<1x128xf32>
    %272 = vector.broadcast %267 : vector<128x1xf32> to vector<128x128xf32>
    %273 = vector.broadcast %271 : vector<1x128xf32> to vector<128x128xf32>
    %274 = arith.mulf %272, %273 : vector<128x128xf32>
    %275 = arith.addf %266, %274 : vector<128x128xf32>
    %276 = vector.extract_strided_slice %231 {offsets = [0, 1], sizes = [128, 1], strides = [1, 1]} : vector<128x2xf32> to vector<128x1xf32>
    %c2_i32 = arith.constant 2 : i32
    %277 = vector.broadcast %c2_i32 : i32 to vector<1x128xi32>
    %278 = arith.cmpi eq, %259, %277 : vector<1x128xi32>
    %279 = arith.extui %278 : vector<1x128xi1> to vector<1x128xi32>
    %280 = arith.sitofp %279 : vector<1x128xi32> to vector<1x128xf32>
    %281 = vector.broadcast %276 : vector<128x1xf32> to vector<128x128xf32>
    %282 = vector.broadcast %280 : vector<1x128xf32> to vector<128x128xf32>
    %283 = arith.mulf %281, %282 : vector<128x128xf32>
    %284 = arith.addf %275, %283 : vector<128x128xf32>
    %c3_i32 = arith.constant 3 : i32
    %285 = vector.broadcast %c3_i32 : i32 to vector<1x128xi32>
    %286 = arith.cmpi eq, %259, %285 : vector<1x128xi32>
    %287 = arith.extui %286 : vector<1x128xi1> to vector<1x128xi32>
    %288 = arith.sitofp %287 : vector<1x128xi32> to vector<1x128xf32>
    %289 = vector.broadcast %258 : vector<128x1xf32> to vector<128x128xf32>
    %290 = vector.broadcast %288 : vector<1x128xf32> to vector<128x128xf32>
    %291 = arith.mulf %289, %290 : vector<128x128xf32>
    %292 = arith.addf %284, %291 : vector<128x128xf32>
    %c0_209 = arith.constant 0 : index
    %c0_210 = arith.constant 0 : index
    %293 = vector.load %arg66[%c0_209, %c0_210] : memref<128x128xf32, #tpu.memory_space<vmem>>, vector<128x128xf32>
    tpu.vector_store %arg66[%c0_209, %c0_210], %292 {strides = array<i32>} : memref<128x128xf32, #tpu.memory_space<vmem>>, vector<128x128xf32>,
    return
  }
}

</mosaic_0001>

<bundles_post_ra>
// kernel: perfect_ec_graph_tcn.1
= control target key start
LH: loop header
LB: loop body
LE: loop exit
PB: predicated region body
PF: predicated region fallthrough
CT: control target
= control target key end

     0   :  { %s19015_s6 = smov 1   ;;  %s19016_s10 = smov 2   ;;  %s24008_s0 = inlined_call_operand.smem [shape: u32[67], index: -1, kind: input, shape index: {}] }
   0x1   :  { %s19108_s5 = sld [smem:[%s24008_s0]]   ;;  %s19017_s14 = smov 3  }
   0x2   :  { %s19113_s9 = sld [smem:[%s24008_s0 + %s19015_s6]]   ;;  %s19018_s18 = smov 4  }
   0x3   :  { %s19118_s13 = sld [smem:[%s24008_s0 + %s19016_s10]]   ;;  %s19019_s22 = smov 5  }
   0x4   :  { %s19123_s17 = sld [smem:[%s24008_s0 + %s19017_s14]]   ;;  %s19020_s26 = smov 6  }
   0x5   :  { %s19128_s21 = sld [smem:[%s24008_s0 + %s19018_s18]]   ;;  %s19021_s30 = smov 7  }
   0x6   :  { %s19133_s25 = sld [smem:[%s24008_s0 + %s19019_s22]]   ;;  %s19022_s4 = smov 8  }
   0x7   :  { %24292 = sst [smem:[#allocation36_spill]] %s19108_s5  ;;  %s19023_s10 = smov 9  }
   0x8   :  { %24293 = sst [smem:[#allocation37_spill]] %s19113_s9  ;;  %s19024_s15 = smov 10  }
   0x9   :  { %24294 = sst [smem:[#allocation38_spill]] %s19118_s13  ;;  %s19025_s20 = smov 11  }
   0xa   :  { %24295 = sst [smem:[#allocation39_spill]] %s19123_s17  ;;  %s19027_s1 = smov 13  }
   0xb   :  { %24296 = sst [smem:[#allocation40_spill]] %s19128_s21  ;;  %s19028_s7 = smov 14  }
   0xc   :  { %24297 = sst [smem:[#allocation41_spill]] %s19133_s25  ;;  %s19030_s22 = smov 16  }
   0xd   :  { %s19138_s29 = sld [smem:[%s24008_s0 + %s19020_s26]]   ;;  %s19026_s26 = smov 12  }
   0xe   :  { %s19143_s3 = sld [smem:[%s24008_s0 + %s19021_s30]]   ;;  %s19031_s28 = smov 17  }
   0xf   :  { %s19148_s8 = sld [smem:[%s24008_s0 + %s19022_s4]]   ;;  %s19034_s23 = smov 20  }
  0x10   :  { %s19153_s14 = sld [smem:[%s24008_s0 + %s19023_s10]]  }
  0x11   :  { %s19158_s19 = sld [smem:[%s24008_s0 + %s19024_s15]]   ;;  %s19029_s15 = smov 15  }
  0x12   :  { %s13474_s24 = sld [smem:[%s24008_s0 + %s19025_s20]]  }
  0x13   :  { %24298 = sst [smem:[#allocation42_spill]] %s19138_s29 }
  0x14   :  { %24299 = sst [smem:[#allocation43_spill]] %s19143_s3 }
  0x15   :  { %24300 = sst [smem:[#allocation44_spill]] %s19148_s8 }
  0x16   :  { %24301 = sst [smem:[#allocation45_spill]] %s19153_s14 }
  0x17   :  { %24302 = sst [smem:[#allocation46_spill]] %s19158_s19 }
  0x18   :  { %s19166_s30 = sld [smem:[%s24008_s0 + %s19026_s26]]   ;;  %v138_v0 = vstv %s13474_s24  ;;  %s19035_s24 = smov 21  }
  0x19   :  { %s19171_s6 = sld [smem:[%s24008_s0 + %s19027_s1]]   ;;  %139 = vst [vmem:[#allocation2] sm:$0x1] %v138_v0 }
  0x1a   :  { %s19176_s12 = sld [smem:[%s24008_s0 + %s19028_s7]]   ;;  %s19032_s7 = smov 18  }
  0x1b   :  { %s19181_s20 = sld [smem:[%s24008_s0 + %s19029_s15]]   ;;  %s19033_s15 = smov 19  }
  0x1c   :  { %s19186_s27 = sld [smem:[%s24008_s0 + %s19030_s22]]  }
  0x1d   :  { %s19191_s4 = sld [smem:[%s24008_s0 + %s19031_s28]]  }
  0x1e   :  { %24303 = sst [smem:[#allocation47_spill]] %s19166_s30 }
  0x1f   :  { %24304 = sst [smem:[#allocation48_spill]] %s19171_s6  ;;  %s19038_s6 = smov 24  }
  0x20   :  { %24305 = sst [smem:[#allocation49_spill]] %s19176_s12 }
  0x21   :  { %24306 = sst [smem:[#allocation50_spill]] %s19181_s20  ;;  %s19037_s20 = smov 23  }
  0x22   :  { %24307 = sst [smem:[#allocation51_spill]] %s19186_s27 }
  0x23   :  { %24308 = sst [smem:[#allocation52_spill]] %s19191_s4  ;;  %s19040_s4 = smov 26  }
  0x24   :  { %s19196_s16 = sld [smem:[%s24008_s0 + %s19032_s7]]   ;;  %s19036_s7 = smov 22  }
  0x25   :  { %s19201_s22 = sld [smem:[%s24008_s0 + %s19033_s15]]  }
  0x26   :  { %s19206_s28 = sld [smem:[%s24008_s0 + %s19034_s23]]  }
  0x27   :  { %s19211_s10 = sld [smem:[%s24008_s0 + %s19035_s24]]   ;;  %s19039_s24 = smov 25  }
  0x28   :  { %s19221_s14 = sld [smem:[%s24008_s0 + %s19037_s20]]   ;;  %s19041_s20 = smov 27  }
  0x29   :  { %s19226_s27 = sld [smem:[%s24008_s0 + %s19038_s6]]   ;;  %s19042_s6 = smov 28  }
  0x2a   :  { %24309 = sst [smem:[#allocation53_spill]] %s19196_s16 }
  0x2b   :  { %s19216_s16 = sld [smem:[%s24008_s0 + %s19036_s7]]   ;;  %s19080_s7 = smov 64  }
  0x2c   :  { %24310 = sst [smem:[#allocation54_spill]] %s19206_s28 }
  0x2d   :  { %24311 = sst [smem:[#allocation55_spill]] %s19211_s10 }
  0x2e   :  { %24312 = sst [smem:[#allocation56_spill]] %s19221_s14 }
  0x2f   :  { %s19231_s3 = sld [smem:[%s24008_s0 + %s19039_s24]]   ;;  %s19043_s24 = smov 29  }
  0x30   :  { %s19236_s30 = sld [smem:[%s24008_s0 + %s19040_s4]]   ;;  %s19044_s4 = smov 30  }
  0x31   :  { %s19241_s12 = sld [smem:[%s24008_s0 + %s19041_s20]]   ;;  %s19045_s20 = smov 31  }
  0x32   :  { %s19246_s19 = sld [smem:[%s24008_s0 + %s19042_s6]]   ;;  %s19046_s6 = smov 32  }
  0x33   :  { %s19251_s8 = sld [smem:[%s24008_s0 + %s19043_s24]]   ;;  %s19047_s24 = smov 33  }
  0x34   :  { %s19256_s14 = sld [smem:[%s24008_s0 + %s19044_s4]]   ;;  %s19048_s4 = smov 34  }
  0x35   :  { %24313 = sst [smem:[#allocation57_spill]] %s19231_s3 }
  0x36   :  { %24314 = sst [smem:[#allocation58_spill]] %s19236_s30 }
  0x37   :  { %24315 = sst [smem:[#allocation59_spill]] %s19241_s12 }
  0x38   :  { %s19261_s28 = sld [smem:[%s24008_s0 + %s19045_s20]]   ;;  %s19049_s20 = smov 35  }
  0x39   :  { %24316 = sst [smem:[#allocation60_spill]] %s19251_s8 }
  0x3a   :  { %s19266_s10 = sld [smem:[%s24008_s0 + %s19046_s6]]   ;;  %s19050_s6 = smov 36  }
  0x3b   :  { %s19271_s8 = sld [smem:[%s24008_s0 + %s19047_s24]]   ;;  %s19051_s24 = smov 37  }
  0x3c   :  { %s19276_s12 = sld [smem:[%s24008_s0 + %s19048_s4]]   ;;  %s19052_s4 = smov 38  }
  0x3d   :  { %s19291_s13 = sld [smem:[%s24008_s0 + %s19051_s24]]   ;;  %s19055_s24 = smov 41  }
  0x3e   :  { %24317 = sst [smem:[#allocation61_spill]] %s19261_s28 }
  0x3f   :  { %s19281_s28 = sld [smem:[%s24008_s0 + %s19049_s20]]   ;;  %s19053_s20 = smov 39  }
  0x40   :  { %24318 = sst [smem:[#allocation62_spill]] %s19266_s10 }
  0x41   :  { %s19286_s10 = sld [smem:[%s24008_s0 + %s19050_s6]]   ;;  %s19054_s6 = smov 40  }
  0x42   :  { %24319 = sst [smem:[#allocation63_spill]] %s19276_s12 }
  0x43   :  { %24321 = sst [smem:[#allocation65_spill]] %s19291_s13 }
  0x44   :  { %s19296_s12 = sld [smem:[%s24008_s0 + %s19052_s4]]   ;;  %s19056_s4 = smov 42  }
  0x45   :  { %s19301_s30 = sld [smem:[%s24008_s0 + %s19053_s20]]   ;;  %s19057_s20 = smov 43  }
  0x46   :  { %s19311_s13 = sld [smem:[%s24008_s0 + %s19055_s24]]   ;;  %s19059_s24 = smov 45  }
  0x47   :  { %24320 = sst [smem:[#allocation64_spill]] %s19286_s10 }
  0x48   :  { %s19306_s10 = sld [smem:[%s24008_s0 + %s19054_s6]]   ;;  %s19058_s6 = smov 44  }
  0x49   :  { %s19321_s3 = sld [smem:[%s24008_s0 + %s19057_s20]]   ;;  %s19061_s20 = smov 47  }
  0x4a   :  { %24322 = sst [smem:[#allocation66_spill]] %s19296_s12 }
  0x4b   :  { %s19316_s12 = sld [smem:[%s24008_s0 + %s19056_s4]]   ;;  %s19060_s4 = smov 46  }
  0x4c   :  { %s19331_s9 = sld [smem:[%s24008_s0 + %s19059_s24]]   ;;  %s19063_s24 = smov 49  }
  0x4e   :  { %24323 = sst [smem:[#allocation67_spill]] %s19306_s10 }
  0x4f   :  { %24325 = sst [smem:[#allocation69_spill]] %s19321_s3 }
  0x50   :  { %s19326_s10 = sld [smem:[%s24008_s0 + %s19058_s6]]   ;;  %s19062_s6 = smov 48  }
  0x51   :  { %24324 = sst [smem:[#allocation68_spill]] %s19316_s12 }
  0x52   :  { %24326 = sst [smem:[#allocation70_spill]] %s19331_s9 }
  0x53   :  { %s19336_s12 = sld [smem:[%s24008_s0 + %s19060_s4]]   ;;  %s19064_s4 = smov 50  }
  0x54   :  { %s19341_s3 = sld [smem:[%s24008_s0 + %s19061_s20]]   ;;  %s19065_s20 = smov 51  }
  0x55   :  { %s19346_s21 = sld [smem:[%s24008_s0 + %s19062_s6]]   ;;  %s19066_s6 = smov 52  }
  0x56   :  { %s19351_s9 = sld [smem:[%s24008_s0 + %s19063_s24]]   ;;  %s19067_s24 = smov 53  }
  0x57   :  { %s19356_s17 = sld [smem:[%s24008_s0 + %s19064_s4]]   ;;  %s19068_s4 = smov 54  }
  0x58   :  { %s19376_s29 = sld [smem:[%s24008_s0 + %s19068_s4]]   ;;  %s19072_s4 = smov 59  }
  0x59   :  { %s19396_s25 = sld [smem:[%s24008_s0 + %s19072_s4]]   ;;  %s19076_s4 = smov 63  }
  0x5a   :  { %24327 = sst [smem:[#allocation71_spill]] %s19341_s3 }
  0x5b   :  { %24328 = sst [smem:[#allocation72_spill]] %s19346_s21 }
  0x5c   :  { %24329 = sst [smem:[#allocation73_spill]] %s19351_s9 }
  0x5d   :  { %s19361_s3 = sld [smem:[%s24008_s0 + %s19065_s20]]   ;;  %s19069_s20 = smov 56  }
  0x5e   :  { %s19366_s21 = sld [smem:[%s24008_s0 + %s19066_s6]]   ;;  %s19070_s6 = smov 57  }
  0x5f   :  { %s19371_s9 = sld [smem:[%s24008_s0 + %s19067_s24]]   ;;  %s19071_s24 = smov 58  }
  0x60   :  { %s19386_s5 = sld [smem:[%s24008_s0 + %s19070_s6]]   ;;  %s19074_s6 = smov 61  }
  0x61   :  { %24335 = sst [smem:[#allocation79_spill]] %s19396_s25 }
  0x62   :  { %s19416_s25 = sld [smem:[%s24008_s0 + %s19076_s4]]  }
  0x63   :  { %24330 = sst [smem:[#allocation74_spill]] %s19361_s3 }
  0x64   :  { %s19381_s3 = sld [smem:[%s24008_s0 + %s19069_s20]]   ;;  %s19073_s20 = smov 60  }
  0x65   :  { %24331 = sst [smem:[#allocation75_spill]] %s19371_s9 }
  0x66   :  { %24333 = sst [smem:[#allocation77_spill]] %s19386_s5 }
  0x67   :  { %s19391_s9 = sld [smem:[%s24008_s0 + %s19071_s24]]   ;;  %s19075_s24 = smov 62  }
  0x68   :  { %s19406_s5 = sld [smem:[%s24008_s0 + %s19074_s6]]   ;;  %s19078_s6 = smov 66  }
  0x69   :  { %24339 = sst [smem:[#allocation83_spill]] %s19416_s25 }
  0x6a   :  { %24332 = sst [smem:[#allocation76_spill]] %s19381_s3 }
  0x6b   :  { %s19401_s3 = sld [smem:[%s24008_s0 + %s19073_s20]]   ;;  %s19077_s20 = smov 65  }
  0x6c   :  { %s13527_s25 = sld [smem:[%s24008_s0 + %s19080_s7]]  }
  0x6d   :  { %24334 = sst [smem:[#allocation78_spill]] %s19391_s9 }
  0x6e   :  { %24337 = sst [smem:[#allocation81_spill]] %s19406_s5 }
  0x6f   :  { %s19411_s9 = sld [smem:[%s24008_s0 + %s19075_s24]]   ;;  %s19079_s24 = smov 55  }
  0x70   :  { %s19426_s5 = sld [smem:[%s24008_s0 + %s19078_s6]]  }
  0x71   :  { %24336 = sst [smem:[#allocation80_spill]] %s19401_s3 }
  0x72   :  { %s19421_s3 = sld [smem:[%s24008_s0 + %s19077_s20]]   ;;  %v142_v2 = vstv %s13527_s25 }
  0x73   :  { %143 = vst [vmem:[#allocation4] sm:$0x1] %v142_v2 }
  0x75   :  { %24338 = sst [smem:[#allocation82_spill]] %s19411_s9 }
  0x76   :  { %s13518_s9 = sld [smem:[%s24008_s0 + %s19079_s24]]  }
  0x7c   :  { %v140_v1 = vstv %s13518_s9 }
  0x7d   :  { %141 = vst [vmem:[#allocation3] sm:$0x1] %v140_v1 }
  0x7e   :  { %144 = vsyncpa [#allocation6], 0 }
  0x7f   :  { %145 = vsyncpa [#allocation8], 0 }
  0x80   :  { %146 = vsyncpa [#allocation11], 0 }
  0x81   :  { %147 = vsyncpa [#allocation14], 0 }
  0x82   :  { %148 = vsyncpa [#allocation17], 0 }
  0x83   :  { %149 = vsyncpa [#allocation20], 0 }
  0x84   :  { %150 = vsyncpa [#allocation23], 0 }
  0x85   :  { %151 = vsyncpa [#allocation26], 0  ;;  %s19081_s20 = smov [#allocation7]   ;;  %s19082_s18 = smov [#allocation10]  }
  0x86   :  { %s210_s15 = sshll.u32 %s19081_s20, 4  ;;  %s238_s6 = sshll.u32 %s19082_s18, 4  ;;  %s211_s15 = int_to_ptr.vmem [resolvable:$true] %s210_s15  ;;  %s239_s6 = int_to_ptr.vmem [resolvable:$true] %s238_s6 }
  0x87   :  { %s18669_s0 = scalar_lea.hbm %s19216_s16, 16 }
  0x88   :  { %p18670_p0 = scmp.ne.s32.totalorder %s19216_s16, %s18669_s0  ;;  %p18673_p1 = scmp.lt.u32.totalorder %s18669_s0, %s19216_s16 }
  0x8a   :  { %p18675_p2 = pnand %p18673_p1, %p18670_p0 }
  0x8c   :  { %18678 = shalt.err (!%p18675_p2)
}
  0x8d   :  { %s18679_s9 = scalar_lea.vmem %s211_s15, 16  ;;  %s18683_s25 = scalar_lea.vmem %s211_s15, 32 }
  0x8e   :  { %p18680_p3 = scmp.ne.s32.totalorder %s211_s15, %s18679_s9  ;;  %p18684_p4 = scmp.lt.s32.totalorder %s211_s15, %s211_s15 }
  0x8f   :  { %p18685_p5 = scmp.lt.s32.totalorder %s18683_s25, %s18679_s9 }
  0x91   :  { %p18686_p6 = por %p18685_p5, %p18684_p4 }
  0x93   :  { %p18687_p7 = pnand %p18686_p6, %p18680_p3 }
  0x95   :  { %18690 = shalt.err (!%p18687_p7)
}
  0x96   :  { %213 = dma.hbm_to_vmem [thread:$0]  %s19216_s16, 16, %s211_s15, [#allocation8]  }
  0x97   :  { %s18691_s23 = scalar_lea.hbm %s19246_s19, 16 }
  0x98   :  { %p18692_p8 = scmp.ne.s32.totalorder %s19246_s19, %s18691_s23  ;;  %p18695_p9 = scmp.lt.u32.totalorder %s18691_s23, %s19246_s19 }
  0x9a   :  { %p18697_p10 = pnand %p18695_p9, %p18692_p8 }
  0x9c   :  { %18700 = shalt.err (!%p18697_p10)
}
  0x9d   :  { %s18701_s26 = scalar_lea.vmem %s239_s6, 16  ;;  %s18705_s24 = scalar_lea.vmem %s239_s6, 32 }
  0x9e   :  { %p18702_p11 = scmp.ne.s32.totalorder %s239_s6, %s18701_s26  ;;  %p18706_p12 = scmp.lt.s32.totalorder %s239_s6, %s239_s6 }
  0x9f   :  { %p18707_p13 = scmp.lt.s32.totalorder %s18705_s24, %s18701_s26 }
  0xa1   :  { %p18708_p0 = por %p18707_p13, %p18706_p12 }
  0xa3   :  { %p18709_p1 = pnand %p18708_p0, %p18702_p11 }
  0xa5   :  { %18712 = shalt.err (!%p18709_p1)
}
  0xa6   :  { %241 = dma.hbm_to_vmem [thread:$0]  %s19246_s19, 16, %s239_s6, [#allocation11]  }
  0xa7   :  { %s19083_s1 = smov [#allocation13]   ;;  %s19084_s2 = smov [#allocation16]  }
  0xa8   :  { %s264_s16 = sshll.u32 %s19083_s1, 4  ;;  %s292_s7 = sshll.u32 %s19084_s2, 4  ;;  %s265_s16 = int_to_ptr.vmem [resolvable:$true] %s264_s16  ;;  %s293_s7 = int_to_ptr.vmem [resolvable:$true] %s292_s7 }
  0xa9   :  { %s18713_s4 = scalar_lea.hbm %s19271_s8, 16 }
  0xaa   :  { %p18714_p2 = scmp.ne.s32.totalorder %s19271_s8, %s18713_s4  ;;  %p18717_p3 = scmp.lt.u32.totalorder %s18713_s4, %s19271_s8 }
  0xac   :  { %p18719_p4 = pnand %p18717_p3, %p18714_p2 }
  0xae   :  { %18722 = shalt.err (!%p18719_p4)
}
  0xaf   :  { %s18723_s11 = scalar_lea.vmem %s265_s16, 16  ;;  %s18727_s20 = scalar_lea.vmem %s265_s16, 32 }
  0xb0   :  { %p18724_p5 = scmp.ne.s32.totalorder %s265_s16, %s18723_s11  ;;  %p18728_p6 = scmp.lt.s32.totalorder %s265_s16, %s265_s16 }
  0xb1   :  { %p18729_p7 = scmp.lt.s32.totalorder %s18727_s20, %s18723_s11 }
  0xb3   :  { %p18730_p8 = por %p18729_p7, %p18728_p6 }
  0xb5   :  { %p18731_p9 = pnand %p18730_p8, %p18724_p5 }
  0xb7   :  { %18734 = shalt.err (!%p18731_p9)
}
  0xb8   :  { %267 = dma.hbm_to_vmem [thread:$0]  %s19271_s8, 16, %s265_s16, [#allocation14]  }
  0xb9   :  { %s18735_s19 = scalar_lea.hbm %s19301_s30, 16 }
  0xba   :  { %p18736_p10 = scmp.ne.s32.totalorder %s19301_s30, %s18735_s19  ;;  %p18739_p11 = scmp.lt.u32.totalorder %s18735_s19, %s19301_s30 }
  0xbc   :  { %p18741_p12 = pnand %p18739_p11, %p18736_p10 }
  0xbe   :  { %18744 = shalt.err (!%p18741_p12)
}
  0xbf   :  { %s18745_s15 = scalar_lea.vmem %s293_s7, 16  ;;  %s18749_s18 = scalar_lea.vmem %s293_s7, 32 }
  0xc0   :  { %p18746_p13 = scmp.ne.s32.totalorder %s293_s7, %s18745_s15  ;;  %p18750_p0 = scmp.lt.s32.totalorder %s293_s7, %s293_s7 }
  0xc1   :  { %p18751_p1 = scmp.lt.s32.totalorder %s18749_s18, %s18745_s15 }
  0xc3   :  { %p18752_p2 = por %p18751_p1, %p18750_p0 }
  0xc5   :  { %p18753_p3 = pnand %p18752_p2, %p18746_p13 }
  0xc7   :  { %18756 = shalt.err (!%p18753_p3)
}
  0xc8   :  { %295 = dma.hbm_to_vmem [thread:$0]  %s19301_s30, 16, %s293_s7, [#allocation17]  }
  0xc9   :  { %s19085_s6 = smov [#allocation19]   ;;  %s19086_s0 = smov [#allocation22]  }
  0xca   :  { %s318_s8 = sshll.u32 %s19085_s6, 4  ;;  %s346_s9 = sshll.u32 %s19086_s0, 4  ;;  %s319_s8 = int_to_ptr.vmem [resolvable:$true] %s318_s8  ;;  %s347_s9 = int_to_ptr.vmem [resolvable:$true] %s346_s9 }
  0xcb   :  { %s18757_s25 = scalar_lea.hbm %s19326_s10, 16 }
  0xcc   :  { %p18758_p4 = scmp.ne.s32.totalorder %s19326_s10, %s18757_s25  ;;  %p18761_p5 = scmp.lt.u32.totalorder %s18757_s25, %s19326_s10 }
  0xce   :  { %p18763_p6 = pnand %p18761_p5, %p18758_p4 }
  0xd0   :  { %18766 = shalt.err (!%p18763_p6)
}
  0xd1   :  { %s18767_s23 = scalar_lea.vmem %s319_s8, 16  ;;  %s18771_s26 = scalar_lea.vmem %s319_s8, 32 }
  0xd2   :  { %p18768_p7 = scmp.ne.s32.totalorder %s319_s8, %s18767_s23  ;;  %p18772_p8 = scmp.lt.s32.totalorder %s319_s8, %s319_s8 }
  0xd3   :  { %p18773_p9 = scmp.lt.s32.totalorder %s18771_s26, %s18767_s23 }
  0xd5   :  { %p18774_p10 = por %p18773_p9, %p18772_p8 }
  0xd7   :  { %p18775_p11 = pnand %p18774_p10, %p18768_p7 }
  0xd9   :  { %18778 = shalt.err (!%p18775_p11)
}
  0xda   :  { %321 = dma.hbm_to_vmem [thread:$0]  %s19326_s10, 16, %s319_s8, [#allocation20]  }
  0xdb   :  { %s18779_s30 = scalar_lea.hbm %s19356_s17, 16 }
  0xdc   :  { %p18780_p12 = scmp.ne.s32.totalorder %s19356_s17, %s18779_s30  ;;  %p18783_p13 = scmp.lt.u32.totalorder %s18779_s30, %s19356_s17 }
  0xde   :  { %p18785_p0 = pnand %p18783_p13, %p18780_p12 }
  0xe0   :  { %18788 = shalt.err (!%p18785_p0)
}
  0xe1   :  { %s18789_s24 = scalar_lea.vmem %s347_s9, 16  ;;  %s18793_s1 = scalar_lea.vmem %s347_s9, 32 }
  0xe2   :  { %p18790_p1 = scmp.ne.s32.totalorder %s347_s9, %s18789_s24  ;;  %p18794_p2 = scmp.lt.s32.totalorder %s347_s9, %s347_s9 }
  0xe3   :  { %p18795_p3 = scmp.lt.s32.totalorder %s18793_s1, %s18789_s24 }
  0xe5   :  { %p18796_p4 = por %p18795_p3, %p18794_p2 }
  0xe7   :  { %p18797_p5 = pnand %p18796_p4, %p18790_p1 }
  0xe9   :  { %18800 = shalt.err (!%p18797_p5)
}
  0xea   :  { %349 = dma.hbm_to_vmem [thread:$0]  %s19356_s17, 16, %s347_s9, [#allocation23]  }
  0xeb   :  { %s19087_s16 = smov [#allocation25]   ;;  %s19088_s2 = smov [#allocation5]  }
  0xec   :  { %s370_s10 = sshll.u32 %s19087_s16, 4  ;;  %s196_s7 = sshll.u32 %s19088_s2, 4  ;;  %s371_s10 = int_to_ptr.vmem [resolvable:$true] %s370_s10  ;;  %s197_s7 = int_to_ptr.vmem [resolvable:$true] %s196_s7 }
  0xed   :  { %s18801_s4 = scalar_lea.hbm %s19376_s29, 16 }
  0xee   :  { %p18802_p6 = scmp.ne.s32.totalorder %s19376_s29, %s18801_s4  ;;  %p18805_p7 = scmp.lt.u32.totalorder %s18801_s4, %s19376_s29 }
  0xf0   :  { %p18807_p8 = pnand %p18805_p7, %p18802_p6 }
  0xf2   :  { %18810 = shalt.err (!%p18807_p8)
}
  0xf3   :  { %s18811_s11 = scalar_lea.vmem %s371_s10, 16  ;;  %s18815_s20 = scalar_lea.vmem %s371_s10, 32 }
  0xf4   :  { %p18812_p9 = scmp.ne.s32.totalorder %s371_s10, %s18811_s11  ;;  %p18816_p10 = scmp.lt.s32.totalorder %s371_s10, %s371_s10 }
  0xf5   :  { %p18817_p11 = scmp.lt.s32.totalorder %s18815_s20, %s18811_s11 }
  0xf7   :  { %p18818_p12 = por %p18817_p11, %p18816_p10 }
  0xf9   :  { %p18819_p13 = pnand %p18818_p12, %p18812_p9 }
  0xfb   :  { %18822 = shalt.err (!%p18819_p13)
}
  0xfc   :  { %373 = dma.hbm_to_vmem [thread:$0]  %s19376_s29, 16, %s371_s10, [#allocation26]  }
  0xfd   :  { %s18823_s17 = scalar_lea.hbm %s19201_s22, 16 }
  0xfe   :  { %p18824_p0 = scmp.ne.s32.totalorder %s19201_s22, %s18823_s17  ;;  %p18827_p1 = scmp.lt.u32.totalorder %s18823_s17, %s19201_s22 }
 0x100   :  { %p18829_p2 = pnand %p18827_p1, %p18824_p0 }
 0x102   :  { %18832 = shalt.err (!%p18829_p2)
}
 0x103   :  { %s18833_s19 = scalar_lea.vmem %s197_s7, 16  ;;  %s18837_s15 = scalar_lea.vmem %s197_s7, 32 }
 0x104   :  { %p18834_p3 = scmp.ne.s32.totalorder %s197_s7, %s18833_s19  ;;  %p18838_p4 = scmp.lt.s32.totalorder %s197_s7, %s197_s7 }
 0x105   :  { %p18839_p5 = scmp.lt.s32.totalorder %s18837_s15, %s18833_s19 }
 0x107   :  { %p18840_p6 = por %p18839_p5, %p18838_p4 }
 0x109   :  { %p18841_p7 = pnand %p18840_p6, %p18834_p3 }
 0x10b   :  { %18844 = shalt.err (!%p18841_p7)
}
 0x10c   :  { %199 = dma.hbm_to_vmem [thread:$0]  %s19201_s22, 16, %s197_s7, [#allocation6]  }
 0x10d   :  { %s19089_s18 = smov [#allocation9]   ;;  %s19090_s6 = smov [#allocation12]  }
 0x10e   :  { %s222_s29 = sshll.u32 %s19089_s18, 4  ;;  %s250_s8 = sshll.u32 %s19090_s6, 4  ;;  %s223_s29 = int_to_ptr.vmem [resolvable:$true] %s222_s29  ;;  %s251_s8 = int_to_ptr.vmem [resolvable:$true] %s250_s8 }
 0x10f   :  { %s18845_s0 = scalar_lea.hbm %s19226_s27, 16 }
 0x110   :  { %p18846_p8 = scmp.ne.s32.totalorder %s19226_s27, %s18845_s0  ;;  %p18849_p9 = scmp.lt.u32.totalorder %s18845_s0, %s19226_s27 }
 0x112   :  { %p18851_p10 = pnand %p18849_p9, %p18846_p8 }
 0x114   :  { %18854 = shalt.err (!%p18851_p10)
}
 0x115   :  { %s18855_s9 = scalar_lea.vmem %s223_s29, 16  ;;  %s18859_s25 = scalar_lea.vmem %s223_s29, 32 }
 0x116   :  { %p18856_p11 = scmp.ne.s32.totalorder %s223_s29, %s18855_s9  ;;  %p18860_p12 = scmp.lt.s32.totalorder %s223_s29, %s223_s29 }
 0x117   :  { %p18861_p13 = scmp.lt.s32.totalorder %s18859_s25, %s18855_s9 }
 0x119   :  { %p18862_p0 = por %p18861_p13, %p18860_p12 }
 0x11b   :  { %p18863_p1 = pnand %p18862_p0, %p18856_p11 }
 0x11d   :  { %18866 = shalt.err (!%p18863_p1)
}
 0x11e   :  { %225 = dma.hbm_to_vmem [thread:$0]  %s19226_s27, 16, %s223_s29, [#allocation8]  }
 0x11f   :  { %s18867_s22 = scalar_lea.hbm %s19256_s14, 16 }
 0x120   :  { %p18868_p2 = scmp.ne.s32.totalorder %s19256_s14, %s18867_s22  ;;  %p18871_p3 = scmp.lt.u32.totalorder %s18867_s22, %s19256_s14 }
 0x122   :  { %p18873_p4 = pnand %p18871_p3, %p18868_p2 }
 0x124   :  { %18876 = shalt.err (!%p18873_p4)
}
 0x125   :  { %s18877_s23 = scalar_lea.vmem %s251_s8, 16  ;;  %s18881_s26 = scalar_lea.vmem %s251_s8, 32 }
 0x126   :  { %p18878_p5 = scmp.ne.s32.totalorder %s251_s8, %s18877_s23  ;;  %p18882_p6 = scmp.lt.s32.totalorder %s251_s8, %s251_s8 }
 0x127   :  { %p18883_p7 = scmp.lt.s32.totalorder %s18881_s26, %s18877_s23 }
 0x129   :  { %p18884_p8 = por %p18883_p7, %p18882_p6 }
 0x12b   :  { %p18885_p9 = pnand %p18884_p8, %p18878_p5 }
 0x12d   :  { %18888 = shalt.err (!%p18885_p9)
}
 0x12e   :  { %253 = dma.hbm_to_vmem [thread:$0]  %s19256_s14, 16, %s251_s8, [#allocation11]  }
 0x12f   :  { %s19091_s30 = smov [#allocation15]   ;;  %s19092_s24 = smov [#allocation18]  }
 0x130   :  { %s276_s27 = sshll.u32 %s19091_s30, 4  ;;  %s304_s1 = sshll.u32 %s19092_s24, 4  ;;  %s277_s27 = int_to_ptr.vmem [resolvable:$true] %s276_s27  ;;  %s305_s1 = int_to_ptr.vmem [resolvable:$true] %s304_s1 }
 0x131   :  { %s18889_s16 = scalar_lea.hbm %s19281_s28, 16 }
 0x132   :  { %p18890_p10 = scmp.ne.s32.totalorder %s19281_s28, %s18889_s16  ;;  %p18893_p11 = scmp.lt.u32.totalorder %s18889_s16, %s19281_s28 }
 0x134   :  { %p18895_p12 = pnand %p18893_p11, %p18890_p10 }
 0x136   :  { %18898 = shalt.err (!%p18895_p12)
}
 0x137   :  { %s18899_s10 = scalar_lea.vmem %s277_s27, 16  ;;  %s18903_s2 = scalar_lea.vmem %s277_s27, 32 }
 0x138   :  { %p18900_p13 = scmp.ne.s32.totalorder %s277_s27, %s18899_s10  ;;  %p18904_p0 = scmp.lt.s32.totalorder %s277_s27, %s277_s27 }
 0x139   :  { %p18905_p1 = scmp.lt.s32.totalorder %s18903_s2, %s18899_s10 }
 0x13b   :  { %p18906_p2 = por %p18905_p1, %p18904_p0 }
 0x13d   :  { %p18907_p3 = pnand %p18906_p2, %p18900_p13 }
 0x13f   :  { %18910 = shalt.err (!%p18907_p3)
}
 0x140   :  { %279 = dma.hbm_to_vmem [thread:$0]  %s19281_s28, 16, %s277_s27, [#allocation14]  }
 0x141   :  { %s18911_s14 = scalar_lea.hbm %s19311_s13, 16 }
 0x142   :  { %p18912_p4 = scmp.ne.s32.totalorder %s19311_s13, %s18911_s14  ;;  %p18915_p5 = scmp.lt.u32.totalorder %s18911_s14, %s19311_s13 }
 0x144   :  { %p18917_p6 = pnand %p18915_p5, %p18912_p4 }
 0x146   :  { %18920 = shalt.err (!%p18917_p6)
}
 0x147   :  { %s18921_s7 = scalar_lea.vmem %s305_s1, 16  ;;  %s18925_s4 = scalar_lea.vmem %s305_s1, 32 }
 0x148   :  { %p18922_p7 = scmp.ne.s32.totalorder %s305_s1, %s18921_s7  ;;  %p18926_p8 = scmp.lt.s32.totalorder %s305_s1, %s305_s1 }
 0x149   :  { %p18927_p9 = scmp.lt.s32.totalorder %s18925_s4, %s18921_s7 }
 0x14b   :  { %p18928_p10 = por %p18927_p9, %p18926_p8 }
 0x14d   :  { %p18929_p11 = pnand %p18928_p10, %p18922_p7 }
 0x14f   :  { %18932 = shalt.err (!%p18929_p11)
}
 0x150   :  { %307 = dma.hbm_to_vmem [thread:$0]  %s19311_s13, 16, %s305_s1, [#allocation17]  }
 0x151   :  { %s19093_s11 = smov [#allocation21]   ;;  %s19094_s20 = smov [#allocation24]  }
 0x152   :  { %s330_s28 = sshll.u32 %s19093_s11, 4  ;;  %s358_s17 = sshll.u32 %s19094_s20, 4  ;;  %s331_s28 = int_to_ptr.vmem [resolvable:$true] %s330_s28  ;;  %s359_s17 = int_to_ptr.vmem [resolvable:$true] %s358_s17 }
 0x153   :  { %s18933_s19 = scalar_lea.hbm %s19336_s12, 16 }
 0x154   :  { %p18934_p12 = scmp.ne.s32.totalorder %s19336_s12, %s18933_s19  ;;  %p18937_p13 = scmp.lt.u32.totalorder %s18933_s19, %s19336_s12 }
 0x156   :  { %p18939_p0 = pnand %p18937_p13, %p18934_p12 }
 0x158   :  { %18942 = shalt.err (!%p18939_p0)
}
 0x159   :  { %s18943_s15 = scalar_lea.vmem %s331_s28, 16  ;;  %s18947_s18 = scalar_lea.vmem %s331_s28, 32 }
 0x15a   :  { %p18944_p1 = scmp.ne.s32.totalorder %s331_s28, %s18943_s15  ;;  %p18948_p2 = scmp.lt.s32.totalorder %s331_s28, %s331_s28 }
 0x15b   :  { %p18949_p3 = scmp.lt.s32.totalorder %s18947_s18, %s18943_s15 }
 0x15d   :  { %p18950_p4 = por %p18949_p3, %p18948_p2 }
 0x15f   :  { %p18951_p5 = pnand %p18950_p4, %p18944_p1 }
 0x161   :  { %18954 = shalt.err (!%p18951_p5)
}
 0x162   :  { %333 = dma.hbm_to_vmem [thread:$0]  %s19336_s12, 16, %s331_s28, [#allocation20]  }
 0x163   :  { %s18955_s13 = scalar_lea.hbm %s19366_s21, 16 }
 0x164   :  { %p18956_p6 = scmp.ne.s32.totalorder %s19366_s21, %s18955_s13  ;;  %p18959_p7 = scmp.lt.u32.totalorder %s18955_s13, %s19366_s21 }
 0x166   :  { %p18961_p8 = pnand %p18959_p7, %p18956_p6 }
 0x168   :  { %18964 = shalt.err (!%p18961_p8)
}
 0x169   :  { %s18965_s29 = scalar_lea.vmem %s359_s17, 16  ;;  %s18969_s6 = scalar_lea.vmem %s359_s17, 32 }
 0x16a   :  { %p18966_p9 = scmp.ne.s32.totalorder %s359_s17, %s18965_s29  ;;  %p18970_p10 = scmp.lt.s32.totalorder %s359_s17, %s359_s17 }
 0x16b   :  { %p18971_p11 = scmp.lt.s32.totalorder %s18969_s6, %s18965_s29 }
 0x16d   :  { %p18972_p12 = por %p18971_p11, %p18970_p10 }
 0x16f   :  { %p18973_p13 = pnand %p18972_p12, %p18966_p9 }
 0x171   :  { %18976 = shalt.err (!%p18973_p13)
}
 0x172   :  { %s24340_s8 = sld [smem:[#allocation77_spill]]  ;;  %s19095_s0 = smov [#allocation27]  }
 0x173   :  { %361 = dma.hbm_to_vmem [thread:$0]  %s19366_s21, 16, %s359_s17, [#allocation23]  }
 0x174   :  { %s384_s12 = sshll.u32 %s19095_s0, 4  ;;  %s385_s12 = int_to_ptr.vmem [resolvable:$true] %s384_s12 }
 0x178   :  { %s18977_s9 = scalar_lea.hbm %s24340_s8, 16 }
 0x179   :  { %p18978_p0 = scmp.ne.s32.totalorder %s24340_s8, %s18977_s9  ;;  %p18981_p1 = scmp.lt.u32.totalorder %s18977_s9, %s24340_s8 }
 0x17b   :  { %p18983_p2 = pnand %p18981_p1, %p18978_p0 }
 0x17d   :  { %18986 = shalt.err (!%p18983_p2)
}
 0x17e   :  { %s18987_s25 = scalar_lea.vmem %s385_s12, 16  ;;  %s18991_s22 = scalar_lea.vmem %s385_s12, 32 }
 0x17f   :  { %p18988_p3 = scmp.ne.s32.totalorder %s385_s12, %s18987_s25  ;;  %p18992_p4 = scmp.lt.s32.totalorder %s385_s12, %s385_s12 }
 0x180   :  { %p18993_p5 = scmp.lt.s32.totalorder %s18991_s22, %s18987_s25 }
 0x182   :  { %p18994_p6 = por %p18993_p5, %p18992_p4 }
 0x184   :  { %p18995_p7 = pnand %p18994_p6, %p18988_p3 }
 0x186   :  { %18998 = shalt.err (!%p18995_p7)
}
 0x187   :  { %387 = dma.hbm_to_vmem [thread:$0]  %s24340_s8, 16, %s385_s12, [#allocation26]  }
 0x188   :  { %18999 = dma.done.wait [#allocation6], 16  }
 0x189   :  { %19000 = vsyncadd [#allocation6], 4294967280 }
 0x18a   :  { %19001 = dma.done.wait [#allocation8], 32  }
 0x18b   :  { %19002 = vsyncadd [#allocation8], 4294967264 }
 0x18c   :  { %19003 = dma.done.wait [#allocation11], 32  }
 0x18d   :  { %19004 = vsyncadd [#allocation11], 4294967264 }
 0x18e   :  { %19005 = dma.done.wait [#allocation14], 32  }
 0x18f   :  { %19006 = vsyncadd [#allocation14], 4294967264 }
 0x190   :  { %19007 = dma.done.wait [#allocation17], 32  }
 0x191   :  { %19008 = vsyncadd [#allocation17], 4294967264 }
 0x192   :  { %19009 = dma.done.wait [#allocation20], 32  }
 0x193   :  { %19010 = vsyncadd [#allocation20], 4294967264 }
 0x194   :  { %19011 = dma.done.wait [#allocation23], 32  }
 0x195   :  { %19012 = vsyncadd [#allocation23], 4294967264 }
 0x196   :  { %19013 = dma.done.wait [#allocation26], 32  }
 0x197   :  { %19014 = vsyncadd [#allocation26], 4294967264  ;;  %s24341_s21 = sld [smem:[#allocation41_spill]]  ;;  %s24342_s23 = sld [smem:[#allocation36_spill]]  ;;  %vm940_vm0 = vcmask 1045504   ;;  %vm891_vm1 = vcmask 48128  }
 0x198   :  { %s24343_s26 = sld [smem:[#allocation42_spill]]  ;;  %s24344_s30 = sld [smem:[#allocation39_spill]]  ;;  %vm24218_vm2 = vcmask 1043456   ;;  %vm24221_vm3 = vcmask 326656   ;;  %vm24219_vm4 = vcmask 31744   ;;  %vm24220_vm5 = vcmask 1044480  }
 0x199   :  { %s24345_s27 = sld [smem:[#allocation40_spill]]  ;;  %s24346_s24 = sld [smem:[#allocation37_spill]]  ;;  %vm24212_vm8 = vcmask 39936  }
 0x19a   :  { %s24347_s1 = sld [smem:[#allocation57_spill]]  ;;  %s24348_s16 = sld [smem:[#allocation58_spill]] }
 0x19b   :  { %s24349_s10 = sld [smem:[#allocation38_spill]]  ;;  %s24357_s2 = sld [smem:[#allocation59_spill]] }
 0x19c   :  { %s24416_s14 = sld [smem:[#allocation60_spill]]  ;;  %s24438_s7 = sld [smem:[#allocation55_spill]] }
 0x19d   :  { %v456_v3 = vld [vmem:[%s24341_s21] sm:$0x3f]  ;;  %v570_v5 = vld [vmem:[%s24342_s23 + $0x8] sm:$0xff]  ;;  %v571_v6 = vld [vmem:[%s24342_s23 + $0x10] sm:$0xff]  ;;  %s24439_s4 = sld [smem:[#allocation54_spill]]  ;;  %s24440_s11 = sld [smem:[#allocation81_spill]] }
 0x19e   :  { %v569_v4 = vld [vmem:[%s24342_s23] sm:$0xff]  ;;  %16176 = vmatprep.subr.msk.mxu0 %vm940_vm0, %v456_v3  ;;  %v572_v7 = vld [vmem:[%s24342_s23 + $0x18] sm:$0xff]  ;;  %v458_v10 = vld [vmem:[%s24343_s26 + $0x8] sm:$0xff]  ;;  %s24441_s28 = sld [smem:[#allocation80_spill]]  ;;  %s24442_s20 = sld [smem:[#allocation66_spill]] }
 0x19f   :  { %16178 = vmatprep.mubr.msk.f32.mxu0 %vm891_vm1, %v569_v4  ;;  %16177 = vmatpush3.msk.msra.mxu0 %vm940_vm0, %v456_v3  ;;  %v573_v8 = vld [vmem:[%s24342_s23 + $0x20] sm:$0xff]  ;;  %v459_v11 = vld [vmem:[%s24343_s26 + $0x10] sm:$0xff]  ;;  %v460_v12 = vld [vmem:[%s24343_s26 + $0x18] sm:$0xff]  ;;  %s24555_s17 = sld [smem:[#allocation56_spill]]  ;;  %s24623_s15 = sld [smem:[#allocation65_spill]] }
 0x1a0   :  { %16179 = vmatmul.mubr.msk.f32.vlgmr.msra.gmra.mrb[0].mxu0 %vm891_vm1, %v570_v5  ;;  %v457_v9 = vld [vmem:[%s24343_s26] sm:$0xff]  ;;  %v18150_v14 = vpack.c.bf16 %v460_v12, %v459_v11  ;;  %v574_v15 = vld [vmem:[%s24342_s23 + $0x28] sm:$0xff]  ;;  %v575_v16 = vld [vmem:[%s24342_s23 + $0x30] sm:$0xff]  ;;  %s24621_s19 = sld [smem:[#allocation64_spill]]  ;;  %s24670_s18 = sld [smem:[#allocation67_spill]] }
 0x1a1   :  { %16181 = vmatprep.mubr.msk.f32.mxu0 %vm891_vm1, %v571_v6  ;;  %v18146_v13 = vpack.c.bf16 %v458_v10, %v457_v9  ;;  %v576_v17 = vld [vmem:[%s24342_s23 + $0x38] sm:$0xff]  ;;  %v577_v18 = vld [vmem:[%s24342_s23 + $0x40] sm:$0xff]  ;;  %v578_v19 = vld [vmem:[%s24342_s23 + $0x48] sm:$0xff]  ;;  %s24696_s13 = sld [smem:[#allocation62_spill]]  ;;  %s24742_s29 = sld [smem:[#allocation61_spill]] }
 0x1a2   :  { %v579_v20 = vld [vmem:[%s24342_s23 + $0x50] sm:$0xff]  ;;  %v580_v21 = vld [vmem:[%s24342_s23 + $0x58] sm:$0xff]  ;;  %v581_v22 = vld [vmem:[%s24342_s23 + $0x60] sm:$0xff]  ;;  %s24803_s6 = sld [smem:[#allocation82_spill]]  ;;  %s24822_s8 = sld [smem:[#allocation63_spill]] }
 0x1a3   :  { %18147 = vmatprep.subr.bf16.mxu0 %v18146_v13  ;;  %18258 = vmatprep.subr.bf16.mxu1 %v18146_v13  ;;  %v582_v23 = vld [vmem:[%s24342_s23 + $0x68] sm:$0xff]  ;;  %v583_v24 = vld [vmem:[%s24342_s23 + $0x70] sm:$0xff]  ;;  %v584_v25 = vld [vmem:[%s24342_s23 + $0x78] sm:$0xff]  ;;  %s24868_s0 = sld [smem:[#allocation71_spill]]  ;;  %s24870_s12 = sld [smem:[#allocation72_spill]] }
 0x1a4   :  { %16182 = vmatmul.mubr.msk.f32.gmra.mrb[2].mxu0 %vm891_vm1, %v572_v7  ;;  %18261 = vmatpush3.bf16.msra.mxu1 %v18146_v13  ;;  %v461_v26 = vld [vmem:[%s24343_s26 + $0x20] sm:$0xff]  ;;  %v452_v29 = vld [vmem:[%s24345_s27 + $0x8] sm:$0xff]  ;;  %v587_v41 = vld [vmem:[%s24346_s24 + $0x10] sm:$0xff]  ;;  %s24876_s9 = sld [smem:[#allocation73_spill]]  ;;  %s24956_s25 = sld [smem:[#allocation74_spill]] }
 0x1a5   :  { %16184 = vmatprep.mubr.msk.f32.mxu0 %vm891_vm1, %v573_v8  ;;  %18149 = vmatpush3.bf16.msra.mxu0 %v18146_v13  ;;  %v450_v27 = vld [vmem:[%s24344_s30] sm:$0xf]  ;;  %v586_v39 = vld [vmem:[%s24346_s24 + $0x8] sm:$0xff]  ;;  %v588_v45 = vld [vmem:[%s24346_s24 + $0x18] sm:$0xff]  ;;  %s24982_s22 = sld [smem:[#allocation69_spill]]  ;;  %s25016_s21 = sld [smem:[#allocation68_spill]] }
 0x1a6   :  { %18151 = vmatprep.subr.bf16.mxu0 %v18150_v14  ;;  %18259 = vmatprep.subr.bf16.mxu1 %v18150_v14  ;;  %v451_v28 = vld [vmem:[%s24345_s27] sm:$0xff]  ;;  %v590_v51 = vld [vmem:[%s24346_s24 + $0x28] sm:$0xff]  ;;  %v591_v53 = vld [vmem:[%s24346_s24 + $0x30] sm:$0xff]  ;;  %s25018_s23 = sld [smem:[#allocation83_spill]]  ;;  %s25126_s26 = sld [smem:[#allocation70_spill]] }
 0x1a7   :  { %v18154_v30 = vpack.c.bf16 %v452_v29, %v451_v28  ;;  %v585_v35 = vld [vmem:[%s24346_s24] sm:$0xff]  ;;  %v592_v57 = vld [vmem:[%s24346_s24 + $0x38] sm:$0xff]  ;;  %v594_v63 = vld [vmem:[%s24346_s24 + $0x48] sm:$0xff]  ;;  %s25154_s30 = sld [smem:[#allocation44_spill]] }
 0x1a8   :  { %16185 = vmatmul.mubr.msk.f32.gmra.mrb[4].mxu0 %vm891_vm1, %v574_v15  ;;  %18262 = vmatpush3.bf16.msra.mxu1 %v18150_v14  ;;  %v589_v47 = vld [vmem:[%s24346_s24 + $0x20] sm:$0xff]  ;;  %v595_v1 = vld [vmem:[%s24346_s24 + $0x50] sm:$0xff]  ;;  %v596_v5 = vld [vmem:[%s24346_s24 + $0x58] sm:$0xff] }
 0x1a9   :  { %16187 = vmatprep.mubr.msk.f32.mxu0 %vm891_vm1, %v575_v16  ;;  %18153 = vmatpush3.bf16.msra.mxu0 %v18150_v14  ;;  %v593_v59 = vld [vmem:[%s24346_s24 + $0x40] sm:$0xff]  ;;  %v598_v11 = vld [vmem:[%s24346_s24 + $0x68] sm:$0xff]  ;;  %v599_v13 = vld [vmem:[%s24346_s24 + $0x70] sm:$0xff] }
 0x1aa   :  { %16210 = vmatprep.subr.mxu0 %v461_v26  ;;  %18260 = vmatprep.subr.mxu1 %v461_v26  ;;  %v597_v7 = vld [vmem:[%s24346_s24 + $0x60] sm:$0xff]  ;;  %v600_v14 = vld [vmem:[%s24346_s24 + $0x78] sm:$0xff]  ;;  %v602_v16 = vld [vmem:[%s24346_s24 + $0x88] sm:$0xff] }
 0x1ab   :  { %v601_v15 = vld [vmem:[%s24346_s24 + $0x80] sm:$0xff]  ;;  %v614_v28 = vld [vmem:[%s24346_s24 + $0xe8] sm:$0xff]  ;;  %v615_v29 = vld [vmem:[%s24346_s24 + $0xf0] sm:$0xff] }
 0x1ac   :  { %16188 = vmatmul.mubr.msk.f32.gmra.mrb[6].mxu0 %vm891_vm1, %v576_v17  ;;  %18263 = vmatpush3.msra.mxu1 %v461_v26  ;;  %v603_v17 = vld [vmem:[%s24346_s24 + $0x90] sm:$0xff] }
 0x1ad   :  { %16190 = vmatprep.mubr.msk.f32.mxu0 %vm891_vm1, %v577_v18  ;;  %16211 = vmatpush3.msra.mxu0 %v461_v26  ;;  %v604_v18 = vld [vmem:[%s24346_s24 + $0x98] sm:$0xff] }
 0x1ae   :  { %16236 = vmatprep.subr.msk.mxu0 %vm24218_vm2, %v450_v27  ;;  %18155 = vmatprep.subr.bf16.mxu1 %v18154_v30  ;;  %v612_v26 = vld [vmem:[%s24346_s24 + $0xd8] sm:$0xff] }
 0x1b0   :  { %16191 = vmatmul.mubr.msk.f32.gmra.mrb[8].mxu0 %vm891_vm1, %v578_v19  ;;  %v605_v19 = vld [vmem:[%s24346_s24 + $0xa0] sm:$0xff] }
 0x1b1   :  { %16193 = vmatprep.mubr.msk.f32.mxu0 %vm891_vm1, %v579_v20  ;;  %v606_v20 = vld [vmem:[%s24346_s24 + $0xa8] sm:$0xff] }
 0x1b4   :  { %16194 = vmatmul.mubr.msk.f32.gmra.mrb[10].mxu0 %vm891_vm1, %v580_v21  ;;  %v607_v21 = vld [vmem:[%s24346_s24 + $0xb0] sm:$0xff] }
 0x1b5   :  { %16196 = vmatprep.mubr.msk.f32.mxu0 %vm891_vm1, %v581_v22  ;;  %v608_v22 = vld [vmem:[%s24346_s24 + $0xb8] sm:$0xff] }
 0x1b8   :  { %16197 = vmatmul.mubr.msk.f32.gmra.mrb[12].mxu0 %vm891_vm1, %v582_v23  ;;  %v609_v23 = vld [vmem:[%s24346_s24 + $0xc0] sm:$0xff] }
 0x1b9   :  { %16199 = vmatprep.mubr.msk.f32.mxu0 %vm891_vm1, %v583_v24  ;;  %v610_v24 = vld [vmem:[%s24346_s24 + $0xc8] sm:$0xff] }
 0x1bc   :  { %16200 = vmatmul.mubr.msk.f32.gmra.mrb[14].mxu0 %vm891_vm1, %v584_v25  ;;  %v611_v25 = vld [vmem:[%s24346_s24 + $0xd0] sm:$0xff] }
 0x273   :  { %v16180_v31 = vpop.f32.mrb[0].mxu0 }
 0x274   :  { %v1010_v32 = vpop.f32.mrb[1].mxu0  ;;  %v1090_v34 = vmax.f32 %v16180_v31, 0.0  ;;  %v453_v31 = vld [vmem:[%s24345_s27 + $0x10] sm:$0xff] }
 0x275   :  { %v1089_v33 = vmax.f32 %v1010_v32, 0.0  ;;  %v454_v32 = vld [vmem:[%s24345_s27 + $0x18] sm:$0xff] }
 0x277   :  { %16212 = vmatprep.mubr.msk.f32.mxu0 %vm24221_vm3, %v1089_v33  ;;  %v16183_v36 = vpop.f32.mrb[2].mxu0  ;;  %v18158_v33 = vpack.c.bf16 %v454_v32, %v453_v31 }
 0x278   :  { %16213 = vmatmul.mubr.msk.f32.vlgmr.msra.gmra.mrb[16].mxu0 %vm24221_vm3, %v1090_v34  ;;  %v1092_v37 = vmax.f32 %v16183_v36, 0.0  ;;  %v1020_v38 = vpop.f32.mrb[3].mxu0  ;;  %v500_v34 = vld [vmem:[%s24347_s1] sm:$0x1f]  ;;  %s25174_s1 = sld [smem:[#allocation47_spill]] }
 0x279   :  { %16237 = vmatpush3.msk.msra.mxu0 %vm24218_vm2, %v450_v27  ;;  %16238 = vmatprep.mubr.msk.f32.mxu0 %vm24219_vm4, %v585_v35  ;;  %v1091_v40 = vmax.f32 %v1020_v38, 0.0  ;;  %v613_v27 = vld [vmem:[%s24346_s24 + $0xe0] sm:$0xff] }
 0x27a   :  { %16344 = vmatprep.subr.msk.mxu0 %vm24220_vm5, %v500_v34  ;;  %v455_v35 = vld [vmem:[%s24345_s27 + $0x20] sm:$0xff]  ;;  %s25156_s27 = sld [smem:[#allocation46_spill]] }
 0x27b   :  { %v16186_v42 = vpop.f32.mrb[4].mxu0  ;;  %16215 = vmatprep.mubr.msk.f32.mxu1 %vm24221_vm3, %v1091_v40  ;;  %v501_v36 = vld [vmem:[%s24348_s16] sm:$0x1f]  ;;  %s25176_s16 = sld [smem:[#allocation43_spill]] }
 0x27c   :  { %16239 = vmatmul.mubr.msk.f32.vlgmr.msra.gmra.mrb[18].mxu0 %vm24219_vm4, %v586_v39  ;;  %v1094_v43 = vmax.f32 %v16186_v42, 0.0  ;;  %v1030_v44 = vpop.f32.mrb[5].mxu0  ;;  %16216 = vmatmul.mubr.msk.f32.vlgmr.msra.gmra.mrb[0].mxu1 %vm24221_vm3, %v1092_v37  ;;  %v24047_v37 = vlaneseq  ;;  %v19629_v39 = vld [vmem:[%s24349_s10] sm:$0xf]  ;;  %s25202_s10 = sld [smem:[#allocation51_spill]] }
 0x27d   :  { %16241 = vmatprep.mubr.msk.f32.mxu0 %vm24219_vm4, %v587_v41  ;;  %v1093_v46 = vmax.f32 %v1030_v44, 0.0  ;;  %18157 = vmatpush3.bf16.msra.mxu1 %v18154_v30  ;;  %v616_v30 = vld [vmem:[%s24346_s24 + $0xf8] sm:$0xff]  ;;  %v24045_v44 = vmov 0.0   ;;  %s25173_s24 = sld [smem:[#allocation49_spill]] }
 0x27e   :  { %18159 = vmatprep.subr.bf16.mxu1 %v18158_v33  ;;  %16345 = vmatpush3.msk.msra.mxu0 %vm24220_vm5, %v500_v34  ;;  %v19626_v38 = vshrl.u32 %v24047_v37, 7 }
 0x27f   :  { %v16189_v48 = vpop.f32.mrb[6].mxu0  ;;  %16218 = vmatprep.mubr.msk.f32.mxu1 %vm24221_vm3, %v1093_v46 }
 0x280   :  { %16242 = vmatmul.mubr.msk.f32.gmra.mrb[20].mxu0 %vm24219_vm4, %v588_v45  ;;  %v1096_v49 = vmax.f32 %v16189_v48, 0.0  ;;  %v1040_v50 = vpop.f32.mrb[7].mxu0  ;;  %16219 = vmatmul.mubr.msk.f32.gmra.mrb[2].mxu1 %vm24221_vm3, %v1094_v43  ;;  %24350 = vst [vmem:[#allocation84_spill] sm:$0xff] %v19626_v38  ;;  %v19632_v40 = vsub.s32 0, %v19626_v38  ;;  %v19635_v41 = vadd.s32 8, %v19626_v38 }
 0x281   :  { %16244 = vmatprep.mubr.msk.f32.mxu0 %vm24219_vm4, %v589_v47  ;;  %v1095_v52 = vmax.f32 %v1040_v50, 0.0  ;;  %18161 = vmatpush3.bf16.msra.mxu1 %v18158_v33 }
 0x282   :  { %16294 = vmatprep.subr.mxu1 %v455_v35  ;;  %24351 = vst [vmem:[#allocation85_spill] sm:$0xff] %v19635_v41  ;;  %v638_v42 = vrot.slane %v19629_v39, %v19632_v40 }
 0x283   :  { %v16192_v54 = vpop.f32.mrb[8].mxu0  ;;  %16221 = vmatprep.mubr.msk.f32.mxu1 %vm24221_vm3, %v1095_v52 }
 0x284   :  { %16245 = vmatmul.mubr.msk.f32.gmra.mrb[22].mxu0 %vm24219_vm4, %v590_v51  ;;  %v1098_v55 = vmax.f32 %v16192_v54, 0.0  ;;  %v1050_v56 = vpop.f32.mrb[9].mxu0  ;;  %16222 = vmatmul.mubr.msk.f32.gmra.mrb[4].mxu1 %vm24221_vm3, %v1096_v49  ;;  %v19640_v43 = vrot.slane %v638_v42, %v19632_v40 }
 0x285   :  { %16247 = vmatprep.mubr.msk.f32.mxu0 %vm24219_vm4, %v591_v53  ;;  %v1097_v58 = vmax.f32 %v1050_v56, 0.0  ;;  %16295 = vmatpush3.msra.mxu1 %v455_v35 }
 0x286   :  { %16370 = vmatprep.subr.msk.mxu1 %vm24220_vm5, %v501_v36  ;;  %vm651_vm6 = vcmp.eq.s32.totalorder %v19626_v38, %v19640_v43  ;;  %vm653_vm7 = vcmp.eq.s32.totalorder %v19635_v41, %v19640_v43 }
 0x287   :  { %v16195_v60 = vpop.f32.mrb[10].mxu0  ;;  %16224 = vmatprep.mubr.msk.f32.mxu1 %vm24221_vm3, %v1097_v58  ;;  %v13530_v45 = vsel %vm651_vm6, 1.0, %v24045_v44  ;;  %v13532_v46 = vsel %vm653_vm7, 1.0, %v24045_v44 }
 0x288   :  { %16248 = vmatmul.mubr.msk.f32.gmra.mrb[24].mxu0 %vm24219_vm4, %v592_v57  ;;  %v1100_v61 = vmax.f32 %v16195_v60, 0.0  ;;  %v1060_v62 = vpop.f32.mrb[11].mxu0  ;;  %16225 = vmatmul.mubr.msk.f32.gmra.mrb[6].mxu1 %vm24221_vm3, %v1098_v55  ;;  %v747_v47 = vpack.c.bf16 %v13532_v46, %v13530_v45 }
 0x289   :  { %16250 = vmatprep.mubr.msk.f32.mxu0 %vm24219_vm4, %v593_v59  ;;  %v1099_v0 = vmax.f32 %v1060_v62, 0.0 }
 0x28a   :  { %2388 = vxpose.xlu0.c.b16.start [1/8] %v747_v47, 128 }
 0x28b   :  { %v16198_v2 = vpop.f32.mrb[12].mxu0  ;;  %16227 = vmatprep.mubr.msk.f32.mxu1 %vm24221_vm3, %v1099_v0 }
 0x28c   :  { %16251 = vmatmul.mubr.msk.f32.gmra.mrb[26].mxu0 %vm24219_vm4, %v594_v63  ;;  %v1102_v3 = vmax.f32 %v16198_v2, 0.0  ;;  %v1070_v4 = vpop.f32.mrb[13].mxu0  ;;  %16228 = vmatmul.mubr.msk.f32.gmra.mrb[8].mxu1 %vm24221_vm3, %v1100_v61 }
 0x28d   :  { %16253 = vmatprep.mubr.msk.f32.mxu0 %vm24219_vm4, %v595_v1  ;;  %v1101_v6 = vmax.f32 %v1070_v4, 0.0 }
 0x28f   :  { %v16201_v8 = vpop.f32.mrb[14].mxu0  ;;  %16230 = vmatprep.mubr.msk.f32.mxu1 %vm24221_vm3, %v1101_v6 }
 0x290   :  { %16254 = vmatmul.mubr.msk.f32.gmra.mrb[28].mxu0 %vm24219_vm4, %v596_v5  ;;  %v1104_v9 = vmax.f32 %v16201_v8, 0.0  ;;  %v1080_v10 = vpop.f32.mrb[15].mxu0  ;;  %16231 = vmatmul.mubr.msk.f32.gmra.mrb[10].mxu1 %vm24221_vm3, %v1102_v3 }
 0x291   :  { %16256 = vmatprep.mubr.msk.f32.mxu0 %vm24219_vm4, %v597_v7  ;;  %v1103_v12 = vmax.f32 %v1080_v10, 0.0 }
 0x293   :  { %16233 = vmatprep.mubr.msk.f32.mxu1 %vm24221_vm3, %v1103_v12 }
 0x294   :  { %16257 = vmatmul.mubr.msk.f32.gmra.mrb[30].mxu0 %vm24219_vm4, %v598_v11  ;;  %16234 = vmatmul.mubr.msk.f32.gmra.mrb[12].mxu1 %vm24221_vm3, %v1104_v9 }
 0x295   :  { %16259 = vmatprep.mubr.msk.f32.mxu0 %vm24219_vm4, %v599_v13 }
 0x298   :  { %16260 = vmatmul.mubr.msk.f32.gmra.mrb[32].mxu0 %vm24219_vm4, %v600_v14 }
 0x299   :  { %16262 = vmatprep.mubr.msk.f32.mxu0 %vm24219_vm4, %v601_v15 }
 0x29c   :  { %16263 = vmatmul.mubr.msk.f32.gmra.mrb[34].mxu0 %vm24219_vm4, %v602_v16 }
 0x29d   :  { %16265 = vmatprep.mubr.msk.f32.mxu0 %vm24219_vm4, %v603_v17 }
 0x2a0   :  { %16266 = vmatmul.mubr.msk.f32.gmra.mrb[36].mxu0 %vm24219_vm4, %v604_v18 }
 0x2a1   :  { %16268 = vmatprep.mubr.msk.f32.mxu0 %vm24219_vm4, %v605_v19 }
 0x2a4   :  { %16269 = vmatmul.mubr.msk.f32.gmra.mrb[38].mxu0 %vm24219_vm4, %v606_v20 }
 0x2a5   :  { %16271 = vmatprep.mubr.msk.f32.mxu0 %vm24219_vm4, %v607_v21 }
 0x2a8   :  { %16272 = vmatmul.mubr.msk.f32.gmra.mrb[40].mxu0 %vm24219_vm4, %v608_v22 }
 0x2a9   :  { %16274 = vmatprep.mubr.msk.f32.mxu0 %vm24219_vm4, %v609_v23 }
 0x2ac   :  { %16275 = vmatmul.mubr.msk.f32.gmra.mrb[42].mxu0 %vm24219_vm4, %v610_v24 }
 0x2ad   :  { %16277 = vmatprep.mubr.msk.f32.mxu0 %vm24219_vm4, %v611_v25 }
 0x2b0   :  { %16278 = vmatmul.mubr.msk.f32.gmra.mrb[44].mxu0 %vm24219_vm4, %v612_v26 }
 0x2b1   :  { %16280 = vmatprep.mubr.msk.f32.mxu0 %vm24219_vm4, %v613_v27 }
 0x2b4   :  { %16281 = vmatmul.mubr.msk.f32.gmra.mrb[46].mxu0 %vm24219_vm4, %v614_v28 }
 0x2b5   :  { %16283 = vmatprep.mubr.msk.f32.mxu0 %vm24219_vm4, %v615_v29 }
 0x2b8   :  { %16284 = vmatmul.mubr.msk.f32.gmra.mrb[48].mxu0 %vm24219_vm4, %v616_v30 }
 0x34b   :  { %v16214_v48 = vpop.f32.mrb[16].mxu0 }
 0x34c   :  { %v1220_v49 = vpop.f32.mrb[17].mxu0  ;;  %v19650_v51 = vmax.f32 %v16214_v48, 0.0 }
 0x34d   :  { %v19648_v50 = vmax.f32 %v1220_v49, 0.0 }
 0x34f   :  { %v16240_v52 = vpop.f32.mrb[18].mxu0  ;;  %16346 = vmatprep.mubr.msk.f32.mxu0 %vm24212_vm8, %v19648_v50  ;;  %v16217_v53 = vpop.f32.mrb[0].mxu1 }
 0x350   :  { %v1482_v54 = vpop.f32.mrb[19].mxu0  ;;  %16347 = vmatmul.mubr.msk.f32.vlgmr.msra.gmra.mrb[50].mxu0 %vm24212_vm8, %v19650_v51  ;;  %v19656_v55 = vmax.f32 %v16217_v53, 0.0  ;;  %v1230_v56 = vpop.f32.mrb[1].mxu1  ;;  %v1642_v59 = vmax.f32 %v16240_v52, 0.0 }
 0x351   :  { %v1641_v57 = vmax.f32 %v1482_v54, 0.0  ;;  %v19658_v58 = vmax.f32 %v1230_v56, 0.0 }
 0x353   :  { %v16243_v60 = vpop.f32.mrb[20].mxu0  ;;  %16296 = vmatprep.mubr.msk.f32.mxu1 %vm24221_vm3, %v1641_v57  ;;  %v16220_v61 = vpop.f32.mrb[2].mxu1  ;;  %16349 = vmatprep.mubr.msk.f32.mxu0 %vm24212_vm8, %v19658_v58 }
 0x354   :  { %v1492_v62 = vpop.f32.mrb[21].mxu0  ;;  %16297 = vmatmul.mubr.msk.f32.vlgmr.msra.gmra.mrb[14].mxu1 %vm24221_vm3, %v1642_v59  ;;  %v19664_v63 = vmax.f32 %v16220_v61, 0.0  ;;  %v1240_v0 = vpop.f32.mrb[3].mxu1  ;;  %16350 = vmatmul.mubr.msk.f32.gmra.mrb[52].mxu0 %vm24212_vm8, %v19656_v55  ;;  %v1644_v3 = vmax.f32 %v16243_v60, 0.0 }
 0x355   :  { %v1643_v1 = vmax.f32 %v1492_v62, 0.0  ;;  %16371 = vmatpush3.msk.msra.mxu1 %vm24220_vm5, %v501_v36  ;;  %v19669_v2 = vmax.f32 %v1240_v0, 0.0 }
 0x357   :  { %v16246_v4 = vpop.f32.mrb[22].mxu0  ;;  %16299 = vmatprep.mubr.msk.f32.mxu1 %vm24221_vm3, %v1643_v1  ;;  %v16223_v5 = vpop.f32.mrb[4].mxu1  ;;  %16352 = vmatprep.mubr.msk.f32.mxu0 %vm24212_vm8, %v19669_v2 }
 0x358   :  { %v1502_v6 = vpop.f32.mrb[23].mxu0  ;;  %16300 = vmatmul.mubr.msk.f32.gmra.mrb[16].mxu1 %vm24221_vm3, %v1644_v3  ;;  %v19675_v7 = vmax.f32 %v16223_v5, 0.0  ;;  %v1250_v8 = vpop.f32.mrb[5].mxu1  ;;  %16353 = vmatmul.mubr.msk.f32.gmra.mrb[54].mxu0 %vm24212_vm8, %v19664_v63  ;;  %v1646_v11 = vmax.f32 %v16246_v4, 0.0 }
 0x359   :  { %v1645_v9 = vmax.f32 %v1502_v6, 0.0  ;;  %v19679_v10 = vmax.f32 %v1250_v8, 0.0 }
 0x35b   :  { %v16249_v12 = vpop.f32.mrb[24].mxu0  ;;  %16302 = vmatprep.mubr.msk.f32.mxu1 %vm24221_vm3, %v1645_v9  ;;  %v16226_v13 = vpop.f32.mrb[6].mxu1  ;;  %16355 = vmatprep.mubr.msk.f32.mxu0 %vm24212_vm8, %v19679_v10 }
 0x35c   :  { %v1512_v14 = vpop.f32.mrb[25].mxu0  ;;  %16303 = vmatmul.mubr.msk.f32.gmra.mrb[18].mxu1 %vm24221_vm3, %v1646_v11  ;;  %v19685_v15 = vmax.f32 %v16226_v13, 0.0  ;;  %v1260_v16 = vpop.f32.mrb[7].mxu1  ;;  %16356 = vmatmul.mubr.msk.f32.gmra.mrb[56].mxu0 %vm24212_vm8, %v19675_v7  ;;  %v1648_v19 = vmax.f32 %v16249_v12, 0.0 }
 0x35d   :  { %v1647_v17 = vmax.f32 %v1512_v14, 0.0  ;;  %v19689_v18 = vmax.f32 %v1260_v16, 0.0 }
 0x35f   :  { %v16252_v20 = vpop.f32.mrb[26].mxu0  ;;  %16305 = vmatprep.mubr.msk.f32.mxu1 %vm24221_vm3, %v1647_v17  ;;  %v16229_v21 = vpop.f32.mrb[8].mxu1  ;;  %16358 = vmatprep.mubr.msk.f32.mxu0 %vm24212_vm8, %v19689_v18 }
 0x360   :  { %v1522_v22 = vpop.f32.mrb[27].mxu0  ;;  %16306 = vmatmul.mubr.msk.f32.gmra.mrb[20].mxu1 %vm24221_vm3, %v1648_v19  ;;  %v19695_v23 = vmax.f32 %v16229_v21, 0.0  ;;  %v1270_v24 = vpop.f32.mrb[9].mxu1  ;;  %16359 = vmatmul.mubr.msk.f32.gmra.mrb[58].mxu0 %vm24212_vm8, %v19685_v15  ;;  %v1650_v27 = vmax.f32 %v16252_v20, 0.0 }
 0x361   :  { %v1649_v25 = vmax.f32 %v1522_v22, 0.0  ;;  %v19699_v26 = vmax.f32 %v1270_v24, 0.0 }
 0x363   :  { %v16255_v28 = vpop.f32.mrb[28].mxu0  ;;  %16308 = vmatprep.mubr.msk.f32.mxu1 %vm24221_vm3, %v1649_v25  ;;  %v16232_v29 = vpop.f32.mrb[10].mxu1  ;;  %16361 = vmatprep.mubr.msk.f32.mxu0 %vm24212_vm8, %v19699_v26 }
 0x364   :  { %v1532_v30 = vpop.f32.mrb[29].mxu0  ;;  %16309 = vmatmul.mubr.msk.f32.gmra.mrb[22].mxu1 %vm24221_vm3, %v1650_v27  ;;  %v19705_v31 = vmax.f32 %v16232_v29, 0.0  ;;  %v1280_v32 = vpop.f32.mrb[11].mxu1  ;;  %16362 = vmatmul.mubr.msk.f32.gmra.mrb[60].mxu0 %vm24212_vm8, %v19695_v23  ;;  %v1652_v35 = vmax.f32 %v16255_v28, 0.0 }
 0x365   :  { %v1651_v33 = vmax.f32 %v1532_v30, 0.0  ;;  %v19709_v34 = vmax.f32 %v1280_v32, 0.0 }
 0x367   :  { %v16258_v36 = vpop.f32.mrb[30].mxu0  ;;  %16311 = vmatprep.mubr.msk.f32.mxu1 %vm24221_vm3, %v1651_v33  ;;  %v16235_v42 = vpop.f32.mrb[12].mxu1  ;;  %16364 = vmatprep.mubr.msk.f32.mxu0 %vm24212_vm8, %v19709_v34 }
 0x368   :  { %v1542_v45 = vpop.f32.mrb[31].mxu0  ;;  %16312 = vmatmul.mubr.msk.f32.gmra.mrb[24].mxu1 %vm24221_vm3, %v1652_v35  ;;  %v19715_v46 = vmax.f32 %v16235_v42, 0.0  ;;  %v1290_v47 = vpop.f32.mrb[13].mxu1  ;;  %16365 = vmatmul.mubr.msk.f32.gmra.mrb[62].mxu0 %vm24212_vm8, %v19705_v31  ;;  %v1654_v52 = vmax.f32 %v16258_v36, 0.0  ;;  %v19760_v42 = vadd.s32 16, %v19626_v38 }
 0x369   :  { %v1653_v48 = vmax.f32 %v1542_v45, 0.0  ;;  %v19719_v49 = vmax.f32 %v1290_v47, 0.0  ;;  %v19763_v45 = vadd.s32 24, %v19626_v38 }
 0x36a   :  { %24352 = vst [vmem:[#allocation86_spill] sm:$0xff] %v19715_v46  ;;  %24353 = vst [vmem:[#allocation87_spill] sm:$0xff] %v19760_v42  ;;  %vm655_vm9 = vcmp.eq.s32.totalorder %v19760_v42, %v19640_v43 }
 0x36b   :  { %v16261_v53 = vpop.f32.mrb[32].mxu0  ;;  %16314 = vmatprep.mubr.msk.f32.mxu1 %vm24221_vm3, %v1653_v48  ;;  %16367 = vmatprep.mubr.msk.f32.mxu0 %vm24212_vm8, %v19719_v49  ;;  %24354 = vst [vmem:[#allocation88_spill] sm:$0xff] %v19763_v45  ;;  %vm657_vm10 = vcmp.eq.s32.totalorder %v19763_v45, %v19640_v43  ;;  %v13534_v47 = vsel %vm655_vm9, 1.0, %v24045_v44 }
 0x36c   :  { %v1552_v54 = vpop.f32.mrb[33].mxu0  ;;  %16315 = vmatmul.mubr.msk.f32.gmra.mrb[26].mxu1 %vm24221_vm3, %v1654_v52  ;;  %16368 = vmatmul.mubr.msk.f32.gmra.mrb[64].mxu0 %vm24212_vm8, %v19715_v46  ;;  %v1656_v57 = vmax.f32 %v16261_v53, 0.0  ;;  %v13536_v48 = vsel %vm657_vm10, 1.0, %v24045_v44  ;;  %v19776_v53 = vadd.s32 32, %v19626_v38 }
 0x36d   :  { %v1655_v56 = vmax.f32 %v1552_v54, 0.0  ;;  %v749_v52 = vpack.c.bf16 %v13536_v48, %v13534_v47  ;;  %v19779_v54 = vadd.s32 40, %v19626_v38 }
 0x36e   :  { %24355 = vst [vmem:[#allocation89_spill] sm:$0xff] %v19776_v53  ;;  %vm659_vm11 = vcmp.eq.s32.totalorder %v19776_v53, %v19640_v43 }
 0x36f   :  { %v16264_v59 = vpop.f32.mrb[34].mxu0  ;;  %16317 = vmatprep.mubr.msk.f32.mxu1 %vm24221_vm3, %v1655_v56  ;;  %24356 = vst [vmem:[#allocation90_spill] sm:$0xff] %v19779_v54  ;;  %2389 = vxpose.xlu0.c.b16.cont [2/8] %v749_v52, 128  ;;  %vm661_vm12 = vcmp.eq.s32.totalorder %v19779_v54, %v19640_v43  ;;  %v13538_v56 = vsel %vm659_vm11, 1.0, %v24045_v44 }
 0x370   :  { %v1562_v60 = vpop.f32.mrb[35].mxu0  ;;  %16318 = vmatmul.mubr.msk.f32.gmra.mrb[28].mxu1 %vm24221_vm3, %v1656_v57  ;;  %v1658_v62 = vmax.f32 %v16264_v59, 0.0  ;;  %v13540_v57 = vsel %vm661_vm12, 1.0, %v24045_v44 }
 0x371   :  { %v1657_v61 = vmax.f32 %v1562_v60, 0.0  ;;  %v751_v59 = vpack.c.bf16 %v13540_v57, %v13538_v56  ;;  %v19792_v60 = vadd.s32 48, %v19626_v38 }
 0x373   :  { %v16267_v0 = vpop.f32.mrb[36].mxu0  ;;  %16320 = vmatprep.mubr.msk.f32.mxu1 %vm24221_vm3, %v1657_v61  ;;  %24358 = vst [vmem:[#allocation91_spill] sm:$0xff] %v19792_v60  ;;  %v19795_v61 = vadd.s32 56, %v19626_v38  ;;  %2390 = vxpose.xlu0.c.b16.cont [3/8] %v751_v59, 128  ;;  %vm663_vm13 = vcmp.eq.s32.totalorder %v19792_v60, %v19640_v43 }
 0x374   :  { %v1572_v1 = vpop.f32.mrb[37].mxu0  ;;  %16321 = vmatmul.mubr.msk.f32.gmra.mrb[30].mxu1 %vm24221_vm3, %v1658_v62  ;;  %v1660_v4 = vmax.f32 %v16267_v0, 0.0  ;;  %v502_v62 = vld [vmem:[%s24357_s2] sm:$0xf]  ;;  %v13542_v0 = vsel %vm663_vm13, 1.0, %v24045_v44  ;;  %s25206_s2 = sld [smem:[#allocation45_spill]] }
 0x375   :  { %v1659_v3 = vmax.f32 %v1572_v1, 0.0  ;;  %24359 = vst [vmem:[#allocation92_spill] sm:$0xff] %v19795_v61  ;;  %vm665_vm14 = vcmp.eq.s32.totalorder %v19795_v61, %v19640_v43  ;;  %16492 = vmatprep.subr.msk.mxu1 %vm24218_vm2, %v502_v62 }
 0x376   :  { %v13544_v1 = vsel %vm665_vm14, 1.0, %v24045_v44 }
 0x377   :  { %v16270_v5 = vpop.f32.mrb[38].mxu0  ;;  %16323 = vmatprep.mubr.msk.f32.mxu1 %vm24221_vm3, %v1659_v3  ;;  %v753_v3 = vpack.c.bf16 %v13544_v1, %v13542_v0 }
 0x378   :  { %v1582_v6 = vpop.f32.mrb[39].mxu0  ;;  %16324 = vmatmul.mubr.msk.f32.gmra.mrb[32].mxu1 %vm24221_vm3, %v1660_v4  ;;  %v1662_v9 = vmax.f32 %v16270_v5, 0.0  ;;  %v19810_v4 = vadd.s32 64, %v19626_v38  ;;  %v19813_v5 = vadd.s32 72, %v19626_v38 }
 0x379   :  { %v1661_v8 = vmax.f32 %v1582_v6, 0.0  ;;  %2391 = vxpose.xlu0.c.b16.cont [4/8] %v753_v3, 128 }
 0x37a   :  { %24360 = vst [vmem:[#allocation93_spill] sm:$0xff] %v19810_v4  ;;  %24361 = vst [vmem:[#allocation94_spill] sm:$0xff] %v19813_v5  ;;  %vm667_vm15 = vcmp.eq.s32.totalorder %v19810_v4, %v19640_v43  ;;  %vm669_vm0 = vcmp.eq.s32.totalorder %v19813_v5, %v19640_v43 }
 0x37b   :  { %v16273_v11 = vpop.f32.mrb[40].mxu0  ;;  %16326 = vmatprep.mubr.msk.f32.mxu1 %vm24221_vm3, %v1661_v8  ;;  %v13546_v6 = vsel %vm667_vm15, 1.0, %v24045_v44  ;;  %v13548_v8 = vsel %vm669_vm0, 1.0, %v24045_v44 }
 0x37c   :  { %v1592_v12 = vpop.f32.mrb[41].mxu0  ;;  %16327 = vmatmul.mubr.msk.f32.gmra.mrb[34].mxu1 %vm24221_vm3, %v1662_v9  ;;  %v1664_v14 = vmax.f32 %v16273_v11, 0.0  ;;  %v755_v9 = vpack.c.bf16 %v13548_v8, %v13546_v6  ;;  %v19827_v11 = vadd.s32 80, %v19626_v38 }
 0x37d   :  { %v1663_v13 = vmax.f32 %v1592_v12, 0.0  ;;  %v19830_v12 = vadd.s32 88, %v19626_v38 }
 0x37e   :  { %24362 = vst [vmem:[#allocation95_spill] sm:$0xff] %v19827_v11  ;;  %2392 = vxpose.xlu0.c.b16.cont [5/8] %v755_v9, 128  ;;  %vm671_vm1 = vcmp.eq.s32.totalorder %v19827_v11, %v19640_v43 }
 0x37f   :  { %v16276_v16 = vpop.f32.mrb[42].mxu0  ;;  %16329 = vmatprep.mubr.msk.f32.mxu1 %vm24221_vm3, %v1663_v13  ;;  %24363 = vst [vmem:[#allocation96_spill] sm:$0xff] %v19830_v12  ;;  %vm673_vm6 = vcmp.eq.s32.totalorder %v19830_v12, %v19640_v43  ;;  %v13550_v13 = vsel %vm671_vm1, 1.0, %v24045_v44 }
 0x380   :  { %v1602_v17 = vpop.f32.mrb[43].mxu0  ;;  %16330 = vmatmul.mubr.msk.f32.gmra.mrb[36].mxu1 %vm24221_vm3, %v1664_v14  ;;  %v1666_v20 = vmax.f32 %v16276_v16, 0.0  ;;  %v13552_v14 = vsel %vm673_vm6, 1.0, %v24045_v44 }
 0x381   :  { %v1665_v19 = vmax.f32 %v1602_v17, 0.0  ;;  %v757_v16 = vpack.c.bf16 %v13552_v14, %v13550_v13  ;;  %v19841_v17 = vadd.s32 96, %v19626_v38 }
 0x383   :  { %v16279_v21 = vpop.f32.mrb[44].mxu0  ;;  %16332 = vmatprep.mubr.msk.f32.mxu1 %vm24221_vm3, %v1665_v19  ;;  %24364 = vst [vmem:[#allocation97_spill] sm:$0xff] %v19841_v17  ;;  %v19844_v19 = vadd.s32 104, %v19626_v38  ;;  %2393 = vxpose.xlu0.c.b16.cont [6/8] %v757_v16, 128  ;;  %vm675_vm7 = vcmp.eq.s32.totalorder %v19841_v17, %v19640_v43 }
 0x384   :  { %v1612_v22 = vpop.f32.mrb[45].mxu0  ;;  %16333 = vmatmul.mubr.msk.f32.gmra.mrb[38].mxu1 %vm24221_vm3, %v1666_v20  ;;  %v1668_v25 = vmax.f32 %v16279_v21, 0.0  ;;  %v13554_v20 = vsel %vm675_vm7, 1.0, %v24045_v44 }
 0x385   :  { %v1667_v24 = vmax.f32 %v1612_v22, 0.0  ;;  %24365 = vst [vmem:[#allocation98_spill] sm:$0xff] %v19844_v19  ;;  %vm677_vm9 = vcmp.eq.s32.totalorder %v19844_v19, %v19640_v43 }
 0x386   :  { %v13556_v21 = vsel %vm677_vm9, 1.0, %v24045_v44 }
 0x387   :  { %v16282_v27 = vpop.f32.mrb[46].mxu0  ;;  %16335 = vmatprep.mubr.msk.f32.mxu1 %vm24221_vm3, %v1667_v24  ;;  %v759_v22 = vpack.c.bf16 %v13556_v21, %v13554_v20  ;;  %v19853_v24 = vadd.s32 112, %v19626_v38  ;;  %v765_v21 = vsub.s32 1, %v19626_v38 }
 0x388   :  { %v1622_v28 = vpop.f32.mrb[47].mxu0  ;;  %16336 = vmatmul.mubr.msk.f32.gmra.mrb[40].mxu1 %vm24221_vm3, %v1668_v25  ;;  %v1670_v30 = vmax.f32 %v16282_v27, 0.0  ;;  %v19856_v25 = vadd.s32 120, %v19626_v38  ;;  %v641_v27 = vsub.s32 2, %v19626_v38 }
 0x389   :  { %v1669_v29 = vmax.f32 %v1622_v28, 0.0  ;;  %24366 = vst [vmem:[#allocation99_spill] sm:$0xff] %v19853_v24  ;;  %2394 = vxpose.xlu0.c.b16.cont [7/8] %v759_v22, 128  ;;  %vm679_vm10 = vcmp.eq.s32.totalorder %v19853_v24, %v19640_v43  ;;  %v766_v22 = vrot.slane %v19629_v39, %v765_v21 }
 0x38a   :  { %24367 = vst [vmem:[#allocation100_spill] sm:$0xff] %v19856_v25  ;;  %vm681_vm11 = vcmp.eq.s32.totalorder %v19856_v25, %v19640_v43  ;;  %v642_v28 = vrot.slane %v19629_v39, %v641_v27 }
 0x38b   :  { %v16285_v32 = vpop.f32.mrb[48].mxu0  ;;  %16338 = vmatprep.mubr.msk.f32.mxu1 %vm24221_vm3, %v1669_v29  ;;  %v13558_v29 = vsel %vm679_vm10, 1.0, %v24045_v44 }
 0x38c   :  { %v1632_v33 = vpop.f32.mrb[49].mxu0  ;;  %16339 = vmatmul.mubr.msk.f32.gmra.mrb[42].mxu1 %vm24221_vm3, %v1670_v30  ;;  %v1672_v36 = vmax.f32 %v16285_v32, 0.0  ;;  %v13560_v30 = vsel %vm681_vm11, 1.0, %v24045_v44 }
 0x38d   :  { %v1671_v35 = vmax.f32 %v1632_v33, 0.0  ;;  %v761_v32 = vpack.c.bf16 %v13560_v30, %v13558_v29  ;;  %v650_v33 = vrot.slane %v642_v28, %v19632_v40  ;;  %v19901_v30 = vrot.slane %v766_v22, %v765_v21 }
 0x38f   :  { %16341 = vmatprep.mubr.msk.f32.mxu1 %vm24221_vm3, %v1671_v35  ;;  %2395 = vxpose.xlu0.c.b16.end [8/8] %v761_v32, 128  ;;  %vm652_vm12 = vcmp.eq.s32.totalorder %v19626_v38, %v650_v33  ;;  %vm654_vm13 = vcmp.eq.s32.totalorder %v19635_v41, %v650_v33  ;;  %vm656_vm14 = vcmp.eq.s32.totalorder %v19760_v42, %v650_v33 }
 0x390   :  { %16342 = vmatmul.mubr.msk.f32.gmra.mrb[44].mxu1 %vm24221_vm3, %v1672_v36  ;;  %v13531_v35 = vsel %vm652_vm12, 1.0, %v24045_v44  ;;  %v13533_v36 = vsel %vm654_vm13, 1.0, %v24045_v44  ;;  %vm658_vm15 = vcmp.eq.s32.totalorder %v19763_v45, %v650_v33  ;;  %v13535_v43 = vsel %vm656_vm14, 1.0, %v24045_v44  ;;  %24368 = vst [vmem:[#allocation101_spill] sm:$0xff] %v19901_v30 }
 0x391   :  { %16372 = vmatprep.mubr.msk.f32.mxu1 %vm24212_vm8, %v19648_v50  ;;  %v748_v47 = vpack.c.bf16 %v13533_v36, %v13531_v35  ;;  %v13537_v48 = vsel %vm658_vm15, 1.0, %v24045_v44  ;;  %vm660_vm0 = vcmp.eq.s32.totalorder %v19776_v53, %v650_v33  ;;  %vm662_vm1 = vcmp.eq.s32.totalorder %v19779_v54, %v650_v33 }
 0x392   :  { %v750_v40 = vpack.c.bf16 %v13537_v48, %v13535_v43  ;;  %v13539_v52 = vsel %vm660_vm0, 1.0, %v24045_v44  ;;  %v13541_v56 = vsel %vm662_vm1, 1.0, %v24045_v44  ;;  %vm664_vm6 = vcmp.eq.s32.totalorder %v19792_v60, %v650_v33 }
 0x393   :  { %2404 = vxpose.xlu1.c.b16.start [1/8] %v748_v47, 128  ;;  %v752_v57 = vpack.c.bf16 %v13541_v56, %v13539_v52  ;;  %vm666_vm7 = vcmp.eq.s32.totalorder %v19795_v61, %v650_v33  ;;  %v13543_v59 = vsel %vm664_vm6, 1.0, %v24045_v44  ;;  %vm668_vm9 = vcmp.eq.s32.totalorder %v19810_v4, %v650_v33 }
 0x394   :  { %16373 = vmatmul.mubr.msk.f32.vlgmr.msra.gmra.mrb[46].mxu1 %vm24212_vm8, %v19650_v51  ;;  %vm670_vm10 = vcmp.eq.s32.totalorder %v19813_v5, %v650_v33  ;;  %v13547_v1 = vsel %vm668_vm9, 1.0, %v24045_v44  ;;  %vm672_vm11 = vcmp.eq.s32.totalorder %v19827_v11, %v650_v33  ;;  %vm674_vm12 = vcmp.eq.s32.totalorder %v19830_v12, %v650_v33 }
 0x395   :  { %16375 = vmatprep.mubr.msk.f32.mxu1 %vm24212_vm8, %v19658_v58  ;;  %16493 = vmatpush3.msk.msra.mxu1 %vm24218_vm2, %v502_v62  ;;  %v13545_v62 = vsel %vm666_vm7, 1.0, %v24045_v44  ;;  %v13549_v3 = vsel %vm670_vm10, 1.0, %v24045_v44  ;;  %v13551_v8 = vsel %vm672_vm11, 1.0, %v24045_v44  ;;  %v13553_v9 = vsel %vm674_vm12, 1.0, %v24045_v44 }
 0x396   :  { %v754_v0 = vpack.c.bf16 %v13545_v62, %v13543_v59  ;;  %v756_v6 = vpack.c.bf16 %v13549_v3, %v13547_v1  ;;  %v758_v13 = vpack.c.bf16 %v13553_v9, %v13551_v8  ;;  %vm676_vm13 = vcmp.eq.s32.totalorder %v19841_v17, %v650_v33 }
 0x397   :  { %2405 = vxpose.xlu1.c.b16.cont [2/8] %v750_v40, 128  ;;  %vm678_vm14 = vcmp.eq.s32.totalorder %v19844_v19, %v650_v33  ;;  %v13555_v14 = vsel %vm676_vm13, 1.0, %v24045_v44  ;;  %vm680_vm15 = vcmp.eq.s32.totalorder %v19853_v24, %v650_v33  ;;  %vm682_vm0 = vcmp.eq.s32.totalorder %v19856_v25, %v650_v33 }
 0x398   :  { %16376 = vmatmul.mubr.msk.f32.gmra.mrb[48].mxu1 %vm24212_vm8, %v19656_v55  ;;  %v13557_v16 = vsel %vm678_vm14, 1.0, %v24045_v44  ;;  %v13559_v27 = vsel %vm680_vm15, 1.0, %v24045_v44  ;;  %v13561_v28 = vsel %vm682_vm0, 1.0, %v24045_v44  ;;  %vm779_vm1 = vcmp.eq.s32.totalorder %v19626_v38, %v19901_v30 }
 0x399   :  { %16378 = vmatprep.mubr.msk.f32.mxu1 %vm24212_vm8, %v19669_v2  ;;  %v760_v20 = vpack.c.bf16 %v13557_v16, %v13555_v14  ;;  %v762_v29 = vpack.c.bf16 %v13561_v28, %v13559_v27  ;;  %vm781_vm6 = vcmp.eq.s32.totalorder %v19635_v41, %v19901_v30  ;;  %v13562_v32 = vsel %vm779_vm1, 1.0, %v24045_v44 }
 0x39a   :  { %v13564_v33 = vsel %vm781_vm6, 1.0, %v24045_v44  ;;  %vm19909_vm7 = vmpackc.low %vm781_vm6, %vm779_vm1  ;;  %v24369_v36 = vmov 0  ;;  %vm783_vm9 = vcmp.eq.s32.totalorder %v19760_v42, %v19901_v30  ;;  %vm785_vm10 = vcmp.eq.s32.totalorder %v19763_v45, %v19901_v30 }
 0x39b   :  { %2406 = vxpose.xlu1.c.b16.cont [3/8] %v752_v57, 128  ;;  %v875_v35 = vpack.c.bf16 %v13564_v33, %v13562_v32  ;;  %v24370_v36 = vsel %vm19909_vm7, 4294967295, %v24369_v36  ;;  %v13566_v47 = vsel %vm783_vm9, 1.0, %v24045_v44  ;;  %v13568_v43 = vsel %vm785_vm10, 1.0, %v24045_v44 }
 0x39c   :  { %16379 = vmatmul.mubr.msk.f32.gmra.mrb[50].mxu1 %vm24212_vm8, %v19664_v63  ;;  %24371 = vst [vmem:[#allocation102_spill] sm:$0xff] %v24370_v36  ;;  %v877_v48 = vpack.c.bf16 %v13568_v43, %v13566_v47  ;;  %vm24036_vm11 = vcmp.eq.s32.totalorder %v19776_v53, %v19901_v30  ;;  %vm24035_vm12 = vcmp.eq.s32.totalorder %v19779_v54, %v19901_v30 }
 0x39d   :  { %16381 = vmatprep.mubr.msk.f32.mxu1 %vm24212_vm8, %v19679_v10  ;;  %2581 = vxpose.xlu0.c.b16.start [1/8] %v875_v35, 128  ;;  %v13570_v40 = vsel %vm24036_vm11, 1.0, %v24045_v44  ;;  %v13572_v52 = vsel %vm24035_vm12, 1.0, %v24045_v44  ;;  %vm24034_vm13 = vcmp.eq.s32.totalorder %v19792_v60, %v19901_v30  ;;  %vm24033_vm14 = vcmp.eq.s32.totalorder %v19795_v61, %v19901_v30 }
 0x39e   :  { %v879_v56 = vpack.c.bf16 %v13572_v52, %v13570_v40  ;;  %v13574_v57 = vsel %vm24034_vm13, 1.0, %v24045_v44  ;;  %v13576_v59 = vsel %vm24033_vm14, 1.0, %v24045_v44  ;;  %vm24026_vm15 = vcmp.eq.s32.totalorder %v19810_v4, %v19901_v30 }
 0x39f   :  { %2407 = vxpose.xlu1.c.b16.cont [4/8] %v754_v0, 128  ;;  %v881_v62 = vpack.c.bf16 %v13576_v59, %v13574_v57  ;;  %vm24025_vm0 = vcmp.eq.s32.totalorder %v19813_v5, %v19901_v30  ;;  %v13578_v0 = vsel %vm24026_vm15, 1.0, %v24045_v44  ;;  %vm24028_vm1 = vcmp.eq.s32.totalorder %v19827_v11, %v19901_v30 }
 0x3a0   :  { %16382 = vmatmul.mubr.msk.f32.gmra.mrb[52].mxu1 %vm24212_vm8, %v19675_v7  ;;  %v13580_v1 = vsel %vm24025_vm0, 1.0, %v24045_v44  ;;  %vm24027_vm6 = vcmp.eq.s32.totalorder %v19830_v12, %v19901_v30  ;;  %vm24030_vm0 = vcmp.eq.s32.totalorder %v19841_v17, %v19901_v30  ;;  %vm24029_vm15 = vcmp.eq.s32.totalorder %v19844_v19, %v19901_v30 }
 0x3a1   :  { %16384 = vmatprep.mubr.msk.f32.mxu1 %vm24212_vm8, %v19689_v18  ;;  %2582 = vxpose.xlu0.c.b16.cont [2/8] %v877_v48, 128  ;;  %v883_v3 = vpack.c.bf16 %v13580_v1, %v13578_v0  ;;  %v13584_v8 = vsel %vm24027_vm6, 1.0, %v24045_v44  ;;  %v13588_v14 = vsel %vm24029_vm15, 1.0, %v24045_v44  ;;  %vm24032_vm6 = vcmp.eq.s32.totalorder %v19853_v24, %v19901_v30 }
 0x3a2   :  { %v13590_v27 = vsel %vm24032_vm6, 1.0, %v24045_v44 }
 0x3a3   :  { %2408 = vxpose.xlu1.c.b16.cont [5/8] %v756_v6, 128  ;;  %v13582_v6 = vsel %vm24028_vm1, 1.0, %v24045_v44  ;;  %vm24031_vm1 = vcmp.eq.s32.totalorder %v19856_v25, %v19901_v30 }
 0x3a4   :  { %16385 = vmatmul.mubr.msk.f32.gmra.mrb[54].mxu1 %vm24212_vm8, %v19685_v15  ;;  %v885_v9 = vpack.c.bf16 %v13584_v8, %v13582_v6  ;;  %v13592_v28 = vsel %vm24031_vm1, 1.0, %v24045_v44 }
 0x3a5   :  { %16387 = vmatprep.mubr.msk.f32.mxu1 %vm24212_vm8, %v19699_v26  ;;  %2583 = vxpose.xlu0.c.b16.cont [3/8] %v879_v56, 128 }
 0x3a7   :  { %2409 = vxpose.xlu1.c.b16.cont [6/8] %v758_v13, 128  ;;  %v13586_v13 = vsel %vm24030_vm0, 1.0, %v24045_v44 }
 0x3a8   :  { %16388 = vmatmul.mubr.msk.f32.gmra.mrb[56].mxu1 %vm24212_vm8, %v19695_v23  ;;  %v887_v16 = vpack.c.bf16 %v13588_v14, %v13586_v13 }
 0x3a9   :  { %16390 = vmatprep.mubr.msk.f32.mxu1 %vm24212_vm8, %v19709_v34  ;;  %2584 = vxpose.xlu0.c.b16.cont [4/8] %v881_v62, 128 }
 0x3ab   :  { %2410 = vxpose.xlu1.c.b16.cont [7/8] %v760_v20, 128  ;;  %v769_v20 = vsub.s32 3, %v19626_v38 }
 0x3ac   :  { %16391 = vmatmul.mubr.msk.f32.gmra.mrb[58].mxu1 %vm24212_vm8, %v19705_v31 }
 0x3ad   :  { %16393 = vmatprep.mubr.msk.f32.mxu1 %vm24212_vm8, %v19719_v49  ;;  %2585 = vxpose.xlu0.c.b16.cont [5/8] %v883_v3, 128  ;;  %v770_v22 = vrot.slane %v19629_v39, %v769_v20 }
 0x3af   :  { %2411 = vxpose.xlu1.c.b16.end [8/8] %v762_v29, 128  ;;  %v889_v29 = vpack.c.bf16 %v13592_v28, %v13590_v27  ;;  %v19999_v32 = vrot.slane %v770_v22, %v765_v21 }
 0x3b0   :  { %16394 = vmatmul.mubr.msk.f32.gmra.mrb[60].mxu1 %vm24212_vm8, %v19715_v46 }
 0x3b1   :  { %2586 = vxpose.xlu0.c.b16.cont [6/8] %v885_v9, 128  ;;  %24372 = vst [vmem:[#allocation103_spill] sm:$0xff] %v19999_v32  ;;  %vm780_vm15 = vcmp.eq.s32.totalorder %v19626_v38, %v19999_v32  ;;  %vm782_vm0 = vcmp.eq.s32.totalorder %v19635_v41, %v19999_v32  ;;  %vm784_vm1 = vcmp.eq.s32.totalorder %v19760_v42, %v19999_v32 }
 0x3b2   :  { %v13563_v39 = vsel %vm780_vm15, 1.0, %v24045_v44  ;;  %v13565_v33 = vsel %vm782_vm0, 1.0, %v24045_v44  ;;  %vm786_vm6 = vcmp.eq.s32.totalorder %v19763_v45, %v19999_v32  ;;  %v13567_v21 = vsel %vm784_vm1, 1.0, %v24045_v44 }
 0x3b3   :  { %v876_v35 = vpack.c.bf16 %v13565_v33, %v13563_v39  ;;  %v13569_v47 = vsel %vm786_vm6, 1.0, %v24045_v44  ;;  %vm24038_vm14 = vcmp.eq.s32.totalorder %v19776_v53, %v19999_v32  ;;  %vm24037_vm13 = vcmp.eq.s32.totalorder %v19779_v54, %v19999_v32 }
 0x3b4   :  { %v878_v43 = vpack.c.bf16 %v13569_v47, %v13567_v21  ;;  %v13571_v48 = vsel %vm24038_vm14, 1.0, %v24045_v44  ;;  %v13573_v40 = vsel %vm24037_vm13, 1.0, %v24045_v44  ;;  %vm24040_vm12 = vcmp.eq.s32.totalorder %v19792_v60, %v19999_v32 }
 0x3b5   :  { %2587 = vxpose.xlu0.c.b16.cont [7/8] %v887_v16, 128  ;;  %2597 = vxpose.xlu1.c.b16.start [1/8] %v876_v35, 128  ;;  %v880_v56 = vpack.c.bf16 %v13573_v40, %v13571_v48  ;;  %vm24039_vm11 = vcmp.eq.s32.totalorder %v19795_v61, %v19999_v32  ;;  %v13575_v57 = vsel %vm24040_vm12, 1.0, %v24045_v44  ;;  %vm24042_vm13 = vcmp.eq.s32.totalorder %v19810_v4, %v19999_v32 }
 0x3b6   :  { %v13577_v59 = vsel %vm24039_vm11, 1.0, %v24045_v44  ;;  %vm24041_vm14 = vcmp.eq.s32.totalorder %v19813_v5, %v19999_v32  ;;  %v13579_v0 = vsel %vm24042_vm13, 1.0, %v24045_v44  ;;  %vm24044_vm11 = vcmp.eq.s32.totalorder %v19827_v11, %v19999_v32 }
 0x3b7   :  { %v882_v62 = vpack.c.bf16 %v13577_v59, %v13575_v57  ;;  %v13581_v1 = vsel %vm24041_vm14, 1.0, %v24045_v44  ;;  %vm24043_vm12 = vcmp.eq.s32.totalorder %v19830_v12, %v19999_v32  ;;  %v13583_v6 = vsel %vm24044_vm11, 1.0, %v24045_v44 }
 0x3b8   :  { %v884_v3 = vpack.c.bf16 %v13581_v1, %v13579_v0  ;;  %v13585_v8 = vsel %vm24043_vm12, 1.0, %v24045_v44  ;;  %vm24225_vm14 = vcmp.eq.s32.totalorder %v19841_v17, %v19999_v32  ;;  %vm24224_vm13 = vcmp.eq.s32.totalorder %v19844_v19, %v19999_v32 }
 0x3b9   :  { %2588 = vxpose.xlu0.c.b16.end [8/8] %v889_v29, 128  ;;  %2598 = vxpose.xlu1.c.b16.cont [2/8] %v878_v43, 128  ;;  %v886_v9 = vpack.c.bf16 %v13585_v8, %v13583_v6  ;;  %v13587_v13 = vsel %vm24225_vm14, 1.0, %v24045_v44  ;;  %v13589_v14 = vsel %vm24224_vm13, 1.0, %v24045_v44  ;;  %vm24223_vm12 = vcmp.eq.s32.totalorder %v19853_v24, %v19999_v32 }
 0x3ba   :  { %v888_v16 = vpack.c.bf16 %v13589_v14, %v13587_v13  ;;  %vm24222_vm11 = vcmp.eq.s32.totalorder %v19856_v25, %v19999_v32  ;;  %v13591_v20 = vsel %vm24223_vm12, 1.0, %v24045_v44 }
 0x3bb   :  { %v13593_v22 = vsel %vm24222_vm11, 1.0, %v24045_v44 }
 0x3bc   :  { %v890_v27 = vpack.c.bf16 %v13593_v22, %v13591_v20 }
 0x3bd   :  { %2599 = vxpose.xlu1.c.b16.cont [3/8] %v880_v56, 128 }
 0x3c1   :  { %2600 = vxpose.xlu1.c.b16.cont [4/8] %v882_v62, 128 }
 0x3c5   :  { %2601 = vxpose.xlu1.c.b16.cont [5/8] %v884_v3, 128 }
 0x3c9   :  { %2602 = vxpose.xlu1.c.b16.cont [6/8] %v886_v9, 128 }
 0x3cd   :  { %2603 = vxpose.xlu1.c.b16.cont [7/8] %v888_v16, 128 }
 0x3d1   :  { %2604 = vxpose.xlu1.c.b16.end [8/8] %v890_v27, 128 }
 0x3d9   :  { %v20037_v52 = vpop.trf.xlu0 }
 0x3da   :  { %24373 = vst [vmem:[#allocation104_spill] sm:$0xff] %v20037_v52  ;;  %16412 = vmatprep.mubr.bf16.mxu0 %v20037_v52 }
 0x423   :  { %v16348_v28 = vpop.f32.mrb[50].mxu0 }
 0x424   :  { %v2145_v29 = vpop.f32.mrb[51].mxu0 }
 0x425   :  { %v20100_v39 = vpack.c.bf16 %v16348_v28, %v2145_v29 }
 0x427   :  { %v20102_v33 = vpop.f32.mrb[14].mxu1  ;;  %v16351_v35 = vpop.f32.mrb[52].mxu0 }
 0x428   :  { %24374 = vst [vmem:[#allocation105_spill] sm:$0xff] %v20102_v33  ;;  %v20104_v21 = vpop.f32.mrb[15].mxu1  ;;  %v2155_v47 = vpop.f32.mrb[53].mxu0  ;;  %v24055_v40 = vmax.f32 %v20102_v33, 0.0 }
 0x429   :  { %24375 = vst [vmem:[#allocation106_spill] sm:$0xff] %v20104_v21  ;;  %v24057_v43 = vmax.f32 %v20104_v21, 0.0  ;;  %v20107_v48 = vpack.c.bf16 %v16351_v35, %v2155_v47 }
 0x42b   :  { %v20110_v56 = vpop.f32.mrb[16].mxu1  ;;  %16494 = vmatprep.mubr.msk.f32.mxu1 %vm24219_vm4, %v24057_v43  ;;  %v16354_v57 = vpop.f32.mrb[54].mxu0 }
 0x42c   :  { %24376 = vst [vmem:[#allocation107_spill] sm:$0xff] %v20110_v56  ;;  %v20115_v59 = vpop.f32.mrb[17].mxu1  ;;  %16495 = vmatmul.mubr.msk.f32.vlgmr.msra.gmra.mrb[62].mxu1 %vm24219_vm4, %v24055_v40  ;;  %v2165_v62 = vpop.f32.mrb[55].mxu0  ;;  %v24052_v3 = vmax.f32 %v20110_v56, 0.0 }
 0x42d   :  { %24377 = vst [vmem:[#allocation108_spill] sm:$0xff] %v20115_v59  ;;  %v24053_v0 = vmax.f32 %v20115_v59, 0.0  ;;  %v20121_v1 = vpack.c.bf16 %v16354_v57, %v2165_v62 }
 0x42f   :  { %v20124_v6 = vpop.f32.mrb[18].mxu1  ;;  %16497 = vmatprep.mubr.msk.f32.mxu1 %vm24219_vm4, %v24053_v0  ;;  %v16357_v8 = vpop.f32.mrb[56].mxu0 }
 0x430   :  { %24378 = vst [vmem:[#allocation109_spill] sm:$0xff] %v20124_v6  ;;  %v20129_v9 = vpop.f32.mrb[19].mxu1  ;;  %16498 = vmatmul.mubr.msk.f32.gmra.mrb[64].mxu1 %vm24219_vm4, %v24052_v3  ;;  %v2175_v13 = vpop.f32.mrb[57].mxu0  ;;  %v24048_v20 = vmax.f32 %v20124_v6, 0.0 }
 0x431   :  { %24379 = vst [vmem:[#allocation110_spill] sm:$0xff] %v20129_v9  ;;  %v24050_v14 = vmax.f32 %v20129_v9, 0.0  ;;  %v20135_v16 = vpack.c.bf16 %v16357_v8, %v2175_v13 }
 0x433   :  { %v20138_v22 = vpop.f32.mrb[20].mxu1  ;;  %16500 = vmatprep.mubr.msk.f32.mxu1 %vm24219_vm4, %v24050_v14  ;;  %v16360_v27 = vpop.f32.mrb[58].mxu0 }
 0x434   :  { %24380 = vst [vmem:[#allocation111_spill] sm:$0xff] %v20138_v22  ;;  %v20143_v28 = vpop.f32.mrb[21].mxu1  ;;  %16501 = vmatmul.mubr.msk.f32.gmra.mrb[66].mxu1 %vm24219_vm4, %v24048_v20  ;;  %v2185_v29 = vpop.f32.mrb[59].mxu0  ;;  %v24051_v57 = vmax.f32 %v20138_v22, 0.0 }
 0x435   :  { %24381 = vst [vmem:[#allocation112_spill] sm:$0xff] %v20143_v28  ;;  %v24049_v35 = vmax.f32 %v20143_v28, 0.0  ;;  %v20149_v47 = vpack.c.bf16 %v16360_v27, %v2185_v29 }
 0x437   :  { %v20152_v62 = vpop.f32.mrb[22].mxu1  ;;  %16503 = vmatprep.mubr.msk.f32.mxu1 %vm24219_vm4, %v24049_v35  ;;  %v16363_v8 = vpop.f32.mrb[60].mxu0 }
 0x438   :  { %24382 = vst [vmem:[#allocation113_spill] sm:$0xff] %v20152_v62  ;;  %v20157_v13 = vpop.f32.mrb[23].mxu1  ;;  %16504 = vmatmul.mubr.msk.f32.gmra.mrb[68].mxu1 %vm24219_vm4, %v24051_v57  ;;  %v2195_v44 = vpop.f32.mrb[61].mxu0  ;;  %v24056_v29 = vmax.f32 %v20152_v62, 0.0 }
 0x439   :  { %24383 = vst [vmem:[#allocation114_spill] sm:$0xff] %v20157_v13  ;;  %v24054_v37 = vmax.f32 %v20157_v13, 0.0  ;;  %v20163_v27 = vpack.c.bf16 %v16363_v8, %v2195_v44 }
 0x43b   :  { %v20166_v20 = vpop.f32.mrb[24].mxu1  ;;  %16506 = vmatprep.mubr.msk.f32.mxu1 %vm24219_vm4, %v24054_v37  ;;  %v16366_v35 = vpop.f32.mrb[62].mxu0 }
 0x43c   :  { %24384 = vst [vmem:[#allocation115_spill] sm:$0xff] %v20166_v20  ;;  %v20171_v14 = vpop.f32.mrb[25].mxu1  ;;  %16507 = vmatmul.mubr.msk.f32.gmra.mrb[70].mxu1 %vm24219_vm4, %v24056_v29  ;;  %v2205_v57 = vpop.f32.mrb[63].mxu0  ;;  %v24061_v8 = vmax.f32 %v20166_v20, 0.0 }
 0x43d   :  { %24385 = vst [vmem:[#allocation116_spill] sm:$0xff] %v20171_v14  ;;  %v24060_v3 = vmax.f32 %v20171_v14, 0.0  ;;  %v20177_v44 = vpack.c.bf16 %v16366_v35, %v2205_v57  ;;  %v20475_v14 = vld [vmem:[#allocation9] ss:$0 sm:$0xff] }
 0x43f   :  { %v20180_v0 = vpop.f32.mrb[26].mxu1  ;;  %16509 = vmatprep.mubr.msk.f32.mxu1 %vm24219_vm4, %v24060_v3  ;;  %v16369_v37 = vpop.f32.mrb[64].mxu0 }
 0x440   :  { %24386 = vst [vmem:[#allocation117_spill] sm:$0xff] %v20180_v0  ;;  %v20185_v40 = vpop.f32.mrb[27].mxu1  ;;  %16510 = vmatmul.mubr.msk.f32.gmra.mrb[72].mxu1 %vm24219_vm4, %v24061_v8  ;;  %v2215_v29 = vpop.f32.mrb[65].mxu0  ;;  %v24065_v57 = vmax.f32 %v20180_v0, 0.0 }
 0x441   :  { %24387 = vst [vmem:[#allocation118_spill] sm:$0xff] %v20185_v40  ;;  %v24064_v43 = vmax.f32 %v20185_v40, 0.0  ;;  %v20191_v35 = vpack.c.bf16 %v16369_v37, %v2215_v29  ;;  %v492_v40 = vld [vmem:[%s24438_s7] sm:$0xf]  ;;  %s25221_s7 = sld [smem:[#allocation48_spill]] }
 0x443   :  { %v20194_v52 = vpop.f32.mrb[28].mxu1  ;;  %16512 = vmatprep.mubr.msk.f32.mxu1 %vm24219_vm4, %v24064_v43 }
 0x444   :  { %24388 = vst [vmem:[#allocation119_spill] sm:$0xff] %v20194_v52  ;;  %v20199_v3 = vpop.f32.mrb[29].mxu1  ;;  %16513 = vmatmul.mubr.msk.f32.gmra.mrb[74].mxu1 %vm24219_vm4, %v24065_v57  ;;  %v24071_v25 = vmax.f32 %v20194_v52, 0.0 }
 0x445   :  { %24389 = vst [vmem:[#allocation120_spill] sm:$0xff] %v20199_v3  ;;  %v24070_v8 = vmax.f32 %v20199_v3, 0.0 }
 0x447   :  { %v20206_v37 = vpop.f32.mrb[30].mxu1  ;;  %16515 = vmatprep.mubr.msk.f32.mxu1 %vm24219_vm4, %v24070_v8 }
 0x448   :  { %24390 = vst [vmem:[#allocation121_spill] sm:$0xff] %v20206_v37  ;;  %v20211_v29 = vpop.f32.mrb[31].mxu1  ;;  %16516 = vmatmul.mubr.msk.f32.gmra.mrb[76].mxu1 %vm24219_vm4, %v24071_v25  ;;  %v24077_v57 = vmax.f32 %v20206_v37, 0.0 }
 0x449   :  { %24391 = vst [vmem:[#allocation122_spill] sm:$0xff] %v20211_v29  ;;  %v24076_v43 = vmax.f32 %v20211_v29, 0.0 }
 0x44b   :  { %v20218_v24 = vpop.f32.mrb[32].mxu1  ;;  %16518 = vmatprep.mubr.msk.f32.mxu1 %vm24219_vm4, %v24076_v43 }
 0x44c   :  { %24392 = vst [vmem:[#allocation123_spill] sm:$0xff] %v20218_v24  ;;  %v20223_v19 = vpop.f32.mrb[33].mxu1  ;;  %16519 = vmatmul.mubr.msk.f32.gmra.mrb[78].mxu1 %vm24219_vm4, %v24077_v57  ;;  %v24083_v25 = vmax.f32 %v20218_v24, 0.0 }
 0x44d   :  { %24393 = vst [vmem:[#allocation124_spill] sm:$0xff] %v20223_v19  ;;  %v24082_v8 = vmax.f32 %v20223_v19, 0.0 }
 0x44f   :  { %v20230_v17 = vpop.f32.mrb[34].mxu1  ;;  %16521 = vmatprep.mubr.msk.f32.mxu1 %vm24219_vm4, %v24082_v8 }
 0x450   :  { %24394 = vst [vmem:[#allocation125_spill] sm:$0xff] %v20230_v17  ;;  %v20235_v12 = vpop.f32.mrb[35].mxu1  ;;  %16522 = vmatmul.mubr.msk.f32.gmra.mrb[80].mxu1 %vm24219_vm4, %v24083_v25  ;;  %v24089_v57 = vmax.f32 %v20230_v17, 0.0  ;;  %v508_v17 = vld [vmem:[%s24416_s14 + $0x20] sm:$0xff] }
 0x451   :  { %24395 = vst [vmem:[#allocation126_spill] sm:$0xff] %v20235_v12  ;;  %v24088_v43 = vmax.f32 %v20235_v12, 0.0 }
 0x453   :  { %v20242_v11 = vpop.f32.mrb[36].mxu1  ;;  %16524 = vmatprep.mubr.msk.f32.mxu1 %vm24219_vm4, %v24088_v43 }
 0x454   :  { %24396 = vst [vmem:[#allocation127_spill] sm:$0xff] %v20242_v11  ;;  %v20247_v5 = vpop.f32.mrb[37].mxu1  ;;  %16525 = vmatmul.mubr.msk.f32.gmra.mrb[82].mxu1 %vm24219_vm4, %v24089_v57  ;;  %v24095_v25 = vmax.f32 %v20242_v11, 0.0 }
 0x455   :  { %24397 = vst [vmem:[#allocation128_spill] sm:$0xff] %v20247_v5  ;;  %v24094_v8 = vmax.f32 %v20247_v5, 0.0 }
 0x457   :  { %v20254_v4 = vpop.f32.mrb[38].mxu1  ;;  %16527 = vmatprep.mubr.msk.f32.mxu1 %vm24219_vm4, %v24094_v8 }
 0x458   :  { %24398 = vst [vmem:[#allocation129_spill] sm:$0xff] %v20254_v4  ;;  %v20259_v61 = vpop.f32.mrb[39].mxu1  ;;  %16528 = vmatmul.mubr.msk.f32.gmra.mrb[84].mxu1 %vm24219_vm4, %v24095_v25  ;;  %v24101_v57 = vmax.f32 %v20254_v4, 0.0 }
 0x459   :  { %24399 = vst [vmem:[#allocation130_spill] sm:$0xff] %v20259_v61  ;;  %v24100_v43 = vmax.f32 %v20259_v61, 0.0 }
 0x45b   :  { %v20266_v60 = vpop.f32.mrb[40].mxu1  ;;  %16530 = vmatprep.mubr.msk.f32.mxu1 %vm24219_vm4, %v24100_v43 }
 0x45c   :  { %24400 = vst [vmem:[#allocation131_spill] sm:$0xff] %v20266_v60  ;;  %v20271_v54 = vpop.f32.mrb[41].mxu1  ;;  %16531 = vmatmul.mubr.msk.f32.gmra.mrb[86].mxu1 %vm24219_vm4, %v24101_v57  ;;  %v24107_v25 = vmax.f32 %v20266_v60, 0.0 }
 0x45d   :  { %24401 = vst [vmem:[#allocation132_spill] sm:$0xff] %v20271_v54  ;;  %v24106_v8 = vmax.f32 %v20271_v54, 0.0 }
 0x45f   :  { %v20278_v53 = vpop.f32.mrb[42].mxu1  ;;  %16533 = vmatprep.mubr.msk.f32.mxu1 %vm24219_vm4, %v24106_v8 }
 0x460   :  { %24402 = vst [vmem:[#allocation133_spill] sm:$0xff] %v20278_v53  ;;  %v20283_v30 = vpop.f32.mrb[43].mxu1  ;;  %16534 = vmatmul.mubr.msk.f32.gmra.mrb[88].mxu1 %vm24219_vm4, %v24107_v25  ;;  %v24114_v57 = vmax.f32 %v20278_v53, 0.0 }
 0x461   :  { %24403 = vst [vmem:[#allocation134_spill] sm:$0xff] %v20283_v30  ;;  %v24111_v43 = vmax.f32 %v20283_v30, 0.0 }
 0x463   :  { %v20290_v36 = vpop.f32.mrb[44].mxu1  ;;  %16536 = vmatprep.mubr.msk.f32.mxu1 %vm24219_vm4, %v24111_v43 }
 0x464   :  { %24404 = vst [vmem:[#allocation135_spill] sm:$0xff] %v20290_v36  ;;  %v20295_v45 = vpop.f32.mrb[45].mxu1  ;;  %16537 = vmatmul.mubr.msk.f32.gmra.mrb[90].mxu1 %vm24219_vm4, %v24114_v57  ;;  %v24123_v25 = vmax.f32 %v20290_v36, 0.0 }
 0x465   :  { %24405 = vst [vmem:[#allocation136_spill] sm:$0xff] %v20295_v45  ;;  %v24120_v8 = vmax.f32 %v20295_v45, 0.0 }
 0x467   :  { %v16374_v42 = vpop.f32.mrb[46].mxu1  ;;  %16539 = vmatprep.mubr.msk.f32.mxu1 %vm24219_vm4, %v24120_v8 }
 0x468   :  { %v2293_v60 = vpop.f32.mrb[47].mxu1  ;;  %16540 = vmatmul.mubr.msk.f32.gmra.mrb[92].mxu1 %vm24219_vm4, %v24123_v25  ;;  %v20308_v25 = vpop.trf.xlu0 }
 0x469   :  { %v2380_v43 = vpack.c.bf16 %v16374_v42, %v2293_v60  ;;  %24406 = vst [vmem:[#allocation137_spill] sm:$0xff] %v20308_v25 }
 0x46b   :  { %v16377_v30 = vpop.f32.mrb[48].mxu1  ;;  %16396 = vmatprep.subr.bf16.mxu0 %v2380_v43 }
 0x46c   :  { %v2303_v53 = vpop.f32.mrb[49].mxu1  ;;  %16397 = vmatpush3.bf16.msra.mxu0 %v2380_v43 }
 0x46d   :  { %v2381_v57 = vpack.c.bf16 %v16377_v30, %v2303_v53 }
 0x46f   :  { %v16380_v54 = vpop.f32.mrb[50].mxu1  ;;  %16398 = vmatprep.subr.bf16.mxu0 %v2381_v57 }
 0x470   :  { %v2313_v4 = vpop.f32.mrb[51].mxu1  ;;  %16399 = vmatpush3.bf16.msra.mxu0 %v2381_v57  ;;  %v20310_v57 = vpop.trf.xlu0 }
 0x471   :  { %v2382_v61 = vpack.c.bf16 %v16380_v54, %v2313_v4  ;;  %24407 = vst [vmem:[#allocation138_spill] sm:$0xff] %v20310_v57 }
 0x473   :  { %v16383_v11 = vpop.f32.mrb[52].mxu1  ;;  %16400 = vmatprep.subr.bf16.mxu0 %v2382_v61 }
 0x474   :  { %v2323_v45 = vpop.f32.mrb[53].mxu1  ;;  %16401 = vmatpush3.bf16.msra.mxu0 %v2382_v61 }
 0x475   :  { %v2383_v8 = vpack.c.bf16 %v16383_v11, %v2323_v45 }
 0x477   :  { %v16386_v5 = vpop.f32.mrb[54].mxu1  ;;  %16402 = vmatprep.subr.bf16.mxu0 %v2383_v8 }
 0x478   :  { %v2333_v36 = vpop.f32.mrb[55].mxu1  ;;  %16403 = vmatpush3.bf16.msra.mxu0 %v2383_v8 }
 0x479   :  { %v2384_v42 = vpack.c.bf16 %v16386_v5, %v2333_v36  ;;  %v20312_v5 = vpop.trf.xlu0 }
 0x47a   :  { %24408 = vst [vmem:[#allocation139_spill] sm:$0xff] %v20312_v5 }
 0x47b   :  { %v16389_v60 = vpop.f32.mrb[56].mxu1  ;;  %16404 = vmatprep.subr.bf16.mxu0 %v2384_v42 }
 0x47c   :  { %v2343_v53 = vpop.f32.mrb[57].mxu1  ;;  %16405 = vmatpush3.bf16.msra.mxu0 %v2384_v42 }
 0x47d   :  { %v2385_v30 = vpack.c.bf16 %v16389_v60, %v2343_v53  ;;  %v20319_v36 = vpop.trf.xlu0 }
 0x47e   :  { %24409 = vst [vmem:[#allocation140_spill] sm:$0xff] %v20319_v36 }
 0x47f   :  { %v16392_v43 = vpop.f32.mrb[58].mxu1  ;;  %16406 = vmatprep.subr.bf16.mxu0 %v2385_v30 }
 0x480   :  { %v2353_v54 = vpop.f32.mrb[59].mxu1  ;;  %16407 = vmatpush3.bf16.msra.mxu0 %v2385_v30 }
 0x481   :  { %v2386_v4 = vpack.c.bf16 %v16392_v43, %v2353_v54  ;;  %v20324_v8 = vpop.trf.xlu0  ;;  %v505_v43 = vld [vmem:[%s24416_s14 + $0x8] sm:$0xff] }
 0x482   :  { %24410 = vst [vmem:[#allocation141_spill] sm:$0xff] %v20324_v8 }
 0x483   :  { %v16395_v45 = vpop.f32.mrb[60].mxu1  ;;  %16408 = vmatprep.subr.bf16.mxu0 %v2386_v4 }
 0x484   :  { %v2363_v61 = vpop.f32.mrb[61].mxu1  ;;  %16409 = vmatpush3.bf16.msra.mxu0 %v2386_v4 }
 0x485   :  { %v2387_v11 = vpack.c.bf16 %v16395_v45, %v2363_v61  ;;  %v20333_v42 = vpop.trf.xlu0 }
 0x486   :  { %24412 = vst [vmem:[#allocation143_spill] sm:$0xff] %v20333_v42 }
 0x487   :  { %16410 = vmatprep.subr.bf16.mxu0 %v2387_v11 }
 0x488   :  { %16411 = vmatpush3.bf16.msra.mxu0 %v2387_v11 }
 0x489   :  { %16444 = vmatprep.subr.bf16.mxu0 %v20100_v39 }
 0x48b   :  { %16413 = vmatmul.mubr.bf16.vlgmr.msra.gmra.mrb[68].mxu0 %v20308_v25 }
 0x48c   :  { %16445 = vmatpush3.bf16.msra.mxu0 %v20100_v39  ;;  %16416 = vmatprep.mubr.bf16.mxu0 %v20310_v57  ;;  %v20329_v39 = vpop.trf.xlu1 }
 0x48d   :  { %16446 = vmatprep.subr.bf16.mxu0 %v20107_v48  ;;  %24411 = vst [vmem:[#allocation142_spill] sm:$0xff] %v20329_v39 }
 0x490   :  { %16447 = vmatpush3.bf16.msra.mxu0 %v20107_v48  ;;  %v20336_v48 = vpop.trf.xlu1 }
 0x491   :  { %16448 = vmatprep.subr.bf16.mxu0 %v20121_v1  ;;  %24413 = vst [vmem:[#allocation144_spill] sm:$0xff] %v20336_v48 }
 0x493   :  { %16417 = vmatmul.mubr.bf16.gmra.mrb[72].mxu0 %v20312_v5 }
 0x494   :  { %16449 = vmatpush3.bf16.msra.mxu0 %v20121_v1  ;;  %16420 = vmatprep.mubr.bf16.mxu0 %v20319_v36  ;;  %v20342_v1 = vpop.trf.xlu0 }
 0x495   :  { %16450 = vmatprep.subr.bf16.mxu0 %v20135_v16  ;;  %24414 = vst [vmem:[#allocation145_spill] sm:$0xff] %v20342_v1 }
 0x498   :  { %16451 = vmatpush3.bf16.msra.mxu0 %v20135_v16  ;;  %v20345_v16 = vpop.trf.xlu1 }
 0x499   :  { %16452 = vmatprep.subr.bf16.mxu0 %v20149_v47  ;;  %24415 = vst [vmem:[#allocation146_spill] sm:$0xff] %v20345_v16 }
 0x49b   :  { %16421 = vmatmul.mubr.bf16.gmra.mrb[76].mxu0 %v20324_v8  ;;  %v507_v8 = vld [vmem:[%s24416_s14 + $0x18] sm:$0xff] }
 0x49c   :  { %16453 = vmatpush3.bf16.msra.mxu0 %v20149_v47  ;;  %16424 = vmatprep.mubr.bf16.mxu0 %v20333_v42  ;;  %v20351_v47 = vpop.trf.xlu1  ;;  %v506_v42 = vld [vmem:[%s24416_s14 + $0x10] sm:$0xff] }
 0x49d   :  { %16454 = vmatprep.subr.bf16.mxu0 %v20163_v27  ;;  %24417 = vst [vmem:[#allocation147_spill] sm:$0xff] %v20351_v47  ;;  %v18166_v5 = vpack.c.bf16 %v507_v8, %v506_v42 }
 0x4a0   :  { %16455 = vmatpush3.bf16.msra.mxu0 %v20163_v27  ;;  %v20356_v27 = vpop.trf.xlu1 }
 0x4a1   :  { %16456 = vmatprep.subr.bf16.mxu0 %v20177_v44  ;;  %24418 = vst [vmem:[#allocation148_spill] sm:$0xff] %v20356_v27 }
 0x4a3   :  { %16425 = vmatmul.mubr.bf16.gmra.mrb[80].mxu0 %v20342_v1 }
 0x4a4   :  { %16457 = vmatpush3.bf16.msra.mxu0 %v20177_v44  ;;  %16428 = vmatprep.mubr.bf16.mxu0 %v20329_v39  ;;  %v20359_v60 = vpop.trf.xlu1  ;;  %v20362_v44 = vpop.trf.xlu0 }
 0x4a5   :  { %16458 = vmatprep.subr.bf16.mxu0 %v20191_v35  ;;  %24419 = vst [vmem:[#allocation149_spill] sm:$0xff] %v20359_v60  ;;  %24420 = vst [vmem:[#allocation150_spill] sm:$0xff] %v20362_v44 }
 0x4a8   :  { %16459 = vmatpush3.bf16.msra.mxu0 %v20191_v35  ;;  %v20364_v53 = vpop.trf.xlu1  ;;  %v20367_v30 = vpop.trf.xlu0  ;;  %v504_v35 = vld [vmem:[%s24416_s14] sm:$0xff]  ;;  %s25209_s14 = sld [smem:[#allocation78_spill]] }
 0x4a9   :  { %24421 = vst [vmem:[#allocation151_spill] sm:$0xff] %v20364_v53  ;;  %24422 = vst [vmem:[#allocation152_spill] sm:$0xff] %v20367_v30  ;;  %v18162_v54 = vpack.c.bf16 %v505_v43, %v504_v35  ;;  %16600 = vmatprep.subr.msk.mxu0 %vm24218_vm2, %v492_v40 }
 0x4ab   :  { %16429 = vmatmul.mubr.bf16.gmra.mrb[84].mxu0 %v20336_v48  ;;  %18163 = vmatprep.subr.bf16.mxu1 %v18162_v54 }
 0x4ac   :  { %16432 = vmatprep.mubr.bf16.mxu0 %v20345_v16  ;;  %v20372_v4 = vpop.trf.xlu1  ;;  %18165 = vmatpush3.bf16.msra.mxu1 %v18162_v54  ;;  %v20374_v45 = vpop.trf.xlu0 }
 0x4ad   :  { %24423 = vst [vmem:[#allocation153_spill] sm:$0xff] %v20372_v4  ;;  %24424 = vst [vmem:[#allocation154_spill] sm:$0xff] %v20374_v45  ;;  %18167 = vmatprep.subr.bf16.mxu1 %v18166_v5 }
 0x4b0   :  { %v20378_v61 = vpop.trf.xlu0  ;;  %v20388_v43 = vpop.trf.xlu1  ;;  %18169 = vmatpush3.bf16.msra.mxu1 %v18166_v5 }
 0x4b1   :  { %24425 = vst [vmem:[#allocation155_spill] sm:$0xff] %v20378_v61  ;;  %24428 = vst [vmem:[#allocation158_spill] sm:$0xff] %v20388_v43  ;;  %16550 = vmatprep.subr.mxu1 %v508_v17 }
 0x4b3   :  { %16433 = vmatmul.mubr.bf16.gmra.mrb[88].mxu0 %v20351_v47 }
 0x4b4   :  { %16436 = vmatprep.mubr.bf16.mxu0 %v20356_v27  ;;  %v20382_v11 = vpop.trf.xlu0  ;;  %16551 = vmatpush3.msra.mxu1 %v508_v17 }
 0x4b5   :  { %24426 = vst [vmem:[#allocation156_spill] sm:$0xff] %v20382_v11 }
 0x4b8   :  { %v20385_v35 = vpop.trf.xlu0 }
 0x4b9   :  { %24427 = vst [vmem:[#allocation157_spill] sm:$0xff] %v20385_v35 }
 0x4bb   :  { %16437 = vmatmul.mubr.bf16.gmra.mrb[92].mxu0 %v20359_v60 }
 0x4bc   :  { %16440 = vmatprep.mubr.bf16.mxu0 %v20364_v53  ;;  %v20390_v54 = vpop.trf.xlu0 }
 0x4bd   :  { %24429 = vst [vmem:[#allocation159_spill] sm:$0xff] %v20390_v54 }
 0x4c3   :  { %16441 = vmatmul.mubr.bf16.gmra.mrb[96].mxu0 %v20372_v4 }
 0x4c4   :  { %16460 = vmatprep.mubr.bf16.mxu0 %v20362_v44  ;;  %v20393_v44 = vpop.trf.xlu1 }
 0x4c5   :  { %24430 = vst [vmem:[#allocation160_spill] sm:$0xff] %v20393_v44 }
 0x4cb   :  { %16461 = vmatmul.mubr.bf16.vlgmr.msra.gmra.mrb[68].mxu0 %v20367_v30  ;;  %v20396_v30 = vpop.trf.xlu0 }
 0x4cc   :  { %16464 = vmatprep.mubr.bf16.mxu0 %v20374_v45  ;;  %24431 = vst [vmem:[#allocation161_spill] sm:$0xff] %v20396_v30  ;;  %v20398_v45 = vpop.trf.xlu1  ;;  %16601 = vmatpush3.msk.msra.mxu0 %vm24218_vm2, %v492_v40 }
 0x4cd   :  { %24432 = vst [vmem:[#allocation162_spill] sm:$0xff] %v20398_v45 }
 0x4d3   :  { %16465 = vmatmul.mubr.bf16.gmra.mrb[72].mxu0 %v20378_v61  ;;  %v20402_v61 = vpop.trf.xlu1 }
 0x4d4   :  { %16468 = vmatprep.mubr.bf16.mxu0 %v20382_v11  ;;  %24433 = vst [vmem:[#allocation163_spill] sm:$0xff] %v20402_v61 }
 0x4d7   :  { %v20406_v11 = vpop.trf.xlu1 }
 0x4d8   :  { %24434 = vst [vmem:[#allocation164_spill] sm:$0xff] %v20406_v11 }
 0x4db   :  { %16469 = vmatmul.mubr.bf16.gmra.mrb[76].mxu0 %v20385_v35  ;;  %v20409_v35 = vpop.trf.xlu1 }
 0x4dc   :  { %16472 = vmatprep.mubr.bf16.mxu0 %v20390_v54  ;;  %24435 = vst [vmem:[#allocation165_spill] sm:$0xff] %v20409_v35 }
 0x4df   :  { %v20412_v54 = vpop.trf.xlu1 }
 0x4e0   :  { %24436 = vst [vmem:[#allocation166_spill] sm:$0xff] %v20412_v54 }
 0x4e3   :  { %16473 = vmatmul.mubr.bf16.gmra.mrb[80].mxu0 %v20396_v30  ;;  %v20416_v4 = vpop.trf.xlu1 }
 0x4e4   :  { %16476 = vmatprep.mubr.bf16.mxu0 %v20388_v43  ;;  %24437 = vst [vmem:[#allocation167_spill] sm:$0xff] %v20416_v4 }
 0x4eb   :  { %16477 = vmatmul.mubr.bf16.gmra.mrb[84].mxu0 %v20393_v44 }
 0x4ec   :  { %16480 = vmatprep.mubr.bf16.mxu0 %v20398_v45 }
 0x4f3   :  { %16481 = vmatmul.mubr.bf16.gmra.mrb[88].mxu0 %v20402_v61 }
 0x4f4   :  { %16484 = vmatprep.mubr.bf16.mxu0 %v20406_v11 }
 0x4fb   :  { %16485 = vmatmul.mubr.bf16.gmra.mrb[92].mxu0 %v20409_v35 }
 0x4fc   :  { %16488 = vmatprep.mubr.bf16.mxu0 %v20412_v54 }
 0x4ff   :  { %v16496_v43 = vpop.f32.mrb[62].mxu1 }
 0x500   :  { %v2939_v30 = vpop.f32.mrb[63].mxu1 }
 0x503   :  { %16489 = vmatmul.mubr.bf16.gmra.mrb[96].mxu0 %v20416_v4  ;;  %v16499_v45 = vpop.f32.mrb[64].mxu1 }
 0x504   :  { %v2949_v61 = vpop.f32.mrb[65].mxu1 }
 0x507   :  { %v20419_v44 = vpop.f32.mrb[66].mxu1 }
 0x508   :  { %v2959_v53 = vpop.f32.mrb[67].mxu1 }
 0x50b   :  { %v16505_v11 = vpop.f32.mrb[68].mxu1 }
 0x50c   :  { %v2969_v60 = vpop.f32.mrb[69].mxu1 }
 0x50f   :  { %v20421_v27 = vpop.f32.mrb[70].mxu1 }
 0x510   :  { %v20423_v35 = vpop.f32.mrb[71].mxu1 }
 0x513   :  { %v20425_v54 = vpop.f32.mrb[72].mxu1 }
 0x514   :  { %v20427_v47 = vpop.f32.mrb[73].mxu1 }
 0x517   :  { %v20429_v16 = vpop.f32.mrb[74].mxu1 }
 0x518   :  { %v20431_v4 = vpop.f32.mrb[75].mxu1 }
 0x51b   :  { %v20433_v48 = vpop.f32.mrb[76].mxu1 }
 0x51c   :  { %v20435_v39 = vpop.f32.mrb[77].mxu1 }
 0x51f   :  { %v20437_v1 = vpop.f32.mrb[78].mxu1 }
 0x520   :  { %v20441_v36 = vpop.f32.mrb[79].mxu1 }
 0x523   :  { %v20443_v57 = vpop.f32.mrb[80].mxu1 }
 0x524   :  { %v20445_v25 = vpop.f32.mrb[81].mxu1 }
 0x527   :  { %v20448_v12 = vpop.f32.mrb[82].mxu1 }
 0x528   :  { %v20450_v24 = vpop.f32.mrb[83].mxu1 }
 0x52b   :  { %v20452_v19 = vpop.f32.mrb[84].mxu1 }
 0x52c   :  { %v20454_v37 = vpop.f32.mrb[85].mxu1 }
 0x52f   :  { %v20456_v29 = vpop.f32.mrb[86].mxu1 }
 0x530   :  { %v20458_v8 = vpop.f32.mrb[87].mxu1 }
 0x533   :  { %v20460_v42 = vpop.f32.mrb[88].mxu1 }
 0x534   :  { %v20462_v5 = vpop.f32.mrb[89].mxu1 }
 0x537   :  { %v20464_v52 = vpop.f32.mrb[90].mxu1 }
 0x538   :  { %v20466_v3 = vpop.f32.mrb[91].mxu1 }
 0x53b   :  { %v20468_v0 = vpop.f32.mrb[92].mxu1 }
 0x53c   :  { %v20470_v17 = vpop.f32.mrb[93].mxu1 }
 0x59e   :  { %v16462_v20 = vpop.f32.mrb[68].mxu0 }
 0x59f   :  { %v3100_v62 = vadd.f32 %v16462_v20, %v2949_v61  ;;  %v2647_v13 = vpop.f32.mrb[69].mxu0 }
 0x5a0   :  { %v3098_v22 = vadd.f32 %v2939_v30, %v2647_v13  ;;  %v16463_v28 = vpop.f32.mrb[70].mxu0 }
 0x5a1   :  { %v3101_v6 = vadd.f32 %v16499_v45, %v16463_v28  ;;  %v2650_v9 = vpop.f32.mrb[71].mxu0  ;;  %v3138_v33 = vadd.f32 %v20475_v14, %v3100_v62 }
 0x5a2   :  { %v3136_v56 = vadd.f32 %v20475_v14, %v3098_v22  ;;  %v3099_v59 = vadd.f32 %v16496_v43, %v2650_v9 }
 0x5a3   :  { %v3139_v32 = vadd.f32 %v20475_v14, %v3101_v6  ;;  %v3170_v20 = vmax.f32 %v3138_v33, 0.0 }
 0x5a4   :  { %v3168_v21 = vmax.f32 %v3136_v56, 0.0  ;;  %v3137_v41 = vadd.f32 %v20475_v14, %v3099_v59 }
 0x5a5   :  { %v3171_v56 = vmax.f32 %v3139_v32, 0.0 }
 0x5a6   :  { %v3169_v40 = vmax.f32 %v3137_v41, 0.0  ;;  %v16466_v38 = vpop.f32.mrb[72].mxu0  ;;  %16552 = vmatprep.mubr.msk.f32.mxu1 %vm24221_vm3, %v3168_v21 }
 0x5a7   :  { %v3104_v61 = vadd.f32 %v16466_v38, %v2969_v60  ;;  %v2663_v13 = vpop.f32.mrb[73].mxu0 }
 0x5a8   :  { %v3102_v30 = vadd.f32 %v2959_v53, %v2663_v13  ;;  %v16467_v28 = vpop.f32.mrb[74].mxu0  ;;  %16553 = vmatmul.mubr.msk.f32.vlgmr.msra.gmra.mrb[94].mxu1 %vm24221_vm3, %v3169_v40 }
 0x5a9   :  { %v3105_v22 = vadd.f32 %v16505_v11, %v16467_v28  ;;  %v2666_v9 = vpop.f32.mrb[75].mxu0  ;;  %16555 = vmatprep.mubr.msk.f32.mxu1 %vm24221_vm3, %v3170_v20  ;;  %v3142_v41 = vadd.f32 %v20475_v14, %v3104_v61 }
 0x5aa   :  { %v3140_v59 = vadd.f32 %v20475_v14, %v3102_v30  ;;  %v3103_v6 = vadd.f32 %v20419_v44, %v2666_v9 }
 0x5ab   :  { %v3143_v38 = vadd.f32 %v20475_v14, %v3105_v22  ;;  %v3174_v53 = vmax.f32 %v3142_v41, 0.0 }
 0x5ac   :  { %v3172_v62 = vmax.f32 %v3140_v59, 0.0  ;;  %v3141_v33 = vadd.f32 %v20475_v14, %v3103_v6  ;;  %16556 = vmatmul.mubr.msk.f32.gmra.mrb[96].mxu1 %vm24221_vm3, %v3171_v56 }
 0x5ad   :  { %v3175_v20 = vmax.f32 %v3143_v38, 0.0 }
 0x5ae   :  { %v3173_v21 = vmax.f32 %v3141_v33, 0.0  ;;  %v16470_v60 = vpop.f32.mrb[76].mxu0  ;;  %16558 = vmatprep.mubr.msk.f32.mxu1 %vm24221_vm3, %v3172_v62 }
 0x5af   :  { %v3108_v32 = vadd.f32 %v16470_v60, %v20427_v47  ;;  %v2679_v45 = vpop.f32.mrb[77].mxu0 }
 0x5b0   :  { %v3106_v11 = vadd.f32 %v20423_v35, %v2679_v45  ;;  %v16471_v44 = vpop.f32.mrb[78].mxu0  ;;  %16559 = vmatmul.mubr.msk.f32.gmra.mrb[98].mxu1 %vm24221_vm3, %v3173_v21 }
 0x5b1   :  { %v3109_v43 = vadd.f32 %v20425_v54, %v16471_v44  ;;  %v2682_v40 = vpop.f32.mrb[79].mxu0  ;;  %16561 = vmatprep.mubr.msk.f32.mxu1 %vm24221_vm3, %v3174_v53  ;;  %v3146_v30 = vadd.f32 %v20475_v14, %v3108_v32 }
 0x5b2   :  { %v3144_v61 = vadd.f32 %v20475_v14, %v3106_v11  ;;  %v3107_v13 = vadd.f32 %v20421_v27, %v2682_v40 }
 0x5b3   :  { %v3147_v35 = vadd.f32 %v20475_v14, %v3109_v43  ;;  %v3178_v54 = vmax.f32 %v3146_v30, 0.0 }
 0x5b4   :  { %v3176_v28 = vmax.f32 %v3144_v61, 0.0  ;;  %v3145_v47 = vadd.f32 %v20475_v14, %v3107_v13  ;;  %16562 = vmatmul.mubr.msk.f32.gmra.mrb[100].mxu1 %vm24221_vm3, %v3175_v20 }
 0x5b5   :  { %v3179_v33 = vmax.f32 %v3147_v35, 0.0 }
 0x5b6   :  { %v3177_v22 = vmax.f32 %v3145_v47, 0.0  ;;  %v16474_v9 = vpop.f32.mrb[80].mxu0  ;;  %16564 = vmatprep.mubr.msk.f32.mxu1 %vm24221_vm3, %v3176_v28 }
 0x5b7   :  { %v3112_v56 = vadd.f32 %v16474_v9, %v20435_v39  ;;  %v2695_v59 = vpop.f32.mrb[81].mxu0 }
 0x5b8   :  { %v3110_v6 = vadd.f32 %v20431_v4, %v2695_v59  ;;  %v16475_v27 = vpop.f32.mrb[82].mxu0  ;;  %16565 = vmatmul.mubr.msk.f32.gmra.mrb[102].mxu1 %vm24221_vm3, %v3177_v22 }
 0x5b9   :  { %v3113_v41 = vadd.f32 %v20433_v48, %v16475_v27  ;;  %v2698_v62 = vpop.f32.mrb[83].mxu0  ;;  %16567 = vmatprep.mubr.msk.f32.mxu1 %vm24221_vm3, %v3178_v54  ;;  %v3150_v60 = vadd.f32 %v20475_v14, %v3112_v56 }
 0x5ba   :  { %v3148_v38 = vadd.f32 %v20475_v14, %v3110_v6  ;;  %v3111_v21 = vadd.f32 %v20429_v16, %v2698_v62 }
 0x5bb   :  { %v3151_v4 = vadd.f32 %v20475_v14, %v3113_v41  ;;  %v3182_v48 = vmax.f32 %v3150_v60, 0.0 }
 0x5bc   :  { %v3180_v53 = vmax.f32 %v3148_v38, 0.0  ;;  %v3149_v39 = vadd.f32 %v20475_v14, %v3111_v21  ;;  %16568 = vmatmul.mubr.msk.f32.gmra.mrb[104].mxu1 %vm24221_vm3, %v3179_v33 }
 0x5bd   :  { %v3183_v61 = vmax.f32 %v3151_v4, 0.0 }
 0x5be   :  { %v3181_v32 = vmax.f32 %v3149_v39, 0.0  ;;  %v16478_v45 = vpop.f32.mrb[84].mxu0  ;;  %16570 = vmatprep.mubr.msk.f32.mxu1 %vm24221_vm3, %v3180_v53 }
 0x5bf   :  { %v3116_v11 = vadd.f32 %v16478_v45, %v20445_v25  ;;  %v2711_v44 = vpop.f32.mrb[85].mxu0 }
 0x5c0   :  { %v3114_v43 = vadd.f32 %v20441_v36, %v2711_v44  ;;  %v16479_v16 = vpop.f32.mrb[86].mxu0  ;;  %16571 = vmatmul.mubr.msk.f32.gmra.mrb[106].mxu1 %vm24221_vm3, %v3181_v32 }
 0x5c1   :  { %v3117_v40 = vadd.f32 %v20443_v57, %v16479_v16  ;;  %v2714_v20 = vpop.f32.mrb[87].mxu0  ;;  %16573 = vmatprep.mubr.msk.f32.mxu1 %vm24221_vm3, %v3182_v48  ;;  %v3154_v28 = vadd.f32 %v20475_v14, %v3116_v11 }
 0x5c2   :  { %v3152_v13 = vadd.f32 %v20475_v14, %v3114_v43  ;;  %v3115_v30 = vadd.f32 %v20437_v1, %v2714_v20 }
 0x5c3   :  { %v3155_v36 = vadd.f32 %v20475_v14, %v3117_v40  ;;  %v3186_v57 = vmax.f32 %v3154_v28, 0.0 }
 0x5c4   :  { %v3184_v47 = vmax.f32 %v3152_v13, 0.0  ;;  %v3153_v25 = vadd.f32 %v20475_v14, %v3115_v30  ;;  %16574 = vmatmul.mubr.msk.f32.gmra.mrb[108].mxu1 %vm24221_vm3, %v3183_v61 }
 0x5c5   :  { %v3187_v27 = vmax.f32 %v3155_v36, 0.0 }
 0x5c6   :  { %v3185_v35 = vmax.f32 %v3153_v25, 0.0  ;;  %v16482_v22 = vpop.f32.mrb[88].mxu0  ;;  %16576 = vmatprep.mubr.msk.f32.mxu1 %vm24221_vm3, %v3184_v47 }
 0x5c7   :  { %v3120_v9 = vadd.f32 %v16482_v22, %v20454_v37  ;;  %v2727_v54 = vpop.f32.mrb[89].mxu0 }
 0x5c8   :  { %v3118_v56 = vadd.f32 %v20450_v24, %v2727_v54  ;;  %v16483_v1 = vpop.f32.mrb[90].mxu0  ;;  %16577 = vmatmul.mubr.msk.f32.gmra.mrb[110].mxu1 %vm24221_vm3, %v3185_v35 }
 0x5c9   :  { %v3121_v59 = vadd.f32 %v20452_v19, %v16483_v1  ;;  %v2730_v6 = vpop.f32.mrb[91].mxu0  ;;  %16579 = vmatprep.mubr.msk.f32.mxu1 %vm24221_vm3, %v3186_v57  ;;  %v3158_v33 = vadd.f32 %v20475_v14, %v3120_v9 }
 0x5ca   :  { %v3156_v41 = vadd.f32 %v20475_v14, %v3118_v56  ;;  %v3119_v62 = vadd.f32 %v20448_v12, %v2730_v6  ;;  %v20568_v56 = vld [vmem:[#allocation10] ss:$0 sm:$0xff] }
 0x5cb   :  { %v3159_v24 = vadd.f32 %v20475_v14, %v3121_v59  ;;  %v3190_v19 = vmax.f32 %v3158_v33, 0.0 }
 0x5cc   :  { %v3188_v38 = vmax.f32 %v3156_v41, 0.0  ;;  %v3157_v37 = vadd.f32 %v20475_v14, %v3119_v62  ;;  %16580 = vmatmul.mubr.msk.f32.gmra.mrb[112].mxu1 %vm24221_vm3, %v3187_v27  ;;  %v20579_v41 = vld [vmem:[%s24440_s11] sm:$0xf]  ;;  %s25258_s11 = sld [smem:[#allocation79_spill]] }
 0x5cd   :  { %v3191_v48 = vmax.f32 %v3159_v24, 0.0 }
 0x5ce   :  { %v3189_v21 = vmax.f32 %v3157_v37, 0.0  ;;  %v16486_v60 = vpop.f32.mrb[92].mxu0  ;;  %16582 = vmatprep.mubr.msk.f32.mxu1 %vm24221_vm3, %v3188_v38 }
 0x5cf   :  { %v3124_v53 = vadd.f32 %v16486_v60, %v20462_v5  ;;  %v2743_v39 = vpop.f32.mrb[93].mxu0 }
 0x5d0   :  { %v3122_v4 = vadd.f32 %v20458_v8, %v2743_v39  ;;  %v16487_v12 = vpop.f32.mrb[94].mxu0  ;;  %16583 = vmatmul.mubr.msk.f32.gmra.mrb[114].mxu1 %vm24221_vm3, %v3189_v21 }
 0x5d1   :  { %v3125_v32 = vadd.f32 %v20460_v42, %v16487_v12  ;;  %v2746_v45 = vpop.f32.mrb[95].mxu0  ;;  %16585 = vmatprep.mubr.msk.f32.mxu1 %vm24221_vm3, %v3190_v19  ;;  %v3162_v43 = vadd.f32 %v20475_v14, %v3124_v53 }
 0x5d2   :  { %v3160_v11 = vadd.f32 %v20475_v14, %v3122_v4  ;;  %v3123_v44 = vadd.f32 %v20456_v29, %v2746_v45 }
 0x5d3   :  { %v3163_v8 = vadd.f32 %v20475_v14, %v3125_v32  ;;  %v3194_v42 = vmax.f32 %v3162_v43, 0.0 }
 0x5d4   :  { %v3192_v16 = vmax.f32 %v3160_v11, 0.0  ;;  %v3161_v5 = vadd.f32 %v20475_v14, %v3123_v44  ;;  %16586 = vmatmul.mubr.msk.f32.gmra.mrb[116].mxu1 %vm24221_vm3, %v3191_v48 }
 0x5d5   :  { %v3195_v25 = vmax.f32 %v3163_v8, 0.0 }
 0x5d6   :  { %v3193_v40 = vmax.f32 %v3161_v5, 0.0  ;;  %v16490_v20 = vpop.f32.mrb[96].mxu0  ;;  %16588 = vmatprep.mubr.msk.f32.mxu1 %vm24221_vm3, %v3192_v16 }
 0x5d7   :  { %v3128_v61 = vadd.f32 %v16490_v20, %v20470_v17  ;;  %v2759_v13 = vpop.f32.mrb[97].mxu0 }
 0x5d8   :  { %v3126_v30 = vadd.f32 %v20466_v3, %v2759_v13  ;;  %v16491_v29 = vpop.f32.mrb[98].mxu0  ;;  %16589 = vmatmul.mubr.msk.f32.gmra.mrb[118].mxu1 %vm24221_vm3, %v3193_v40 }
 0x5d9   :  { %v3129_v28 = vadd.f32 %v20468_v0, %v16491_v29  ;;  %v2762_v47 = vpop.f32.mrb[99].mxu0  ;;  %16591 = vmatprep.mubr.msk.f32.mxu1 %vm24221_vm3, %v3194_v42  ;;  %v3166_v22 = vadd.f32 %v20475_v14, %v3128_v61 }
 0x5da   :  { %v3164_v36 = vadd.f32 %v20475_v14, %v3126_v30  ;;  %v3127_v35 = vadd.f32 %v20464_v52, %v2762_v47  ;;  %v491_v52 = vld [vmem:[%s24439_s4] sm:$0x1f]  ;;  %s25248_s4 = sld [smem:[#allocation53_spill]] }
 0x5db   :  { %v3167_v3 = vadd.f32 %v20475_v14, %v3129_v28  ;;  %v3198_v0 = vmax.f32 %v3166_v22, 0.0  ;;  %16650 = vmatprep.subr.msk.mxu0 %vm24220_vm5, %v491_v52 }
 0x5dc   :  { %v3196_v17 = vmax.f32 %v3164_v36, 0.0  ;;  %v3165_v57 = vadd.f32 %v20475_v14, %v3127_v35  ;;  %16592 = vmatmul.mubr.msk.f32.gmra.mrb[120].mxu1 %vm24221_vm3, %v3195_v25 }
 0x5dd   :  { %v3199_v54 = vmax.f32 %v3167_v3, 0.0 }
 0x5de   :  { %v3197_v9 = vmax.f32 %v3165_v57, 0.0  ;;  %16594 = vmatprep.mubr.msk.f32.mxu1 %vm24221_vm3, %v3196_v17 }
 0x5e0   :  { %16595 = vmatmul.mubr.msk.f32.gmra.mrb[122].mxu1 %vm24221_vm3, %v3197_v9 }
 0x5e1   :  { %16597 = vmatprep.mubr.msk.f32.mxu1 %vm24221_vm3, %v3198_v0 }
 0x5e4   :  { %16598 = vmatmul.mubr.msk.f32.gmra.mrb[124].mxu1 %vm24221_vm3, %v3199_v54 }
 0x67b   :  { %v16554_v1 = vpop.f32.mrb[94].mxu1 }
 0x67c   :  { %v3368_v59 = vpop.f32.mrb[95].mxu1  ;;  %v20574_v6 = vadd.f32 %v16554_v1, %v20568_v56 }
 0x67d   :  { %v20571_v14 = vadd.f32 %v20568_v56, %v3368_v59 }
 0x67f   :  { %v16557_v27 = vpop.f32.mrb[96].mxu1  ;;  %16602 = vmatprep.mubr.msk.f32.mxu0 %vm24219_vm4, %v20571_v14 }
 0x680   :  { %v3378_v62 = vpop.f32.mrb[97].mxu1  ;;  %16603 = vmatmul.mubr.msk.f32.vlgmr.msra.gmra.mrb[66].mxu0 %vm24219_vm4, %v20574_v6  ;;  %v20588_v38 = vadd.f32 %v16557_v27, %v20568_v56 }
 0x681   :  { %v20584_v33 = vadd.f32 %v20568_v56, %v3378_v62  ;;  %16651 = vmatpush3.msk.msra.mxu0 %vm24220_vm5, %v491_v52 }
 0x682   :  { %16710 = vmatprep.subr.msk.mxu0 %vm24218_vm2, %v20579_v41 }
 0x683   :  { %v16560_v37 = vpop.f32.mrb[98].mxu1  ;;  %16605 = vmatprep.mubr.msk.f32.mxu0 %vm24219_vm4, %v20584_v33 }
 0x684   :  { %v3388_v24 = vpop.f32.mrb[99].mxu1  ;;  %16606 = vmatmul.mubr.msk.f32.gmra.mrb[100].mxu0 %vm24219_vm4, %v20588_v38  ;;  %v20600_v60 = vadd.f32 %v16560_v37, %v20568_v56 }
 0x685   :  { %v20597_v21 = vadd.f32 %v20568_v56, %v3388_v24 }
 0x687   :  { %v16563_v19 = vpop.f32.mrb[100].mxu1  ;;  %16608 = vmatprep.mubr.msk.f32.mxu0 %vm24219_vm4, %v20597_v21 }
 0x688   :  { %v3398_v53 = vpop.f32.mrb[101].mxu1  ;;  %16609 = vmatmul.mubr.msk.f32.gmra.mrb[102].mxu0 %vm24219_vm4, %v20600_v60  ;;  %v20610_v4 = vadd.f32 %v16563_v19, %v20568_v56 }
 0x689   :  { %v20607_v39 = vadd.f32 %v20568_v56, %v3398_v53 }
 0x68b   :  { %v16566_v12 = vpop.f32.mrb[102].mxu1  ;;  %16611 = vmatprep.mubr.msk.f32.mxu0 %vm24219_vm4, %v20607_v39 }
 0x68c   :  { %v3408_v32 = vpop.f32.mrb[103].mxu1  ;;  %16612 = vmatmul.mubr.msk.f32.gmra.mrb[104].mxu0 %vm24219_vm4, %v20610_v4  ;;  %v20620_v48 = vadd.f32 %v16566_v12, %v20568_v56 }
 0x68d   :  { %v20617_v45 = vadd.f32 %v20568_v56, %v3408_v32 }
 0x68f   :  { %v16569_v11 = vpop.f32.mrb[104].mxu1  ;;  %16614 = vmatprep.mubr.msk.f32.mxu0 %vm24219_vm4, %v20617_v45 }
 0x690   :  { %v3418_v44 = vpop.f32.mrb[105].mxu1  ;;  %16615 = vmatmul.mubr.msk.f32.gmra.mrb[106].mxu0 %vm24219_vm4, %v20620_v48  ;;  %v20630_v16 = vadd.f32 %v16569_v11, %v20568_v56 }
 0x691   :  { %v20627_v43 = vadd.f32 %v20568_v56, %v3418_v44 }
 0x693   :  { %v16572_v5 = vpop.f32.mrb[106].mxu1  ;;  %16617 = vmatprep.mubr.msk.f32.mxu0 %vm24219_vm4, %v20627_v43 }
 0x694   :  { %v3428_v8 = vpop.f32.mrb[107].mxu1  ;;  %16618 = vmatmul.mubr.msk.f32.gmra.mrb[108].mxu0 %vm24219_vm4, %v20630_v16  ;;  %v20640_v20 = vadd.f32 %v16572_v5, %v20568_v56 }
 0x695   :  { %v20637_v40 = vadd.f32 %v20568_v56, %v3428_v8 }
 0x697   :  { %v16575_v42 = vpop.f32.mrb[108].mxu1  ;;  %16620 = vmatprep.mubr.msk.f32.mxu0 %vm24219_vm4, %v20637_v40 }
 0x698   :  { %v3438_v61 = vpop.f32.mrb[109].mxu1  ;;  %16621 = vmatmul.mubr.msk.f32.gmra.mrb[110].mxu0 %vm24219_vm4, %v20640_v20  ;;  %v20650_v30 = vadd.f32 %v16575_v42, %v20568_v56 }
 0x699   :  { %v20647_v13 = vadd.f32 %v20568_v56, %v3438_v61 }
 0x69b   :  { %v16578_v29 = vpop.f32.mrb[110].mxu1  ;;  %16623 = vmatprep.mubr.msk.f32.mxu0 %vm24219_vm4, %v20647_v13 }
 0x69c   :  { %v3448_v28 = vpop.f32.mrb[111].mxu1  ;;  %16624 = vmatmul.mubr.msk.f32.gmra.mrb[112].mxu0 %vm24219_vm4, %v20650_v30  ;;  %v20660_v25 = vadd.f32 %v16578_v29, %v20568_v56 }
 0x69d   :  { %v20657_v47 = vadd.f32 %v20568_v56, %v3448_v28 }
 0x69f   :  { %v16581_v36 = vpop.f32.mrb[112].mxu1  ;;  %16626 = vmatprep.mubr.msk.f32.mxu0 %vm24219_vm4, %v20657_v47 }
 0x6a0   :  { %v3458_v35 = vpop.f32.mrb[113].mxu1  ;;  %16627 = vmatmul.mubr.msk.f32.gmra.mrb[114].mxu0 %vm24219_vm4, %v20660_v25  ;;  %v20670_v17 = vadd.f32 %v16581_v36, %v20568_v56  ;;  %v559_v36 = vld [vmem:[%s24441_s28] sm:$0xf]  ;;  %s25261_s28 = sld [smem:[#allocation50_spill]] }
 0x6a1   :  { %v20667_v22 = vadd.f32 %v20568_v56, %v3458_v35  ;;  %v24444_v35 = vld [vmem:[#allocation103_spill] sm:$0xff] }
 0x6a3   :  { %v16584_v57 = vpop.f32.mrb[114].mxu1  ;;  %16629 = vmatprep.mubr.msk.f32.mxu0 %vm24219_vm4, %v20667_v22 }
 0x6a4   :  { %v3468_v3 = vpop.f32.mrb[115].mxu1  ;;  %16630 = vmatmul.mubr.msk.f32.gmra.mrb[116].mxu0 %vm24219_vm4, %v20670_v17  ;;  %v20680_v0 = vadd.f32 %v16584_v57, %v20568_v56 }
 0x6a5   :  { %v20677_v9 = vadd.f32 %v20568_v56, %v3468_v3  ;;  %v24446_v3 = vmov 0 }
 0x6a7   :  { %v16587_v54 = vpop.f32.mrb[116].mxu1  ;;  %16632 = vmatprep.mubr.msk.f32.mxu0 %vm24219_vm4, %v20677_v9 }
 0x6a8   :  { %v3478_v52 = vpop.f32.mrb[117].mxu1  ;;  %16633 = vmatmul.mubr.msk.f32.gmra.mrb[118].mxu0 %vm24219_vm4, %v20680_v0  ;;  %v20690_v59 = vadd.f32 %v16587_v54, %v20568_v56  ;;  %v24213_v54 = vmov 1.0|1.0  }
 0x6a9   :  { %v20687_v1 = vadd.f32 %v20568_v56, %v3478_v52  ;;  %v24449_v52 = vld [vmem:[#allocation106_spill] sm:$0xff] }
 0x6ab   :  { %v16590_v27 = vpop.f32.mrb[118].mxu1  ;;  %16635 = vmatprep.mubr.msk.f32.mxu0 %vm24219_vm4, %v20687_v1 }
 0x6ac   :  { %v3488_v62 = vpop.f32.mrb[119].mxu1  ;;  %16636 = vmatmul.mubr.msk.f32.gmra.mrb[120].mxu0 %vm24219_vm4, %v20690_v59  ;;  %v20700_v24 = vadd.f32 %v16590_v27, %v20568_v56  ;;  %v24450_v27 = vmax.f32 %v24449_v52, 0.0  ;;  %v24461_v52 = vld [vmem:[#allocation112_spill] sm:$0xff] }
 0x6ad   :  { %v20697_v37 = vadd.f32 %v20568_v56, %v3488_v62  ;;  %v24451_v62 = vld [vmem:[#allocation105_spill] sm:$0xff] }
 0x6af   :  { %v16593_v19 = vpop.f32.mrb[120].mxu1  ;;  %16638 = vmatprep.mubr.msk.f32.mxu0 %vm24219_vm4, %v20697_v37 }
 0x6b0   :  { %v3498_v53 = vpop.f32.mrb[121].mxu1  ;;  %16639 = vmatmul.mubr.msk.f32.gmra.mrb[122].mxu0 %vm24219_vm4, %v20700_v24  ;;  %v20710_v32 = vadd.f32 %v16593_v19, %v20568_v56  ;;  %v24452_v19 = vmax.f32 %v24451_v62, 0.0  ;;  %v24463_v62 = vld [vmem:[#allocation111_spill] sm:$0xff] }
 0x6b1   :  { %v20707_v12 = vadd.f32 %v20568_v56, %v3498_v53  ;;  %v24453_v53 = vld [vmem:[#allocation108_spill] sm:$0xff] }
 0x6b3   :  { %v16596_v11 = vpop.f32.mrb[122].mxu1  ;;  %16641 = vmatprep.mubr.msk.f32.mxu0 %vm24219_vm4, %v20707_v12 }
 0x6b4   :  { %v3508_v44 = vpop.f32.mrb[123].mxu1  ;;  %16642 = vmatmul.mubr.msk.f32.gmra.mrb[124].mxu0 %vm24219_vm4, %v20710_v32  ;;  %v20720_v8 = vadd.f32 %v16596_v11, %v20568_v56  ;;  %v24454_v11 = vmax.f32 %v24453_v53, 0.0 }
 0x6b5   :  { %v20717_v5 = vadd.f32 %v20568_v56, %v3508_v44  ;;  %v24455_v44 = vld [vmem:[#allocation107_spill] sm:$0xff] }
 0x6b7   :  { %v16599_v42 = vpop.f32.mrb[124].mxu1  ;;  %16644 = vmatprep.mubr.msk.f32.mxu0 %vm24219_vm4, %v20717_v5 }
 0x6b8   :  { %v3518_v61 = vpop.f32.mrb[125].mxu1  ;;  %16645 = vmatmul.mubr.msk.f32.gmra.mrb[126].mxu0 %vm24219_vm4, %v20720_v8  ;;  %v20730_v28 = vadd.f32 %v16599_v42, %v20568_v56  ;;  %v24456_v42 = vmax.f32 %v24455_v44, 0.0 }
 0x6b9   :  { %v20727_v29 = vadd.f32 %v20568_v56, %v3518_v61  ;;  %v521_v56 = vld [vmem:[%s24442_s20] sm:$0xf]  ;;  %v24457_v61 = vld [vmem:[#allocation110_spill] sm:$0xff]  ;;  %s25287_s20 = sld [smem:[#allocation52_spill]] }
 0x6bb   :  { %16647 = vmatprep.mubr.msk.f32.mxu0 %vm24219_vm4, %v20727_v29 }
 0x6bc   :  { %16648 = vmatmul.mubr.msk.f32.gmra.mrb[128].mxu0 %vm24219_vm4, %v20730_v28 }
 0x6bd   :  { %16652 = vmatprep.mubr.msk.f32.mxu0 %vm24212_vm8, %v19648_v50 }
 0x6c0   :  { %16653 = vmatmul.mubr.msk.f32.vlgmr.msra.gmra.mrb[130].mxu0 %vm24212_vm8, %v19650_v51 }
 0x6c1   :  { %16655 = vmatprep.mubr.msk.f32.mxu0 %vm24212_vm8, %v19658_v58  ;;  %16711 = vmatpush3.msk.msra.mxu0 %vm24218_vm2, %v20579_v41  ;;  %v24459_v41 = vld [vmem:[#allocation109_spill] sm:$0xff] }
 0x6c2   :  { %16760 = vmatprep.subr.msk.mxu0 %vm24218_vm2, %v559_v36  ;;  %v24460_v57 = vmax.f32 %v24459_v41, 0.0 }
 0x6c4   :  { %16656 = vmatmul.mubr.msk.f32.gmra.mrb[132].mxu0 %vm24212_vm8, %v19656_v55 }
 0x6c5   :  { %16658 = vmatprep.mubr.msk.f32.mxu0 %vm24212_vm8, %v19669_v2 }
 0x6c8   :  { %16659 = vmatmul.mubr.msk.f32.gmra.mrb[134].mxu0 %vm24212_vm8, %v19664_v63 }
 0x6c9   :  { %16661 = vmatprep.mubr.msk.f32.mxu0 %vm24212_vm8, %v19679_v10 }
 0x6cc   :  { %16662 = vmatmul.mubr.msk.f32.gmra.mrb[136].mxu0 %vm24212_vm8, %v19675_v7 }
 0x6cd   :  { %16664 = vmatprep.mubr.msk.f32.mxu0 %vm24212_vm8, %v19689_v18 }
 0x6d0   :  { %16665 = vmatmul.mubr.msk.f32.gmra.mrb[138].mxu0 %vm24212_vm8, %v19685_v15 }
 0x6d1   :  { %16667 = vmatprep.mubr.msk.f32.mxu0 %vm24212_vm8, %v19699_v26 }
 0x6d4   :  { %16668 = vmatmul.mubr.msk.f32.gmra.mrb[140].mxu0 %vm24212_vm8, %v19695_v23 }
 0x6d5   :  { %16670 = vmatprep.mubr.msk.f32.mxu0 %vm24212_vm8, %v19709_v34 }
 0x6d8   :  { %16671 = vmatmul.mubr.msk.f32.gmra.mrb[142].mxu0 %vm24212_vm8, %v19705_v31 }
 0x6d9   :  { %16673 = vmatprep.mubr.msk.f32.mxu0 %vm24212_vm8, %v19719_v49 }
 0x6dc   :  { %16674 = vmatmul.mubr.msk.f32.gmra.mrb[144].mxu0 %vm24212_vm8, %v19715_v46  ;;  %vm20839_vm8 = vmpackc.low %vm782_vm0, %vm780_vm15  ;;  %v24511_v46 = vld [vmem:[#allocation135_spill] sm:$0xff] }
 0x6dd   :  { %16712 = vmatprep.mubr.msk.f32.mxu0 %vm24219_vm4, %v20571_v14  ;;  %v24447_v3 = vsel %vm20839_vm8, 4294967295, %v24446_v3  ;;  %13827 = vmatprep.mubr.msk.bf16.mxu1 %vm20839_vm8, %v24213_v54  ;;  %vm21017_vm15 = vmpackc.low %vm786_vm6, %vm784_vm1 }
 0x6de   :  { %24448 = vst [vmem:[#allocation84_spill] sm:$0xff] %v24447_v3  ;;  %vm21047_vm0 = vmpackc.low %vm785_vm10, %vm783_vm9 }
 0x6e0   :  { %16713 = vmatmul.mubr.msk.f32.vlgmr.msra.gmra.mrb[146].mxu0 %vm24219_vm4, %v20574_v6 }
 0x6e1   :  { %16715 = vmatprep.mubr.msk.f32.mxu0 %vm24219_vm4, %v20584_v33  ;;  %16761 = vmatpush3.msk.msra.mxu0 %vm24218_vm2, %v559_v36  ;;  %v24458_v36 = vmax.f32 %v24457_v61, 0.0 }
 0x6e2   :  { %16958 = vmatprep.subr.msk.mxu0 %vm24218_vm2, %v521_v56 }
 0x6e4   :  { %16716 = vmatmul.mubr.msk.f32.gmra.mrb[148].mxu0 %vm24219_vm4, %v20588_v38 }
 0x6e5   :  { %16718 = vmatprep.mubr.msk.f32.mxu0 %vm24219_vm4, %v20597_v21 }
 0x6e8   :  { %16719 = vmatmul.mubr.msk.f32.gmra.mrb[150].mxu0 %vm24219_vm4, %v20600_v60 }
 0x6e9   :  { %16721 = vmatprep.mubr.msk.f32.mxu0 %vm24219_vm4, %v20607_v39 }
 0x6ec   :  { %16722 = vmatmul.mubr.msk.f32.gmra.mrb[152].mxu0 %vm24219_vm4, %v20610_v4 }
 0x6ed   :  { %16724 = vmatprep.mubr.msk.f32.mxu0 %vm24219_vm4, %v20617_v45 }
 0x6f0   :  { %16725 = vmatmul.mubr.msk.f32.gmra.mrb[154].mxu0 %vm24219_vm4, %v20620_v48 }
 0x6f1   :  { %16727 = vmatprep.mubr.msk.f32.mxu0 %vm24219_vm4, %v20627_v43 }
 0x6f4   :  { %16728 = vmatmul.mubr.msk.f32.gmra.mrb[156].mxu0 %vm24219_vm4, %v20630_v16 }
 0x6f5   :  { %16730 = vmatprep.mubr.msk.f32.mxu0 %vm24219_vm4, %v20637_v40 }
 0x6f8   :  { %16731 = vmatmul.mubr.msk.f32.gmra.mrb[158].mxu0 %vm24219_vm4, %v20640_v20 }
 0x6f9   :  { %16733 = vmatprep.mubr.msk.f32.mxu0 %vm24219_vm4, %v20647_v13 }
 0x6fc   :  { %16734 = vmatmul.mubr.msk.f32.gmra.mrb[160].mxu0 %vm24219_vm4, %v20650_v30 }
 0x6fd   :  { %16736 = vmatprep.mubr.msk.f32.mxu0 %vm24219_vm4, %v20657_v47 }
 0x700   :  { %16737 = vmatmul.mubr.msk.f32.gmra.mrb[162].mxu0 %vm24219_vm4, %v20660_v25 }
 0x701   :  { %16739 = vmatprep.mubr.msk.f32.mxu0 %vm24219_vm4, %v20667_v22 }
 0x704   :  { %16740 = vmatmul.mubr.msk.f32.gmra.mrb[164].mxu0 %vm24219_vm4, %v20670_v17 }
 0x705   :  { %16742 = vmatprep.mubr.msk.f32.mxu0 %vm24219_vm4, %v20677_v9 }
 0x708   :  { %16743 = vmatmul.mubr.msk.f32.gmra.mrb[166].mxu0 %vm24219_vm4, %v20680_v0 }
 0x709   :  { %16745 = vmatprep.mubr.msk.f32.mxu0 %vm24219_vm4, %v20687_v1 }
 0x70c   :  { %16746 = vmatmul.mubr.msk.f32.gmra.mrb[168].mxu0 %vm24219_vm4, %v20690_v59 }
 0x70d   :  { %16748 = vmatprep.mubr.msk.f32.mxu0 %vm24219_vm4, %v20697_v37 }
 0x710   :  { %16749 = vmatmul.mubr.msk.f32.gmra.mrb[170].mxu0 %vm24219_vm4, %v20700_v24 }
 0x711   :  { %16751 = vmatprep.mubr.msk.f32.mxu0 %vm24219_vm4, %v20707_v12 }
 0x714   :  { %16752 = vmatmul.mubr.msk.f32.gmra.mrb[172].mxu0 %vm24219_vm4, %v20710_v32 }
 0x715   :  { %16754 = vmatprep.mubr.msk.f32.mxu0 %vm24219_vm4, %v20717_v5 }
 0x718   :  { %16755 = vmatmul.mubr.msk.f32.gmra.mrb[174].mxu0 %vm24219_vm4, %v20720_v8 }
 0x719   :  { %16757 = vmatprep.mubr.msk.f32.mxu0 %vm24219_vm4, %v20727_v29 }
 0x71c   :  { %16758 = vmatmul.mubr.msk.f32.gmra.mrb[176].mxu0 %vm24219_vm4, %v20730_v28 }
 0x71d   :  { %16762 = vmatprep.mubr.msk.f32.mxu0 %vm24219_vm4, %v24450_v27  ;;  %v24462_v27 = vmax.f32 %v24461_v52, 0.0 }
 0x720   :  { %16763 = vmatmul.mubr.msk.f32.vlgmr.msra.gmra.mrb[146].mxu0 %vm24219_vm4, %v24452_v19  ;;  %v24464_v19 = vmax.f32 %v24463_v62, 0.0 }
 0x721   :  { %16765 = vmatprep.mubr.msk.f32.mxu0 %vm24219_vm4, %v24454_v11  ;;  %16959 = vmatpush3.msk.msra.mxu0 %vm24218_vm2, %v521_v56  ;;  %v24465_v56 = vld [vmem:[#allocation114_spill] sm:$0xff]  ;;  %v24467_v11 = vld [vmem:[#allocation113_spill] sm:$0xff] }
 0x722   :  { %v24466_v53 = vmax.f32 %v24465_v56, 0.0  ;;  %v24468_v44 = vmax.f32 %v24467_v11, 0.0 }
 0x724   :  { %16766 = vmatmul.mubr.msk.f32.gmra.mrb[148].mxu0 %vm24219_vm4, %v24456_v42  ;;  %v24469_v42 = vld [vmem:[#allocation116_spill] sm:$0xff] }
 0x725   :  { %16768 = vmatprep.mubr.msk.f32.mxu0 %vm24219_vm4, %v24458_v36  ;;  %v24470_v61 = vmax.f32 %v24469_v42, 0.0  ;;  %v24471_v36 = vld [vmem:[#allocation115_spill] sm:$0xff] }
 0x726   :  { %v24472_v41 = vmax.f32 %v24471_v36, 0.0 }
 0x728   :  { %16769 = vmatmul.mubr.msk.f32.gmra.mrb[150].mxu0 %vm24219_vm4, %v24460_v57  ;;  %v24473_v57 = vld [vmem:[#allocation118_spill] sm:$0xff] }
 0x729   :  { %16771 = vmatprep.mubr.msk.f32.mxu0 %vm24219_vm4, %v24462_v27  ;;  %v24474_v52 = vmax.f32 %v24473_v57, 0.0  ;;  %v24475_v27 = vld [vmem:[#allocation117_spill] sm:$0xff] }
 0x72a   :  { %v24476_v62 = vmax.f32 %v24475_v27, 0.0 }
 0x72c   :  { %16772 = vmatmul.mubr.msk.f32.gmra.mrb[152].mxu0 %vm24219_vm4, %v24464_v19  ;;  %v24477_v19 = vld [vmem:[#allocation120_spill] sm:$0xff] }
 0x72d   :  { %16774 = vmatprep.mubr.msk.f32.mxu0 %vm24219_vm4, %v24466_v53  ;;  %v24478_v56 = vmax.f32 %v24477_v19, 0.0  ;;  %v24479_v53 = vld [vmem:[#allocation119_spill] sm:$0xff] }
 0x72e   :  { %v24480_v11 = vmax.f32 %v24479_v53, 0.0 }
 0x730   :  { %16775 = vmatmul.mubr.msk.f32.gmra.mrb[154].mxu0 %vm24219_vm4, %v24468_v44  ;;  %v24481_v44 = vld [vmem:[#allocation122_spill] sm:$0xff] }
 0x731   :  { %16777 = vmatprep.mubr.msk.f32.mxu0 %vm24219_vm4, %v24470_v61  ;;  %v24482_v42 = vmax.f32 %v24481_v44, 0.0  ;;  %v24483_v61 = vld [vmem:[#allocation121_spill] sm:$0xff] }
 0x732   :  { %v24484_v36 = vmax.f32 %v24483_v61, 0.0 }
 0x734   :  { %16778 = vmatmul.mubr.msk.f32.gmra.mrb[156].mxu0 %vm24219_vm4, %v24472_v41  ;;  %v24485_v41 = vld [vmem:[#allocation124_spill] sm:$0xff] }
 0x735   :  { %16780 = vmatprep.mubr.msk.f32.mxu0 %vm24219_vm4, %v24474_v52  ;;  %v24486_v57 = vmax.f32 %v24485_v41, 0.0  ;;  %v24487_v52 = vld [vmem:[#allocation123_spill] sm:$0xff] }
 0x736   :  { %v24488_v27 = vmax.f32 %v24487_v52, 0.0 }
 0x738   :  { %16781 = vmatmul.mubr.msk.f32.gmra.mrb[158].mxu0 %vm24219_vm4, %v24476_v62  ;;  %v24489_v62 = vld [vmem:[#allocation126_spill] sm:$0xff] }
 0x739   :  { %16783 = vmatprep.mubr.msk.f32.mxu0 %vm24219_vm4, %v24478_v56  ;;  %v24490_v19 = vmax.f32 %v24489_v62, 0.0  ;;  %v24491_v56 = vld [vmem:[#allocation125_spill] sm:$0xff] }
 0x73a   :  { %v24492_v53 = vmax.f32 %v24491_v56, 0.0 }
 0x73c   :  { %16784 = vmatmul.mubr.msk.f32.gmra.mrb[160].mxu0 %vm24219_vm4, %v24480_v11  ;;  %v24493_v11 = vld [vmem:[#allocation128_spill] sm:$0xff] }
 0x73d   :  { %16786 = vmatprep.mubr.msk.f32.mxu0 %vm24219_vm4, %v24482_v42  ;;  %v24494_v44 = vmax.f32 %v24493_v11, 0.0  ;;  %v24495_v42 = vld [vmem:[#allocation127_spill] sm:$0xff] }
 0x73e   :  { %v24496_v61 = vmax.f32 %v24495_v42, 0.0  ;;  %v24505_v42 = vld [vmem:[#allocation134_spill] sm:$0xff] }
 0x740   :  { %16787 = vmatmul.mubr.msk.f32.gmra.mrb[162].mxu0 %vm24219_vm4, %v24484_v36  ;;  %v24497_v36 = vld [vmem:[#allocation130_spill] sm:$0xff] }
 0x741   :  { %16789 = vmatprep.mubr.msk.f32.mxu0 %vm24219_vm4, %v24486_v57  ;;  %v24498_v41 = vmax.f32 %v24497_v36, 0.0  ;;  %v24499_v57 = vld [vmem:[#allocation129_spill] sm:$0xff] }
 0x742   :  { %v24500_v52 = vmax.f32 %v24499_v57, 0.0  ;;  %v24507_v57 = vld [vmem:[#allocation133_spill] sm:$0xff] }
 0x743   :  { %v24508_v54 = vmax.f32 %v24507_v57, 0.0 }
 0x744   :  { %16790 = vmatmul.mubr.msk.f32.gmra.mrb[164].mxu0 %vm24219_vm4, %v24488_v27  ;;  %v24501_v27 = vld [vmem:[#allocation132_spill] sm:$0xff] }
 0x745   :  { %16792 = vmatprep.mubr.msk.f32.mxu0 %vm24219_vm4, %v24490_v19  ;;  %v24502_v62 = vmax.f32 %v24501_v27, 0.0  ;;  %v24509_v27 = vld [vmem:[#allocation136_spill] sm:$0xff] }
 0x748   :  { %16793 = vmatmul.mubr.msk.f32.gmra.mrb[166].mxu0 %vm24219_vm4, %v24492_v53  ;;  %v24503_v53 = vld [vmem:[#allocation131_spill] sm:$0xff] }
 0x749   :  { %16795 = vmatprep.mubr.msk.f32.mxu0 %vm24219_vm4, %v24494_v44  ;;  %v24504_v11 = vmax.f32 %v24503_v53, 0.0 }
 0x74c   :  { %16796 = vmatmul.mubr.msk.f32.gmra.mrb[168].mxu0 %vm24219_vm4, %v24496_v61  ;;  %v24506_v61 = vmax.f32 %v24505_v42, 0.0 }
 0x74d   :  { %16798 = vmatprep.mubr.msk.f32.mxu0 %vm24219_vm4, %v24498_v41 }
 0x750   :  { %16799 = vmatmul.mubr.msk.f32.gmra.mrb[170].mxu0 %vm24219_vm4, %v24500_v52 }
 0x751   :  { %16801 = vmatprep.mubr.msk.f32.mxu0 %vm24219_vm4, %v24502_v62  ;;  %v24510_v62 = vmax.f32 %v24509_v27, 0.0 }
 0x753   :  { %v16604_v19 = vpop.f32.mrb[66].mxu0 }
 0x754   :  { %v3692_v56 = vpop.f32.mrb[67].mxu0  ;;  %16802 = vmatmul.mubr.msk.f32.gmra.mrb[172].mxu0 %vm24219_vm4, %v24504_v11  ;;  %v24512_v11 = vmax.f32 %v24511_v46, 0.0 }
 0x755   :  { %v3851_v44 = vpack.c.bf16 %v16604_v19, %v3692_v56  ;;  %16804 = vmatprep.mubr.msk.f32.mxu0 %vm24219_vm4, %v24506_v61 }
 0x757   :  { %v16607_v36 = vpop.f32.mrb[100].mxu0 }
 0x758   :  { %v3702_v41 = vpop.f32.mrb[101].mxu0  ;;  %16805 = vmatmul.mubr.msk.f32.gmra.mrb[174].mxu0 %vm24219_vm4, %v24508_v54 }
 0x759   :  { %v3852_v52 = vpack.c.bf16 %v16607_v36, %v3702_v41  ;;  %16807 = vmatprep.mubr.msk.f32.mxu0 %vm24219_vm4, %v24510_v62 }
 0x75b   :  { %v16610_v3 = vpop.f32.mrb[102].mxu0 }
 0x75c   :  { %v3712_v53 = vpop.f32.mrb[103].mxu0  ;;  %16808 = vmatmul.mubr.msk.f32.gmra.mrb[176].mxu0 %vm24219_vm4, %v24512_v11 }
 0x75d   :  { %v3853_v19 = vpack.c.bf16 %v16610_v3, %v3712_v53  ;;  %16960 = vmatprep.mubr.msk.f32.mxu0 %vm24219_vm4, %v20571_v14 }
 0x75f   :  { %v16613_v56 = vpop.f32.mrb[104].mxu0 }
 0x760   :  { %v3722_v42 = vpop.f32.mrb[105].mxu0  ;;  %16961 = vmatmul.mubr.msk.f32.vlgmr.msra.gmra.mrb[178].mxu0 %vm24219_vm4, %v20574_v6 }
 0x761   :  { %v3854_v54 = vpack.c.bf16 %v16613_v56, %v3722_v42  ;;  %16963 = vmatprep.mubr.msk.f32.mxu0 %vm24219_vm4, %v20584_v33  ;;  %v24518_v42 = vmov 1.0|1.0  }
 0x763   :  { %v16616_v61 = vpop.f32.mrb[106].mxu0 }
 0x764   :  { %v3732_v36 = vpop.f32.mrb[107].mxu0  ;;  %16964 = vmatmul.mubr.msk.f32.gmra.mrb[180].mxu0 %vm24219_vm4, %v20588_v38 }
 0x765   :  { %v3855_v46 = vpack.c.bf16 %v16616_v61, %v3732_v36  ;;  %16966 = vmatprep.mubr.msk.f32.mxu0 %vm24219_vm4, %v20597_v21 }
 0x767   :  { %v16619_v3 = vpop.f32.mrb[108].mxu0 }
 0x768   :  { %v3742_v14 = vpop.f32.mrb[109].mxu0  ;;  %16967 = vmatmul.mubr.msk.f32.gmra.mrb[182].mxu0 %vm24219_vm4, %v20600_v60 }
 0x769   :  { %v3856_v41 = vpack.c.bf16 %v16619_v3, %v3742_v14  ;;  %16969 = vmatprep.mubr.msk.f32.mxu0 %vm24219_vm4, %v20607_v39  ;;  %v24524_v3 = vld [vmem:[#allocation89_spill] sm:$0xff]  ;;  %v24528_v14 = vmov 0 }
 0x76a   :  { %vm24525_vm1 = vcmp.eq.s32.totalorder %v24524_v3, %v24444_v35 }
 0x76b   :  { %v16622_v6 = vpop.f32.mrb[110].mxu0 }
 0x76c   :  { %v3752_v33 = vpop.f32.mrb[111].mxu0  ;;  %16970 = vmatmul.mubr.msk.f32.gmra.mrb[184].mxu0 %vm24219_vm4, %v20610_v4 }
 0x76d   :  { %v3857_v57 = vpack.c.bf16 %v16622_v6, %v3752_v33  ;;  %16972 = vmatprep.mubr.msk.f32.mxu0 %vm24219_vm4, %v20617_v45 }
 0x76f   :  { %v16625_v38 = vpop.f32.mrb[112].mxu0 }
 0x770   :  { %v3762_v21 = vpop.f32.mrb[113].mxu0  ;;  %16973 = vmatmul.mubr.msk.f32.gmra.mrb[186].mxu0 %vm24219_vm4, %v20620_v48 }
 0x771   :  { %v3858_v27 = vpack.c.bf16 %v16625_v38, %v3762_v21  ;;  %16975 = vmatprep.mubr.msk.f32.mxu0 %vm24219_vm4, %v20627_v43  ;;  %v24536_v38 = vld [vmem:[#allocation91_spill] sm:$0xff]  ;;  %v24538_v21 = vld [vmem:[#allocation92_spill] sm:$0xff] }
 0x773   :  { %v16628_v60 = vpop.f32.mrb[114].mxu0 }
 0x774   :  { %v3772_v39 = vpop.f32.mrb[115].mxu0  ;;  %16976 = vmatmul.mubr.msk.f32.gmra.mrb[188].mxu0 %vm24219_vm4, %v20630_v16 }
 0x775   :  { %v3859_v62 = vpack.c.bf16 %v16628_v60, %v3772_v39  ;;  %16978 = vmatprep.mubr.msk.f32.mxu0 %vm24219_vm4, %v20637_v40 }
 0x777   :  { %v16631_v4 = vpop.f32.mrb[116].mxu0  ;;  %14996 = vmatprep.subr.bf16.mxu1 %v3859_v62 }
 0x778   :  { %v3782_v45 = vpop.f32.mrb[117].mxu0  ;;  %14997 = vmatpush3.bf16.msra.mxu1 %v3851_v44  ;;  %16979 = vmatmul.mubr.msk.f32.gmra.mrb[190].mxu0 %vm24219_vm4, %v20640_v20 }
 0x779   :  { %v3860_v48 = vpack.c.bf16 %v16631_v4, %v3782_v45  ;;  %16981 = vmatprep.mubr.msk.f32.mxu0 %vm24219_vm4, %v20647_v13  ;;  %v24545_v45 = vmov 0 }
 0x77b   :  { %v16634_v43 = vpop.f32.mrb[118].mxu0  ;;  %14998 = vmatprep.subr.bf16.mxu1 %v3860_v48  ;;  %v24548_v48 = vld [vmem:[#allocation93_spill] sm:$0xff] }
 0x77c   :  { %v3792_v53 = vpop.f32.mrb[119].mxu0  ;;  %14999 = vmatpush3.bf16.msra.mxu1 %v3852_v52  ;;  %16982 = vmatmul.mubr.msk.f32.gmra.mrb[192].mxu0 %vm24219_vm4, %v20650_v30 }
 0x77d   :  { %v3861_v16 = vpack.c.bf16 %v16634_v43, %v3792_v53  ;;  %16984 = vmatprep.mubr.msk.f32.mxu0 %vm24219_vm4, %v20657_v47  ;;  %v24550_v43 = vld [vmem:[#allocation94_spill] sm:$0xff]  ;;  %v24552_v53 = vmov 0 }
 0x77e   :  { %vm24551_vm3 = vcmp.eq.s32.totalorder %v24550_v43, %v24444_v35 }
 0x77f   :  { %v16637_v40 = vpop.f32.mrb[120].mxu0  ;;  %15000 = vmatprep.subr.bf16.mxu1 %v3861_v16 }
 0x780   :  { %v3802_v44 = vpop.f32.mrb[121].mxu0  ;;  %15001 = vmatpush3.bf16.msra.mxu1 %v3853_v19  ;;  %16985 = vmatmul.mubr.msk.f32.gmra.mrb[194].mxu0 %vm24219_vm4, %v20660_v25 }
 0x781   :  { %v3862_v20 = vpack.c.bf16 %v16637_v40, %v3802_v44  ;;  %16987 = vmatprep.mubr.msk.f32.mxu0 %vm24219_vm4, %v20667_v22  ;;  %v24558_v44 = vmov 0 }
 0x783   :  { %v16640_v13 = vpop.f32.mrb[122].mxu0  ;;  %15002 = vmatprep.subr.bf16.mxu1 %v3862_v20  ;;  %v24561_v20 = vld [vmem:[#allocation95_spill] sm:$0xff] }
 0x784   :  { %v3812_v52 = vpop.f32.mrb[123].mxu0  ;;  %15003 = vmatpush3.bf16.msra.mxu1 %v3854_v54  ;;  %16988 = vmatmul.mubr.msk.f32.gmra.mrb[196].mxu0 %vm24219_vm4, %v20670_v17 }
 0x785   :  { %v3863_v30 = vpack.c.bf16 %v16640_v13, %v3812_v52  ;;  %16990 = vmatprep.mubr.msk.f32.mxu0 %vm24219_vm4, %v20677_v9  ;;  %v24563_v13 = vld [vmem:[#allocation96_spill] sm:$0xff]  ;;  %v24565_v52 = vmov 0 }
 0x786   :  { %vm24564_vm12 = vcmp.eq.s32.totalorder %v24563_v13, %v24444_v35 }
 0x787   :  { %v16643_v47 = vpop.f32.mrb[124].mxu0  ;;  %15004 = vmatprep.subr.bf16.mxu1 %v3863_v30  ;;  %v24570_v30 = vmov 0 }
 0x788   :  { %v3822_v11 = vpop.f32.mrb[125].mxu0  ;;  %15005 = vmatpush3.bf16.msra.mxu1 %v3855_v46  ;;  %16991 = vmatmul.mubr.msk.f32.gmra.mrb[198].mxu0 %vm24219_vm4, %v20680_v0  ;;  %v24520_v46 = vld [vmem:[#allocation101_spill] sm:$0xff] }
 0x789   :  { %v3864_v25 = vpack.c.bf16 %v16643_v47, %v3822_v11  ;;  %16993 = vmatprep.mubr.msk.f32.mxu0 %vm24219_vm4, %v20687_v1  ;;  %vm24531_vm9 = vcmp.eq.s32.totalorder %v24524_v3, %v24520_v46  ;;  %v24573_v47 = vld [vmem:[#allocation97_spill] sm:$0xff]  ;;  %v24575_v11 = vld [vmem:[#allocation98_spill] sm:$0xff] }
 0x78a   :  { %v497_v3 = vld [vmem:[%s24555_s17 + $0x18] sm:$0xff] }
 0x78b   :  { %v16646_v22 = vpop.f32.mrb[126].mxu0  ;;  %15006 = vmatprep.subr.bf16.mxu1 %v3864_v25  ;;  %v24577_v25 = vmov 0 }
 0x78c   :  { %v3832_v19 = vpop.f32.mrb[127].mxu0  ;;  %15007 = vmatpush3.bf16.msra.mxu1 %v3856_v41  ;;  %16994 = vmatmul.mubr.msk.f32.gmra.mrb[200].mxu0 %vm24219_vm4, %v20690_v59 }
 0x78d   :  { %v3865_v17 = vpack.c.bf16 %v16646_v22, %v3832_v19  ;;  %16996 = vmatprep.mubr.msk.f32.mxu0 %vm24219_vm4, %v20697_v37  ;;  %v24582_v22 = vmov 0  ;;  %v24585_v19 = vld [vmem:[#allocation99_spill] sm:$0xff] }
 0x78f   :  { %v16649_v9 = vpop.f32.mrb[128].mxu0  ;;  %15008 = vmatprep.subr.bf16.mxu1 %v3865_v17  ;;  %v24587_v17 = vld [vmem:[#allocation100_spill] sm:$0xff] }
 0x790   :  { %v3842_v56 = vpop.f32.mrb[129].mxu0  ;;  %15009 = vmatpush3.bf16.msra.mxu1 %v3857_v57  ;;  %16997 = vmatmul.mubr.msk.f32.gmra.mrb[202].mxu0 %vm24219_vm4, %v20700_v24  ;;  %v24533_v57 = vmov 0  ;;  %v496_v24 = vld [vmem:[%s24555_s17 + $0x10] sm:$0xff] }
 0x791   :  { %v3866_v0 = vpack.c.bf16 %v16649_v9, %v3842_v56  ;;  %16999 = vmatprep.mubr.msk.f32.mxu0 %vm24219_vm4, %v20707_v12  ;;  %v24515_v12 = vmov 0  ;;  %v24589_v9 = vmov 0  ;;  %v494_v56 = vld [vmem:[%s24555_s17] sm:$0xff] }
 0x792   :  { %v24516_v12 = vsel %vm21017_vm15, 4294967295, %v24515_v12 }
 0x793   :  { %15010 = vmatprep.subr.bf16.mxu1 %v3866_v0  ;;  %v21003_v1 = vpop.f32.mrb[130].mxu0  ;;  %24517 = vst [vmem:[#allocation103_spill] sm:$0xff] %v24516_v12  ;;  %v495_v0 = vld [vmem:[%s24555_s17 + $0x8] sm:$0xff] }
 0x794   :  { %15011 = vmatpush3.bf16.msra.mxu1 %v3858_v27  ;;  %v21005_v59 = vpop.f32.mrb[131].mxu0  ;;  %17000 = vmatmul.mubr.msk.f32.gmra.mrb[204].mxu0 %vm24219_vm4, %v20710_v32  ;;  %v24540_v27 = vmov 0  ;;  %v18170_v37 = vpack.c.bf16 %v495_v0, %v494_v56 }
 0x795   :  { %17002 = vmatprep.mubr.msk.f32.mxu0 %vm24219_vm4, %v20717_v5 }
 0x796   :  { %18171 = vmatprep.subr.bf16.mxu1 %v18170_v37 }
 0x797   :  { %13829 = vmatmul.mubr.msk.bf16.vlgmr.msra.gmra.mrb[128].mxu1 %vm19909_vm7, %v24518_v42  ;;  %v21024_v61 = vpop.f32.mrb[132].mxu0 }
 0x798   :  { %v21026_v32 = vpop.f32.mrb[133].mxu0  ;;  %17003 = vmatmul.mubr.msk.f32.gmra.mrb[206].mxu0 %vm24219_vm4, %v20720_v8  ;;  %13831 = vmatprep.mubr.msk.bf16.mxu1 %vm21017_vm15, %v24518_v42  ;;  %v24521_v8 = vmov 0 }
 0x799   :  { %17005 = vmatprep.mubr.msk.f32.mxu0 %vm24219_vm4, %v20727_v29  ;;  %v24522_v8 = vsel %vm21047_vm0, 4294967295, %v24521_v8  ;;  %v24526_v29 = vld [vmem:[#allocation90_spill] sm:$0xff]  ;;  %18173 = vmatpush3.bf16.msra.mxu1 %v18170_v37 }
 0x79a   :  { %24523 = vst [vmem:[#allocation85_spill] sm:$0xff] %v24522_v8  ;;  %vm24527_vm6 = vcmp.eq.s32.totalorder %v24526_v29, %v24444_v35  ;;  %vm24532_vm10 = vcmp.eq.s32.totalorder %v24526_v29, %v24520_v46  ;;  %v18174_v29 = vpack.c.bf16 %v497_v3, %v496_v24 }
 0x79b   :  { %v21035_v5 = vpop.f32.mrb[134].mxu0  ;;  %vm21057_vm2 = vmpackc.low %vm24527_vm6, %vm24525_vm1  ;;  %vm24537_vm6 = vcmp.eq.s32.totalorder %v24536_v38, %v24444_v35 }
 0x79c   :  { %v21037_v36 = vpop.f32.mrb[135].mxu0  ;;  %17006 = vmatmul.mubr.msk.f32.gmra.mrb[208].mxu0 %vm24219_vm4, %v20730_v28  ;;  %v24529_v14 = vsel %vm21057_vm2, 4294967295, %v24528_v14  ;;  %vm21081_vm1 = vmpackc.low %vm24532_vm10, %vm24531_vm9  ;;  %vm24539_vm4 = vcmp.eq.s32.totalorder %v24538_v21, %v24444_v35  ;;  %vm24544_vm9 = vcmp.eq.s32.totalorder %v24538_v21, %v24520_v46  ;;  %18175 = vmatprep.subr.bf16.mxu1 %v18174_v29 }
 0x79d   :  { %24530 = vst [vmem:[#allocation106_spill] sm:$0xff] %v24529_v14  ;;  %v24534_v57 = vsel %vm21081_vm1, 4294967295, %v24533_v57  ;;  %vm21091_vm5 = vmpackc.low %vm24539_vm4, %vm24537_vm6  ;;  %vm24543_vm4 = vcmp.eq.s32.totalorder %v24536_v38, %v24520_v46  ;;  %vm24549_vm6 = vcmp.eq.s32.totalorder %v24548_v48, %v24444_v35  ;;  %18177 = vmatpush3.bf16.msra.mxu1 %v18174_v29  ;;  %v498_v38 = vld [vmem:[%s24555_s17 + $0x20] sm:$0xff]  ;;  %s25398_s17 = sld [smem:[#allocation76_spill]] }
 0x79e   :  { %24535 = vst [vmem:[#allocation105_spill] sm:$0xff] %v24534_v57  ;;  %v24541_v27 = vsel %vm21091_vm5, 4294967295, %v24540_v27  ;;  %vm21115_vm10 = vmpackc.low %vm24544_vm9, %vm24543_vm4  ;;  %vm24556_vm4 = vcmp.eq.s32.totalorder %v24548_v48, %v24520_v46  ;;  %16684 = vmatprep.subr.mxu1 %v498_v38 }
 0x79f   :  { %13833 = vmatmul.mubr.msk.bf16.gmra.mrb[132].mxu1 %vm21047_vm0, %v24518_v42  ;;  %v21064_v28 = vpop.f32.mrb[136].mxu0  ;;  %24542 = vst [vmem:[#allocation108_spill] sm:$0xff] %v24541_v27  ;;  %v24546_v45 = vsel %vm21115_vm10, 4294967295, %v24545_v45  ;;  %vm21125_vm11 = vmpackc.low %vm24551_vm3, %vm24549_vm6  ;;  %vm24557_vm3 = vcmp.eq.s32.totalorder %v24550_v43, %v24520_v46  ;;  %vm24562_vm6 = vcmp.eq.s32.totalorder %v24561_v20, %v24444_v35 }
 0x7a0   :  { %v21066_v41 = vpop.f32.mrb[137].mxu0  ;;  %13835 = vmatprep.mubr.msk.bf16.mxu1 %vm21057_vm2, %v24518_v42  ;;  %24547 = vst [vmem:[#allocation107_spill] sm:$0xff] %v24546_v45  ;;  %v24553_v53 = vsel %vm21125_vm11, 4294967295, %v24552_v53  ;;  %vm21145_vm9 = vmpackc.low %vm24557_vm3, %vm24556_vm4  ;;  %vm24568_vm4 = vcmp.eq.s32.totalorder %v24561_v20, %v24520_v46  ;;  %vm24569_vm3 = vcmp.eq.s32.totalorder %v24563_v13, %v24520_v46 }
 0x7a1   :  { %24554 = vst [vmem:[#allocation110_spill] sm:$0xff] %v24553_v53  ;;  %v24559_v44 = vsel %vm21145_vm9, 4294967295, %v24558_v44  ;;  %vm21155_vm13 = vmpackc.low %vm24564_vm12, %vm24562_vm6  ;;  %vm24574_vm12 = vcmp.eq.s32.totalorder %v24573_v47, %v24444_v35  ;;  %vm24576_vm6 = vcmp.eq.s32.totalorder %v24575_v11, %v24444_v35  ;;  %16685 = vmatpush3.msra.mxu1 %v498_v38 }
 0x7a2   :  { %24560 = vst [vmem:[#allocation109_spill] sm:$0xff] %v24559_v44  ;;  %v24566_v52 = vsel %vm21155_vm13, 4294967295, %v24565_v52  ;;  %vm21171_vm14 = vmpackc.low %vm24569_vm3, %vm24568_vm4  ;;  %vm24580_vm4 = vcmp.eq.s32.totalorder %v24573_v47, %v24520_v46  ;;  %vm24581_vm3 = vcmp.eq.s32.totalorder %v24575_v11, %v24520_v46 }
 0x7a3   :  { %v21071_v6 = vpop.f32.mrb[138].mxu0  ;;  %24567 = vst [vmem:[#allocation112_spill] sm:$0xff] %v24566_v52  ;;  %v24571_v30 = vsel %vm21171_vm14, 4294967295, %v24570_v30 }
 0x7a4   :  { %v21073_v33 = vpop.f32.mrb[139].mxu0  ;;  %24572 = vst [vmem:[#allocation111_spill] sm:$0xff] %v24571_v30 }
 0x7a7   :  { %13837 = vmatmul.mubr.msk.bf16.gmra.mrb[136].mxu1 %vm21081_vm1, %v24518_v42  ;;  %v21098_v60 = vpop.f32.mrb[140].mxu0 }
 0x7a8   :  { %v21100_v39 = vpop.f32.mrb[141].mxu0  ;;  %13839 = vmatprep.mubr.msk.bf16.mxu1 %vm21091_vm5, %v24518_v42 }
 0x7ab   :  { %v21105_v62 = vpop.f32.mrb[142].mxu0 }
 0x7ac   :  { %v21107_v4 = vpop.f32.mrb[143].mxu0 }
 0x7af   :  { %13841 = vmatmul.mubr.msk.bf16.gmra.mrb[140].mxu1 %vm21115_vm10, %v24518_v42  ;;  %v21132_v16 = vpop.f32.mrb[144].mxu0 }
 0x7b0   :  { %v21134_v40 = vpop.f32.mrb[145].mxu0  ;;  %13843 = vmatprep.mubr.msk.bf16.mxu1 %vm21125_vm11, %v24518_v42 }
 0x7b7   :  { %13845 = vmatmul.mubr.msk.bf16.gmra.mrb[144].mxu1 %vm21145_vm9, %v24518_v42  ;;  %vm21181_vm9 = vmpackc.low %vm24576_vm6, %vm24574_vm12  ;;  %vm24586_vm12 = vcmp.eq.s32.totalorder %v24585_v19, %v24444_v35  ;;  %vm24588_vm6 = vcmp.eq.s32.totalorder %v24587_v17, %v24444_v35  ;;  %v24594_v35 = vmov 0 }
 0x7b8   :  { %13847 = vmatprep.mubr.msk.bf16.mxu1 %vm21155_vm13, %v24518_v42  ;;  %v24578_v25 = vsel %vm21181_vm9, 4294967295, %v24577_v25  ;;  %vm21197_vm13 = vmpackc.low %vm24581_vm3, %vm24580_vm4  ;;  %vm24592_vm4 = vcmp.eq.s32.totalorder %v24585_v19, %v24520_v46  ;;  %vm24593_vm3 = vcmp.eq.s32.totalorder %v24587_v17, %v24520_v46 }
 0x7b9   :  { %24579 = vst [vmem:[#allocation114_spill] sm:$0xff] %v24578_v25  ;;  %v24583_v22 = vsel %vm21197_vm13, 4294967295, %v24582_v22 }
 0x7ba   :  { %24584 = vst [vmem:[#allocation113_spill] sm:$0xff] %v24583_v22 }
 0x7bf   :  { %13849 = vmatmul.mubr.msk.bf16.gmra.mrb[148].mxu1 %vm21171_vm14, %v24518_v42  ;;  %vm21207_vm14 = vmpackc.low %vm24588_vm6, %vm24586_vm12  ;;  %vm24611_vm12 = vcmask 326656  }
 0x7c0   :  { %13851 = vmatprep.mubr.msk.bf16.mxu1 %vm21181_vm9, %v24518_v42  ;;  %v24590_v9 = vsel %vm21207_vm14, 4294967295, %v24589_v9  ;;  %vm21223_vm9 = vmpackc.low %vm24593_vm3, %vm24592_vm4 }
 0x7c1   :  { %24591 = vst [vmem:[#allocation116_spill] sm:$0xff] %v24590_v9  ;;  %v24595_v35 = vsel %vm21223_vm9, 4294967295, %v24594_v35  ;;  %vm24612_vm6 = vmmov %vm24611_vm12 }
 0x7c2   :  { %24596 = vst [vmem:[#allocation115_spill] sm:$0xff] %v24595_v35  ;;  %vm24613_vm4 = vmmov %vm24612_vm6 }
 0x7c3   :  { %vm24614_vm3 = vmmov %vm24613_vm4 }
 0x7c7   :  { %13853 = vmatmul.mubr.msk.bf16.gmra.mrb[152].mxu1 %vm21197_vm13, %v24518_v42 }
 0x7c8   :  { %13855 = vmatprep.mubr.msk.bf16.mxu1 %vm21207_vm14, %v24518_v42 }
 0x7cf   :  { %13857 = vmatmul.mubr.msk.bf16.gmra.mrb[156].mxu1 %vm21223_vm9, %v24518_v42 }
 0x833   :  { %v21235_v46 = vpop.f32.mrb[178].mxu0 }
 0x834   :  { %v21237_v21 = vpop.f32.mrb[179].mxu0 }
 0x837   :  { %v21239_v48 = vpop.f32.mrb[180].mxu0 }
 0x838   :  { %v21241_v43 = vpop.f32.mrb[181].mxu0 }
 0x83b   :  { %v21243_v20 = vpop.f32.mrb[182].mxu0 }
 0x83c   :  { %v21245_v13 = vpop.f32.mrb[183].mxu0 }
 0x83f   :  { %v21247_v47 = vpop.f32.mrb[184].mxu0 }
 0x840   :  { %v21249_v11 = vpop.f32.mrb[185].mxu0 }
 0x843   :  { %v21251_v19 = vpop.f32.mrb[186].mxu0 }
 0x844   :  { %v21253_v17 = vpop.f32.mrb[187].mxu0 }
 0x847   :  { %v21255_v56 = vpop.f32.mrb[188].mxu0 }
 0x848   :  { %v21257_v0 = vpop.f32.mrb[189].mxu0 }
 0x84b   :  { %v21259_v37 = vpop.f32.mrb[190].mxu0 }
 0x84c   :  { %v21261_v24 = vpop.f32.mrb[191].mxu0 }
 0x84f   :  { %v21263_v3 = vpop.f32.mrb[192].mxu0 }
 0x850   :  { %v21265_v29 = vpop.f32.mrb[193].mxu0 }
 0x853   :  { %v21267_v38 = vpop.f32.mrb[194].mxu0 }
 0x854   :  { %24597 = vst [vmem:[#allocation118_spill] sm:$0xff] %v21267_v38  ;;  %v21269_v35 = vpop.f32.mrb[195].mxu0 }
 0x855   :  { %24598 = vst [vmem:[#allocation117_spill] sm:$0xff] %v21269_v35 }
 0x857   :  { %v21271_v9 = vpop.f32.mrb[196].mxu0 }
 0x858   :  { %24599 = vst [vmem:[#allocation120_spill] sm:$0xff] %v21271_v9  ;;  %v21273_v22 = vpop.f32.mrb[197].mxu0 }
 0x859   :  { %24600 = vst [vmem:[#allocation119_spill] sm:$0xff] %v21273_v22 }
 0x85b   :  { %v21275_v25 = vpop.f32.mrb[198].mxu0 }
 0x85c   :  { %24601 = vst [vmem:[#allocation122_spill] sm:$0xff] %v21275_v25  ;;  %v21277_v30 = vpop.f32.mrb[199].mxu0 }
 0x85d   :  { %24602 = vst [vmem:[#allocation121_spill] sm:$0xff] %v21277_v30  ;;  %v21295_v30 = vld [vmem:[#allocation5] ss:$0 sm:$0xff] }
 0x85f   :  { %v21279_v52 = vpop.f32.mrb[200].mxu0 }
 0x860   :  { %24603 = vst [vmem:[#allocation124_spill] sm:$0xff] %v21279_v52  ;;  %v21281_v44 = vpop.f32.mrb[201].mxu0 }
 0x861   :  { %24604 = vst [vmem:[#allocation123_spill] sm:$0xff] %v21281_v44 }
 0x863   :  { %v21283_v53 = vpop.f32.mrb[202].mxu0 }
 0x864   :  { %24605 = vst [vmem:[#allocation126_spill] sm:$0xff] %v21283_v53  ;;  %v21285_v45 = vpop.f32.mrb[203].mxu0 }
 0x865   :  { %24606 = vst [vmem:[#allocation125_spill] sm:$0xff] %v21285_v45 }
 0x867   :  { %v21287_v27 = vpop.f32.mrb[204].mxu0 }
 0x868   :  { %24607 = vst [vmem:[#allocation128_spill] sm:$0xff] %v21287_v27  ;;  %v21289_v57 = vpop.f32.mrb[205].mxu0 }
 0x869   :  { %24608 = vst [vmem:[#allocation127_spill] sm:$0xff] %v21289_v57 }
 0x86a   :  { %v15012_v14 = vpop.f32.mrb[128].mxu1 }
 0x86b   :  { %v15013_v8 = vpop.f32.mrb[129].mxu1  ;;  %v21291_v12 = vpop.f32.mrb[206].mxu0 }
 0x86c   :  { %24609 = vst [vmem:[#allocation130_spill] sm:$0xff] %v21291_v12  ;;  %v15014_v54 = vadd.f32 %v15013_v8, %v15012_v14  ;;  %v15015_v42 = vpop.f32.mrb[130].mxu1  ;;  %v21293_v25 = vpop.f32.mrb[207].mxu0 }
 0x86d   :  { %24610 = vst [vmem:[#allocation129_spill] sm:$0xff] %v21293_v25  ;;  %v15016_v52 = vpop.f32.mrb[131].mxu1 }
 0x86e   :  { %v4034_v44 = vadd.f32 %v15014_v54, %v21005_v59  ;;  %v15017_v53 = vadd.f32 %v15016_v52, %v15015_v42 }
 0x86f   :  { %v21298_v38 = vpop.f32.mrb[208].mxu0 }
 0x870   :  { %v4118_v27 = vadd.f32 %v21295_v30, %v4034_v44  ;;  %v4039_v45 = vadd.f32 %v21003_v1, %v15017_v53  ;;  %v21302_v57 = vpop.f32.mrb[209].mxu0 }
 0x872   :  { %v4119_v12 = vadd.f32 %v21295_v30, %v4039_v45  ;;  %v15018_v8 = vpop.f32.mrb[132].mxu1  ;;  %v4134_v14 = vmax.f32 %v4118_v27, 0.0 }
 0x873   :  { %v15019_v9 = vpop.f32.mrb[133].mxu1 }
 0x874   :  { %v4135_v25 = vmax.f32 %v4119_v12, 0.0  ;;  %v15020_v35 = vadd.f32 %v15019_v9, %v15018_v8  ;;  %v15021_v22 = vpop.f32.mrb[134].mxu1  ;;  %16686 = vmatprep.mubr.msk.f32.mxu1 %vm24611_vm12, %v4134_v14  ;;  %vm24615_vm12 = vmmov %vm24614_vm3 }
 0x875   :  { %v15022_v59 = vpop.f32.mrb[135].mxu1 }
 0x876   :  { %v4044_v42 = vadd.f32 %v15020_v35, %v21026_v32  ;;  %v15023_v54 = vadd.f32 %v15022_v59, %v15021_v22  ;;  %16687 = vmatmul.mubr.msk.f32.vlgmr.msra.gmra.mrb[126].mxu1 %vm24612_vm6, %v4135_v25  ;;  %vm24616_vm6 = vmmov %vm24614_vm3 }
 0x878   :  { %v4120_v1 = vadd.f32 %v21295_v30, %v4044_v42  ;;  %v4049_v53 = vadd.f32 %v21024_v61, %v15023_v54 }
 0x87a   :  { %v4121_v45 = vadd.f32 %v21295_v30, %v4049_v53  ;;  %v15024_v44 = vpop.f32.mrb[136].mxu1  ;;  %v4136_v27 = vmax.f32 %v4120_v1, 0.0 }
 0x87b   :  { %v15025_v52 = vpop.f32.mrb[137].mxu1 }
 0x87c   :  { %v15026_v12 = vadd.f32 %v15025_v52, %v15024_v44  ;;  %v15027_v9 = vpop.f32.mrb[138].mxu1  ;;  %16689 = vmatprep.mubr.msk.f32.mxu1 %vm24613_vm4, %v4136_v27  ;;  %v4137_v8 = vmax.f32 %v4121_v45, 0.0  ;;  %vm24617_vm4 = vmmov %vm24614_vm3 }
 0x87d   :  { %v15028_v14 = vpop.f32.mrb[139].mxu1 }
 0x87e   :  { %v4054_v32 = vadd.f32 %v15026_v12, %v21037_v36  ;;  %v15029_v22 = vadd.f32 %v15028_v14, %v15027_v9  ;;  %16690 = vmatmul.mubr.msk.f32.gmra.mrb[160].mxu1 %vm24614_vm3, %v4137_v8 }
 0x880   :  { %v4122_v25 = vadd.f32 %v21295_v30, %v4054_v32  ;;  %v4059_v61 = vadd.f32 %v21035_v5, %v15029_v22 }
 0x882   :  { %v4123_v35 = vadd.f32 %v21295_v30, %v4059_v61  ;;  %v15030_v59 = vpop.f32.mrb[140].mxu1  ;;  %v4138_v42 = vmax.f32 %v4122_v25, 0.0 }
 0x883   :  { %v15031_v54 = vpop.f32.mrb[141].mxu1 }
 0x884   :  { %v15032_v1 = vadd.f32 %v15031_v54, %v15030_v59  ;;  %v15033_v53 = vpop.f32.mrb[142].mxu1  ;;  %16692 = vmatprep.mubr.msk.f32.mxu1 %vm24615_vm12, %v4138_v42  ;;  %v4139_v45 = vmax.f32 %v4123_v35, 0.0  ;;  %vm24618_vm12 = vmmov %vm24614_vm3 }
 0x885   :  { %v15034_v44 = vpop.f32.mrb[143].mxu1 }
 0x886   :  { %v4064_v36 = vadd.f32 %v15032_v1, %v21066_v41  ;;  %v15035_v27 = vadd.f32 %v15034_v44, %v15033_v53  ;;  %16693 = vmatmul.mubr.msk.f32.gmra.mrb[162].mxu1 %vm24616_vm6, %v4139_v45  ;;  %vm24619_vm6 = vmmov %vm24614_vm3 }
 0x888   :  { %v4124_v52 = vadd.f32 %v21295_v30, %v4064_v36  ;;  %v4069_v5 = vadd.f32 %v21064_v28, %v15035_v27 }
 0x88a   :  { %v4125_v12 = vadd.f32 %v21295_v30, %v4069_v5  ;;  %v15036_v9 = vpop.f32.mrb[144].mxu1  ;;  %v4140_v8 = vmax.f32 %v4124_v52, 0.0 }
 0x88b   :  { %v15037_v14 = vpop.f32.mrb[145].mxu1 }
 0x88c   :  { %v15038_v32 = vadd.f32 %v15037_v14, %v15036_v9  ;;  %v15039_v22 = vpop.f32.mrb[146].mxu1  ;;  %16695 = vmatprep.mubr.msk.f32.mxu1 %vm24617_vm4, %v4140_v8  ;;  %v4141_v25 = vmax.f32 %v4125_v12, 0.0  ;;  %vm24620_vm4 = vmmov %vm24614_vm3 }
 0x88d   :  { %v15040_v61 = vpop.f32.mrb[147].mxu1 }
 0x88e   :  { %v4074_v41 = vadd.f32 %v15038_v32, %v21073_v33  ;;  %v15041_v35 = vadd.f32 %v15040_v61, %v15039_v22  ;;  %16696 = vmatmul.mubr.msk.f32.gmra.mrb[164].mxu1 %vm24614_vm3, %v4141_v25 }
 0x890   :  { %v4126_v59 = vadd.f32 %v21295_v30, %v4074_v41  ;;  %v4079_v28 = vadd.f32 %v21071_v6, %v15041_v35 }
 0x892   :  { %v4127_v42 = vadd.f32 %v21295_v30, %v4079_v28  ;;  %v15042_v54 = vpop.f32.mrb[148].mxu1  ;;  %v4142_v1 = vmax.f32 %v4126_v59, 0.0 }
 0x893   :  { %v15043_v53 = vpop.f32.mrb[149].mxu1 }
 0x894   :  { %v15044_v45 = vadd.f32 %v15043_v53, %v15042_v54  ;;  %v15045_v44 = vpop.f32.mrb[150].mxu1  ;;  %16698 = vmatprep.mubr.msk.f32.mxu1 %vm24618_vm12, %v4142_v1  ;;  %v4143_v36 = vmax.f32 %v4127_v42, 0.0  ;;  %vm24622_vm12 = vmmov %vm24614_vm3 }
 0x895   :  { %v15046_v27 = vpop.f32.mrb[151].mxu1 }
 0x896   :  { %v4084_v33 = vadd.f32 %v15044_v45, %v21100_v39  ;;  %v15047_v52 = vadd.f32 %v15046_v27, %v15045_v44  ;;  %16699 = vmatmul.mubr.msk.f32.gmra.mrb[166].mxu1 %vm24619_vm6, %v4143_v36  ;;  %vm24624_vm6 = vmmov %vm24614_vm3 }
 0x898   :  { %v4128_v5 = vadd.f32 %v21295_v30, %v4084_v33  ;;  %v4089_v6 = vadd.f32 %v21098_v60, %v15047_v52 }
 0x89a   :  { %v4129_v12 = vadd.f32 %v21295_v30, %v4089_v6  ;;  %v15048_v9 = vpop.f32.mrb[152].mxu1  ;;  %v4144_v8 = vmax.f32 %v4128_v5, 0.0  ;;  %v519_v6 = vld [vmem:[%s24621_s19] sm:$0x1f] }
 0x89b   :  { %v15049_v14 = vpop.f32.mrb[153].mxu1 }
 0x89c   :  { %v15050_v32 = vadd.f32 %v15049_v14, %v15048_v9  ;;  %v15051_v22 = vpop.f32.mrb[154].mxu1  ;;  %16701 = vmatprep.mubr.msk.f32.mxu1 %vm24620_vm4, %v4144_v8  ;;  %v4145_v25 = vmax.f32 %v4129_v12, 0.0  ;;  %vm24625_vm4 = vmmov %vm24614_vm3  ;;  %v21354_v12 = vld [vmem:[#allocation7] ss:$0 sm:$0xff] }
 0x89d   :  { %v15052_v61 = vpop.f32.mrb[155].mxu1 }
 0x89e   :  { %v4094_v39 = vadd.f32 %v15050_v32, %v21107_v4  ;;  %v15053_v41 = vadd.f32 %v15052_v61, %v15051_v22  ;;  %16702 = vmatmul.mubr.msk.f32.gmra.mrb[168].mxu1 %vm24614_vm3, %v4145_v25  ;;  %v4349_v32 = vmul.f32 0.5, %v19648_v50  ;;  %v4350_v25 = vmul.f32 0.5, %v19650_v51 }
 0x89f   :  { %v4351_v51 = vmul.f32 0.5, %v19658_v58 }
 0x8a0   :  { %v4130_v35 = vadd.f32 %v21295_v30, %v4094_v39  ;;  %v4099_v60 = vadd.f32 %v21105_v62, %v15053_v41 }
 0x8a2   :  { %v4131_v59 = vadd.f32 %v21295_v30, %v4099_v60  ;;  %v15054_v28 = vpop.f32.mrb[156].mxu1  ;;  %v4146_v42 = vmax.f32 %v4130_v35, 0.0 }
 0x8a3   :  { %v15055_v54 = vpop.f32.mrb[157].mxu1 }
 0x8a4   :  { %v15056_v1 = vadd.f32 %v15055_v54, %v15054_v28  ;;  %v15057_v53 = vpop.f32.mrb[158].mxu1  ;;  %16704 = vmatprep.mubr.msk.f32.mxu1 %vm24622_vm12, %v4146_v42  ;;  %v4147_v45 = vmax.f32 %v4131_v59, 0.0  ;;  %vm24626_vm12 = vcmask 1044480   ;;  %v4352_v42 = vmul.f32 0.5, %v19656_v55 }
 0x8a5   :  { %v15058_v4 = vpop.f32.mrb[159].mxu1  ;;  %16810 = vmatprep.subr.msk.mxu1 %vm24626_vm12, %v519_v6  ;;  %vm24627_vm9 = vmmov %vm24626_vm12 }
 0x8a6   :  { %v4104_v44 = vadd.f32 %v15056_v1, %v21134_v40  ;;  %v15059_v36 = vadd.f32 %v15058_v4, %v15057_v53  ;;  %16705 = vmatmul.mubr.msk.f32.gmra.mrb[170].mxu1 %vm24624_vm6, %v4147_v45  ;;  %v520_v40 = vld [vmem:[%s24623_s15] sm:$0x1f]  ;;  %vm24628_vm14 = vmmov %vm24627_vm9 }
 0x8a7   :  { %16811 = vmatpush3.msk.msra.mxu1 %vm24627_vm9, %v519_v6  ;;  %vm24631_vm6 = vmmov %vm24626_vm12 }
 0x8a8   :  { %v4132_v62 = vadd.f32 %v21295_v30, %v4104_v44  ;;  %v4109_v27 = vadd.f32 %v21132_v16, %v15059_v36  ;;  %16836 = vmatprep.subr.msk.mxu1 %vm24628_vm14, %v520_v40  ;;  %vm24629_vm14 = vcmask 39936   ;;  %v4353_v36 = vmul.f32 0.5, %v19669_v2 }
 0x8a9   :  { %vm24630_vm9 = vmmov %vm24629_vm14 }
 0x8aa   :  { %v4133_v33 = vadd.f32 %v21295_v30, %v4109_v27  ;;  %v4148_v52 = vmax.f32 %v4132_v62, 0.0  ;;  %v4354_v62 = vmul.f32 0.5, %v19664_v63 }
 0x8ac   :  { %16707 = vmatprep.mubr.msk.f32.mxu1 %vm24625_vm4, %v4148_v52  ;;  %v4149_v5 = vmax.f32 %v4133_v33, 0.0  ;;  %vm24632_vm4 = vmmov %vm24630_vm9 }
 0x8ae   :  { %16708 = vmatmul.mubr.msk.f32.gmra.mrb[172].mxu1 %vm24614_vm3, %v4149_v5  ;;  %vm24633_vm3 = vmmov %vm24632_vm4 }
 0x8af   :  { %vm24634_vm12 = vmmov %vm24633_vm3 }
 0x8b0   :  { %vm24659_vm13 = vmmov %vm24633_vm3 }
 0x949   :  { %v16688_v9 = vpop.f32.mrb[126].mxu1 }
 0x94a   :  { %v4276_v16 = vadd.f32 %v16688_v9, %v21354_v12  ;;  %v4270_v30 = vpop.f32.mrb[127].mxu1  ;;  %v4355_v9 = vmul.f32 0.5, %v19679_v10 }
 0x94b   :  { %v4271_v8 = vadd.f32 %v21354_v12, %v4270_v30 }
 0x94c   :  { %v4366_v14 = vmul.f32 0.5, %v4276_v16  ;;  %v4356_v16 = vmul.f32 0.5, %v19675_v7 }
 0x94d   :  { %v4365_v22 = vmul.f32 0.5, %v4271_v8 }
 0x94e   :  { %v21362_v39 = vadd.f32 %v4366_v14, %v4350_v25 }
 0x94f   :  { %v21360_v61 = vadd.f32 %v4365_v22, %v4349_v32 }
 0x951   :  { %v16691_v41 = vpop.f32.mrb[160].mxu1  ;;  %16812 = vmatprep.mubr.msk.f32.mxu1 %vm24629_vm14, %v21360_v61  ;;  %vm24635_vm14 = vmmov %vm24633_vm3 }
 0x952   :  { %v4286_v35 = vadd.f32 %v16691_v41, %v21354_v12  ;;  %v4280_v60 = vpop.f32.mrb[161].mxu1  ;;  %16813 = vmatmul.mubr.msk.f32.vlgmr.msra.gmra.mrb[174].mxu1 %vm24630_vm9, %v21362_v39  ;;  %vm24638_vm9 = vmmov %vm24633_vm3  ;;  %v4357_v41 = vmul.f32 0.5, %v19689_v18 }
 0x953   :  { %v4281_v59 = vadd.f32 %v21354_v12, %v4280_v60  ;;  %16837 = vmatpush3.msk.msra.mxu1 %vm24631_vm6, %v520_v40  ;;  %vm24639_vm6 = vmmov %vm24633_vm3 }
 0x954   :  { %v4368_v50 = vmul.f32 0.5, %v4286_v35  ;;  %v4358_v35 = vmul.f32 0.5, %v19685_v15 }
 0x955   :  { %v4367_v28 = vmul.f32 0.5, %v4281_v59 }
 0x956   :  { %v21375_v1 = vadd.f32 %v4368_v50, %v4352_v42 }
 0x957   :  { %v21373_v54 = vadd.f32 %v4367_v28, %v4351_v51 }
 0x959   :  { %v16694_v53 = vpop.f32.mrb[162].mxu1  ;;  %16815 = vmatprep.mubr.msk.f32.mxu1 %vm24632_vm4, %v21373_v54  ;;  %vm24642_vm4 = vmmov %vm24633_vm3 }
 0x95a   :  { %v4296_v45 = vadd.f32 %v16694_v53, %v21354_v12  ;;  %v4290_v4 = vpop.f32.mrb[163].mxu1  ;;  %16816 = vmatmul.mubr.msk.f32.gmra.mrb[176].mxu1 %vm24633_vm3, %v21375_v1  ;;  %v4359_v53 = vmul.f32 0.5, %v19699_v26 }
 0x95b   :  { %v4291_v44 = vadd.f32 %v21354_v12, %v4290_v4 }
 0x95c   :  { %v4370_v58 = vmul.f32 0.5, %v4296_v45  ;;  %v4360_v45 = vmul.f32 0.5, %v19695_v23 }
 0x95d   :  { %v4369_v55 = vmul.f32 0.5, %v4291_v44 }
 0x95e   :  { %v21387_v33 = vadd.f32 %v4370_v58, %v4354_v62 }
 0x95f   :  { %v21385_v27 = vadd.f32 %v4369_v55, %v4353_v36 }
 0x961   :  { %v16697_v52 = vpop.f32.mrb[164].mxu1  ;;  %16818 = vmatprep.mubr.msk.f32.mxu1 %vm24634_vm12, %v21385_v27  ;;  %vm24645_vm12 = vmmov %vm24633_vm3 }
 0x962   :  { %v4306_v5 = vadd.f32 %v16697_v52, %v21354_v12  ;;  %v4300_v6 = vpop.f32.mrb[165].mxu1  ;;  %16819 = vmatmul.mubr.msk.f32.gmra.mrb[178].mxu1 %vm24635_vm14, %v21387_v33  ;;  %vm24646_vm14 = vmmov %vm24633_vm3  ;;  %v4361_v52 = vmul.f32 0.5, %v19709_v34 }
 0x963   :  { %v4301_v40 = vadd.f32 %v21354_v12, %v4300_v6 }
 0x964   :  { %v4372_v2 = vmul.f32 0.5, %v4306_v5  ;;  %v4362_v5 = vmul.f32 0.5, %v19705_v31 }
 0x965   :  { %v4371_v63 = vmul.f32 0.5, %v4301_v40 }
 0x966   :  { %v21399_v8 = vadd.f32 %v4372_v2, %v4356_v16 }
 0x967   :  { %v21397_v30 = vadd.f32 %v4371_v63, %v4355_v9 }
 0x968   :  { %24637 = vst [vmem:[#allocation131_spill] sm:$0xff] %v21399_v8 }
 0x969   :  { %24636 = vst [vmem:[#allocation132_spill] sm:$0xff] %v21397_v30  ;;  %v16700_v14 = vpop.f32.mrb[166].mxu1  ;;  %16821 = vmatprep.mubr.msk.f32.mxu1 %vm24638_vm9, %v21397_v30  ;;  %vm24649_vm9 = vmmov %vm24633_vm3 }
 0x96a   :  { %v4316_v32 = vadd.f32 %v16700_v14, %v21354_v12  ;;  %v4310_v22 = vpop.f32.mrb[167].mxu1  ;;  %16822 = vmatmul.mubr.msk.f32.gmra.mrb[180].mxu1 %vm24639_vm6, %v21399_v8  ;;  %vm24650_vm6 = vmmov %vm24633_vm3  ;;  %v4363_v14 = vmul.f32 0.5, %v19719_v49  ;;  %v24669_v49 = vld [vmem:[#allocation104_spill] sm:$0xff] }
 0x96b   :  { %v4311_v25 = vadd.f32 %v21354_v12, %v4310_v22 }
 0x96c   :  { %v4374_v10 = vmul.f32 0.5, %v4316_v32  ;;  %v24651_v32 = vld [vmem:[#allocation86_spill] sm:$0xff] }
 0x96d   :  { %v4373_v7 = vmul.f32 0.5, %v4311_v25  ;;  %v4364_v22 = vmul.f32 0.5, %v24651_v32 }
 0x96e   :  { %v21411_v59 = vadd.f32 %v4374_v10, %v4358_v35 }
 0x96f   :  { %v21409_v60 = vadd.f32 %v4373_v7, %v4357_v41 }
 0x970   :  { %24641 = vst [vmem:[#allocation133_spill] sm:$0xff] %v21411_v59 }
 0x971   :  { %24640 = vst [vmem:[#allocation134_spill] sm:$0xff] %v21409_v60  ;;  %v16703_v50 = vpop.f32.mrb[168].mxu1  ;;  %16824 = vmatprep.mubr.msk.f32.mxu1 %vm24642_vm4, %v21409_v60  ;;  %vm24654_vm4 = vmmov %vm24633_vm3 }
 0x972   :  { %v4326_v51 = vadd.f32 %v16703_v50, %v21354_v12  ;;  %v4320_v28 = vpop.f32.mrb[169].mxu1  ;;  %16825 = vmatmul.mubr.msk.f32.gmra.mrb[182].mxu1 %vm24633_vm3, %v21411_v59 }
 0x973   :  { %v4321_v42 = vadd.f32 %v21354_v12, %v4320_v28 }
 0x974   :  { %v4376_v18 = vmul.f32 0.5, %v4326_v51 }
 0x975   :  { %v4375_v15 = vmul.f32 0.5, %v4321_v42 }
 0x976   :  { %v21423_v44 = vadd.f32 %v4376_v18, %v4360_v45 }
 0x977   :  { %v21421_v4 = vadd.f32 %v4375_v15, %v4359_v53 }
 0x978   :  { %24644 = vst [vmem:[#allocation135_spill] sm:$0xff] %v21423_v44 }
 0x979   :  { %24643 = vst [vmem:[#allocation136_spill] sm:$0xff] %v21421_v4  ;;  %v16706_v58 = vpop.f32.mrb[170].mxu1  ;;  %16827 = vmatprep.mubr.msk.f32.mxu1 %vm24645_vm12, %v21421_v4  ;;  %vm24655_vm12 = vmmov %vm24633_vm3 }
 0x97a   :  { %v4336_v36 = vadd.f32 %v16706_v58, %v21354_v12  ;;  %v4330_v55 = vpop.f32.mrb[171].mxu1  ;;  %16828 = vmatmul.mubr.msk.f32.gmra.mrb[184].mxu1 %vm24646_vm14, %v21423_v44  ;;  %vm24656_vm14 = vmmov %vm24633_vm3 }
 0x97b   :  { %v4331_v62 = vadd.f32 %v21354_v12, %v4330_v55 }
 0x97c   :  { %v4378_v26 = vmul.f32 0.5, %v4336_v36 }
 0x97d   :  { %v4377_v23 = vmul.f32 0.5, %v4331_v62 }
 0x97e   :  { %v21435_v40 = vadd.f32 %v4378_v26, %v4362_v5 }
 0x97f   :  { %v21433_v6 = vadd.f32 %v4377_v23, %v4361_v52 }
 0x980   :  { %24648 = vst [vmem:[#allocation88_spill] sm:$0xff] %v21435_v40 }
 0x981   :  { %24647 = vst [vmem:[#allocation87_spill] sm:$0xff] %v21433_v6  ;;  %v16709_v2 = vpop.f32.mrb[172].mxu1  ;;  %16830 = vmatprep.mubr.msk.f32.mxu1 %vm24649_vm9, %v21433_v6  ;;  %vm24657_vm9 = vmmov %vm24633_vm3 }
 0x982   :  { %v4346_v9 = vadd.f32 %v16709_v2, %v21354_v12  ;;  %v4340_v63 = vpop.f32.mrb[173].mxu1  ;;  %16831 = vmatmul.mubr.msk.f32.gmra.mrb[186].mxu1 %vm24650_vm6, %v21435_v40  ;;  %vm24658_vm6 = vmmov %vm24633_vm3 }
 0x983   :  { %v4341_v16 = vadd.f32 %v21354_v12, %v4340_v63 }
 0x984   :  { %v4380_v34 = vmul.f32 0.5, %v4346_v9 }
 0x985   :  { %v4379_v31 = vmul.f32 0.5, %v4341_v16 }
 0x986   :  { %v21447_v10 = vadd.f32 %v4380_v34, %v4364_v22 }
 0x987   :  { %v21445_v25 = vadd.f32 %v4379_v31, %v4363_v14 }
 0x988   :  { %24653 = vst [vmem:[#allocation89_spill] sm:$0xff] %v21447_v10 }
 0x989   :  { %24652 = vst [vmem:[#allocation101_spill] sm:$0xff] %v21445_v25  ;;  %16833 = vmatprep.mubr.msk.f32.mxu1 %vm24654_vm4, %v21445_v25  ;;  %vm24660_vm4 = vmmov %vm24633_vm3 }
 0x98a   :  { %16834 = vmatmul.mubr.msk.f32.gmra.mrb[188].mxu1 %vm24633_vm3, %v21447_v10 }
 0x98b   :  { %16838 = vmatprep.mubr.msk.f32.mxu1 %vm24655_vm12, %v21360_v61  ;;  %vm24661_vm12 = vmmov %vm24633_vm3 }
 0x98e   :  { %16839 = vmatmul.mubr.msk.f32.vlgmr.msra.gmra.mrb[190].mxu1 %vm24656_vm14, %v21362_v39  ;;  %vm24662_vm14 = vmmov %vm24633_vm3 }
 0x98f   :  { %16841 = vmatprep.mubr.msk.f32.mxu1 %vm24657_vm9, %v21373_v54  ;;  %vm24663_vm9 = vmmov %vm24633_vm3 }
 0x992   :  { %16842 = vmatmul.mubr.msk.f32.gmra.mrb[192].mxu1 %vm24658_vm6, %v21375_v1  ;;  %vm24664_vm6 = vmmov %vm24633_vm3 }
 0x993   :  { %16844 = vmatprep.mubr.msk.f32.mxu1 %vm24659_vm13, %v21385_v27  ;;  %vm24665_vm13 = vmmov %vm24633_vm3 }
 0x996   :  { %16845 = vmatmul.mubr.msk.f32.gmra.mrb[194].mxu1 %vm24660_vm4, %v21387_v33  ;;  %vm24666_vm4 = vmmov %vm24633_vm3 }
 0x997   :  { %16847 = vmatprep.mubr.msk.f32.mxu1 %vm24633_vm3, %v21397_v30 }
 0x99a   :  { %16848 = vmatmul.mubr.msk.f32.gmra.mrb[196].mxu1 %vm24661_vm12, %v21399_v8  ;;  %vm24667_vm12 = vmmov %vm24633_vm3 }
 0x99b   :  { %16850 = vmatprep.mubr.msk.f32.mxu1 %vm24662_vm14, %v21409_v60  ;;  %vm24668_vm14 = vmmov %vm24633_vm3 }
 0x99e   :  { %16851 = vmatmul.mubr.msk.f32.gmra.mrb[198].mxu1 %vm24663_vm9, %v21411_v59  ;;  %vm24703_vm9 = vcmask 1043456  }
 0x99f   :  { %16853 = vmatprep.mubr.msk.f32.mxu1 %vm24664_vm6, %v21421_v4  ;;  %vm24704_vm6 = vmmov %vm24703_vm9 }
 0x9a2   :  { %16854 = vmatmul.mubr.msk.f32.gmra.mrb[200].mxu1 %vm24665_vm13, %v21423_v44  ;;  %vm24705_vm13 = vcmask 326656  }
 0x9a3   :  { %16856 = vmatprep.mubr.msk.f32.mxu1 %vm24666_vm4, %v21433_v6  ;;  %vm24706_vm4 = vmmov %vm24705_vm13 }
 0x9a6   :  { %16857 = vmatmul.mubr.msk.f32.gmra.mrb[202].mxu1 %vm24633_vm3, %v21435_v40  ;;  %vm24707_vm3 = vmmov %vm24706_vm4 }
 0x9a7   :  { %16859 = vmatprep.mubr.msk.f32.mxu1 %vm24667_vm12, %v21445_v25  ;;  %vm24708_vm12 = vmmov %vm24707_vm3 }
 0x9aa   :  { %16860 = vmatmul.mubr.msk.f32.gmra.mrb[204].mxu1 %vm24668_vm14, %v21447_v10  ;;  %vm24709_vm14 = vmmov %vm24707_vm3 }
 0x9ab   :  { %16878 = vmatprep.mubr.bf16.mxu1 %v24669_v49 }
 0xa25   :  { %v16814_v12 = vpop.f32.mrb[174].mxu1 }
 0xa26   :  { %v4970_v41 = vpop.f32.mrb[175].mxu1 }
 0xa27   :  { %v21486_v7 = vpack.c.bf16 %v16814_v12, %v4970_v41 }
 0xa2d   :  { %v16817_v35 = vpop.f32.mrb[176].mxu1 }
 0xa2e   :  { %v4980_v50 = vpop.f32.mrb[177].mxu1 }
 0xa2f   :  { %v21488_v51 = vpack.c.bf16 %v16817_v35, %v4980_v50 }
 0xa35   :  { %v16820_v28 = vpop.f32.mrb[178].mxu1 }
 0xa36   :  { %v4990_v42 = vpop.f32.mrb[179].mxu1 }
 0xa37   :  { %v21490_v18 = vpack.c.bf16 %v16820_v28, %v4990_v42 }
 0xa3d   :  { %v16823_v53 = vpop.f32.mrb[180].mxu1 }
 0xa3e   :  { %v5000_v15 = vpop.f32.mrb[181].mxu1 }
 0xa3f   :  { %v21492_v45 = vpack.c.bf16 %v16823_v53, %v5000_v15 }
 0xa45   :  { %v16826_v58 = vpop.f32.mrb[182].mxu1 }
 0xa46   :  { %v5010_v36 = vpop.f32.mrb[183].mxu1 }
 0xa47   :  { %v21494_v55 = vpack.c.bf16 %v16826_v58, %v5010_v36 }
 0xa4d   :  { %v16829_v62 = vpop.f32.mrb[184].mxu1 }
 0xa4e   :  { %v5020_v26 = vpop.f32.mrb[185].mxu1 }
 0xa4f   :  { %v21496_v52 = vpack.c.bf16 %v16829_v62, %v5020_v26 }
 0xa55   :  { %v16832_v23 = vpop.f32.mrb[186].mxu1 }
 0xa56   :  { %v5030_v5 = vpop.f32.mrb[187].mxu1 }
 0xa57   :  { %v21498_v2 = vpack.c.bf16 %v16832_v23, %v5030_v5 }
 0xa5d   :  { %v16835_v9 = vpop.f32.mrb[188].mxu1 }
 0xa5e   :  { %v5040_v63 = vpop.f32.mrb[189].mxu1 }
 0xa5f   :  { %v21500_v16 = vpack.c.bf16 %v16835_v9, %v5040_v63 }
 0xa61   :  { %v16840_v34 = vpop.f32.mrb[190].mxu1 }
 0xa62   :  { %v5118_v14 = vpop.f32.mrb[191].mxu1 }
 0xa63   :  { %v5205_v31 = vpack.c.bf16 %v16840_v34, %v5118_v14  ;;  %v523_v14 = vld [vmem:[%s24670_s18] sm:$0xff] }
 0xa65   :  { %v16843_v32 = vpop.f32.mrb[192].mxu1  ;;  %16862 = vmatprep.subr.bf16.mxu1 %v5205_v31 }
 0xa66   :  { %v5128_v22 = vpop.f32.mrb[193].mxu1  ;;  %16863 = vmatpush3.bf16.msra.mxu1 %v5205_v31  ;;  %v524_v31 = vld [vmem:[%s24670_s18 + $0x8] sm:$0xff] }
 0xa67   :  { %v5206_v12 = vpack.c.bf16 %v16843_v32, %v5128_v22  ;;  %v18178_v22 = vpack.c.bf16 %v524_v31, %v523_v14  ;;  %v24695_v14 = vld [vmem:[#allocation160_spill] sm:$0xff]  ;;  %v24697_v31 = vld [vmem:[#allocation162_spill] sm:$0xff] }
 0xa69   :  { %v16846_v41 = vpop.f32.mrb[194].mxu1  ;;  %16864 = vmatprep.subr.bf16.mxu1 %v5206_v12  ;;  %18179 = vmatprep.subr.bf16.mxu0 %v18178_v22 }
 0xa6a   :  { %v5138_v35 = vpop.f32.mrb[195].mxu1  ;;  %16865 = vmatpush3.bf16.msra.mxu1 %v5206_v12  ;;  %18181 = vmatpush3.bf16.msra.mxu0 %v18178_v22  ;;  %v24699_v22 = vld [vmem:[#allocation164_spill] sm:$0xff] }
 0xa6b   :  { %v5207_v50 = vpack.c.bf16 %v16846_v41, %v5138_v35  ;;  %v24671_v41 = vld [vmem:[#allocation137_spill] sm:$0xff]  ;;  %v24672_v35 = vld [vmem:[#allocation138_spill] sm:$0xff] }
 0xa6d   :  { %v16849_v28 = vpop.f32.mrb[196].mxu1  ;;  %16866 = vmatprep.subr.bf16.mxu1 %v5207_v50 }
 0xa6e   :  { %v5148_v42 = vpop.f32.mrb[197].mxu1  ;;  %16867 = vmatpush3.bf16.msra.mxu1 %v5207_v50  ;;  %v24673_v50 = vld [vmem:[#allocation139_spill] sm:$0xff] }
 0xa6f   :  { %v5208_v53 = vpack.c.bf16 %v16849_v28, %v5148_v42  ;;  %v24674_v28 = vld [vmem:[#allocation140_spill] sm:$0xff]  ;;  %v24675_v42 = vld [vmem:[#allocation141_spill] sm:$0xff] }
 0xa71   :  { %v16852_v15 = vpop.f32.mrb[198].mxu1  ;;  %16868 = vmatprep.subr.bf16.mxu1 %v5208_v53 }
 0xa72   :  { %v5158_v58 = vpop.f32.mrb[199].mxu1  ;;  %16869 = vmatpush3.bf16.msra.mxu1 %v5208_v53  ;;  %v24680_v53 = vld [vmem:[#allocation146_spill] sm:$0xff] }
 0xa73   :  { %v5209_v36 = vpack.c.bf16 %v16852_v15, %v5158_v58  ;;  %v24682_v15 = vld [vmem:[#allocation148_spill] sm:$0xff]  ;;  %v24684_v58 = vld [vmem:[#allocation151_spill] sm:$0xff] }
 0xa75   :  { %v16855_v62 = vpop.f32.mrb[200].mxu1  ;;  %16870 = vmatprep.subr.bf16.mxu1 %v5209_v36 }
 0xa76   :  { %v5168_v26 = vpop.f32.mrb[201].mxu1  ;;  %16871 = vmatpush3.bf16.msra.mxu1 %v5209_v36  ;;  %v24685_v36 = vld [vmem:[#allocation153_spill] sm:$0xff] }
 0xa77   :  { %v5210_v23 = vpack.c.bf16 %v16855_v62, %v5168_v26  ;;  %v24686_v62 = vld [vmem:[#allocation150_spill] sm:$0xff]  ;;  %v24689_v26 = vld [vmem:[#allocation155_spill] sm:$0xff] }
 0xa79   :  { %v16858_v5 = vpop.f32.mrb[202].mxu1  ;;  %16872 = vmatprep.subr.bf16.mxu1 %v5210_v23 }
 0xa7a   :  { %v5178_v9 = vpop.f32.mrb[203].mxu1  ;;  %16873 = vmatpush3.bf16.msra.mxu1 %v5210_v23  ;;  %v24690_v23 = vld [vmem:[#allocation156_spill] sm:$0xff] }
 0xa7b   :  { %v5211_v63 = vpack.c.bf16 %v16858_v5, %v5178_v9  ;;  %v24691_v5 = vld [vmem:[#allocation157_spill] sm:$0xff]  ;;  %v24692_v9 = vld [vmem:[#allocation159_spill] sm:$0xff] }
 0xa7d   :  { %v16861_v34 = vpop.f32.mrb[204].mxu1  ;;  %16874 = vmatprep.subr.bf16.mxu1 %v5211_v63 }
 0xa7e   :  { %v5188_v32 = vpop.f32.mrb[205].mxu1  ;;  %16875 = vmatpush3.bf16.msra.mxu1 %v5211_v63  ;;  %v24693_v63 = vld [vmem:[#allocation161_spill] sm:$0xff] }
 0xa7f   :  { %v5212_v12 = vpack.c.bf16 %v16861_v34, %v5188_v32  ;;  %v24694_v34 = vld [vmem:[#allocation158_spill] sm:$0xff]  ;;  %v24698_v32 = vld [vmem:[#allocation163_spill] sm:$0xff] }
 0xa81   :  { %16876 = vmatprep.subr.bf16.mxu1 %v5212_v12 }
 0xa82   :  { %16877 = vmatpush3.bf16.msra.mxu1 %v5212_v12  ;;  %v24700_v12 = vld [vmem:[#allocation165_spill] sm:$0xff] }
 0xa83   :  { %16910 = vmatprep.subr.bf16.mxu1 %v21486_v7 }
 0xa85   :  { %16879 = vmatmul.mubr.bf16.vlgmr.msra.gmra.mrb[208].mxu1 %v24671_v41 }
 0xa86   :  { %16882 = vmatprep.mubr.bf16.mxu1 %v24672_v35  ;;  %16911 = vmatpush3.bf16.msra.mxu1 %v21486_v7  ;;  %v24676_v7 = vld [vmem:[#allocation143_spill] sm:$0xff] }
 0xa87   :  { %16912 = vmatprep.subr.bf16.mxu1 %v21488_v51 }
 0xa8a   :  { %16913 = vmatpush3.bf16.msra.mxu1 %v21488_v51  ;;  %v24677_v51 = vld [vmem:[#allocation145_spill] sm:$0xff] }
 0xa8b   :  { %16914 = vmatprep.subr.bf16.mxu1 %v21490_v18 }
 0xa8d   :  { %16883 = vmatmul.mubr.bf16.gmra.mrb[212].mxu1 %v24673_v50 }
 0xa8e   :  { %16886 = vmatprep.mubr.bf16.mxu1 %v24674_v28  ;;  %16915 = vmatpush3.bf16.msra.mxu1 %v21490_v18  ;;  %v24678_v18 = vld [vmem:[#allocation142_spill] sm:$0xff] }
 0xa8f   :  { %16916 = vmatprep.subr.bf16.mxu1 %v21492_v45 }
 0xa92   :  { %16917 = vmatpush3.bf16.msra.mxu1 %v21492_v45  ;;  %v24679_v45 = vld [vmem:[#allocation144_spill] sm:$0xff] }
 0xa93   :  { %16918 = vmatprep.subr.bf16.mxu1 %v21494_v55 }
 0xa95   :  { %16887 = vmatmul.mubr.bf16.gmra.mrb[216].mxu1 %v24675_v42 }
 0xa96   :  { %16890 = vmatprep.mubr.bf16.mxu1 %v24676_v7  ;;  %16919 = vmatpush3.bf16.msra.mxu1 %v21494_v55  ;;  %v24681_v55 = vld [vmem:[#allocation147_spill] sm:$0xff] }
 0xa97   :  { %16920 = vmatprep.subr.bf16.mxu1 %v21496_v52 }
 0xa9a   :  { %16921 = vmatpush3.bf16.msra.mxu1 %v21496_v52  ;;  %v24683_v52 = vld [vmem:[#allocation149_spill] sm:$0xff] }
 0xa9b   :  { %16922 = vmatprep.subr.bf16.mxu1 %v21498_v2 }
 0xa9d   :  { %16891 = vmatmul.mubr.bf16.gmra.mrb[220].mxu1 %v24677_v51 }
 0xa9e   :  { %16894 = vmatprep.mubr.bf16.mxu1 %v24678_v18  ;;  %16923 = vmatpush3.bf16.msra.mxu1 %v21498_v2  ;;  %v24687_v2 = vld [vmem:[#allocation152_spill] sm:$0xff] }
 0xa9f   :  { %16924 = vmatprep.subr.bf16.mxu1 %v21500_v16 }
 0xaa2   :  { %16925 = vmatpush3.bf16.msra.mxu1 %v21500_v16  ;;  %v24688_v16 = vld [vmem:[#allocation154_spill] sm:$0xff] }
 0xaa5   :  { %16895 = vmatmul.mubr.bf16.gmra.mrb[224].mxu1 %v24679_v45 }
 0xaa6   :  { %16898 = vmatprep.mubr.bf16.mxu1 %v24680_v53 }
 0xaad   :  { %16899 = vmatmul.mubr.bf16.gmra.mrb[228].mxu1 %v24681_v55 }
 0xaae   :  { %16902 = vmatprep.mubr.bf16.mxu1 %v24682_v15 }
 0xab5   :  { %16903 = vmatmul.mubr.bf16.gmra.mrb[232].mxu1 %v24683_v52 }
 0xab6   :  { %16906 = vmatprep.mubr.bf16.mxu1 %v24684_v58 }
 0xabd   :  { %16907 = vmatmul.mubr.bf16.gmra.mrb[236].mxu1 %v24685_v36 }
 0xabe   :  { %16926 = vmatprep.mubr.bf16.mxu1 %v24686_v62 }
 0xac5   :  { %16927 = vmatmul.mubr.bf16.vlgmr.msra.gmra.mrb[208].mxu1 %v24687_v2 }
 0xac6   :  { %16930 = vmatprep.mubr.bf16.mxu1 %v24688_v16 }
 0xacd   :  { %16931 = vmatmul.mubr.bf16.gmra.mrb[212].mxu1 %v24689_v26  ;;  %v526_v26 = vld [vmem:[%s24670_s18 + $0x18] sm:$0xff] }
 0xace   :  { %16934 = vmatprep.mubr.bf16.mxu1 %v24690_v23  ;;  %v24701_v23 = vld [vmem:[#allocation166_spill] sm:$0xff] }
 0xad5   :  { %16935 = vmatmul.mubr.bf16.gmra.mrb[216].mxu1 %v24691_v5  ;;  %v24702_v5 = vld [vmem:[#allocation167_spill] sm:$0xff] }
 0xad6   :  { %16938 = vmatprep.mubr.bf16.mxu1 %v24692_v9  ;;  %v525_v9 = vld [vmem:[%s24670_s18 + $0x10] sm:$0xff] }
 0xadd   :  { %16939 = vmatmul.mubr.bf16.gmra.mrb[220].mxu1 %v24693_v63  ;;  %v18182_v63 = vpack.c.bf16 %v526_v26, %v525_v9 }
 0xade   :  { %16942 = vmatprep.mubr.bf16.mxu1 %v24694_v34  ;;  %v527_v34 = vld [vmem:[%s24670_s18 + $0x20] sm:$0xff] }
 0xadf   :  { %18183 = vmatprep.subr.bf16.mxu0 %v18182_v63 }
 0xae0   :  { %18185 = vmatpush3.bf16.msra.mxu0 %v18182_v63 }
 0xae1   :  { %17016 = vmatprep.subr.mxu0 %v527_v34 }
 0xae4   :  { %17017 = vmatpush3.msra.mxu0 %v527_v34 }
 0xae5   :  { %16943 = vmatmul.mubr.bf16.gmra.mrb[224].mxu1 %v24695_v14  ;;  %v511_v14 = vld [vmem:[%s24696_s13] sm:$0xf] }
 0xae6   :  { %16946 = vmatprep.mubr.bf16.mxu1 %v24697_v31  ;;  %17066 = vmatprep.subr.msk.mxu1 %vm24703_vm9, %v511_v14  ;;  %vm24710_vm9 = vmmov %vm24707_vm3 }
 0xae7   :  { %17067 = vmatpush3.msk.msra.mxu1 %vm24704_vm6, %v511_v14  ;;  %vm24711_vm6 = vmmov %vm24707_vm3 }
 0xaed   :  { %16947 = vmatmul.mubr.bf16.gmra.mrb[228].mxu1 %v24698_v32  ;;  %v21557_v32 = vld [vmem:[#allocation15] ss:$0 sm:$0xff] }
 0xaee   :  { %16950 = vmatprep.mubr.bf16.mxu1 %v24699_v22 }
 0xaf5   :  { %16951 = vmatmul.mubr.bf16.gmra.mrb[232].mxu1 %v24700_v12 }
 0xaf6   :  { %16954 = vmatprep.mubr.bf16.mxu1 %v24701_v23 }
 0xafd   :  { %16955 = vmatmul.mubr.bf16.gmra.mrb[236].mxu1 %v24702_v5 }
 0xb98   :  { %v16928_v22 = vpop.f32.mrb[208].mxu1 }
 0xb99   :  { %v5765_v23 = vadd.f32 %v16928_v22, %v21241_v43  ;;  %v5408_v12 = vpop.f32.mrb[209].mxu1 }
 0xb9a   :  { %v5763_v5 = vadd.f32 %v21237_v21, %v5408_v12  ;;  %v16929_v31 = vpop.f32.mrb[210].mxu1 }
 0xb9b   :  { %v5766_v26 = vadd.f32 %v21239_v48, %v16929_v31  ;;  %v5411_v9 = vpop.f32.mrb[211].mxu1  ;;  %v5803_v16 = vadd.f32 %v21557_v32, %v5765_v23 }
 0xb9c   :  { %v5801_v63 = vadd.f32 %v21557_v32, %v5763_v5  ;;  %v5764_v34 = vadd.f32 %v21235_v46, %v5411_v9 }
 0xb9d   :  { %v5804_v62 = vadd.f32 %v21557_v32, %v5766_v26  ;;  %v5835_v21 = vmax.f32 %v5803_v16, 0.0 }
 0xb9e   :  { %v5833_v2 = vmax.f32 %v5801_v63, 0.0  ;;  %v5802_v14 = vadd.f32 %v21557_v32, %v5764_v34 }
 0xb9f   :  { %v5836_v12 = vmax.f32 %v5804_v62, 0.0 }
 0xba0   :  { %v5834_v36 = vmax.f32 %v5802_v14, 0.0  ;;  %v16932_v43 = vpop.f32.mrb[212].mxu1  ;;  %17018 = vmatprep.mubr.msk.f32.mxu0 %vm24705_vm13, %v5833_v2  ;;  %vm24712_vm13 = vmmov %vm24707_vm3 }
 0xba1   :  { %v5769_v22 = vadd.f32 %v16932_v43, %v21249_v11  ;;  %v5424_v48 = vpop.f32.mrb[213].mxu1 }
 0xba2   :  { %v5767_v31 = vadd.f32 %v21245_v13, %v5424_v48  ;;  %v16933_v5 = vpop.f32.mrb[214].mxu1  ;;  %17019 = vmatmul.mubr.msk.f32.vlgmr.msra.gmra.mrb[210].mxu0 %vm24706_vm4, %v5834_v36  ;;  %vm24713_vm4 = vmmov %vm24707_vm3 }
 0xba3   :  { %v5770_v46 = vadd.f32 %v21247_v47, %v16933_v5  ;;  %v5427_v23 = vpop.f32.mrb[215].mxu1  ;;  %17021 = vmatprep.mubr.msk.f32.mxu0 %vm24707_vm3, %v5835_v21  ;;  %v5807_v2 = vadd.f32 %v21557_v32, %v5769_v22 }
 0xba4   :  { %v5805_v26 = vadd.f32 %v21557_v32, %v5767_v31  ;;  %v5768_v9 = vadd.f32 %v21243_v20, %v5427_v23 }
 0xba5   :  { %v5808_v13 = vadd.f32 %v21557_v32, %v5770_v46  ;;  %v5839_v47 = vmax.f32 %v5807_v2, 0.0 }
 0xba6   :  { %v5837_v16 = vmax.f32 %v5805_v26, 0.0  ;;  %v5806_v11 = vadd.f32 %v21557_v32, %v5768_v9  ;;  %17022 = vmatmul.mubr.msk.f32.gmra.mrb[212].mxu0 %vm24708_vm12, %v5836_v12  ;;  %vm24714_vm12 = vmmov %vm24707_vm3 }
 0xba7   :  { %v5840_v22 = vmax.f32 %v5808_v13, 0.0 }
 0xba8   :  { %v5838_v36 = vmax.f32 %v5806_v11, 0.0  ;;  %v16936_v63 = vpop.f32.mrb[216].mxu1  ;;  %17024 = vmatprep.mubr.msk.f32.mxu0 %vm24709_vm14, %v5837_v16  ;;  %vm24715_vm14 = vmmov %vm24707_vm3 }
 0xba9   :  { %v5773_v62 = vadd.f32 %v16936_v63, %v21257_v0  ;;  %v5440_v34 = vpop.f32.mrb[217].mxu1 }
 0xbaa   :  { %v5771_v14 = vadd.f32 %v21253_v17, %v5440_v34  ;;  %v16937_v20 = vpop.f32.mrb[218].mxu1  ;;  %17025 = vmatmul.mubr.msk.f32.gmra.mrb[214].mxu0 %vm24710_vm9, %v5838_v36  ;;  %vm24716_vm9 = vmmov %vm24707_vm3 }
 0xbab   :  { %v5774_v43 = vadd.f32 %v21255_v56, %v16937_v20  ;;  %v5443_v21 = vpop.f32.mrb[219].mxu1  ;;  %17027 = vmatprep.mubr.msk.f32.mxu0 %vm24711_vm6, %v5839_v47  ;;  %v5811_v5 = vadd.f32 %v21557_v32, %v5773_v62  ;;  %v24717_v20 = vld [vmem:[#allocation119_spill] sm:$0xff]  ;;  %vm24719_vm6 = vmmov %vm24707_vm3 }
 0xbac   :  { %v5809_v48 = vadd.f32 %v21557_v32, %v5771_v14  ;;  %v5772_v31 = vadd.f32 %v21251_v19, %v5443_v21 }
 0xbad   :  { %v5812_v17 = vadd.f32 %v21557_v32, %v5774_v43  ;;  %v5843_v56 = vmax.f32 %v5811_v5, 0.0 }
 0xbae   :  { %v5841_v46 = vmax.f32 %v5809_v48, 0.0  ;;  %v5810_v0 = vadd.f32 %v21557_v32, %v5772_v31  ;;  %17028 = vmatmul.mubr.msk.f32.gmra.mrb[216].mxu0 %vm24712_vm13, %v5840_v22  ;;  %v24718_v22 = vld [vmem:[#allocation117_spill] sm:$0xff]  ;;  %v24720_v31 = vld [vmem:[#allocation120_spill] sm:$0xff]  ;;  %vm24721_vm13 = vmmov %vm24707_vm3 }
 0xbaf   :  { %v5844_v13 = vmax.f32 %v5812_v17, 0.0 }
 0xbb0   :  { %v5842_v23 = vmax.f32 %v5810_v0, 0.0  ;;  %v16940_v12 = vpop.f32.mrb[220].mxu1  ;;  %17030 = vmatprep.mubr.msk.f32.mxu0 %vm24713_vm4, %v5841_v46  ;;  %vm24723_vm4 = vmmov %vm24707_vm3 }
 0xbb1   :  { %v5777_v26 = vadd.f32 %v16940_v12, %v21265_v29  ;;  %v5456_v9 = vpop.f32.mrb[221].mxu1 }
 0xbb2   :  { %v5775_v2 = vadd.f32 %v21261_v24, %v5456_v9  ;;  %v16941_v19 = vpop.f32.mrb[222].mxu1  ;;  %17031 = vmatmul.mubr.msk.f32.gmra.mrb[218].mxu0 %vm24707_vm3, %v5842_v23  ;;  %v24722_v23 = vld [vmem:[#allocation118_spill] sm:$0xff] }
 0xbb3   :  { %v5778_v16 = vadd.f32 %v21263_v3, %v16941_v19  ;;  %v5459_v11 = vpop.f32.mrb[223].mxu1  ;;  %17033 = vmatprep.mubr.msk.f32.mxu0 %vm24714_vm12, %v5843_v56  ;;  %v5815_v47 = vadd.f32 %v21557_v32, %v5777_v26  ;;  %vm24726_vm12 = vmmov %vm24707_vm3 }
 0xbb4   :  { %v5813_v36 = vadd.f32 %v21557_v32, %v5775_v2  ;;  %v5776_v63 = vadd.f32 %v21259_v37, %v5459_v11 }
 0xbb5   :  { %v5816_v24 = vadd.f32 %v21557_v32, %v5778_v16  ;;  %v5847_v3 = vmax.f32 %v5815_v47, 0.0  ;;  %v24725_v47 = vld [vmem:[#allocation121_spill] sm:$0xff] }
 0xbb6   :  { %v5845_v62 = vmax.f32 %v5813_v36, 0.0  ;;  %v5814_v29 = vadd.f32 %v21557_v32, %v5776_v63  ;;  %17034 = vmatmul.mubr.msk.f32.gmra.mrb[220].mxu0 %vm24715_vm14, %v5844_v13  ;;  %v24724_v13 = vld [vmem:[#allocation123_spill] sm:$0xff]  ;;  %vm24728_vm14 = vmmov %vm24707_vm3 }
 0xbb7   :  { %v5848_v0 = vmax.f32 %v5816_v24, 0.0  ;;  %v24727_v24 = vld [vmem:[#allocation124_spill] sm:$0xff] }
 0xbb8   :  { %v5846_v34 = vmax.f32 %v5814_v29, 0.0  ;;  %v16944_v14 = vpop.f32.mrb[224].mxu1  ;;  %17036 = vmatprep.mubr.msk.f32.mxu0 %vm24716_vm9, %v5845_v62  ;;  %vm24730_vm9 = vmmov %vm24707_vm3 }
 0xbb9   :  { %v5781_v43 = vadd.f32 %v16944_v14, %v24717_v20  ;;  %v5472_v21 = vpop.f32.mrb[225].mxu1 }
 0xbba   :  { %v5779_v48 = vadd.f32 %v24718_v22, %v5472_v21  ;;  %v16945_v37 = vpop.f32.mrb[226].mxu1  ;;  %17037 = vmatmul.mubr.msk.f32.gmra.mrb[222].mxu0 %vm24719_vm6, %v5846_v34  ;;  %vm24731_vm6 = vmmov %vm24707_vm3 }
 0xbbb   :  { %v5782_v5 = vadd.f32 %v24720_v31, %v16945_v37  ;;  %v5475_v46 = vpop.f32.mrb[227].mxu1  ;;  %17039 = vmatprep.mubr.msk.f32.mxu0 %vm24721_vm13, %v5847_v3  ;;  %v5819_v56 = vadd.f32 %v21557_v32, %v5781_v43  ;;  %v24729_v43 = vld [vmem:[#allocation122_spill] sm:$0xff]  ;;  %vm24734_vm13 = vmmov %vm24707_vm3 }
 0xbbc   :  { %v5817_v17 = vadd.f32 %v21557_v32, %v5779_v48  ;;  %v5780_v12 = vadd.f32 %v24722_v23, %v5475_v46 }
 0xbbd   :  { %v5820_v2 = vadd.f32 %v21557_v32, %v5782_v5  ;;  %v5851_v11 = vmax.f32 %v5819_v56, 0.0  ;;  %v24733_v56 = vld [vmem:[#allocation125_spill] sm:$0xff] }
 0xbbe   :  { %v5849_v26 = vmax.f32 %v5817_v17, 0.0  ;;  %v5818_v9 = vadd.f32 %v21557_v32, %v5780_v12  ;;  %17040 = vmatmul.mubr.msk.f32.gmra.mrb[224].mxu0 %vm24723_vm4, %v5848_v0  ;;  %v24732_v17 = vld [vmem:[#allocation127_spill] sm:$0xff]  ;;  %vm24736_vm4 = vmmov %vm24707_vm3 }
 0xbbf   :  { %v5852_v3 = vmax.f32 %v5820_v2, 0.0  ;;  %v24735_v2 = vld [vmem:[#allocation128_spill] sm:$0xff] }
 0xbc0   :  { %v5850_v19 = vmax.f32 %v5818_v9, 0.0  ;;  %v16948_v16 = vpop.f32.mrb[228].mxu1  ;;  %17042 = vmatprep.mubr.msk.f32.mxu0 %vm24707_vm3, %v5849_v26 }
 0xbc1   :  { %v5785_v36 = vadd.f32 %v16948_v16, %v24724_v13  ;;  %v5488_v63 = vpop.f32.mrb[229].mxu1 }
 0xbc2   :  { %v5783_v62 = vadd.f32 %v24725_v47, %v5488_v63  ;;  %v16949_v29 = vpop.f32.mrb[230].mxu1  ;;  %17043 = vmatmul.mubr.msk.f32.gmra.mrb[226].mxu0 %vm24726_vm12, %v5850_v19  ;;  %vm24738_vm12 = vmmov %vm24707_vm3 }
 0xbc3   :  { %v5786_v34 = vadd.f32 %v24727_v24, %v16949_v29  ;;  %v5491_v14 = vpop.f32.mrb[231].mxu1  ;;  %17045 = vmatprep.mubr.msk.f32.mxu0 %vm24728_vm14, %v5851_v11  ;;  %v5823_v22 = vadd.f32 %v21557_v32, %v5785_v36  ;;  %v24737_v36 = vld [vmem:[#allocation126_spill] sm:$0xff]  ;;  %vm24740_vm14 = vmmov %vm24707_vm3 }
 0xbc4   :  { %v5821_v20 = vadd.f32 %v21557_v32, %v5783_v62  ;;  %v5784_v21 = vadd.f32 %v24729_v43, %v5491_v14 }
 0xbc5   :  { %v5824_v31 = vadd.f32 %v21557_v32, %v5786_v34  ;;  %v5855_v0 = vmax.f32 %v5823_v22, 0.0 }
 0xbc6   :  { %v5853_v48 = vmax.f32 %v5821_v20, 0.0  ;;  %v5822_v37 = vadd.f32 %v21557_v32, %v5784_v21  ;;  %17046 = vmatmul.mubr.msk.f32.gmra.mrb[228].mxu0 %vm24730_vm9, %v5852_v3  ;;  %v24739_v21 = vld [vmem:[#allocation129_spill] sm:$0xff]  ;;  %vm24741_vm9 = vmmov %vm24707_vm3 }
 0xbc7   :  { %v5856_v11 = vmax.f32 %v5824_v31, 0.0 }
 0xbc8   :  { %v5854_v5 = vmax.f32 %v5822_v37, 0.0  ;;  %v16952_v46 = vpop.f32.mrb[232].mxu1  ;;  %17048 = vmatprep.mubr.msk.f32.mxu0 %vm24731_vm6, %v5853_v48  ;;  %vm24744_vm6 = vmmov %vm24707_vm3 }
 0xbc9   :  { %v5789_v23 = vadd.f32 %v16952_v46, %v24732_v17  ;;  %v5504_v12 = vpop.f32.mrb[233].mxu1 }
 0xbca   :  { %v5787_v26 = vadd.f32 %v24733_v56, %v5504_v12  ;;  %v16953_v9 = vpop.f32.mrb[234].mxu1  ;;  %17049 = vmatmul.mubr.msk.f32.gmra.mrb[230].mxu0 %vm24734_vm13, %v5854_v5  ;;  %vm24745_vm13 = vmmov %vm24707_vm3 }
 0xbcb   :  { %v5790_v19 = vadd.f32 %v24735_v2, %v16953_v9  ;;  %v5507_v16 = vpop.f32.mrb[235].mxu1  ;;  %17051 = vmatprep.mubr.msk.f32.mxu0 %vm24736_vm4, %v5855_v0  ;;  %v5827_v47 = vadd.f32 %v21557_v32, %v5789_v23  ;;  %v24743_v0 = vld [vmem:[#allocation130_spill] sm:$0xff]  ;;  %vm24746_vm4 = vmmov %vm24707_vm3  ;;  %v24748_v2 = vmov 1.0|1.0  }
 0xbcc   :  { %v5825_v13 = vadd.f32 %v21557_v32, %v5787_v26  ;;  %v5788_v63 = vadd.f32 %v24737_v36, %v5507_v16  ;;  %v510_v16 = vld [vmem:[%s24742_s29] sm:$0x1f] }
 0xbcd   :  { %v5828_v24 = vadd.f32 %v21557_v32, %v5790_v19  ;;  %v5859_v3 = vmax.f32 %v5827_v47, 0.0 }
 0xbce   :  { %v5857_v62 = vmax.f32 %v5825_v13, 0.0  ;;  %v5826_v29 = vadd.f32 %v21557_v32, %v5788_v63  ;;  %17052 = vmatmul.mubr.msk.f32.gmra.mrb[232].mxu0 %vm24707_vm3, %v5856_v11  ;;  %v21660_v11 = vld [vmem:[#allocation16] ss:$0 sm:$0xff] }
 0xbcf   :  { %v5860_v5 = vmax.f32 %v5828_v24, 0.0 }
 0xbd0   :  { %v5858_v34 = vmax.f32 %v5826_v29, 0.0  ;;  %v16956_v14 = vpop.f32.mrb[236].mxu1  ;;  %17054 = vmatprep.mubr.msk.f32.mxu0 %vm24738_vm12, %v5857_v62  ;;  %vm24747_vm12 = vmmov %vm24707_vm3 }
 0xbd1   :  { %v5793_v20 = vadd.f32 %v16956_v14, %v21302_v57  ;;  %v5520_v43 = vpop.f32.mrb[237].mxu1 }
 0xbd2   :  { %v5791_v22 = vadd.f32 %v24739_v21, %v5520_v43  ;;  %v16957_v48 = vpop.f32.mrb[238].mxu1  ;;  %17055 = vmatmul.mubr.msk.f32.gmra.mrb[234].mxu0 %vm24740_vm14, %v5858_v34  ;;  %vm24750_vm14 = vcmask 1044480  }
 0xbd3   :  { %v5794_v37 = vadd.f32 %v21298_v38, %v16957_v48  ;;  %v5523_v31 = vpop.f32.mrb[239].mxu1  ;;  %17057 = vmatprep.mubr.msk.f32.mxu0 %vm24741_vm9, %v5859_v3  ;;  %v5831_v23 = vadd.f32 %v21557_v32, %v5793_v20  ;;  %17116 = vmatprep.subr.msk.mxu1 %vm24750_vm14, %v510_v16  ;;  %vm24751_vm9 = vcmask 31744  }
 0xbd4   :  { %v5829_v46 = vadd.f32 %v21557_v32, %v5791_v22  ;;  %v5792_v17 = vadd.f32 %v24743_v0, %v5523_v31 }
 0xbd5   :  { %v5832_v56 = vadd.f32 %v21557_v32, %v5794_v37  ;;  %v5863_v38 = vmax.f32 %v5831_v23, 0.0 }
 0xbd6   :  { %v5861_v57 = vmax.f32 %v5829_v46, 0.0  ;;  %v5830_v12 = vadd.f32 %v21557_v32, %v5792_v17  ;;  %17058 = vmatmul.mubr.msk.f32.gmra.mrb[236].mxu0 %vm24744_vm6, %v5860_v5  ;;  %vm24752_vm6 = vmmov %vm24751_vm9 }
 0xbd7   :  { %v5864_v9 = vmax.f32 %v5832_v56, 0.0 }
 0xbd8   :  { %v5862_v26 = vmax.f32 %v5830_v12, 0.0  ;;  %17060 = vmatprep.mubr.msk.f32.mxu0 %vm24745_vm13, %v5861_v57  ;;  %vm24753_vm13 = vmmov %vm24750_vm14 }
 0xbda   :  { %17061 = vmatmul.mubr.msk.f32.gmra.mrb[238].mxu0 %vm24746_vm4, %v5862_v26  ;;  %vm24754_vm4 = vmmov %vm24752_vm6 }
 0xbdb   :  { %17063 = vmatprep.mubr.msk.f32.mxu0 %vm24707_vm3, %v5863_v38  ;;  %vm24755_vm3 = vmmov %vm24754_vm4 }
 0xbdc   :  { %vm24757_vm14 = vmmov %vm24755_vm3 }
 0xbde   :  { %17064 = vmatmul.mubr.msk.f32.gmra.mrb[240].mxu0 %vm24747_vm12, %v5864_v9  ;;  %vm24756_vm12 = vmmov %vm24755_vm3 }
 0xbdf   :  { %14094 = vmatprep.mubr.msk.bf16.mxu0 %vm20839_vm8, %v24748_v2 }
 0xc75   :  { %v17020_v32 = vpop.f32.mrb[210].mxu0 }
 0xc76   :  { %v6033_v13 = vpop.f32.mrb[211].mxu0  ;;  %v21666_v63 = vadd.f32 %v17020_v32, %v21660_v11 }
 0xc77   :  { %v21663_v36 = vadd.f32 %v21660_v11, %v6033_v13 }
 0xc79   :  { %v17023_v47 = vpop.f32.mrb[212].mxu0  ;;  %17068 = vmatprep.mubr.msk.f32.mxu1 %vm24751_vm9, %v21663_v36  ;;  %vm24758_vm9 = vmmov %vm24755_vm3 }
 0xc7a   :  { %v6043_v62 = vpop.f32.mrb[213].mxu0  ;;  %17069 = vmatmul.mubr.msk.f32.vlgmr.msra.gmra.mrb[206].mxu1 %vm24752_vm6, %v21666_v63  ;;  %v21677_v24 = vadd.f32 %v17023_v47, %v21660_v11  ;;  %vm24759_vm6 = vmmov %vm24755_vm3 }
 0xc7b   :  { %v21673_v29 = vadd.f32 %v21660_v11, %v6043_v62  ;;  %17117 = vmatpush3.msk.msra.mxu1 %vm24753_vm13, %v510_v16  ;;  %vm24760_vm13 = vmmov %vm24755_vm3 }
 0xc7d   :  { %v17026_v34 = vpop.f32.mrb[214].mxu0  ;;  %17071 = vmatprep.mubr.msk.f32.mxu1 %vm24754_vm4, %v21673_v29  ;;  %vm24761_vm4 = vmmov %vm24755_vm3 }
 0xc7e   :  { %v6053_v14 = vpop.f32.mrb[215].mxu0  ;;  %17072 = vmatmul.mubr.msk.f32.gmra.mrb[240].mxu1 %vm24755_vm3, %v21677_v24  ;;  %v21687_v20 = vadd.f32 %v17026_v34, %v21660_v11 }
 0xc7f   :  { %v21684_v3 = vadd.f32 %v21660_v11, %v6053_v14 }
 0xc81   :  { %v17029_v43 = vpop.f32.mrb[216].mxu0  ;;  %17074 = vmatprep.mubr.msk.f32.mxu1 %vm24756_vm12, %v21684_v3  ;;  %vm24762_vm12 = vmmov %vm24755_vm3 }
 0xc82   :  { %v6063_v21 = vpop.f32.mrb[217].mxu0  ;;  %17075 = vmatmul.mubr.msk.f32.gmra.mrb[242].mxu1 %vm24757_vm14, %v21687_v20  ;;  %v21697_v48 = vadd.f32 %v17029_v43, %v21660_v11  ;;  %vm24763_vm14 = vmmov %vm24755_vm3 }
 0xc83   :  { %v21694_v22 = vadd.f32 %v21660_v11, %v6063_v21 }
 0xc85   :  { %v17032_v37 = vpop.f32.mrb[218].mxu0  ;;  %17077 = vmatprep.mubr.msk.f32.mxu1 %vm24758_vm9, %v21694_v22  ;;  %vm24764_vm9 = vmmov %vm24755_vm3 }
 0xc86   :  { %v6073_v31 = vpop.f32.mrb[219].mxu0  ;;  %17078 = vmatmul.mubr.msk.f32.gmra.mrb[244].mxu1 %vm24759_vm6, %v21697_v48  ;;  %v21707_v46 = vadd.f32 %v17032_v37, %v21660_v11  ;;  %vm24765_vm6 = vmmov %vm24755_vm3 }
 0xc87   :  { %v21704_v5 = vadd.f32 %v21660_v11, %v6073_v31 }
 0xc89   :  { %v17035_v0 = vpop.f32.mrb[220].mxu0  ;;  %17080 = vmatprep.mubr.msk.f32.mxu1 %vm24760_vm13, %v21704_v5  ;;  %vm24766_vm13 = vmmov %vm24755_vm3 }
 0xc8a   :  { %v6083_v17 = vpop.f32.mrb[221].mxu0  ;;  %17081 = vmatmul.mubr.msk.f32.gmra.mrb[246].mxu1 %vm24761_vm4, %v21707_v46  ;;  %v21717_v57 = vadd.f32 %v17035_v0, %v21660_v11  ;;  %vm24767_vm4 = vmmov %vm24755_vm3 }
 0xc8b   :  { %v21714_v23 = vadd.f32 %v21660_v11, %v6083_v17 }
 0xc8d   :  { %v17038_v12 = vpop.f32.mrb[222].mxu0  ;;  %17083 = vmatprep.mubr.msk.f32.mxu1 %vm24755_vm3, %v21714_v23 }
 0xc8e   :  { %v6093_v56 = vpop.f32.mrb[223].mxu0  ;;  %17084 = vmatmul.mubr.msk.f32.gmra.mrb[248].mxu1 %vm24762_vm12, %v21717_v57  ;;  %v21727_v38 = vadd.f32 %v17038_v12, %v21660_v11  ;;  %vm24768_vm12 = vmmov %vm24755_vm3 }
 0xc8f   :  { %v21724_v26 = vadd.f32 %v21660_v11, %v6093_v56 }
 0xc91   :  { %v17041_v9 = vpop.f32.mrb[224].mxu0  ;;  %17086 = vmatprep.mubr.msk.f32.mxu1 %vm24763_vm14, %v21724_v26  ;;  %vm24769_vm14 = vmmov %vm24755_vm3 }
 0xc92   :  { %v6103_v16 = vpop.f32.mrb[225].mxu0  ;;  %17087 = vmatmul.mubr.msk.f32.gmra.mrb[250].mxu1 %vm24764_vm9, %v21727_v38  ;;  %v21737_v13 = vadd.f32 %v17041_v9, %v21660_v11  ;;  %vm24770_vm9 = vmmov %vm24755_vm3 }
 0xc93   :  { %v21734_v32 = vadd.f32 %v21660_v11, %v6103_v16 }
 0xc95   :  { %v17044_v47 = vpop.f32.mrb[226].mxu0  ;;  %17089 = vmatprep.mubr.msk.f32.mxu1 %vm24765_vm6, %v21734_v32  ;;  %vm24771_vm6 = vmmov %vm24755_vm3 }
 0xc96   :  { %v6113_v62 = vpop.f32.mrb[227].mxu0  ;;  %17090 = vmatmul.mubr.msk.f32.gmra.mrb[252].mxu1 %vm24766_vm13, %v21737_v13  ;;  %v21747_v14 = vadd.f32 %v17044_v47, %v21660_v11  ;;  %vm24772_vm13 = vmmov %vm24755_vm3 }
 0xc97   :  { %v21744_v34 = vadd.f32 %v21660_v11, %v6113_v62 }
 0xc99   :  { %v17047_v43 = vpop.f32.mrb[228].mxu0  ;;  %17092 = vmatprep.mubr.msk.f32.mxu1 %vm24767_vm4, %v21744_v34  ;;  %vm24773_vm4 = vmmov %vm24755_vm3 }
 0xc9a   :  { %v6123_v21 = vpop.f32.mrb[229].mxu0  ;;  %17093 = vmatmul.mubr.msk.f32.gmra.mrb[254].mxu1 %vm24755_vm3, %v21747_v14  ;;  %v21757_v31 = vadd.f32 %v17047_v43, %v21660_v11 }
 0xc9b   :  { %v21754_v37 = vadd.f32 %v21660_v11, %v6123_v21 }
 0xc9d   :  { %v17050_v0 = vpop.f32.mrb[230].mxu0  ;;  %17095 = vmatprep.mubr.msk.f32.mxu1 %vm24768_vm12, %v21754_v37  ;;  %vm24776_vm12 = vmmov %vm24755_vm3 }
 0xc9e   :  { %v6133_v17 = vpop.f32.mrb[231].mxu0  ;;  %17096 = vmatmul.mubr.msk.f32.gmra.mrb[0].mxu1 %vm24769_vm14, %v21757_v31  ;;  %v21767_v56 = vadd.f32 %v17050_v0, %v21660_v11  ;;  %vm24779_vm14 = vmmov %vm24755_vm3 }
 0xc9f   :  { %v21764_v12 = vadd.f32 %v21660_v11, %v6133_v17 }
 0xca1   :  { %v17053_v9 = vpop.f32.mrb[232].mxu0  ;;  %17098 = vmatprep.mubr.msk.f32.mxu1 %vm24770_vm9, %v21764_v12  ;;  %vm24780_vm9 = vmmov %vm24755_vm3 }
 0xca2   :  { %v6143_v16 = vpop.f32.mrb[233].mxu0  ;;  %17099 = vmatmul.mubr.msk.f32.gmra.mrb[2].mxu1 %vm24771_vm6, %v21767_v56  ;;  %v21777_v62 = vadd.f32 %v17053_v9, %v21660_v11  ;;  %vm24783_vm6 = vmmov %vm24755_vm3 }
 0xca3   :  { %v21774_v47 = vadd.f32 %v21660_v11, %v6143_v16 }
 0xca5   :  { %v17056_v43 = vpop.f32.mrb[234].mxu0  ;;  %17101 = vmatprep.mubr.msk.f32.mxu1 %vm24772_vm13, %v21774_v47  ;;  %vm24784_vm13 = vmmov %vm24755_vm3 }
 0xca6   :  { %v6153_v21 = vpop.f32.mrb[235].mxu0  ;;  %17102 = vmatmul.mubr.msk.f32.gmra.mrb[4].mxu1 %vm24773_vm4, %v21777_v62  ;;  %v21787_v17 = vadd.f32 %v17056_v43, %v21660_v11  ;;  %vm24787_vm4 = vmmov %vm24755_vm3 }
 0xca7   :  { %v21784_v0 = vadd.f32 %v21660_v11, %v6153_v21 }
 0xca8   :  { %24775 = vst [vmem:[#allocation91_spill] sm:$0xff] %v21787_v17 }
 0xca9   :  { %24774 = vst [vmem:[#allocation90_spill] sm:$0xff] %v21784_v0  ;;  %v17059_v19 = vpop.f32.mrb[236].mxu0  ;;  %17104 = vmatprep.mubr.msk.f32.mxu1 %vm24755_vm3, %v21784_v0 }
 0xcaa   :  { %v6163_v9 = vpop.f32.mrb[237].mxu0  ;;  %17105 = vmatmul.mubr.msk.f32.gmra.mrb[6].mxu1 %vm24776_vm12, %v21787_v17  ;;  %v21797_v58 = vadd.f32 %v17059_v19, %v21660_v11  ;;  %vm24788_vm12 = vcmask 39936  }
 0xcab   :  { %v21794_v16 = vadd.f32 %v21660_v11, %v6163_v9 }
 0xcac   :  { %24778 = vst [vmem:[#allocation93_spill] sm:$0xff] %v21797_v58 }
 0xcad   :  { %24777 = vst [vmem:[#allocation92_spill] sm:$0xff] %v21794_v16  ;;  %v17062_v52 = vpop.f32.mrb[238].mxu0  ;;  %17107 = vmatprep.mubr.msk.f32.mxu1 %vm24779_vm14, %v21794_v16  ;;  %vm24789_vm14 = vmmov %vm24788_vm12 }
 0xcae   :  { %v6173_v43 = vpop.f32.mrb[239].mxu0  ;;  %17108 = vmatmul.mubr.msk.f32.gmra.mrb[8].mxu1 %vm24780_vm9, %v21797_v58  ;;  %v21807_v15 = vadd.f32 %v17062_v52, %v21660_v11  ;;  %vm24790_vm9 = vmmov %vm24788_vm12 }
 0xcaf   :  { %v21804_v21 = vadd.f32 %v21660_v11, %v6173_v43 }
 0xcb0   :  { %24782 = vst [vmem:[#allocation95_spill] sm:$0xff] %v21807_v15 }
 0xcb1   :  { %24781 = vst [vmem:[#allocation94_spill] sm:$0xff] %v21804_v21  ;;  %v17065_v55 = vpop.f32.mrb[240].mxu0  ;;  %17110 = vmatprep.mubr.msk.f32.mxu1 %vm24783_vm6, %v21804_v21  ;;  %vm24791_vm6 = vmmov %vm24790_vm9 }
 0xcb2   :  { %v6183_v19 = vpop.f32.mrb[241].mxu0  ;;  %17111 = vmatmul.mubr.msk.f32.gmra.mrb[10].mxu1 %vm24784_vm13, %v21807_v15  ;;  %v21817_v53 = vadd.f32 %v17065_v55, %v21660_v11  ;;  %vm24792_vm13 = vmmov %vm24791_vm6 }
 0xcb3   :  { %v21814_v9 = vadd.f32 %v21660_v11, %v6183_v19 }
 0xcb4   :  { %24786 = vst [vmem:[#allocation97_spill] sm:$0xff] %v21817_v53 }
 0xcb5   :  { %24785 = vst [vmem:[#allocation96_spill] sm:$0xff] %v21814_v9  ;;  %17113 = vmatprep.mubr.msk.f32.mxu1 %vm24787_vm4, %v21814_v9  ;;  %vm24793_vm4 = vmmov %vm24791_vm6 }
 0xcb6   :  { %17114 = vmatmul.mubr.msk.f32.gmra.mrb[12].mxu1 %vm24755_vm3, %v21817_v53  ;;  %vm24794_vm3 = vmmov %vm24793_vm4 }
 0xcb7   :  { %17118 = vmatprep.mubr.msk.f32.mxu1 %vm24788_vm12, %v21360_v61  ;;  %vm24795_vm12 = vmmov %vm24794_vm3 }
 0xcba   :  { %17119 = vmatmul.mubr.msk.f32.vlgmr.msra.gmra.mrb[14].mxu1 %vm24789_vm14, %v21362_v39  ;;  %vm24796_vm14 = vmmov %vm24794_vm3 }
 0xcbb   :  { %17121 = vmatprep.mubr.msk.f32.mxu1 %vm24790_vm9, %v21373_v54  ;;  %vm24797_vm9 = vmmov %vm24794_vm3 }
 0xcbe   :  { %17122 = vmatmul.mubr.msk.f32.gmra.mrb[16].mxu1 %vm24791_vm6, %v21375_v1  ;;  %vm24798_vm6 = vmmov %vm24794_vm3 }
 0xcbf   :  { %17124 = vmatprep.mubr.msk.f32.mxu1 %vm24792_vm13, %v21385_v27  ;;  %vm24799_vm13 = vmmov %vm24794_vm3 }
 0xcc2   :  { %17125 = vmatmul.mubr.msk.f32.gmra.mrb[18].mxu1 %vm24793_vm4, %v21387_v33  ;;  %vm24800_vm4 = vmmov %vm24794_vm3 }
 0xcc3   :  { %17127 = vmatprep.mubr.msk.f32.mxu1 %vm24794_vm3, %v21397_v30 }
 0xcc6   :  { %17128 = vmatmul.mubr.msk.f32.gmra.mrb[20].mxu1 %vm24795_vm12, %v21399_v8  ;;  %vm24801_vm12 = vmmov %vm24794_vm3 }
 0xcc7   :  { %17130 = vmatprep.mubr.msk.f32.mxu1 %vm24796_vm14, %v21409_v60  ;;  %vm24802_vm14 = vmmov %vm24794_vm3 }
 0xcca   :  { %17131 = vmatmul.mubr.msk.f32.gmra.mrb[22].mxu1 %vm24797_vm9, %v21411_v59  ;;  %vm24804_vm9 = vcmask 1043456  }
 0xccb   :  { %17133 = vmatprep.mubr.msk.f32.mxu1 %vm24798_vm6, %v21421_v4  ;;  %vm24807_vm6 = vmmov %vm24804_vm9 }
 0xcce   :  { %17134 = vmatmul.mubr.msk.f32.gmra.mrb[24].mxu1 %vm24799_vm13, %v21423_v44 }
 0xccf   :  { %17136 = vmatprep.mubr.msk.f32.mxu1 %vm24800_vm4, %v21433_v6 }
 0xcd2   :  { %17137 = vmatmul.mubr.msk.f32.gmra.mrb[26].mxu1 %vm24794_vm3, %v21435_v40 }
 0xcd3   :  { %17139 = vmatprep.mubr.msk.f32.mxu1 %vm24801_vm12, %v21445_v25 }
 0xcd6   :  { %17140 = vmatmul.mubr.msk.f32.gmra.mrb[28].mxu1 %vm24802_vm14, %v21447_v10 }
 0xd4d   :  { %v17070_v55 = vpop.f32.mrb[206].mxu1 }
 0xd4e   :  { %v6357_v52 = vpop.f32.mrb[207].mxu1 }
 0xd4f   :  { %v6516_v11 = vpack.c.bf16 %v17070_v55, %v6357_v52 }
 0xd51   :  { %v17073_v43 = vpop.f32.mrb[240].mxu1 }
 0xd52   :  { %v6367_v19 = vpop.f32.mrb[241].mxu1 }
 0xd53   :  { %v6517_v45 = vpack.c.bf16 %v17073_v43, %v6367_v19 }
 0xd55   :  { %v17076_v18 = vpop.f32.mrb[242].mxu1 }
 0xd56   :  { %v6377_v51 = vpop.f32.mrb[243].mxu1 }
 0xd57   :  { %v6518_v7 = vpack.c.bf16 %v17076_v18, %v6377_v51 }
 0xd59   :  { %v17079_v42 = vpop.f32.mrb[244].mxu1 }
 0xd5a   :  { %v6387_v28 = vpop.f32.mrb[245].mxu1 }
 0xd5b   :  { %v6519_v50 = vpack.c.bf16 %v17079_v42, %v6387_v28 }
 0xd5d   :  { %v17082_v35 = vpop.f32.mrb[246].mxu1 }
 0xd5e   :  { %v6397_v41 = vpop.f32.mrb[247].mxu1 }
 0xd5f   :  { %v6520_v40 = vpack.c.bf16 %v17082_v35, %v6397_v41 }
 0xd61   :  { %v17085_v6 = vpop.f32.mrb[248].mxu1 }
 0xd62   :  { %v6407_v25 = vpop.f32.mrb[249].mxu1 }
 0xd63   :  { %v6521_v44 = vpack.c.bf16 %v17085_v6, %v6407_v25 }
 0xd65   :  { %v17088_v4 = vpop.f32.mrb[250].mxu1 }
 0xd66   :  { %v6417_v10 = vpop.f32.mrb[251].mxu1 }
 0xd67   :  { %v6522_v59 = vpack.c.bf16 %v17088_v4, %v6417_v10 }
 0xd69   :  { %v17091_v60 = vpop.f32.mrb[252].mxu1 }
 0xd6a   :  { %v6427_v55 = vpop.f32.mrb[253].mxu1 }
 0xd6b   :  { %v6523_v52 = vpack.c.bf16 %v17091_v60, %v6427_v55 }
 0xd6d   :  { %v17094_v8 = vpop.f32.mrb[254].mxu1 }
 0xd6e   :  { %v6437_v43 = vpop.f32.mrb[255].mxu1 }
 0xd6f   :  { %v6524_v19 = vpack.c.bf16 %v17094_v8, %v6437_v43 }
 0xd71   :  { %v17097_v30 = vpop.f32.mrb[0].mxu1  ;;  %15349 = vmatprep.subr.bf16.mxu0 %v6524_v19 }
 0xd72   :  { %v6447_v51 = vpop.f32.mrb[1].mxu1  ;;  %15350 = vmatpush3.bf16.msra.mxu0 %v6516_v11 }
 0xd73   :  { %v6525_v28 = vpack.c.bf16 %v17097_v30, %v6447_v51 }
 0xd75   :  { %v17100_v42 = vpop.f32.mrb[2].mxu1  ;;  %15351 = vmatprep.subr.bf16.mxu0 %v6525_v28  ;;  %v561_v28 = vld [vmem:[%s24803_s6] sm:$0xf] }
 0xd76   :  { %v6457_v41 = vpop.f32.mrb[3].mxu1  ;;  %15352 = vmatpush3.bf16.msra.mxu0 %v6517_v45 }
 0xd77   :  { %v6526_v35 = vpack.c.bf16 %v17100_v42, %v6457_v41 }
 0xd79   :  { %v17103_v6 = vpop.f32.mrb[4].mxu1  ;;  %15353 = vmatprep.subr.bf16.mxu0 %v6526_v35 }
 0xd7a   :  { %v6467_v25 = vpop.f32.mrb[5].mxu1  ;;  %15354 = vmatpush3.bf16.msra.mxu0 %v6518_v7 }
 0xd7b   :  { %v6527_v4 = vpack.c.bf16 %v17103_v6, %v6467_v25 }
 0xd7d   :  { %v17106_v10 = vpop.f32.mrb[6].mxu1  ;;  %15355 = vmatprep.subr.bf16.mxu0 %v6527_v4 }
 0xd7e   :  { %v6477_v60 = vpop.f32.mrb[7].mxu1  ;;  %15356 = vmatpush3.bf16.msra.mxu0 %v6519_v50 }
 0xd7f   :  { %v6528_v8 = vpack.c.bf16 %v17106_v10, %v6477_v60  ;;  %v24818_v10 = vld [vmem:[#allocation111_spill] sm:$0xff] }
 0xd80   :  { %vm24819_vm3 = vnez %v24818_v10  ;;  %v516_v10 = vld [vmem:[%s24822_s8 + $0x18] sm:$0xff] }
 0xd81   :  { %v17109_v18 = vpop.f32.mrb[8].mxu1  ;;  %15357 = vmatprep.subr.bf16.mxu0 %v6528_v8 }
 0xd82   :  { %v6487_v11 = vpop.f32.mrb[9].mxu1  ;;  %15358 = vmatpush3.bf16.msra.mxu0 %v6520_v40 }
 0xd83   :  { %v6529_v30 = vpack.c.bf16 %v17109_v18, %v6487_v11  ;;  %v24814_v18 = vld [vmem:[#allocation109_spill] sm:$0xff] }
 0xd84   :  { %vm24815_vm13 = vnez %v24814_v18  ;;  %v24825_v18 = vld [vmem:[#allocation116_spill] sm:$0xff] }
 0xd85   :  { %v17112_v55 = vpop.f32.mrb[10].mxu1  ;;  %15359 = vmatprep.subr.bf16.mxu0 %v6529_v30 }
 0xd86   :  { %v6497_v45 = vpop.f32.mrb[11].mxu1  ;;  %15360 = vmatpush3.bf16.msra.mxu0 %v6521_v44 }
 0xd87   :  { %v6530_v43 = vpack.c.bf16 %v17112_v55, %v6497_v45  ;;  %v24816_v55 = vld [vmem:[#allocation112_spill] sm:$0xff] }
 0xd88   :  { %vm24817_vm4 = vnez %v24816_v55  ;;  %v24827_v55 = vld [vmem:[#allocation115_spill] sm:$0xff] }
 0xd89   :  { %v17115_v19 = vpop.f32.mrb[12].mxu1  ;;  %15361 = vmatprep.subr.bf16.mxu0 %v6530_v43 }
 0xd8a   :  { %v6507_v7 = vpop.f32.mrb[13].mxu1  ;;  %15362 = vmatpush3.bf16.msra.mxu0 %v6522_v59 }
 0xd8b   :  { %v6531_v51 = vpack.c.bf16 %v17115_v19, %v6507_v7  ;;  %v24820_v19 = vld [vmem:[#allocation114_spill] sm:$0xff] }
 0xd8c   :  { %vm24821_vm12 = vnez %v24820_v19  ;;  %v515_v19 = vld [vmem:[%s24822_s8 + $0x10] sm:$0xff] }
 0xd8d   :  { %15363 = vmatprep.subr.bf16.mxu0 %v6531_v51  ;;  %v21856_v50 = vpop.f32.mrb[14].mxu1  ;;  %v18190_v6 = vpack.c.bf16 %v516_v10, %v515_v19 }
 0xd8e   :  { %15364 = vmatpush3.bf16.msra.mxu0 %v6523_v52  ;;  %v21858_v42 = vpop.f32.mrb[15].mxu1 }
 0xd8f   :  { %17176 = vmatprep.subr.msk.mxu0 %vm24804_vm9, %v561_v28  ;;  %vm24826_vm9 = vnez %v24825_v18  ;;  %v514_v18 = vld [vmem:[%s24822_s8 + $0x8] sm:$0xff] }
 0xd91   :  { %14096 = vmatmul.mubr.msk.bf16.vlgmr.msra.gmra.mrb[244].mxu0 %vm19909_vm7, %v24748_v2  ;;  %v21864_v44 = vpop.f32.mrb[16].mxu1 }
 0xd92   :  { %v21866_v41 = vpop.f32.mrb[17].mxu1  ;;  %14098 = vmatprep.mubr.msk.bf16.mxu0 %vm21017_vm15, %v24748_v2  ;;  %17177 = vmatpush3.msk.msra.mxu0 %vm24807_vm6, %v561_v28  ;;  %v24823_v28 = vld [vmem:[#allocation113_spill] sm:$0xff]  ;;  %vm24828_vm6 = vnez %v24827_v55  ;;  %v513_v55 = vld [vmem:[%s24822_s8] sm:$0xff] }
 0xd93   :  { %vm24824_vm14 = vnez %v24823_v28  ;;  %v18186_v28 = vpack.c.bf16 %v514_v18, %v513_v55  ;;  %v517_v18 = vld [vmem:[%s24822_s8 + $0x20] sm:$0xff] }
 0xd95   :  { %v21872_v35 = vpop.f32.mrb[18].mxu1  ;;  %18187 = vmatprep.subr.bf16.mxu1 %v18186_v28 }
 0xd96   :  { %v21874_v52 = vpop.f32.mrb[19].mxu1  ;;  %18189 = vmatpush3.bf16.msra.mxu1 %v18186_v28  ;;  %v22005_v28 = vld [vmem:[#allocation12] ss:$0 sm:$0xff] }
 0xd97   :  { %18191 = vmatprep.subr.bf16.mxu1 %v18190_v6 }
 0xd99   :  { %14100 = vmatmul.mubr.msk.bf16.gmra.mrb[248].mxu0 %vm21047_vm0, %v24748_v2  ;;  %v21879_v25 = vpop.f32.mrb[20].mxu1 }
 0xd9a   :  { %v21881_v4 = vpop.f32.mrb[21].mxu1  ;;  %14102 = vmatprep.mubr.msk.bf16.mxu0 %vm21057_vm2, %v24748_v2  ;;  %18193 = vmatpush3.bf16.msra.mxu1 %v18190_v6 }
 0xd9b   :  { %17150 = vmatprep.subr.mxu1 %v517_v18 }
 0xd9d   :  { %v21886_v60 = vpop.f32.mrb[22].mxu1 }
 0xd9e   :  { %v21888_v8 = vpop.f32.mrb[23].mxu1  ;;  %17151 = vmatpush3.msra.mxu1 %v517_v18 }
 0xda1   :  { %14104 = vmatmul.mubr.msk.bf16.gmra.mrb[252].mxu0 %vm21081_vm1, %v24748_v2  ;;  %v21893_v11 = vpop.f32.mrb[24].mxu1 }
 0xda2   :  { %v21895_v30 = vpop.f32.mrb[25].mxu1  ;;  %14106 = vmatprep.mubr.msk.bf16.mxu0 %vm21091_vm5, %v24748_v2 }
 0xda5   :  { %v21900_v45 = vpop.f32.mrb[26].mxu1 }
 0xda6   :  { %v21902_v43 = vpop.f32.mrb[27].mxu1 }
 0xda9   :  { %14108 = vmatmul.mubr.msk.bf16.gmra.mrb[0].mxu0 %vm21115_vm10, %v24748_v2  ;;  %v21907_v7 = vpop.f32.mrb[28].mxu1 }
 0xdaa   :  { %v21909_v51 = vpop.f32.mrb[29].mxu1  ;;  %14110 = vmatprep.mubr.msk.bf16.mxu0 %vm21125_vm11, %v24748_v2 }
 0xdb1   :  { %14112 = vmatmul.mubr.msk.bf16.gmra.mrb[4].mxu0 %vm24815_vm13, %v24748_v2 }
 0xdb2   :  { %14114 = vmatprep.mubr.msk.bf16.mxu0 %vm24817_vm4, %v24748_v2 }
 0xdb9   :  { %14116 = vmatmul.mubr.msk.bf16.gmra.mrb[8].mxu0 %vm24819_vm3, %v24748_v2  ;;  %vm24829_vm3 = vcmask 31744  }
 0xdba   :  { %14118 = vmatprep.mubr.msk.bf16.mxu0 %vm24821_vm12, %v24748_v2  ;;  %vm24830_vm4 = vmmov %vm24829_vm3 }
 0xdbb   :  { %vm24831_vm12 = vmmov %vm24829_vm3 }
 0xdbc   :  { %vm24832_vm13 = vmmov %vm24829_vm3 }
 0xdc1   :  { %14120 = vmatmul.mubr.msk.bf16.gmra.mrb[12].mxu0 %vm24824_vm14, %v24748_v2  ;;  %vm24833_vm14 = vmmov %vm24829_vm3 }
 0xdc2   :  { %14122 = vmatprep.mubr.msk.bf16.mxu0 %vm24826_vm9, %v24748_v2  ;;  %vm24834_vm9 = vmmov %vm24829_vm3 }
 0xdc9   :  { %14124 = vmatmul.mubr.msk.bf16.gmra.mrb[16].mxu0 %vm24828_vm6, %v24748_v2  ;;  %vm24835_vm6 = vmmov %vm24829_vm3 }
 0xdca   :  { %17178 = vmatprep.mubr.msk.f32.mxu0 %vm24829_vm3, %v21663_v36 }
 0xdd1   :  { %17179 = vmatmul.mubr.msk.f32.vlgmr.msra.gmra.mrb[146].mxu0 %vm24830_vm4, %v21666_v63  ;;  %vm24836_vm4 = vmmov %vm24829_vm3 }
 0xdd2   :  { %17181 = vmatprep.mubr.msk.f32.mxu0 %vm24831_vm12, %v21673_v29  ;;  %vm24837_vm12 = vmmov %vm24829_vm3 }
 0xdd5   :  { %17182 = vmatmul.mubr.msk.f32.gmra.mrb[148].mxu0 %vm24832_vm13, %v21677_v24  ;;  %vm24838_vm13 = vmmov %vm24829_vm3 }
 0xdd6   :  { %17184 = vmatprep.mubr.msk.f32.mxu0 %vm24833_vm14, %v21684_v3  ;;  %vm24839_vm14 = vmmov %vm24829_vm3 }
 0xdd9   :  { %17185 = vmatmul.mubr.msk.f32.gmra.mrb[150].mxu0 %vm24834_vm9, %v21687_v20  ;;  %vm24840_vm9 = vmmov %vm24829_vm3 }
 0xdda   :  { %17187 = vmatprep.mubr.msk.f32.mxu0 %vm24835_vm6, %v21694_v22  ;;  %vm24841_vm6 = vmmov %vm24829_vm3 }
 0xddd   :  { %17188 = vmatmul.mubr.msk.f32.gmra.mrb[152].mxu0 %vm24829_vm3, %v21697_v48 }
 0xdde   :  { %17190 = vmatprep.mubr.msk.f32.mxu0 %vm24836_vm4, %v21704_v5  ;;  %vm24842_vm4 = vmmov %vm24829_vm3 }
 0xde1   :  { %17191 = vmatmul.mubr.msk.f32.gmra.mrb[154].mxu0 %vm24837_vm12, %v21707_v46  ;;  %vm24843_vm12 = vmmov %vm24829_vm3 }
 0xde2   :  { %17193 = vmatprep.mubr.msk.f32.mxu0 %vm24838_vm13, %v21714_v23  ;;  %vm24844_vm13 = vmmov %vm24829_vm3 }
 0xde5   :  { %17194 = vmatmul.mubr.msk.f32.gmra.mrb[156].mxu0 %vm24839_vm14, %v21717_v57  ;;  %vm24845_vm14 = vmmov %vm24829_vm3 }
 0xde6   :  { %17196 = vmatprep.mubr.msk.f32.mxu0 %vm24840_vm9, %v21724_v26  ;;  %vm24846_vm9 = vmmov %vm24829_vm3 }
 0xde9   :  { %17197 = vmatmul.mubr.msk.f32.gmra.mrb[158].mxu0 %vm24841_vm6, %v21727_v38  ;;  %vm24847_vm6 = vmmov %vm24829_vm3 }
 0xdea   :  { %17199 = vmatprep.mubr.msk.f32.mxu0 %vm24829_vm3, %v21734_v32 }
 0xded   :  { %17200 = vmatmul.mubr.msk.f32.gmra.mrb[160].mxu0 %vm24842_vm4, %v21737_v13  ;;  %vm24848_vm4 = vmmov %vm24829_vm3 }
 0xdee   :  { %17202 = vmatprep.mubr.msk.f32.mxu0 %vm24843_vm12, %v21744_v34  ;;  %vm24849_vm12 = vmmov %vm24829_vm3 }
 0xdf1   :  { %17203 = vmatmul.mubr.msk.f32.gmra.mrb[162].mxu0 %vm24844_vm13, %v21747_v14  ;;  %vm24850_vm13 = vmmov %vm24829_vm3 }
 0xdf2   :  { %17205 = vmatprep.mubr.msk.f32.mxu0 %vm24845_vm14, %v21754_v37  ;;  %vm24851_vm14 = vmmov %vm24829_vm3 }
 0xdf5   :  { %17206 = vmatmul.mubr.msk.f32.gmra.mrb[164].mxu0 %vm24846_vm9, %v21757_v31  ;;  %vm24852_vm9 = vmmov %vm24829_vm3 }
 0xdf6   :  { %17208 = vmatprep.mubr.msk.f32.mxu0 %vm24847_vm6, %v21764_v12  ;;  %vm24853_vm6 = vmmov %vm24829_vm3 }
 0xdf9   :  { %17209 = vmatmul.mubr.msk.f32.gmra.mrb[166].mxu0 %vm24829_vm3, %v21767_v56 }
 0xdfa   :  { %17211 = vmatprep.mubr.msk.f32.mxu0 %vm24848_vm4, %v21774_v47  ;;  %vm24854_vm4 = vmmov %vm24829_vm3 }
 0xdfd   :  { %17212 = vmatmul.mubr.msk.f32.gmra.mrb[168].mxu0 %vm24849_vm12, %v21777_v62  ;;  %vm24855_vm12 = vmmov %vm24829_vm3 }
 0xdfe   :  { %17214 = vmatprep.mubr.msk.f32.mxu0 %vm24850_vm13, %v21784_v0  ;;  %vm24856_vm13 = vmmov %vm24829_vm3 }
 0xe01   :  { %17215 = vmatmul.mubr.msk.f32.gmra.mrb[170].mxu0 %vm24851_vm14, %v21787_v17  ;;  %vm24857_vm14 = vcmask 326656  }
 0xe02   :  { %17217 = vmatprep.mubr.msk.f32.mxu0 %vm24852_vm9, %v21794_v16  ;;  %vm24858_vm9 = vmmov %vm24857_vm14 }
 0xe05   :  { %17218 = vmatmul.mubr.msk.f32.gmra.mrb[172].mxu0 %vm24853_vm6, %v21797_v58  ;;  %vm24859_vm6 = vmmov %vm24858_vm9 }
 0xe06   :  { %17220 = vmatprep.mubr.msk.f32.mxu0 %vm24829_vm3, %v21804_v21  ;;  %vm24860_vm3 = vmmov %vm24859_vm6 }
 0xe09   :  { %17221 = vmatmul.mubr.msk.f32.gmra.mrb[174].mxu0 %vm24854_vm4, %v21807_v15  ;;  %vm24861_vm4 = vmmov %vm24860_vm3 }
 0xe0a   :  { %17223 = vmatprep.mubr.msk.f32.mxu0 %vm24855_vm12, %v21814_v9  ;;  %vm24862_vm12 = vmmov %vm24860_vm3 }
 0xe0d   :  { %17224 = vmatmul.mubr.msk.f32.gmra.mrb[176].mxu0 %vm24856_vm13, %v21817_v53  ;;  %vm24863_vm13 = vmmov %vm24860_vm3 }
 0xe0e   :  { %17294 = vmatprep.mubr.bf16.mxu0 %v24669_v49 }
 0xe64   :  { %v15365_v6 = vpop.f32.mrb[244].mxu0 }
 0xe65   :  { %v15366_v10 = vpop.f32.mrb[245].mxu0 }
 0xe66   :  { %v15367_v55 = vadd.f32 %v15366_v10, %v15365_v6  ;;  %v15368_v19 = vpop.f32.mrb[246].mxu0 }
 0xe67   :  { %v15369_v18 = vpop.f32.mrb[247].mxu0 }
 0xe68   :  { %v6699_v59 = vadd.f32 %v15367_v55, %v21858_v42  ;;  %v15370_v40 = vadd.f32 %v15369_v18, %v15368_v19 }
 0xe6a   :  { %v6783_v2 = vadd.f32 %v22005_v28, %v6699_v59  ;;  %v6704_v15 = vadd.f32 %v21856_v50, %v15370_v40 }
 0xe6c   :  { %v6784_v9 = vadd.f32 %v22005_v28, %v6704_v15  ;;  %v15371_v21 = vpop.f32.mrb[248].mxu0  ;;  %v6799_v53 = vmax.f32 %v6783_v2, 0.0 }
 0xe6d   :  { %v15372_v58 = vpop.f32.mrb[249].mxu0 }
 0xe6e   :  { %v6800_v49 = vmax.f32 %v6784_v9, 0.0  ;;  %v15373_v16 = vadd.f32 %v15372_v58, %v15371_v21  ;;  %v15374_v17 = vpop.f32.mrb[250].mxu0  ;;  %17152 = vmatprep.mubr.msk.f32.mxu1 %vm24857_vm14, %v6799_v53  ;;  %vm24864_vm14 = vmmov %vm24860_vm3 }
 0xe6f   :  { %v15375_v6 = vpop.f32.mrb[251].mxu0 }
 0xe70   :  { %v6709_v10 = vadd.f32 %v15373_v16, %v21866_v41  ;;  %v15376_v0 = vadd.f32 %v15375_v6, %v15374_v17  ;;  %17153 = vmatmul.mubr.msk.f32.vlgmr.msra.gmra.mrb[30].mxu1 %vm24858_vm9, %v6800_v49  ;;  %vm24865_vm9 = vmmov %vm24860_vm3 }
 0xe72   :  { %v6785_v42 = vadd.f32 %v22005_v28, %v6709_v10  ;;  %v6714_v50 = vadd.f32 %v21864_v44, %v15376_v0 }
 0xe74   :  { %v6801_v40 = vmax.f32 %v6785_v42, 0.0  ;;  %v6786_v15 = vadd.f32 %v22005_v28, %v6714_v50  ;;  %v15377_v2 = vpop.f32.mrb[252].mxu0 }
 0xe75   :  { %v15378_v59 = vpop.f32.mrb[253].mxu0 }
 0xe76   :  { %v6802_v9 = vmax.f32 %v6786_v15, 0.0  ;;  %v15379_v58 = vadd.f32 %v15378_v59, %v15377_v2  ;;  %v15380_v21 = vpop.f32.mrb[254].mxu0  ;;  %17155 = vmatprep.mubr.msk.f32.mxu1 %vm24859_vm6, %v6801_v40  ;;  %vm24866_vm6 = vmmov %vm24860_vm3 }
 0xe77   :  { %v15381_v53 = vpop.f32.mrb[255].mxu0 }
 0xe78   :  { %v6719_v16 = vadd.f32 %v15379_v58, %v21874_v52  ;;  %v15382_v17 = vadd.f32 %v15381_v53, %v15380_v21  ;;  %17156 = vmatmul.mubr.msk.f32.gmra.mrb[32].mxu1 %vm24860_vm3, %v6802_v9 }
 0xe7a   :  { %v6787_v49 = vadd.f32 %v22005_v28, %v6719_v16  ;;  %v6724_v0 = vadd.f32 %v21872_v35, %v15382_v17 }
 0xe7c   :  { %v6803_v44 = vmax.f32 %v6787_v49, 0.0  ;;  %v6788_v41 = vadd.f32 %v22005_v28, %v6724_v0  ;;  %v15383_v55 = vpop.f32.mrb[0].mxu0 }
 0xe7d   :  { %v15384_v19 = vpop.f32.mrb[1].mxu0 }
 0xe7e   :  { %v6804_v18 = vmax.f32 %v6788_v41, 0.0  ;;  %v15385_v6 = vadd.f32 %v15384_v19, %v15383_v55  ;;  %v15386_v10 = vpop.f32.mrb[2].mxu0  ;;  %17158 = vmatprep.mubr.msk.f32.mxu1 %vm24861_vm4, %v6803_v44  ;;  %vm24867_vm4 = vmmov %vm24860_vm3 }
 0xe7f   :  { %v15387_v42 = vpop.f32.mrb[3].mxu0 }
 0xe80   :  { %v6729_v52 = vadd.f32 %v15385_v6, %v21881_v4  ;;  %v15388_v50 = vadd.f32 %v15387_v42, %v15386_v10  ;;  %17159 = vmatmul.mubr.msk.f32.gmra.mrb[34].mxu1 %vm24862_vm12, %v6804_v18  ;;  %vm24869_vm12 = vmmov %vm24860_vm3 }
 0xe82   :  { %v6789_v40 = vadd.f32 %v22005_v28, %v6729_v52  ;;  %v6734_v35 = vadd.f32 %v21879_v25, %v15388_v50 }
 0xe84   :  { %v6805_v15 = vmax.f32 %v6789_v40, 0.0  ;;  %v6790_v2 = vadd.f32 %v22005_v28, %v6734_v35  ;;  %v15389_v59 = vpop.f32.mrb[4].mxu0 }
 0xe85   :  { %v15390_v9 = vpop.f32.mrb[5].mxu0 }
 0xe86   :  { %v6806_v58 = vmax.f32 %v6790_v2, 0.0  ;;  %v15391_v21 = vadd.f32 %v15390_v9, %v15389_v59  ;;  %v15392_v53 = vpop.f32.mrb[6].mxu0  ;;  %17161 = vmatprep.mubr.msk.f32.mxu1 %vm24863_vm13, %v6805_v15  ;;  %vm24871_vm13 = vmmov %vm24860_vm3 }
 0xe87   :  { %v15393_v16 = vpop.f32.mrb[7].mxu0 }
 0xe88   :  { %v6739_v4 = vadd.f32 %v15391_v21, %v21888_v8  ;;  %v15394_v17 = vadd.f32 %v15393_v16, %v15392_v53  ;;  %17162 = vmatmul.mubr.msk.f32.gmra.mrb[36].mxu1 %vm24864_vm14, %v6806_v58  ;;  %vm24872_vm14 = vmmov %vm24860_vm3 }
 0xe8a   :  { %v6791_v49 = vadd.f32 %v22005_v28, %v6739_v4  ;;  %v6744_v25 = vadd.f32 %v21886_v60, %v15394_v17 }
 0xe8c   :  { %v6807_v0 = vmax.f32 %v6791_v49, 0.0  ;;  %v6792_v44 = vadd.f32 %v22005_v28, %v6744_v25  ;;  %v15395_v41 = vpop.f32.mrb[8].mxu0 }
 0xe8d   :  { %v15396_v55 = vpop.f32.mrb[9].mxu0 }
 0xe8e   :  { %v6808_v19 = vmax.f32 %v6792_v44, 0.0  ;;  %v15397_v18 = vadd.f32 %v15396_v55, %v15395_v41  ;;  %v15398_v6 = vpop.f32.mrb[10].mxu0  ;;  %17164 = vmatprep.mubr.msk.f32.mxu1 %vm24865_vm9, %v6807_v0  ;;  %vm24873_vm9 = vmmov %vm24860_vm3 }
 0xe8f   :  { %v15399_v10 = vpop.f32.mrb[11].mxu0 }
 0xe90   :  { %v6749_v8 = vadd.f32 %v15397_v18, %v21895_v30  ;;  %v15400_v42 = vadd.f32 %v15399_v10, %v15398_v6  ;;  %17165 = vmatmul.mubr.msk.f32.gmra.mrb[38].mxu1 %vm24866_vm6, %v6808_v19  ;;  %vm24874_vm6 = vcmask 1044480  }
 0xe92   :  { %v6793_v52 = vadd.f32 %v22005_v28, %v6749_v8  ;;  %v6754_v60 = vadd.f32 %v21893_v11, %v15400_v42  ;;  %v538_v8 = vld [vmem:[%s24868_s0] sm:$0x1f]  ;;  %v22060_v42 = vld [vmem:[#allocation13] ss:$0 sm:$0xff] }
 0xe93   :  { %17226 = vmatprep.subr.msk.mxu1 %vm24874_vm6, %v538_v8 }
 0xe94   :  { %v6809_v50 = vmax.f32 %v6793_v52, 0.0  ;;  %v6794_v40 = vadd.f32 %v22005_v28, %v6754_v60  ;;  %v15401_v35 = vpop.f32.mrb[12].mxu0 }
 0xe95   :  { %v15402_v15 = vpop.f32.mrb[13].mxu0 }
 0xe96   :  { %v6810_v2 = vmax.f32 %v6794_v40, 0.0  ;;  %v15403_v59 = vadd.f32 %v15402_v15, %v15401_v35  ;;  %v15404_v9 = vpop.f32.mrb[14].mxu0  ;;  %17167 = vmatprep.mubr.msk.f32.mxu1 %vm24860_vm3, %v6809_v50  ;;  %vm24875_vm3 = vmmov %vm24874_vm6  ;;  %v7014_v40 = vmul.f32 0.5, %v21360_v61  ;;  %v7015_v15 = vmul.f32 0.5, %v21362_v39 }
 0xe97   :  { %v15405_v58 = vpop.f32.mrb[15].mxu0  ;;  %17227 = vmatpush3.msk.msra.mxu1 %vm24875_vm3, %v538_v8  ;;  %v24886_v8 = vld [vmem:[#allocation132_spill] sm:$0xff] }
 0xe98   :  { %v6759_v30 = vadd.f32 %v15403_v59, %v21902_v43  ;;  %v15406_v21 = vadd.f32 %v15405_v58, %v15404_v9  ;;  %17168 = vmatmul.mubr.msk.f32.gmra.mrb[40].mxu1 %vm24867_vm4, %v6810_v2  ;;  %vm24877_vm4 = vmmov %vm24875_vm3  ;;  %v22073_v58 = vld [vmem:[%s24876_s9] sm:$0xf] }
 0xe9a   :  { %v6795_v53 = vadd.f32 %v22005_v28, %v6759_v30  ;;  %v6764_v11 = vadd.f32 %v21900_v45, %v15406_v21 }
 0xe9c   :  { %v6811_v16 = vmax.f32 %v6795_v53, 0.0  ;;  %v6796_v4 = vadd.f32 %v22005_v28, %v6764_v11  ;;  %v15407_v17 = vpop.f32.mrb[16].mxu0  ;;  %v7016_v53 = vmul.f32 0.5, %v21373_v54 }
 0xe9d   :  { %v15408_v49 = vpop.f32.mrb[17].mxu0 }
 0xe9e   :  { %v6812_v25 = vmax.f32 %v6796_v4, 0.0  ;;  %v15409_v0 = vadd.f32 %v15408_v49, %v15407_v17  ;;  %v15410_v44 = vpop.f32.mrb[18].mxu0  ;;  %17170 = vmatprep.mubr.msk.f32.mxu1 %vm24869_vm12, %v6811_v16  ;;  %vm24878_vm12 = vcmask 39936   ;;  %v7017_v16 = vmul.f32 0.5, %v21375_v1 }
 0xe9f   :  { %v15411_v43 = vpop.f32.mrb[19].mxu0  ;;  %vm24882_vm6 = vmmov %vm24878_vm12 }
 0xea0   :  { %v6769_v41 = vadd.f32 %v15409_v0, %v21909_v51  ;;  %v15412_v55 = vadd.f32 %v15411_v43, %v15410_v44  ;;  %17171 = vmatmul.mubr.msk.f32.gmra.mrb[42].mxu1 %vm24871_vm13, %v6812_v25  ;;  %v539_v51 = vld [vmem:[%s24870_s12] sm:$0x1f]  ;;  %vm24879_vm13 = vmmov %vm24878_vm12  ;;  %v7018_v43 = vmul.f32 0.5, %v21385_v27 }
 0xea1   :  { %17252 = vmatprep.subr.msk.mxu1 %vm24877_vm4, %v539_v51 }
 0xea2   :  { %v6797_v45 = vadd.f32 %v22005_v28, %v6769_v41  ;;  %v6774_v19 = vadd.f32 %v21907_v7, %v15412_v55  ;;  %v7019_v41 = vmul.f32 0.5, %v21387_v33 }
 0xea4   :  { %v6813_v18 = vmax.f32 %v6797_v45, 0.0  ;;  %v6798_v6 = vadd.f32 %v22005_v28, %v6774_v19 }
 0xea6   :  { %v6814_v10 = vmax.f32 %v6798_v6, 0.0  ;;  %17173 = vmatprep.mubr.msk.f32.mxu1 %vm24872_vm14, %v6813_v18  ;;  %vm24880_vm14 = vmmov %vm24875_vm3 }
 0xea7   :  { %vm24883_vm3 = vmmov %vm24882_vm6 }
 0xea8   :  { %17174 = vmatmul.mubr.msk.f32.gmra.mrb[44].mxu1 %vm24873_vm9, %v6814_v10  ;;  %vm24881_vm9 = vcmask 1043456   ;;  %vm24884_vm4 = vmmov %vm24883_vm3 }
 0xf43   :  { %v17154_v7 = vpop.f32.mrb[30].mxu1 }
 0xf44   :  { %v6941_v52 = vadd.f32 %v17154_v7, %v22060_v42  ;;  %v6935_v28 = vpop.f32.mrb[31].mxu1  ;;  %v24887_v7 = vld [vmem:[#allocation131_spill] sm:$0xff] }
 0xf45   :  { %v6936_v60 = vadd.f32 %v22060_v42, %v6935_v28 }
 0xf46   :  { %v7031_v50 = vmul.f32 0.5, %v6941_v52  ;;  %v7021_v52 = vmul.f32 0.5, %v24887_v7 }
 0xf47   :  { %v7030_v35 = vmul.f32 0.5, %v6936_v60 }
 0xf48   :  { %v22068_v59 = vadd.f32 %v7031_v50, %v7015_v15 }
 0xf49   :  { %v22066_v2 = vadd.f32 %v7030_v35, %v7014_v40 }
 0xf4b   :  { %v17157_v9 = vpop.f32.mrb[32].mxu1  ;;  %17228 = vmatprep.mubr.msk.f32.mxu1 %vm24878_vm12, %v22066_v2  ;;  %vm24885_vm12 = vmmov %vm24883_vm3 }
 0xf4c   :  { %v6951_v30 = vadd.f32 %v17157_v9, %v22060_v42  ;;  %v6945_v21 = vpop.f32.mrb[33].mxu1  ;;  %17229 = vmatmul.mubr.msk.f32.vlgmr.msra.gmra.mrb[46].mxu1 %vm24879_vm13, %v22068_v59  ;;  %vm24888_vm13 = vmmov %vm24883_vm3 }
 0xf4d   :  { %v6946_v61 = vadd.f32 %v22060_v42, %v6945_v21  ;;  %17253 = vmatpush3.msk.msra.mxu1 %vm24880_vm14, %v539_v51  ;;  %v7020_v51 = vmul.f32 0.5, %v24886_v8  ;;  %vm24889_vm14 = vmmov %vm24883_vm3 }
 0xf4e   :  { %v7033_v39 = vmul.f32 0.5, %v6951_v30  ;;  %17374 = vmatprep.subr.msk.mxu1 %vm24881_vm9, %v22073_v58  ;;  %v24890_v30 = vld [vmem:[#allocation134_spill] sm:$0xff]  ;;  %vm24892_vm9 = vmmov %vm24883_vm3 }
 0xf4f   :  { %v7032_v11 = vmul.f32 0.5, %v6946_v61  ;;  %v7022_v21 = vmul.f32 0.5, %v24890_v30 }
 0xf50   :  { %v22086_v17 = vadd.f32 %v7033_v39, %v7017_v16  ;;  %v24891_v39 = vld [vmem:[#allocation133_spill] sm:$0xff] }
 0xf51   :  { %v22084_v4 = vadd.f32 %v7032_v11, %v7016_v53  ;;  %v7023_v53 = vmul.f32 0.5, %v24891_v39 }
 0xf53   :  { %v17160_v49 = vpop.f32.mrb[34].mxu1  ;;  %17231 = vmatprep.mubr.msk.f32.mxu1 %vm24882_vm6, %v22084_v4  ;;  %vm24893_vm6 = vmmov %vm24883_vm3 }
 0xf54   :  { %v6961_v25 = vadd.f32 %v17160_v49, %v22060_v42  ;;  %v6955_v0 = vpop.f32.mrb[35].mxu1  ;;  %17232 = vmatmul.mubr.msk.f32.gmra.mrb[48].mxu1 %vm24883_vm3, %v22086_v17 }
 0xf55   :  { %v6956_v44 = vadd.f32 %v22060_v42, %v6955_v0 }
 0xf56   :  { %v7035_v54 = vmul.f32 0.5, %v6961_v25 }
 0xf57   :  { %v7034_v1 = vmul.f32 0.5, %v6956_v44 }
 0xf58   :  { %v22098_v45 = vadd.f32 %v7035_v54, %v7019_v41 }
 0xf59   :  { %v22096_v55 = vadd.f32 %v7034_v1, %v7018_v43  ;;  %v24894_v43 = vld [vmem:[#allocation136_spill] sm:$0xff] }
 0xf5a   :  { %v7024_v1 = vmul.f32 0.5, %v24894_v43 }
 0xf5b   :  { %v17163_v19 = vpop.f32.mrb[36].mxu1  ;;  %17234 = vmatprep.mubr.msk.f32.mxu1 %vm24884_vm4, %v22096_v55  ;;  %vm24896_vm4 = vmmov %vm24883_vm3 }
 0xf5c   :  { %v6971_v18 = vadd.f32 %v17163_v19, %v22060_v42  ;;  %v6965_v6 = vpop.f32.mrb[37].mxu1  ;;  %17235 = vmatmul.mubr.msk.f32.gmra.mrb[50].mxu1 %vm24885_vm12, %v22098_v45  ;;  %v24895_v19 = vld [vmem:[#allocation135_spill] sm:$0xff]  ;;  %vm24899_vm12 = vmmov %vm24883_vm3 }
 0xf5d   :  { %v6966_v10 = vadd.f32 %v22060_v42, %v6965_v6 }
 0xf5e   :  { %v7037_v27 = vmul.f32 0.5, %v6971_v18  ;;  %v7025_v18 = vmul.f32 0.5, %v24895_v19 }
 0xf5f   :  { %v7036_v33 = vmul.f32 0.5, %v6966_v10 }
 0xf60   :  { %v22110_v60 = vadd.f32 %v7037_v27, %v7021_v52  ;;  %v24897_v52 = vld [vmem:[#allocation87_spill] sm:$0xff] }
 0xf61   :  { %v22108_v28 = vadd.f32 %v7036_v33, %v7020_v51 }
 0xf63   :  { %v17166_v50 = vpop.f32.mrb[38].mxu1  ;;  %17237 = vmatprep.mubr.msk.f32.mxu1 %vm24888_vm13, %v22108_v28  ;;  %vm24900_vm13 = vmmov %vm24883_vm3 }
 0xf64   :  { %v6981_v40 = vadd.f32 %v17166_v50, %v22060_v42  ;;  %v6975_v35 = vpop.f32.mrb[39].mxu1  ;;  %17238 = vmatmul.mubr.msk.f32.gmra.mrb[52].mxu1 %vm24889_vm14, %v22110_v60  ;;  %v7026_v50 = vmul.f32 0.5, %v24897_v52  ;;  %vm24903_vm14 = vmmov %vm24883_vm3 }
 0xf65   :  { %v6976_v15 = vadd.f32 %v22060_v42, %v6975_v35  ;;  %v24898_v35 = vld [vmem:[#allocation88_spill] sm:$0xff] }
 0xf66   :  { %v7039_v9 = vmul.f32 0.5, %v6981_v40 }
 0xf67   :  { %v7038_v61 = vmul.f32 0.5, %v6976_v15  ;;  %v7027_v15 = vmul.f32 0.5, %v24898_v35 }
 0xf68   :  { %v22122_v16 = vadd.f32 %v7039_v9, %v7023_v53 }
 0xf69   :  { %v22120_v11 = vadd.f32 %v7038_v61, %v7022_v21 }
 0xf6b   :  { %v17169_v49 = vpop.f32.mrb[40].mxu1  ;;  %17240 = vmatprep.mubr.msk.f32.mxu1 %vm24892_vm9, %v22120_v11  ;;  %vm24904_vm9 = vmmov %vm24883_vm3 }
 0xf6c   :  { %v6991_v25 = vadd.f32 %v17169_v49, %v22060_v42  ;;  %v6985_v0 = vpop.f32.mrb[41].mxu1  ;;  %17241 = vmatmul.mubr.msk.f32.gmra.mrb[54].mxu1 %vm24893_vm6, %v22122_v16  ;;  %vm24905_vm6 = vmmov %vm24883_vm3 }
 0xf6d   :  { %v6986_v44 = vadd.f32 %v22060_v42, %v6985_v0 }
 0xf6e   :  { %v7041_v54 = vmul.f32 0.5, %v6991_v25  ;;  %v24901_v25 = vld [vmem:[#allocation101_spill] sm:$0xff] }
 0xf6f   :  { %v7040_v41 = vmul.f32 0.5, %v6986_v44  ;;  %v7028_v0 = vmul.f32 0.5, %v24901_v25 }
 0xf70   :  { %v22134_v10 = vadd.f32 %v7041_v54, %v7025_v18  ;;  %v24902_v54 = vld [vmem:[#allocation89_spill] sm:$0xff] }
 0xf71   :  { %v22132_v6 = vadd.f32 %v7040_v41, %v7024_v1  ;;  %v7029_v43 = vmul.f32 0.5, %v24902_v54 }
 0xf73   :  { %v17172_v27 = vpop.f32.mrb[42].mxu1  ;;  %17243 = vmatprep.mubr.msk.f32.mxu1 %vm24883_vm3, %v22132_v6 }
 0xf74   :  { %v7001_v8 = vadd.f32 %v17172_v27, %v22060_v42  ;;  %v6995_v51 = vpop.f32.mrb[43].mxu1  ;;  %17244 = vmatmul.mubr.msk.f32.gmra.mrb[56].mxu1 %vm24896_vm4, %v22134_v10  ;;  %vm24906_vm4 = vmmov %vm24883_vm3 }
 0xf75   :  { %v6996_v33 = vadd.f32 %v22060_v42, %v6995_v51 }
 0xf76   :  { %v7043_v7 = vmul.f32 0.5, %v7001_v8 }
 0xf77   :  { %v7042_v40 = vmul.f32 0.5, %v6996_v33 }
 0xf78   :  { %v22146_v30 = vadd.f32 %v7043_v7, %v7027_v15 }
 0xf79   :  { %v22144_v9 = vadd.f32 %v7042_v40, %v7026_v50 }
 0xf7b   :  { %v17175_v21 = vpop.f32.mrb[44].mxu1  ;;  %17246 = vmatprep.mubr.msk.f32.mxu1 %vm24899_vm12, %v22144_v9  ;;  %vm24907_vm12 = vcmask 1043456  }
 0xf7c   :  { %v7011_v61 = vadd.f32 %v17175_v21, %v22060_v42  ;;  %v7005_v39 = vpop.f32.mrb[45].mxu1  ;;  %17247 = vmatmul.mubr.msk.f32.gmra.mrb[58].mxu1 %vm24900_vm13, %v22146_v30  ;;  %vm24908_vm13 = vmmov %vm24883_vm3 }
 0xf7d   :  { %v7006_v53 = vadd.f32 %v22060_v42, %v7005_v39 }
 0xf7e   :  { %v7045_v49 = vmul.f32 0.5, %v7011_v61 }
 0xf7f   :  { %v7044_v44 = vmul.f32 0.5, %v7006_v53 }
 0xf80   :  { %v22158_v41 = vadd.f32 %v7045_v49, %v7029_v43 }
 0xf81   :  { %v22156_v1 = vadd.f32 %v7044_v44, %v7028_v0 }
 0xf83   :  { %17249 = vmatprep.mubr.msk.f32.mxu1 %vm24903_vm14, %v22156_v1  ;;  %vm24909_vm14 = vmmov %vm24883_vm3 }
 0xf84   :  { %17250 = vmatmul.mubr.msk.f32.gmra.mrb[60].mxu1 %vm24904_vm9, %v22158_v41  ;;  %vm24910_vm9 = vmmov %vm24883_vm3 }
 0xf85   :  { %17254 = vmatprep.mubr.msk.f32.mxu1 %vm24905_vm6, %v22066_v2  ;;  %vm24911_vm6 = vmmov %vm24883_vm3 }
 0xf88   :  { %17255 = vmatmul.mubr.msk.f32.vlgmr.msra.gmra.mrb[62].mxu1 %vm24883_vm3, %v22068_v59 }
 0xf89   :  { %17257 = vmatprep.mubr.msk.f32.mxu1 %vm24906_vm4, %v22084_v4  ;;  %17375 = vmatpush3.msk.msra.mxu1 %vm24907_vm12, %v22073_v58  ;;  %vm24912_vm4 = vmmov %vm24883_vm3 }
 0xf8a   :  { %vm24913_vm12 = vmmov %vm24883_vm3 }
 0xf8c   :  { %17258 = vmatmul.mubr.msk.f32.gmra.mrb[64].mxu1 %vm24908_vm13, %v22086_v17  ;;  %vm24914_vm13 = vmmov %vm24883_vm3 }
 0xf8d   :  { %17260 = vmatprep.mubr.msk.f32.mxu1 %vm24909_vm14, %v22096_v55  ;;  %vm24915_vm14 = vmmov %vm24883_vm3 }
 0xf90   :  { %17261 = vmatmul.mubr.msk.f32.gmra.mrb[66].mxu1 %vm24910_vm9, %v22098_v45  ;;  %vm24916_vm9 = vmmov %vm24883_vm3 }
 0xf91   :  { %17263 = vmatprep.mubr.msk.f32.mxu1 %vm24911_vm6, %v22108_v28  ;;  %vm24917_vm6 = vmmov %vm24883_vm3 }
 0xf94   :  { %17264 = vmatmul.mubr.msk.f32.gmra.mrb[68].mxu1 %vm24883_vm3, %v22110_v60 }
 0xf95   :  { %17266 = vmatprep.mubr.msk.f32.mxu1 %vm24912_vm4, %v22120_v11  ;;  %vm24918_vm4 = vmmov %vm24883_vm3 }
 0xf98   :  { %17267 = vmatmul.mubr.msk.f32.gmra.mrb[70].mxu1 %vm24913_vm12, %v22122_v16  ;;  %vm24919_vm12 = vcmask 31744  }
 0xf99   :  { %17269 = vmatprep.mubr.msk.f32.mxu1 %vm24914_vm13, %v22132_v6  ;;  %vm24920_vm13 = vmmov %vm24919_vm12 }
 0xf9c   :  { %17270 = vmatmul.mubr.msk.f32.gmra.mrb[72].mxu1 %vm24915_vm14, %v22134_v10  ;;  %vm24921_vm14 = vmmov %vm24919_vm12 }
 0xf9d   :  { %17272 = vmatprep.mubr.msk.f32.mxu1 %vm24916_vm9, %v22144_v9  ;;  %vm24922_vm9 = vmmov %vm24919_vm12 }
 0xfa0   :  { %17273 = vmatmul.mubr.msk.f32.gmra.mrb[74].mxu1 %vm24917_vm6, %v22146_v30  ;;  %vm24923_vm6 = vmmov %vm24922_vm9 }
 0xfa1   :  { %17275 = vmatprep.mubr.msk.f32.mxu1 %vm24883_vm3, %v22156_v1  ;;  %vm24924_vm3 = vmmov %vm24923_vm6 }
 0xfa4   :  { %17276 = vmatmul.mubr.msk.f32.gmra.mrb[76].mxu1 %vm24918_vm4, %v22158_v41  ;;  %vm24925_vm4 = vmmov %vm24924_vm3 }
 0xfa5   :  { %17376 = vmatprep.mubr.msk.f32.mxu1 %vm24919_vm12, %v21663_v36  ;;  %vm24926_vm12 = vmmov %vm24924_vm3  ;;  %v24941_v36 = vld [vmem:[#allocation90_spill] sm:$0xff] }
 0xfa8   :  { %17377 = vmatmul.mubr.msk.f32.vlgmr.msra.gmra.mrb[78].mxu1 %vm24920_vm13, %v21666_v63  ;;  %vm24927_vm13 = vmmov %vm24924_vm3  ;;  %v24943_v63 = vld [vmem:[#allocation91_spill] sm:$0xff] }
 0xfa9   :  { %17379 = vmatprep.mubr.msk.f32.mxu1 %vm24921_vm14, %v21673_v29  ;;  %vm24928_vm14 = vmmov %vm24924_vm3  ;;  %v24945_v29 = vld [vmem:[#allocation92_spill] sm:$0xff] }
 0xfac   :  { %17380 = vmatmul.mubr.msk.f32.gmra.mrb[80].mxu1 %vm24922_vm9, %v21677_v24  ;;  %vm24929_vm9 = vmmov %vm24924_vm3  ;;  %v24946_v24 = vld [vmem:[#allocation93_spill] sm:$0xff] }
 0xfad   :  { %17382 = vmatprep.mubr.msk.f32.mxu1 %vm24923_vm6, %v21684_v3  ;;  %vm24930_vm6 = vmmov %vm24924_vm3  ;;  %v24948_v3 = vld [vmem:[#allocation94_spill] sm:$0xff] }
 0xfb0   :  { %17383 = vmatmul.mubr.msk.f32.gmra.mrb[82].mxu1 %vm24924_vm3, %v21687_v20  ;;  %v24950_v20 = vld [vmem:[#allocation95_spill] sm:$0xff] }
 0xfb1   :  { %17385 = vmatprep.mubr.msk.f32.mxu1 %vm24925_vm4, %v21694_v22  ;;  %vm24931_vm4 = vmmov %vm24924_vm3  ;;  %v24952_v22 = vld [vmem:[#allocation96_spill] sm:$0xff] }
 0xfb4   :  { %17386 = vmatmul.mubr.msk.f32.gmra.mrb[84].mxu1 %vm24926_vm12, %v21697_v48  ;;  %vm24932_vm12 = vmmov %vm24924_vm3  ;;  %v24954_v48 = vld [vmem:[#allocation97_spill] sm:$0xff] }
 0xfb5   :  { %17388 = vmatprep.mubr.msk.f32.mxu1 %vm24927_vm13, %v21704_v5  ;;  %vm24933_vm13 = vmmov %vm24924_vm3 }
 0xfb8   :  { %17389 = vmatmul.mubr.msk.f32.gmra.mrb[86].mxu1 %vm24928_vm14, %v21707_v46  ;;  %vm24934_vm14 = vmmov %vm24924_vm3 }
 0xfb9   :  { %17391 = vmatprep.mubr.msk.f32.mxu1 %vm24929_vm9, %v21714_v23  ;;  %vm24935_vm9 = vmmov %vm24924_vm3 }
 0xfbc   :  { %17392 = vmatmul.mubr.msk.f32.gmra.mrb[88].mxu1 %vm24930_vm6, %v21717_v57  ;;  %vm24936_vm6 = vmmov %vm24924_vm3 }
 0xfbd   :  { %17394 = vmatprep.mubr.msk.f32.mxu1 %vm24924_vm3, %v21724_v26 }
 0xfc0   :  { %17395 = vmatmul.mubr.msk.f32.gmra.mrb[90].mxu1 %vm24931_vm4, %v21727_v38  ;;  %vm24937_vm4 = vmmov %vm24924_vm3 }
 0xfc1   :  { %17397 = vmatprep.mubr.msk.f32.mxu1 %vm24932_vm12, %v21734_v32  ;;  %vm24938_vm12 = vmmov %vm24924_vm3 }
 0xfc4   :  { %17398 = vmatmul.mubr.msk.f32.gmra.mrb[92].mxu1 %vm24933_vm13, %v21737_v13  ;;  %vm24939_vm13 = vmmov %vm24924_vm3 }
 0xfc5   :  { %17400 = vmatprep.mubr.msk.f32.mxu1 %vm24934_vm14, %v21744_v34  ;;  %vm24940_vm14 = vmmov %vm24924_vm3 }
 0xfc8   :  { %17401 = vmatmul.mubr.msk.f32.gmra.mrb[94].mxu1 %vm24935_vm9, %v21747_v14  ;;  %vm24942_vm9 = vmmov %vm24924_vm3 }
 0xfc9   :  { %17403 = vmatprep.mubr.msk.f32.mxu1 %vm24936_vm6, %v21754_v37  ;;  %vm24944_vm6 = vmmov %vm24924_vm3 }
 0xfcc   :  { %17404 = vmatmul.mubr.msk.f32.gmra.mrb[96].mxu1 %vm24924_vm3, %v21757_v31 }
 0xfcd   :  { %17406 = vmatprep.mubr.msk.f32.mxu1 %vm24937_vm4, %v21764_v12  ;;  %vm24947_vm4 = vmmov %vm24924_vm3 }
 0xfd0   :  { %17407 = vmatmul.mubr.msk.f32.gmra.mrb[98].mxu1 %vm24938_vm12, %v21767_v56  ;;  %vm24949_vm12 = vmmov %vm24924_vm3 }
 0xfd1   :  { %17409 = vmatprep.mubr.msk.f32.mxu1 %vm24939_vm13, %v21774_v47  ;;  %vm24951_vm13 = vmmov %vm24924_vm3 }
 0xfd4   :  { %17410 = vmatmul.mubr.msk.f32.gmra.mrb[100].mxu1 %vm24940_vm14, %v21777_v62  ;;  %vm24953_vm14 = vmmov %vm24924_vm3 }
 0xfd5   :  { %17412 = vmatprep.mubr.msk.f32.mxu1 %vm24942_vm9, %v24941_v36  ;;  %vm24955_vm9 = vmmov %vm24924_vm3 }
 0xfd8   :  { %17413 = vmatmul.mubr.msk.f32.gmra.mrb[102].mxu1 %vm24944_vm6, %v24943_v63  ;;  %vm24989_vm6 = vcmask 1043456  }
 0xfd9   :  { %17415 = vmatprep.mubr.msk.f32.mxu1 %vm24924_vm3, %v24945_v29  ;;  %vm24990_vm3 = vmmov %vm24989_vm6 }
 0xfdc   :  { %17416 = vmatmul.mubr.msk.f32.gmra.mrb[104].mxu1 %vm24947_vm4, %v24946_v24  ;;  %vm24991_vm4 = vcmask 326656  }
 0xfdd   :  { %17418 = vmatprep.mubr.msk.f32.mxu1 %vm24949_vm12, %v24948_v3  ;;  %vm24992_vm12 = vmmov %vm24991_vm4 }
 0xfe0   :  { %17419 = vmatmul.mubr.msk.f32.gmra.mrb[106].mxu1 %vm24951_vm13, %v24950_v20  ;;  %vm24993_vm13 = vmmov %vm24991_vm4 }
 0xfe1   :  { %17421 = vmatprep.mubr.msk.f32.mxu1 %vm24953_vm14, %v24952_v22  ;;  %v542_v22 = vld [vmem:[%s24956_s25] sm:$0xff]  ;;  %vm24994_vm14 = vmmov %vm24991_vm4 }
 0xfe4   :  { %17422 = vmatmul.mubr.msk.f32.gmra.mrb[108].mxu1 %vm24955_vm9, %v24954_v48  ;;  %v543_v48 = vld [vmem:[%s24956_s25 + $0x8] sm:$0xff]  ;;  %vm24995_vm9 = vmmov %vm24991_vm4 }
0x101f   :  { %v17230_v5 = vpop.f32.mrb[46].mxu1 }
0x1020   :  { %v7439_v46 = vpop.f32.mrb[47].mxu1 }
0x1021   :  { %v22262_v23 = vpack.c.bf16 %v17230_v5, %v7439_v46  ;;  %v18194_v46 = vpack.c.bf16 %v543_v48, %v542_v22  ;;  %v24971_v48 = vld [vmem:[#allocation153_spill] sm:$0xff] }
0x1023   :  { %18195 = vmatprep.subr.bf16.mxu1 %v18194_v46 }
0x1024   :  { %18197 = vmatpush3.bf16.msra.mxu1 %v18194_v46  ;;  %v24972_v46 = vld [vmem:[#allocation150_spill] sm:$0xff] }
0x1027   :  { %v17233_v57 = vpop.f32.mrb[48].mxu1 }
0x1028   :  { %v7449_v26 = vpop.f32.mrb[49].mxu1 }
0x1029   :  { %v22264_v38 = vpack.c.bf16 %v17233_v57, %v7449_v26 }
0x102f   :  { %v17236_v32 = vpop.f32.mrb[50].mxu1 }
0x1030   :  { %v7459_v13 = vpop.f32.mrb[51].mxu1 }
0x1031   :  { %v22266_v34 = vpack.c.bf16 %v17236_v32, %v7459_v13  ;;  %v24957_v13 = vld [vmem:[#allocation137_spill] sm:$0xff] }
0x1037   :  { %v17239_v14 = vpop.f32.mrb[52].mxu1 }
0x1038   :  { %v7469_v37 = vpop.f32.mrb[53].mxu1 }
0x1039   :  { %v22268_v31 = vpack.c.bf16 %v17239_v14, %v7469_v37  ;;  %v24958_v37 = vld [vmem:[#allocation138_spill] sm:$0xff] }
0x103f   :  { %v17242_v12 = vpop.f32.mrb[54].mxu1 }
0x1040   :  { %v7479_v56 = vpop.f32.mrb[55].mxu1 }
0x1041   :  { %v22270_v47 = vpack.c.bf16 %v17242_v12, %v7479_v56 }
0x1047   :  { %v17245_v62 = vpop.f32.mrb[56].mxu1 }
0x1048   :  { %v7489_v42 = vpop.f32.mrb[57].mxu1 }
0x1049   :  { %v22272_v58 = vpack.c.bf16 %v17245_v62, %v7489_v42  ;;  %v24959_v42 = vld [vmem:[#allocation139_spill] sm:$0xff] }
0x104f   :  { %v17248_v19 = vpop.f32.mrb[58].mxu1 }
0x1050   :  { %v7499_v18 = vpop.f32.mrb[59].mxu1 }
0x1051   :  { %v22274_v27 = vpack.c.bf16 %v17248_v19, %v7499_v18  ;;  %v24960_v18 = vld [vmem:[#allocation140_spill] sm:$0xff] }
0x1057   :  { %v17251_v8 = vpop.f32.mrb[60].mxu1 }
0x1058   :  { %v7509_v51 = vpop.f32.mrb[61].mxu1 }
0x1059   :  { %v22276_v33 = vpack.c.bf16 %v17251_v8, %v7509_v51  ;;  %v24961_v51 = vld [vmem:[#allocation141_spill] sm:$0xff] }
0x105b   :  { %v17256_v7 = vpop.f32.mrb[62].mxu1 }
0x105c   :  { %v7587_v52 = vpop.f32.mrb[63].mxu1 }
0x105d   :  { %v7674_v50 = vpack.c.bf16 %v17256_v7, %v7587_v52  ;;  %v24962_v52 = vld [vmem:[#allocation143_spill] sm:$0xff] }
0x105f   :  { %v17259_v40 = vpop.f32.mrb[64].mxu1  ;;  %17278 = vmatprep.subr.bf16.mxu0 %v7674_v50 }
0x1060   :  { %v7597_v35 = vpop.f32.mrb[65].mxu1  ;;  %17279 = vmatpush3.bf16.msra.mxu0 %v7674_v50 }
0x1061   :  { %v7675_v15 = vpack.c.bf16 %v17259_v40, %v7597_v35  ;;  %v24963_v40 = vld [vmem:[#allocation145_spill] sm:$0xff] }
0x1063   :  { %v17262_v21 = vpop.f32.mrb[66].mxu1  ;;  %17280 = vmatprep.subr.bf16.mxu0 %v7675_v15 }
0x1064   :  { %v7607_v61 = vpop.f32.mrb[67].mxu1  ;;  %17281 = vmatpush3.bf16.msra.mxu0 %v7675_v15  ;;  %v24964_v15 = vld [vmem:[#allocation142_spill] sm:$0xff] }
0x1065   :  { %v7676_v39 = vpack.c.bf16 %v17262_v21, %v7607_v61  ;;  %v24965_v61 = vld [vmem:[#allocation144_spill] sm:$0xff] }
0x1067   :  { %v17265_v53 = vpop.f32.mrb[68].mxu1  ;;  %17282 = vmatprep.subr.bf16.mxu0 %v7676_v39 }
0x1068   :  { %v7617_v49 = vpop.f32.mrb[69].mxu1  ;;  %17283 = vmatpush3.bf16.msra.mxu0 %v7676_v39 }
0x1069   :  { %v7677_v25 = vpack.c.bf16 %v17265_v53, %v7617_v49  ;;  %v24966_v53 = vld [vmem:[#allocation146_spill] sm:$0xff] }
0x106b   :  { %v17268_v0 = vpop.f32.mrb[70].mxu1  ;;  %17284 = vmatprep.subr.bf16.mxu0 %v7677_v25 }
0x106c   :  { %v7627_v44 = vpop.f32.mrb[71].mxu1  ;;  %17285 = vmatpush3.bf16.msra.mxu0 %v7677_v25 }
0x106d   :  { %v7678_v54 = vpack.c.bf16 %v17268_v0, %v7627_v44  ;;  %v24967_v0 = vld [vmem:[#allocation147_spill] sm:$0xff] }
0x106f   :  { %v17271_v43 = vpop.f32.mrb[72].mxu1  ;;  %17286 = vmatprep.subr.bf16.mxu0 %v7678_v54 }
0x1070   :  { %v7637_v36 = vpop.f32.mrb[73].mxu1  ;;  %17287 = vmatpush3.bf16.msra.mxu0 %v7678_v54  ;;  %v24968_v54 = vld [vmem:[#allocation148_spill] sm:$0xff] }
0x1071   :  { %v7679_v63 = vpack.c.bf16 %v17271_v43, %v7637_v36 }
0x1073   :  { %v17274_v29 = vpop.f32.mrb[74].mxu1  ;;  %17288 = vmatprep.subr.bf16.mxu0 %v7679_v63 }
0x1074   :  { %v7647_v24 = vpop.f32.mrb[75].mxu1  ;;  %17289 = vmatpush3.bf16.msra.mxu0 %v7679_v63  ;;  %v24969_v63 = vld [vmem:[#allocation149_spill] sm:$0xff] }
0x1075   :  { %v7680_v3 = vpack.c.bf16 %v17274_v29, %v7647_v24  ;;  %v24970_v24 = vld [vmem:[#allocation151_spill] sm:$0xff] }
0x1077   :  { %v17277_v20 = vpop.f32.mrb[76].mxu1  ;;  %17290 = vmatprep.subr.bf16.mxu0 %v7680_v3 }
0x1078   :  { %v7657_v5 = vpop.f32.mrb[77].mxu1  ;;  %17291 = vmatpush3.bf16.msra.mxu0 %v7680_v3 }
0x1079   :  { %v7681_v57 = vpack.c.bf16 %v17277_v20, %v7657_v5 }
0x107b   :  { %17292 = vmatprep.subr.bf16.mxu0 %v7681_v57  ;;  %v22280_v26 = vpop.f32.mrb[78].mxu1 }
0x107c   :  { %17293 = vmatpush3.bf16.msra.mxu0 %v7681_v57  ;;  %v22282_v32 = vpop.f32.mrb[79].mxu1 }
0x107d   :  { %17326 = vmatprep.subr.bf16.mxu0 %v22262_v23 }
0x107f   :  { %17295 = vmatmul.mubr.bf16.vlgmr.msra.gmra.mrb[20].mxu0 %v24957_v13  ;;  %v22286_v14 = vpop.f32.mrb[80].mxu1 }
0x1080   :  { %17298 = vmatprep.mubr.bf16.mxu0 %v24958_v37  ;;  %17327 = vmatpush3.bf16.msra.mxu0 %v22262_v23  ;;  %v22290_v12 = vpop.f32.mrb[81].mxu1 }
0x1081   :  { %17328 = vmatprep.subr.bf16.mxu0 %v22264_v38 }
0x1083   :  { %v22293_v56 = vpop.f32.mrb[82].mxu1 }
0x1084   :  { %17329 = vmatpush3.bf16.msra.mxu0 %v22264_v38  ;;  %v22296_v62 = vpop.f32.mrb[83].mxu1 }
0x1085   :  { %17330 = vmatprep.subr.bf16.mxu0 %v22266_v34 }
0x1087   :  { %17299 = vmatmul.mubr.bf16.gmra.mrb[24].mxu0 %v24959_v42  ;;  %v22300_v19 = vpop.f32.mrb[84].mxu1 }
0x1088   :  { %17302 = vmatprep.mubr.bf16.mxu0 %v24960_v18  ;;  %17331 = vmatpush3.bf16.msra.mxu0 %v22266_v34  ;;  %v22304_v23 = vpop.f32.mrb[85].mxu1 }
0x1089   :  { %17332 = vmatprep.subr.bf16.mxu0 %v22268_v31 }
0x108b   :  { %v22307_v8 = vpop.f32.mrb[86].mxu1 }
0x108c   :  { %17333 = vmatpush3.bf16.msra.mxu0 %v22268_v31  ;;  %v22310_v38 = vpop.f32.mrb[87].mxu1 }
0x108d   :  { %17334 = vmatprep.subr.bf16.mxu0 %v22270_v47 }
0x108f   :  { %17303 = vmatmul.mubr.bf16.gmra.mrb[28].mxu0 %v24961_v51  ;;  %v22314_v7 = vpop.f32.mrb[88].mxu1 }
0x1090   :  { %17306 = vmatprep.mubr.bf16.mxu0 %v24962_v52  ;;  %17335 = vmatpush3.bf16.msra.mxu0 %v22270_v47  ;;  %v22318_v34 = vpop.f32.mrb[89].mxu1  ;;  %v545_v52 = vld [vmem:[%s24956_s25 + $0x18] sm:$0xff] }
0x1091   :  { %17336 = vmatprep.subr.bf16.mxu0 %v22272_v58 }
0x1093   :  { %v22321_v50 = vpop.f32.mrb[90].mxu1 }
0x1094   :  { %17337 = vmatpush3.bf16.msra.mxu0 %v22272_v58  ;;  %v22324_v31 = vpop.f32.mrb[91].mxu1 }
0x1095   :  { %17338 = vmatprep.subr.bf16.mxu0 %v22274_v27 }
0x1097   :  { %17307 = vmatmul.mubr.bf16.gmra.mrb[32].mxu0 %v24963_v40  ;;  %v22328_v35 = vpop.f32.mrb[92].mxu1  ;;  %v24984_v40 = vld [vmem:[#allocation163_spill] sm:$0xff] }
0x1098   :  { %17310 = vmatprep.mubr.bf16.mxu0 %v24964_v15  ;;  %17339 = vmatpush3.bf16.msra.mxu0 %v22274_v27  ;;  %v22332_v47 = vpop.f32.mrb[93].mxu1  ;;  %v24981_v15 = vld [vmem:[#allocation160_spill] sm:$0xff] }
0x1099   :  { %17340 = vmatprep.subr.bf16.mxu0 %v22276_v33 }
0x109b   :  { %v22335_v21 = vpop.f32.mrb[94].mxu1 }
0x109c   :  { %17341 = vmatpush3.bf16.msra.mxu0 %v22276_v33  ;;  %v22338_v58 = vpop.f32.mrb[95].mxu1 }
0x109f   :  { %17311 = vmatmul.mubr.bf16.gmra.mrb[36].mxu0 %v24965_v61  ;;  %v22341_v39 = vpop.f32.mrb[96].mxu1  ;;  %v24978_v61 = vld [vmem:[#allocation159_spill] sm:$0xff] }
0x10a0   :  { %17314 = vmatprep.mubr.bf16.mxu0 %v24966_v53  ;;  %v22344_v49 = vpop.f32.mrb[97].mxu1  ;;  %v24977_v53 = vld [vmem:[#allocation157_spill] sm:$0xff] }
0x10a3   :  { %v22346_v25 = vpop.f32.mrb[98].mxu1 }
0x10a4   :  { %v22348_v27 = vpop.f32.mrb[99].mxu1 }
0x10a7   :  { %17315 = vmatmul.mubr.bf16.gmra.mrb[40].mxu0 %v24967_v0  ;;  %v22351_v44 = vpop.f32.mrb[100].mxu1  ;;  %v24976_v0 = vld [vmem:[#allocation156_spill] sm:$0xff] }
0x10a8   :  { %17318 = vmatprep.mubr.bf16.mxu0 %v24968_v54  ;;  %v22354_v33 = vpop.f32.mrb[101].mxu1  ;;  %v24973_v54 = vld [vmem:[#allocation152_spill] sm:$0xff] }
0x10ab   :  { %v22356_v43 = vpop.f32.mrb[102].mxu1 }
0x10ac   :  { %v22358_v36 = vpop.f32.mrb[103].mxu1 }
0x10af   :  { %17319 = vmatmul.mubr.bf16.gmra.mrb[44].mxu0 %v24969_v63  ;;  %v22361_v29 = vpop.f32.mrb[104].mxu1  ;;  %v24974_v63 = vld [vmem:[#allocation154_spill] sm:$0xff] }
0x10b0   :  { %17322 = vmatprep.mubr.bf16.mxu0 %v24970_v24  ;;  %v22364_v3 = vpop.f32.mrb[105].mxu1  ;;  %v24975_v24 = vld [vmem:[#allocation155_spill] sm:$0xff] }
0x10b3   :  { %v22366_v20 = vpop.f32.mrb[106].mxu1 }
0x10b4   :  { %v22368_v22 = vpop.f32.mrb[107].mxu1 }
0x10b7   :  { %17323 = vmatmul.mubr.bf16.gmra.mrb[48].mxu0 %v24971_v48  ;;  %v22371_v5 = vpop.f32.mrb[108].mxu1  ;;  %v24979_v48 = vld [vmem:[#allocation161_spill] sm:$0xff] }
0x10b8   :  { %17342 = vmatprep.mubr.bf16.mxu0 %v24972_v46  ;;  %v22374_v57 = vpop.f32.mrb[109].mxu1  ;;  %v24980_v46 = vld [vmem:[#allocation158_spill] sm:$0xff] }
0x10bf   :  { %17343 = vmatmul.mubr.bf16.vlgmr.msra.gmra.mrb[20].mxu0 %v24973_v54  ;;  %v24983_v54 = vld [vmem:[#allocation162_spill] sm:$0xff] }
0x10c0   :  { %17346 = vmatprep.mubr.bf16.mxu0 %v24974_v63  ;;  %v24985_v63 = vld [vmem:[#allocation164_spill] sm:$0xff] }
0x10c7   :  { %17347 = vmatmul.mubr.bf16.gmra.mrb[24].mxu0 %v24975_v24  ;;  %v24986_v24 = vld [vmem:[#allocation165_spill] sm:$0xff] }
0x10c8   :  { %17350 = vmatprep.mubr.bf16.mxu0 %v24976_v0  ;;  %v24987_v0 = vld [vmem:[#allocation166_spill] sm:$0xff] }
0x10cf   :  { %17351 = vmatmul.mubr.bf16.gmra.mrb[28].mxu0 %v24977_v53  ;;  %v24988_v53 = vld [vmem:[#allocation167_spill] sm:$0xff] }
0x10d0   :  { %17354 = vmatprep.mubr.bf16.mxu0 %v24978_v61  ;;  %v544_v61 = vld [vmem:[%s24956_s25 + $0x10] sm:$0xff] }
0x10d7   :  { %17355 = vmatmul.mubr.bf16.gmra.mrb[32].mxu0 %v24979_v48  ;;  %v18198_v48 = vpack.c.bf16 %v545_v52, %v544_v61 }
0x10d8   :  { %17358 = vmatprep.mubr.bf16.mxu0 %v24980_v46  ;;  %v546_v46 = vld [vmem:[%s24956_s25 + $0x20] sm:$0xff] }
0x10d9   :  { %18199 = vmatprep.subr.bf16.mxu1 %v18198_v48 }
0x10da   :  { %18201 = vmatpush3.bf16.msra.mxu1 %v18198_v48 }
0x10db   :  { %17432 = vmatprep.subr.mxu1 %v546_v46 }
0x10de   :  { %17433 = vmatpush3.msra.mxu1 %v546_v46 }
0x10df   :  { %17359 = vmatmul.mubr.bf16.gmra.mrb[36].mxu0 %v24981_v15  ;;  %v530_v15 = vld [vmem:[%s24982_s22] sm:$0xf] }
0x10e0   :  { %17362 = vmatprep.mubr.bf16.mxu0 %v24983_v54  ;;  %17482 = vmatprep.subr.msk.mxu0 %vm24989_vm6, %v530_v15  ;;  %vm24996_vm6 = vmmov %vm24991_vm4 }
0x10e1   :  { %17483 = vmatpush3.msk.msra.mxu0 %vm24990_vm3, %v530_v15  ;;  %vm24997_vm3 = vmmov %vm24991_vm4 }
0x10e7   :  { %17363 = vmatmul.mubr.bf16.gmra.mrb[40].mxu0 %v24984_v40  ;;  %v22397_v40 = vld [vmem:[#allocation21] ss:$0 sm:$0xff] }
0x10e8   :  { %17366 = vmatprep.mubr.bf16.mxu0 %v24985_v63 }
0x10ef   :  { %17367 = vmatmul.mubr.bf16.gmra.mrb[44].mxu0 %v24986_v24 }
0x10f0   :  { %17370 = vmatprep.mubr.bf16.mxu0 %v24987_v0 }
0x10f7   :  { %17371 = vmatmul.mubr.bf16.gmra.mrb[48].mxu0 %v24988_v53 }
0x1192   :  { %v17344_v63 = vpop.f32.mrb[20].mxu0 }
0x1193   :  { %v8234_v0 = vadd.f32 %v17344_v63, %v22290_v12  ;;  %v7877_v24 = vpop.f32.mrb[21].mxu0 }
0x1194   :  { %v8232_v53 = vadd.f32 %v22282_v32, %v7877_v24  ;;  %v17345_v54 = vpop.f32.mrb[22].mxu0 }
0x1195   :  { %v8235_v52 = vadd.f32 %v22286_v14, %v17345_v54  ;;  %v7880_v61 = vpop.f32.mrb[23].mxu0  ;;  %v8272_v51 = vadd.f32 %v22397_v40, %v8234_v0 }
0x1196   :  { %v8270_v48 = vadd.f32 %v22397_v40, %v8232_v53  ;;  %v8233_v46 = vadd.f32 %v22280_v26, %v7880_v61 }
0x1197   :  { %v8273_v42 = vadd.f32 %v22397_v40, %v8235_v52  ;;  %v8304_v32 = vmax.f32 %v8272_v51, 0.0 }
0x1198   :  { %v8302_v18 = vmax.f32 %v8270_v48, 0.0  ;;  %v8271_v15 = vadd.f32 %v22397_v40, %v8233_v46 }
0x1199   :  { %v8305_v24 = vmax.f32 %v8273_v42, 0.0 }
0x119a   :  { %v8303_v37 = vmax.f32 %v8271_v15, 0.0  ;;  %v17348_v12 = vpop.f32.mrb[24].mxu0  ;;  %17434 = vmatprep.mubr.msk.f32.mxu1 %vm24991_vm4, %v8302_v18  ;;  %vm24998_vm4 = vmmov %vm24997_vm3 }
0x119b   :  { %v8238_v63 = vadd.f32 %v17348_v12, %v22304_v23  ;;  %v7893_v14 = vpop.f32.mrb[25].mxu0 }
0x119c   :  { %v8236_v54 = vadd.f32 %v22296_v62, %v7893_v14  ;;  %v17349_v53 = vpop.f32.mrb[26].mxu0  ;;  %17435 = vmatmul.mubr.msk.f32.vlgmr.msra.gmra.mrb[110].mxu1 %vm24992_vm12, %v8303_v37  ;;  %vm24999_vm12 = vmmov %vm24997_vm3 }
0x119d   :  { %v8239_v26 = vadd.f32 %v22300_v19, %v17349_v53  ;;  %v7896_v0 = vpop.f32.mrb[27].mxu0  ;;  %17437 = vmatprep.mubr.msk.f32.mxu1 %vm24993_vm13, %v8304_v32  ;;  %v8276_v18 = vadd.f32 %v22397_v40, %v8238_v63  ;;  %vm25000_vm13 = vmmov %vm24997_vm3 }
0x119e   :  { %v8274_v52 = vadd.f32 %v22397_v40, %v8236_v54  ;;  %v8237_v61 = vadd.f32 %v22293_v56, %v7896_v0 }
0x119f   :  { %v8277_v62 = vadd.f32 %v22397_v40, %v8239_v26  ;;  %v8308_v19 = vmax.f32 %v8276_v18, 0.0 }
0x11a0   :  { %v8306_v51 = vmax.f32 %v8274_v52, 0.0  ;;  %v8275_v23 = vadd.f32 %v22397_v40, %v8237_v61  ;;  %17438 = vmatmul.mubr.msk.f32.gmra.mrb[112].mxu1 %vm24994_vm14, %v8305_v24  ;;  %vm25001_vm14 = vmmov %vm24997_vm3 }
0x11a1   :  { %v8309_v63 = vmax.f32 %v8277_v62, 0.0 }
0x11a2   :  { %v8307_v37 = vmax.f32 %v8275_v23, 0.0  ;;  %v17352_v48 = vpop.f32.mrb[28].mxu0  ;;  %17440 = vmatprep.mubr.msk.f32.mxu1 %vm24995_vm9, %v8306_v51  ;;  %vm25002_vm9 = vmmov %vm24997_vm3 }
0x11a3   :  { %v8242_v42 = vadd.f32 %v17352_v48, %v22318_v34  ;;  %v7909_v46 = vpop.f32.mrb[29].mxu0 }
0x11a4   :  { %v8240_v15 = vadd.f32 %v22310_v38, %v7909_v46  ;;  %v17353_v56 = vpop.f32.mrb[30].mxu0  ;;  %17441 = vmatmul.mubr.msk.f32.gmra.mrb[114].mxu1 %vm24996_vm6, %v8307_v37  ;;  %vm25003_vm6 = vmmov %vm24997_vm3 }
0x11a5   :  { %v8243_v12 = vadd.f32 %v22314_v7, %v17353_v56  ;;  %v7912_v32 = vpop.f32.mrb[31].mxu0  ;;  %17443 = vmatprep.mubr.msk.f32.mxu1 %vm24997_vm3, %v8308_v19  ;;  %v8280_v53 = vadd.f32 %v22397_v40, %v8242_v42 }
0x11a6   :  { %v8278_v14 = vadd.f32 %v22397_v40, %v8240_v15  ;;  %v8241_v54 = vadd.f32 %v22307_v8, %v7912_v32 }
0x11a7   :  { %v8281_v38 = vadd.f32 %v22397_v40, %v8243_v12  ;;  %v8312_v7 = vmax.f32 %v8280_v53, 0.0 }
0x11a8   :  { %v8310_v26 = vmax.f32 %v8278_v14, 0.0  ;;  %v8279_v34 = vadd.f32 %v22397_v40, %v8241_v54  ;;  %17444 = vmatmul.mubr.msk.f32.gmra.mrb[116].mxu1 %vm24998_vm4, %v8309_v63  ;;  %vm25004_vm4 = vmmov %vm24997_vm3 }
0x11a9   :  { %v8313_v62 = vmax.f32 %v8281_v38, 0.0 }
0x11aa   :  { %v8311_v0 = vmax.f32 %v8279_v34, 0.0  ;;  %v17356_v24 = vpop.f32.mrb[32].mxu0  ;;  %17446 = vmatprep.mubr.msk.f32.mxu1 %vm24999_vm12, %v8310_v26  ;;  %vm25005_vm12 = vmmov %vm24997_vm3 }
0x11ab   :  { %v8246_v52 = vadd.f32 %v17356_v24, %v22332_v47  ;;  %v7925_v61 = vpop.f32.mrb[33].mxu0 }
0x11ac   :  { %v8244_v18 = vadd.f32 %v22324_v31, %v7925_v61  ;;  %v17357_v8 = vpop.f32.mrb[34].mxu0  ;;  %17447 = vmatmul.mubr.msk.f32.gmra.mrb[118].mxu1 %vm25000_vm13, %v8311_v0  ;;  %vm25006_vm13 = vmmov %vm24997_vm3 }
0x11ad   :  { %v8247_v51 = vadd.f32 %v22328_v35, %v17357_v8  ;;  %v7928_v23 = vpop.f32.mrb[35].mxu0  ;;  %17449 = vmatprep.mubr.msk.f32.mxu1 %vm25001_vm14, %v8312_v7  ;;  %v8284_v19 = vadd.f32 %v22397_v40, %v8246_v52  ;;  %vm25007_vm14 = vmmov %vm24997_vm3 }
0x11ae   :  { %v8282_v37 = vadd.f32 %v22397_v40, %v8244_v18  ;;  %v8245_v48 = vadd.f32 %v22321_v50, %v7928_v23 }
0x11af   :  { %v8285_v31 = vadd.f32 %v22397_v40, %v8247_v51  ;;  %v8316_v35 = vmax.f32 %v8284_v19, 0.0 }
0x11b0   :  { %v8314_v42 = vmax.f32 %v8282_v37, 0.0  ;;  %v8283_v47 = vadd.f32 %v22397_v40, %v8245_v48  ;;  %17450 = vmatmul.mubr.msk.f32.gmra.mrb[120].mxu1 %vm25002_vm9, %v8313_v62  ;;  %vm25008_vm9 = vmmov %vm24997_vm3 }
0x11b1   :  { %v8317_v54 = vmax.f32 %v8285_v31, 0.0 }
0x11b2   :  { %v8315_v46 = vmax.f32 %v8283_v47, 0.0  ;;  %v17360_v15 = vpop.f32.mrb[36].mxu0  ;;  %17452 = vmatprep.mubr.msk.f32.mxu1 %vm25003_vm6, %v8314_v42  ;;  %vm25009_vm6 = vmmov %vm24997_vm3 }
0x11b3   :  { %v8250_v56 = vadd.f32 %v17360_v15, %v22344_v49  ;;  %v7941_v12 = vpop.f32.mrb[37].mxu0 }
0x11b4   :  { %v8248_v32 = vadd.f32 %v22338_v58, %v7941_v12  ;;  %v17361_v50 = vpop.f32.mrb[38].mxu0  ;;  %17453 = vmatmul.mubr.msk.f32.gmra.mrb[122].mxu1 %vm24997_vm3, %v8315_v46 }
0x11b5   :  { %v8251_v63 = vadd.f32 %v22341_v39, %v17361_v50  ;;  %v7944_v14 = vpop.f32.mrb[39].mxu0  ;;  %17455 = vmatprep.mubr.msk.f32.mxu1 %vm25004_vm4, %v8316_v35  ;;  %v8288_v34 = vadd.f32 %v22397_v40, %v8250_v56  ;;  %vm25010_vm4 = vmmov %vm24997_vm3 }
0x11b6   :  { %v8286_v53 = vadd.f32 %v22397_v40, %v8248_v32  ;;  %v8249_v26 = vadd.f32 %v22335_v21, %v7944_v14 }
0x11b7   :  { %v8289_v58 = vadd.f32 %v22397_v40, %v8251_v63  ;;  %v8320_v39 = vmax.f32 %v8288_v34, 0.0 }
0x11b8   :  { %v8318_v38 = vmax.f32 %v8286_v53, 0.0  ;;  %v8287_v49 = vadd.f32 %v22397_v40, %v8249_v26  ;;  %17456 = vmatmul.mubr.msk.f32.gmra.mrb[124].mxu1 %vm25005_vm12, %v8317_v54  ;;  %vm25011_vm12 = vmmov %vm24997_vm3 }
0x11b9   :  { %v8321_v51 = vmax.f32 %v8289_v58, 0.0 }
0x11ba   :  { %v8319_v0 = vmax.f32 %v8287_v49, 0.0  ;;  %v17364_v24 = vpop.f32.mrb[40].mxu0  ;;  %17458 = vmatprep.mubr.msk.f32.mxu1 %vm25006_vm13, %v8318_v38  ;;  %vm25012_vm13 = vmmov %vm24997_vm3 }
0x11bb   :  { %v8254_v7 = vadd.f32 %v17364_v24, %v22354_v33  ;;  %v7957_v52 = vpop.f32.mrb[41].mxu0 }
0x11bc   :  { %v8252_v61 = vadd.f32 %v22348_v27, %v7957_v52  ;;  %v17365_v21 = vpop.f32.mrb[42].mxu0  ;;  %17459 = vmatmul.mubr.msk.f32.gmra.mrb[128].mxu1 %vm25007_vm14, %v8319_v0  ;;  %vm25013_vm14 = vmmov %vm24997_vm3 }
0x11bd   :  { %v8255_v18 = vadd.f32 %v22351_v44, %v17365_v21  ;;  %v7960_v8 = vpop.f32.mrb[43].mxu0  ;;  %17461 = vmatprep.mubr.msk.f32.mxu1 %vm25008_vm9, %v8320_v39  ;;  %v8292_v37 = vadd.f32 %v22397_v40, %v8254_v7  ;;  %vm25014_vm9 = vmmov %vm24997_vm3  ;;  %v25023_v21 = vld [vmem:[#allocation84_spill] sm:$0xff] }
0x11be   :  { %v8290_v23 = vadd.f32 %v22397_v40, %v8252_v61  ;;  %v8253_v62 = vadd.f32 %v22346_v25, %v7960_v8 }
0x11bf   :  { %v8293_v27 = vadd.f32 %v22397_v40, %v8255_v18  ;;  %v8324_v44 = vmax.f32 %v8292_v37, 0.0  ;;  %v529_v18 = vld [vmem:[%s25016_s21] sm:$0x1f] }
0x11c0   :  { %v8322_v48 = vmax.f32 %v8290_v23, 0.0  ;;  %v8291_v33 = vadd.f32 %v22397_v40, %v8253_v62  ;;  %17462 = vmatmul.mubr.msk.f32.gmra.mrb[130].mxu1 %vm25009_vm6, %v8321_v51  ;;  %vm25015_vm6 = vmmov %vm24997_vm3 }
0x11c1   :  { %v8325_v56 = vmax.f32 %v8293_v27, 0.0 }
0x11c2   :  { %v8323_v19 = vmax.f32 %v8291_v33, 0.0  ;;  %v17368_v42 = vpop.f32.mrb[44].mxu0  ;;  %17464 = vmatprep.mubr.msk.f32.mxu1 %vm24997_vm3, %v8322_v48  ;;  %v22511_v48 = vld [vmem:[%s25018_s23] sm:$0xf] }
0x11c3   :  { %v8258_v47 = vadd.f32 %v17368_v42, %v22364_v3  ;;  %v7973_v31 = vpop.f32.mrb[45].mxu0 }
0x11c4   :  { %v8256_v46 = vadd.f32 %v22358_v36, %v7973_v31  ;;  %v17369_v25 = vpop.f32.mrb[46].mxu0  ;;  %17465 = vmatmul.mubr.msk.f32.gmra.mrb[132].mxu1 %vm25010_vm4, %v8323_v19  ;;  %vm25017_vm4 = vmmov %vm24997_vm3 }
0x11c5   :  { %v8259_v15 = vadd.f32 %v22361_v29, %v17369_v25  ;;  %v7976_v35 = vpop.f32.mrb[47].mxu0  ;;  %17467 = vmatprep.mubr.msk.f32.mxu1 %vm25011_vm12, %v8324_v44  ;;  %v8296_v50 = vadd.f32 %v22397_v40, %v8258_v47  ;;  %vm25019_vm12 = vmmov %vm24997_vm3 }
0x11c6   :  { %v8294_v12 = vadd.f32 %v22397_v40, %v8256_v46  ;;  %v8257_v32 = vadd.f32 %v22356_v43, %v7976_v35 }
0x11c7   :  { %v8297_v36 = vadd.f32 %v22397_v40, %v8259_v15  ;;  %v8328_v29 = vmax.f32 %v8296_v50, 0.0 }
0x11c8   :  { %v8326_v63 = vmax.f32 %v8294_v12, 0.0  ;;  %v8295_v3 = vadd.f32 %v22397_v40, %v8257_v32  ;;  %17468 = vmatmul.mubr.msk.f32.gmra.mrb[134].mxu1 %vm25012_vm13, %v8325_v56  ;;  %vm25020_vm13 = vmmov %vm24997_vm3 }
0x11c9   :  { %v8329_v58 = vmax.f32 %v8297_v36, 0.0 }
0x11ca   :  { %v8327_v14 = vmax.f32 %v8295_v3, 0.0  ;;  %v17372_v54 = vpop.f32.mrb[48].mxu0  ;;  %17470 = vmatprep.mubr.msk.f32.mxu1 %vm25013_vm14, %v8326_v63  ;;  %vm25021_vm14 = vmmov %vm24997_vm3 }
0x11cb   :  { %v8262_v53 = vadd.f32 %v17372_v54, %v22374_v57  ;;  %v7989_v26 = vpop.f32.mrb[49].mxu0 }
0x11cc   :  { %v8260_v34 = vadd.f32 %v22368_v22, %v7989_v26  ;;  %v17373_v43 = vpop.f32.mrb[50].mxu0  ;;  %17471 = vmatmul.mubr.msk.f32.gmra.mrb[136].mxu1 %vm25014_vm9, %v8327_v14  ;;  %vm25024_vm9 = vcmask 1044480  }
0x11cd   :  { %v8263_v38 = vadd.f32 %v22371_v5, %v17373_v43  ;;  %v7992_v49 = vpop.f32.mrb[51].mxu0  ;;  %17473 = vmatprep.mubr.msk.f32.mxu1 %vm25015_vm6, %v8328_v29  ;;  %v8300_v39 = vadd.f32 %v22397_v40, %v8262_v53  ;;  %17532 = vmatprep.subr.msk.mxu0 %vm25024_vm9, %v529_v18  ;;  %vm25025_vm6 = vcmask 31744  }
0x11ce   :  { %v8298_v0 = vadd.f32 %v22397_v40, %v8260_v34  ;;  %v8261_v24 = vadd.f32 %v22366_v20, %v7992_v49  ;;  %v25022_v20 = vmov 1.0|1.0  }
0x11cf   :  { %v8301_v22 = vadd.f32 %v22397_v40, %v8263_v38  ;;  %v8332_v5 = vmax.f32 %v8300_v39, 0.0 }
0x11d0   :  { %v8330_v57 = vmax.f32 %v8298_v0, 0.0  ;;  %v8299_v7 = vadd.f32 %v22397_v40, %v8261_v24  ;;  %17474 = vmatmul.mubr.msk.f32.gmra.mrb[138].mxu1 %vm24997_vm3, %v8329_v58  ;;  %v22500_v40 = vld [vmem:[#allocation22] ss:$0 sm:$0xff]  ;;  %vm25026_vm3 = vmmov %vm25025_vm6 }
0x11d1   :  { %v8333_v61 = vmax.f32 %v8301_v22, 0.0 }
0x11d2   :  { %v8331_v52 = vmax.f32 %v8299_v7, 0.0  ;;  %17476 = vmatprep.mubr.msk.f32.mxu1 %vm25017_vm4, %v8330_v57  ;;  %vm25027_vm4 = vmmov %vm25024_vm9 }
0x11d3   :  { %vm25031_vm9 = vmmov %vm25026_vm3 }
0x11d4   :  { %17477 = vmatmul.mubr.msk.f32.gmra.mrb[140].mxu1 %vm25019_vm12, %v8331_v52  ;;  %vm25028_vm12 = vcmask 1043456  }
0x11d5   :  { %17479 = vmatprep.mubr.msk.f32.mxu1 %vm25020_vm13, %v8332_v5  ;;  %vm25029_vm13 = vmmov %vm25026_vm3 }
0x11d8   :  { %17480 = vmatmul.mubr.msk.f32.gmra.mrb[142].mxu1 %vm25021_vm14, %v8333_v61  ;;  %vm25030_vm14 = vmmov %vm25026_vm3 }
0x11d9   :  { %14328 = vmatprep.mubr.msk.bf16.mxu1 %vm20839_vm8, %v25022_v20 }
0x126f   :  { %v17436_v8 = vpop.f32.mrb[110].mxu1 }
0x1270   :  { %v8502_v51 = vpop.f32.mrb[111].mxu1  ;;  %v22506_v62 = vadd.f32 %v17436_v8, %v22500_v40 }
0x1271   :  { %v22503_v23 = vadd.f32 %v22500_v40, %v8502_v51 }
0x1273   :  { %v17439_v37 = vpop.f32.mrb[112].mxu1  ;;  %17484 = vmatprep.mubr.msk.f32.mxu0 %vm25025_vm6, %v22503_v23  ;;  %vm25032_vm6 = vmmov %vm25026_vm3 }
0x1274   :  { %v8512_v33 = vpop.f32.mrb[113].mxu1  ;;  %17485 = vmatmul.mubr.msk.f32.vlgmr.msra.gmra.mrb[242].mxu0 %vm25026_vm3, %v22506_v62  ;;  %v22520_v19 = vadd.f32 %v17439_v37, %v22500_v40 }
0x1275   :  { %v22516_v27 = vadd.f32 %v22500_v40, %v8512_v33  ;;  %17533 = vmatpush3.msk.msra.mxu0 %vm25027_vm4, %v529_v18  ;;  %vm25033_vm4 = vmmov %vm25026_vm3 }
0x1276   :  { %17592 = vmatprep.subr.msk.mxu0 %vm25028_vm12, %v22511_v48  ;;  %vm25034_vm12 = vmmov %vm25026_vm3 }
0x1277   :  { %v17442_v42 = vpop.f32.mrb[114].mxu1  ;;  %17487 = vmatprep.mubr.msk.f32.mxu0 %vm25029_vm13, %v22516_v27  ;;  %vm25035_vm13 = vmmov %vm25026_vm3 }
0x1278   :  { %v8522_v44 = vpop.f32.mrb[115].mxu1  ;;  %17488 = vmatmul.mubr.msk.f32.gmra.mrb[52].mxu0 %vm25030_vm14, %v22520_v19  ;;  %v22532_v31 = vadd.f32 %v17442_v42, %v22500_v40  ;;  %vm25036_vm14 = vmmov %vm25026_vm3 }
0x1279   :  { %v22529_v47 = vadd.f32 %v22500_v40, %v8522_v44 }
0x127b   :  { %v17445_v46 = vpop.f32.mrb[116].mxu1  ;;  %17490 = vmatprep.mubr.msk.f32.mxu0 %vm25031_vm9, %v22529_v47  ;;  %vm25037_vm9 = vmmov %vm25026_vm3 }
0x127c   :  { %v8532_v25 = vpop.f32.mrb[117].mxu1  ;;  %17491 = vmatmul.mubr.msk.f32.gmra.mrb[54].mxu0 %vm25032_vm6, %v22532_v31  ;;  %v22542_v35 = vadd.f32 %v17445_v46, %v22500_v40  ;;  %vm25038_vm6 = vmmov %vm25026_vm3 }
0x127d   :  { %v22539_v15 = vadd.f32 %v22500_v40, %v8532_v25 }
0x127f   :  { %v17448_v56 = vpop.f32.mrb[118].mxu1  ;;  %17493 = vmatprep.mubr.msk.f32.mxu0 %vm25026_vm3, %v22539_v15 }
0x1280   :  { %v8542_v12 = vpop.f32.mrb[119].mxu1  ;;  %17494 = vmatmul.mubr.msk.f32.gmra.mrb[56].mxu0 %vm25033_vm4, %v22542_v35  ;;  %v22552_v50 = vadd.f32 %v17448_v56, %v22500_v40  ;;  %vm25039_vm4 = vmmov %vm25026_vm3 }
0x1281   :  { %v22549_v32 = vadd.f32 %v22500_v40, %v8542_v12 }
0x1283   :  { %v17451_v63 = vpop.f32.mrb[120].mxu1  ;;  %17496 = vmatprep.mubr.msk.f32.mxu0 %vm25034_vm12, %v22549_v32  ;;  %vm25040_vm12 = vmmov %vm25026_vm3 }
0x1284   :  { %v8552_v3 = vpop.f32.mrb[121].mxu1  ;;  %17497 = vmatmul.mubr.msk.f32.gmra.mrb[58].mxu0 %vm25035_vm13, %v22552_v50  ;;  %v22562_v14 = vadd.f32 %v17451_v63, %v22500_v40  ;;  %vm25041_vm13 = vmmov %vm25026_vm3 }
0x1285   :  { %v22559_v36 = vadd.f32 %v22500_v40, %v8552_v3 }
0x1287   :  { %v17454_v54 = vpop.f32.mrb[122].mxu1  ;;  %17499 = vmatprep.mubr.msk.f32.mxu0 %vm25036_vm14, %v22559_v36  ;;  %vm25042_vm14 = vmmov %vm25026_vm3 }
0x1288   :  { %v8562_v29 = vpop.f32.mrb[123].mxu1  ;;  %17500 = vmatmul.mubr.msk.f32.gmra.mrb[60].mxu0 %vm25037_vm9, %v22562_v14  ;;  %v22572_v26 = vadd.f32 %v17454_v54, %v22500_v40  ;;  %vm25043_vm9 = vmmov %vm25026_vm3 }
0x1289   :  { %v22569_v53 = vadd.f32 %v22500_v40, %v8562_v29 }
0x128b   :  { %v17457_v34 = vpop.f32.mrb[124].mxu1  ;;  %17502 = vmatprep.mubr.msk.f32.mxu0 %vm25038_vm6, %v22569_v53  ;;  %vm25044_vm6 = vmmov %vm25026_vm3 }
0x128c   :  { %v8572_v43 = vpop.f32.mrb[125].mxu1  ;;  %17503 = vmatmul.mubr.msk.f32.gmra.mrb[62].mxu0 %vm25026_vm3, %v22572_v26  ;;  %v22582_v49 = vadd.f32 %v17457_v34, %v22500_v40 }
0x128d   :  { %v22579_v38 = vadd.f32 %v22500_v40, %v8572_v43 }
0x128f   :  { %v17460_v58 = vpop.f32.mrb[128].mxu1  ;;  %17505 = vmatprep.mubr.msk.f32.mxu0 %vm25039_vm4, %v22579_v38  ;;  %vm25045_vm4 = vmmov %vm25026_vm3 }
0x1290   :  { %v8582_v0 = vpop.f32.mrb[129].mxu1  ;;  %17506 = vmatmul.mubr.msk.f32.gmra.mrb[64].mxu0 %vm25040_vm12, %v22582_v49  ;;  %v22592_v39 = vadd.f32 %v17460_v58, %v22500_v40  ;;  %vm25046_vm12 = vmmov %vm25026_vm3 }
0x1291   :  { %v22589_v24 = vadd.f32 %v22500_v40, %v8582_v0 }
0x1293   :  { %v17463_v57 = vpop.f32.mrb[130].mxu1  ;;  %17508 = vmatprep.mubr.msk.f32.mxu0 %vm25041_vm13, %v22589_v24  ;;  %vm25047_vm13 = vmmov %vm25026_vm3 }
0x1294   :  { %v8592_v7 = vpop.f32.mrb[131].mxu1  ;;  %17509 = vmatmul.mubr.msk.f32.gmra.mrb[68].mxu0 %vm25042_vm14, %v22592_v39  ;;  %v22602_v52 = vadd.f32 %v17463_v57, %v22500_v40  ;;  %vm25048_vm14 = vmmov %vm25026_vm3 }
0x1295   :  { %v22599_v22 = vadd.f32 %v22500_v40, %v8592_v7 }
0x1297   :  { %v17466_v5 = vpop.f32.mrb[132].mxu1  ;;  %17511 = vmatprep.mubr.msk.f32.mxu0 %vm25043_vm9, %v22599_v22  ;;  %vm25049_vm9 = vmmov %vm25026_vm3 }
0x1298   :  { %v8602_v61 = vpop.f32.mrb[133].mxu1  ;;  %17512 = vmatmul.mubr.msk.f32.gmra.mrb[70].mxu0 %vm25044_vm6, %v22602_v52  ;;  %v22612_v8 = vadd.f32 %v17466_v5, %v22500_v40  ;;  %vm25050_vm6 = vmmov %vm25026_vm3 }
0x1299   :  { %v22609_v18 = vadd.f32 %v22500_v40, %v8602_v61 }
0x129b   :  { %v17469_v51 = vpop.f32.mrb[134].mxu1  ;;  %17514 = vmatprep.mubr.msk.f32.mxu0 %vm25026_vm3, %v22609_v18 }
0x129c   :  { %v8612_v37 = vpop.f32.mrb[135].mxu1  ;;  %17515 = vmatmul.mubr.msk.f32.gmra.mrb[72].mxu0 %vm25045_vm4, %v22612_v8  ;;  %v22622_v42 = vadd.f32 %v17469_v51, %v22500_v40  ;;  %vm25051_vm4 = vmmov %vm25026_vm3 }
0x129d   :  { %v22619_v33 = vadd.f32 %v22500_v40, %v8612_v37 }
0x129f   :  { %v17472_v44 = vpop.f32.mrb[136].mxu1  ;;  %17517 = vmatprep.mubr.msk.f32.mxu0 %vm25046_vm12, %v22619_v33  ;;  %vm25052_vm12 = vmmov %vm25026_vm3 }
0x12a0   :  { %v8622_v46 = vpop.f32.mrb[137].mxu1  ;;  %17518 = vmatmul.mubr.msk.f32.gmra.mrb[74].mxu0 %vm25047_vm13, %v22622_v42  ;;  %v22632_v56 = vadd.f32 %v17472_v44, %v22500_v40  ;;  %vm25053_vm13 = vmmov %vm25026_vm3 }
0x12a1   :  { %v22629_v25 = vadd.f32 %v22500_v40, %v8622_v46 }
0x12a3   :  { %v17475_v12 = vpop.f32.mrb[138].mxu1  ;;  %17520 = vmatprep.mubr.msk.f32.mxu0 %vm25048_vm14, %v22629_v25  ;;  %vm25054_vm14 = vmmov %vm25026_vm3 }
0x12a4   :  { %v8632_v63 = vpop.f32.mrb[139].mxu1  ;;  %17521 = vmatmul.mubr.msk.f32.gmra.mrb[76].mxu0 %vm25049_vm9, %v22632_v56  ;;  %v8638_v54 = vadd.f32 %v17475_v12, %v22500_v40  ;;  %vm25055_vm9 = vcmask 39936  }
0x12a5   :  { %v8633_v3 = vadd.f32 %v22500_v40, %v8632_v63 }
0x12a7   :  { %v17478_v29 = vpop.f32.mrb[140].mxu1  ;;  %17523 = vmatprep.mubr.msk.f32.mxu0 %vm25050_vm6, %v8633_v3  ;;  %vm25056_vm6 = vmmov %vm25055_vm9 }
0x12a8   :  { %v8642_v34 = vpop.f32.mrb[141].mxu1  ;;  %17524 = vmatmul.mubr.msk.f32.gmra.mrb[78].mxu0 %vm25026_vm3, %v8638_v54  ;;  %v8648_v58 = vadd.f32 %v17478_v29, %v22500_v40  ;;  %vm25057_vm3 = vmmov %vm25056_vm6 }
0x12a9   :  { %v8643_v43 = vadd.f32 %v22500_v40, %v8642_v34  ;;  %vm25060_vm8 = vmmov %vm25057_vm3 }
0x12ab   :  { %v17481_v0 = vpop.f32.mrb[142].mxu1  ;;  %17526 = vmatprep.mubr.msk.f32.mxu0 %vm25051_vm4, %v8643_v43  ;;  %vm25058_vm4 = vcmask 1043456  }
0x12ac   :  { %v8652_v57 = vpop.f32.mrb[143].mxu1  ;;  %17527 = vmatmul.mubr.msk.f32.gmra.mrb[80].mxu0 %vm25052_vm12, %v8648_v58  ;;  %v8658_v5 = vadd.f32 %v17481_v0, %v22500_v40  ;;  %vm25059_vm12 = vmmov %vm25057_vm3 }
0x12ad   :  { %v8653_v7 = vadd.f32 %v22500_v40, %v8652_v57 }
0x12af   :  { %17529 = vmatprep.mubr.msk.f32.mxu0 %vm25053_vm13, %v8653_v7  ;;  %vm25061_vm13 = vmmov %vm25057_vm3 }
0x12b0   :  { %17530 = vmatmul.mubr.msk.f32.gmra.mrb[82].mxu0 %vm25054_vm14, %v8658_v5  ;;  %vm25062_vm14 = vmmov %vm25057_vm3 }
0x12b1   :  { %17534 = vmatprep.mubr.msk.f32.mxu0 %vm25055_vm9, %v22066_v2  ;;  %vm25063_vm9 = vmmov %vm25057_vm3 }
0x12b4   :  { %17535 = vmatmul.mubr.msk.f32.vlgmr.msra.gmra.mrb[84].mxu0 %vm25056_vm6, %v22068_v59  ;;  %vm25064_vm6 = vmmov %vm25057_vm3 }
0x12b5   :  { %17537 = vmatprep.mubr.msk.f32.mxu0 %vm25057_vm3, %v22084_v4  ;;  %17593 = vmatpush3.msk.msra.mxu0 %vm25058_vm4, %v22511_v48  ;;  %vm25065_vm4 = vmmov %vm25057_vm3 }
0x12b8   :  { %17538 = vmatmul.mubr.msk.f32.gmra.mrb[86].mxu0 %vm25059_vm12, %v22086_v17  ;;  %vm25067_vm12 = vmmov %vm25057_vm3 }
0x12b9   :  { %17540 = vmatprep.mubr.msk.f32.mxu0 %vm25060_vm8, %v22096_v55  ;;  %vm25066_vm8 = vmmov %vm25057_vm3 }
0x12bc   :  { %17541 = vmatmul.mubr.msk.f32.gmra.mrb[88].mxu0 %vm25061_vm13, %v22098_v45  ;;  %vm25068_vm13 = vmmov %vm25057_vm3 }
0x12bd   :  { %17543 = vmatprep.mubr.msk.f32.mxu0 %vm25062_vm14, %v22108_v28  ;;  %vm25069_vm14 = vmmov %vm25057_vm3 }
0x12c0   :  { %17544 = vmatmul.mubr.msk.f32.gmra.mrb[90].mxu0 %vm25063_vm9, %v22110_v60  ;;  %vm25070_vm9 = vmmov %vm25057_vm3 }
0x12c1   :  { %17546 = vmatprep.mubr.msk.f32.mxu0 %vm25064_vm6, %v22120_v11  ;;  %vm25071_vm6 = vcmask 31744  }
0x12c4   :  { %17547 = vmatmul.mubr.msk.f32.gmra.mrb[92].mxu0 %vm25057_vm3, %v22122_v16  ;;  %vm25072_vm3 = vmmov %vm25071_vm6 }
0x12c5   :  { %17549 = vmatprep.mubr.msk.f32.mxu0 %vm25065_vm4, %v22132_v6  ;;  %vm25073_vm4 = vmmov %vm25072_vm3 }
0x12c6   :  { %vm25097_vm11 = vmmov %vm25072_vm3 }
0x12c8   :  { %17550 = vmatmul.mubr.msk.f32.gmra.mrb[94].mxu0 %vm25066_vm8, %v22134_v10  ;;  %vm25074_vm8 = vmmov %vm25072_vm3 }
0x12c9   :  { %17552 = vmatprep.mubr.msk.f32.mxu0 %vm25067_vm12, %v22144_v9  ;;  %vm25075_vm12 = vmmov %vm25072_vm3 }
0x12cc   :  { %17553 = vmatmul.mubr.msk.f32.gmra.mrb[96].mxu0 %vm25068_vm13, %v22146_v30  ;;  %vm25076_vm13 = vmmov %vm25072_vm3 }
0x12cd   :  { %17555 = vmatprep.mubr.msk.f32.mxu0 %vm25069_vm14, %v22156_v1  ;;  %vm25077_vm14 = vmmov %vm25072_vm3 }
0x12d0   :  { %17556 = vmatmul.mubr.msk.f32.gmra.mrb[98].mxu0 %vm25070_vm9, %v22158_v41  ;;  %vm25078_vm9 = vmmov %vm25072_vm3 }
0x12d1   :  { %17594 = vmatprep.mubr.msk.f32.mxu0 %vm25071_vm6, %v22503_v23  ;;  %vm25079_vm6 = vmmov %vm25072_vm3 }
0x12d4   :  { %17595 = vmatmul.mubr.msk.f32.vlgmr.msra.gmra.mrb[146].mxu0 %vm25072_vm3, %v22506_v62 }
0x12d5   :  { %17597 = vmatprep.mubr.msk.f32.mxu0 %vm25073_vm4, %v22516_v27  ;;  %vm25080_vm4 = vmmov %vm25072_vm3 }
0x12d8   :  { %17598 = vmatmul.mubr.msk.f32.gmra.mrb[148].mxu0 %vm25074_vm8, %v22520_v19  ;;  %vm25081_vm8 = vmmov %vm25072_vm3 }
0x12d9   :  { %17600 = vmatprep.mubr.msk.f32.mxu0 %vm25075_vm12, %v22529_v47  ;;  %vm25082_vm12 = vmmov %vm25072_vm3 }
0x12dc   :  { %17601 = vmatmul.mubr.msk.f32.gmra.mrb[150].mxu0 %vm25076_vm13, %v22532_v31  ;;  %vm25083_vm13 = vmmov %vm25072_vm3 }
0x12dd   :  { %17603 = vmatprep.mubr.msk.f32.mxu0 %vm25077_vm14, %v22539_v15  ;;  %vm25084_vm14 = vmmov %vm25072_vm3 }
0x12e0   :  { %17604 = vmatmul.mubr.msk.f32.gmra.mrb[152].mxu0 %vm25078_vm9, %v22542_v35  ;;  %vm25085_vm9 = vmmov %vm25072_vm3 }
0x12e1   :  { %17606 = vmatprep.mubr.msk.f32.mxu0 %vm25079_vm6, %v22549_v32  ;;  %vm25086_vm6 = vmmov %vm25072_vm3 }
0x12e4   :  { %17607 = vmatmul.mubr.msk.f32.gmra.mrb[154].mxu0 %vm25072_vm3, %v22552_v50 }
0x12e5   :  { %17609 = vmatprep.mubr.msk.f32.mxu0 %vm25080_vm4, %v22559_v36  ;;  %vm25087_vm4 = vmmov %vm25072_vm3 }
0x12e8   :  { %17610 = vmatmul.mubr.msk.f32.gmra.mrb[156].mxu0 %vm25081_vm8, %v22562_v14  ;;  %vm25088_vm8 = vmmov %vm25072_vm3 }
0x12e9   :  { %17612 = vmatprep.mubr.msk.f32.mxu0 %vm25082_vm12, %v22569_v53  ;;  %vm25089_vm12 = vmmov %vm25072_vm3 }
0x12ec   :  { %17613 = vmatmul.mubr.msk.f32.gmra.mrb[158].mxu0 %vm25083_vm13, %v22572_v26  ;;  %vm25090_vm13 = vmmov %vm25072_vm3 }
0x12ed   :  { %17615 = vmatprep.mubr.msk.f32.mxu0 %vm25084_vm14, %v22579_v38  ;;  %vm25091_vm14 = vmmov %vm25072_vm3 }
0x12f0   :  { %17616 = vmatmul.mubr.msk.f32.gmra.mrb[160].mxu0 %vm25085_vm9, %v22582_v49  ;;  %vm25092_vm9 = vmmov %vm25072_vm3 }
0x12f1   :  { %17618 = vmatprep.mubr.msk.f32.mxu0 %vm25086_vm6, %v22589_v24  ;;  %vm25093_vm6 = vmmov %vm25072_vm3 }
0x12f4   :  { %17619 = vmatmul.mubr.msk.f32.gmra.mrb[162].mxu0 %vm25072_vm3, %v22592_v39 }
0x12f5   :  { %17621 = vmatprep.mubr.msk.f32.mxu0 %vm25087_vm4, %v22599_v22  ;;  %vm25094_vm4 = vmmov %vm25072_vm3 }
0x12f8   :  { %17622 = vmatmul.mubr.msk.f32.gmra.mrb[164].mxu0 %vm25088_vm8, %v22602_v52  ;;  %vm25095_vm8 = vmmov %vm25072_vm3 }
0x12f9   :  { %17624 = vmatprep.mubr.msk.f32.mxu0 %vm25089_vm12, %v22609_v18  ;;  %vm25096_vm12 = vmmov %vm25072_vm3 }
0x12fc   :  { %17625 = vmatmul.mubr.msk.f32.gmra.mrb[166].mxu0 %vm25090_vm13, %v22612_v8  ;;  %vm25098_vm13 = vmmov %vm25072_vm3 }
0x12fd   :  { %17627 = vmatprep.mubr.msk.f32.mxu0 %vm25091_vm14, %v22619_v33  ;;  %vm25099_vm14 = vmmov %vm25072_vm3 }
0x1300   :  { %17628 = vmatmul.mubr.msk.f32.gmra.mrb[168].mxu0 %vm25092_vm9, %v22622_v42 }
0x1301   :  { %17630 = vmatprep.mubr.msk.f32.mxu0 %vm25093_vm6, %v22629_v25 }
0x1304   :  { %17631 = vmatmul.mubr.msk.f32.gmra.mrb[170].mxu0 %vm25072_vm3, %v22632_v56 }
0x1305   :  { %17633 = vmatprep.mubr.msk.f32.mxu0 %vm25094_vm4, %v8633_v3 }
0x1308   :  { %17634 = vmatmul.mubr.msk.f32.gmra.mrb[172].mxu0 %vm25095_vm8, %v8638_v54 }
0x1309   :  { %17636 = vmatprep.mubr.msk.f32.mxu0 %vm25096_vm12, %v8643_v43 }
0x130c   :  { %17637 = vmatmul.mubr.msk.f32.gmra.mrb[174].mxu0 %vm25097_vm11, %v8648_v58 }
0x130d   :  { %17639 = vmatprep.mubr.msk.f32.mxu0 %vm25098_vm13, %v8653_v7 }
0x1310   :  { %17640 = vmatmul.mubr.msk.f32.gmra.mrb[176].mxu0 %vm25099_vm14, %v8658_v5  ;;  %vm25145_vm14 = vcmask 326656  }
0x1347   :  { %v17486_v40 = vpop.f32.mrb[242].mxu0 }
0x1348   :  { %v8826_v23 = vpop.f32.mrb[243].mxu0 }
0x1349   :  { %v8985_v62 = vpack.c.bf16 %v17486_v40, %v8826_v23 }
0x134b   :  { %v17489_v48 = vpop.f32.mrb[52].mxu0 }
0x134c   :  { %v8836_v27 = vpop.f32.mrb[53].mxu0 }
0x134d   :  { %v8986_v19 = vpack.c.bf16 %v17489_v48, %v8836_v27 }
0x134f   :  { %v17492_v47 = vpop.f32.mrb[54].mxu0 }
0x1350   :  { %v8846_v31 = vpop.f32.mrb[55].mxu0 }
0x1351   :  { %v8987_v15 = vpack.c.bf16 %v17492_v47, %v8846_v31 }
0x1353   :  { %v17495_v35 = vpop.f32.mrb[56].mxu0 }
0x1354   :  { %v8856_v32 = vpop.f32.mrb[57].mxu0 }
0x1355   :  { %v8988_v50 = vpack.c.bf16 %v17495_v35, %v8856_v32 }
0x1357   :  { %v17498_v36 = vpop.f32.mrb[58].mxu0 }
0x1358   :  { %v8866_v14 = vpop.f32.mrb[59].mxu0 }
0x1359   :  { %v8989_v53 = vpack.c.bf16 %v17498_v36, %v8866_v14 }
0x135b   :  { %v17501_v26 = vpop.f32.mrb[60].mxu0 }
0x135c   :  { %v8876_v38 = vpop.f32.mrb[61].mxu0 }
0x135d   :  { %v8990_v49 = vpack.c.bf16 %v17501_v26, %v8876_v38 }
0x135f   :  { %v17504_v24 = vpop.f32.mrb[62].mxu0 }
0x1360   :  { %v8886_v39 = vpop.f32.mrb[63].mxu0 }
0x1361   :  { %v8991_v22 = vpack.c.bf16 %v17504_v24, %v8886_v39 }
0x1363   :  { %v17507_v52 = vpop.f32.mrb[64].mxu0 }
0x1364   :  { %v8896_v61 = vpop.f32.mrb[65].mxu0 }
0x1365   :  { %v8992_v18 = vpack.c.bf16 %v17507_v52, %v8896_v61 }
0x1367   :  { %v17510_v8 = vpop.f32.mrb[68].mxu0 }
0x1368   :  { %v8906_v51 = vpop.f32.mrb[69].mxu0 }
0x1369   :  { %v8993_v37 = vpack.c.bf16 %v17510_v8, %v8906_v51 }
0x136b   :  { %v17513_v33 = vpop.f32.mrb[70].mxu0  ;;  %15669 = vmatprep.subr.bf16.mxu1 %v8993_v37  ;;  %v25107_v37 = vld [vmem:[#allocation110_spill] sm:$0xff] }
0x136c   :  { %v8916_v42 = vpop.f32.mrb[71].mxu0  ;;  %15670 = vmatpush3.bf16.msra.mxu1 %v8985_v62  ;;  %vm25108_vm11 = vnez %v25107_v37 }
0x136d   :  { %v8994_v44 = vpack.c.bf16 %v17513_v33, %v8916_v42 }
0x136f   :  { %v17516_v46 = vpop.f32.mrb[72].mxu0  ;;  %15671 = vmatprep.subr.bf16.mxu1 %v8994_v44  ;;  %v25109_v44 = vld [vmem:[#allocation109_spill] sm:$0xff] }
0x1370   :  { %v8926_v25 = vpop.f32.mrb[73].mxu0  ;;  %15672 = vmatpush3.bf16.msra.mxu1 %v8986_v19  ;;  %vm25110_vm9 = vnez %v25109_v44  ;;  %v532_v19 = vld [vmem:[%s25126_s26] sm:$0xff] }
0x1371   :  { %v8995_v56 = vpack.c.bf16 %v17516_v46, %v8926_v25 }
0x1373   :  { %v17519_v12 = vpop.f32.mrb[74].mxu0  ;;  %15673 = vmatprep.subr.bf16.mxu1 %v8995_v56  ;;  %v25111_v56 = vld [vmem:[#allocation112_spill] sm:$0xff] }
0x1374   :  { %v8936_v63 = vpop.f32.mrb[75].mxu0  ;;  %15674 = vmatpush3.bf16.msra.mxu1 %v8987_v15  ;;  %vm25112_vm6 = vnez %v25111_v56 }
0x1375   :  { %v8996_v3 = vpack.c.bf16 %v17519_v12, %v8936_v63 }
0x1377   :  { %v17522_v54 = vpop.f32.mrb[76].mxu0  ;;  %15675 = vmatprep.subr.bf16.mxu1 %v8996_v3  ;;  %v25113_v3 = vld [vmem:[#allocation111_spill] sm:$0xff] }
0x1378   :  { %v8946_v29 = vpop.f32.mrb[77].mxu0  ;;  %15676 = vmatpush3.bf16.msra.mxu1 %v8988_v50  ;;  %vm25114_vm3 = vnez %v25113_v3 }
0x1379   :  { %v8997_v34 = vpack.c.bf16 %v17522_v54, %v8946_v29 }
0x137b   :  { %v17525_v43 = vpop.f32.mrb[78].mxu0  ;;  %15677 = vmatprep.subr.bf16.mxu1 %v8997_v34  ;;  %v25115_v34 = vld [vmem:[#allocation114_spill] sm:$0xff] }
0x137c   :  { %v8956_v58 = vpop.f32.mrb[79].mxu0  ;;  %15678 = vmatpush3.bf16.msra.mxu1 %v8989_v53  ;;  %vm25116_vm4 = vnez %v25115_v34 }
0x137d   :  { %v8998_v0 = vpack.c.bf16 %v17525_v43, %v8956_v58 }
0x137f   :  { %v17528_v57 = vpop.f32.mrb[80].mxu0  ;;  %15679 = vmatprep.subr.bf16.mxu1 %v8998_v0  ;;  %v25118_v0 = vld [vmem:[#allocation113_spill] sm:$0xff] }
0x1380   :  { %v8966_v7 = vpop.f32.mrb[81].mxu0  ;;  %15680 = vmatpush3.bf16.msra.mxu1 %v8990_v49  ;;  %vm25119_vm8 = vnez %v25118_v0 }
0x1381   :  { %v8999_v5 = vpack.c.bf16 %v17528_v57, %v8966_v7 }
0x1383   :  { %v17531_v40 = vpop.f32.mrb[82].mxu0  ;;  %15681 = vmatprep.subr.bf16.mxu1 %v8999_v5  ;;  %v25120_v5 = vld [vmem:[#allocation116_spill] sm:$0xff] }
0x1384   :  { %v8976_v23 = vpop.f32.mrb[83].mxu0  ;;  %15682 = vmatpush3.bf16.msra.mxu1 %v8991_v22  ;;  %vm25121_vm12 = vnez %v25120_v5 }
0x1385   :  { %v9000_v62 = vpack.c.bf16 %v17531_v40, %v8976_v23 }
0x1387   :  { %15683 = vmatprep.subr.bf16.mxu1 %v9000_v62  ;;  %v22742_v48 = vpop.f32.mrb[84].mxu0  ;;  %v25124_v62 = vld [vmem:[#allocation115_spill] sm:$0xff] }
0x1388   :  { %15684 = vmatpush3.bf16.msra.mxu1 %v8992_v18  ;;  %v22744_v27 = vpop.f32.mrb[85].mxu0  ;;  %vm25125_vm13 = vnez %v25124_v62 }
0x138b   :  { %14330 = vmatmul.mubr.msk.bf16.vlgmr.msra.gmra.mrb[144].mxu1 %vm19909_vm7, %v25022_v20  ;;  %v22749_v47 = vpop.f32.mrb[86].mxu0 }
0x138c   :  { %v22751_v31 = vpop.f32.mrb[87].mxu0  ;;  %14332 = vmatprep.mubr.msk.bf16.mxu1 %vm21017_vm15, %v25022_v20 }
0x138f   :  { %v22756_v35 = vpop.f32.mrb[88].mxu0 }
0x1390   :  { %v22758_v32 = vpop.f32.mrb[89].mxu0 }
0x1393   :  { %14334 = vmatmul.mubr.msk.bf16.gmra.mrb[148].mxu1 %vm21047_vm0, %v25022_v20  ;;  %v22763_v36 = vpop.f32.mrb[90].mxu0 }
0x1394   :  { %v22765_v14 = vpop.f32.mrb[91].mxu0  ;;  %14336 = vmatprep.mubr.msk.bf16.mxu1 %vm21057_vm2, %v25022_v20 }
0x1397   :  { %v22770_v26 = vpop.f32.mrb[92].mxu0 }
0x1398   :  { %v22772_v38 = vpop.f32.mrb[93].mxu0 }
0x139b   :  { %14338 = vmatmul.mubr.msk.bf16.gmra.mrb[152].mxu1 %vm21081_vm1, %v25022_v20  ;;  %v22777_v24 = vpop.f32.mrb[94].mxu0 }
0x139c   :  { %v22779_v39 = vpop.f32.mrb[95].mxu0  ;;  %14340 = vmatprep.mubr.msk.bf16.mxu1 %vm21091_vm5, %v25022_v20 }
0x139f   :  { %v22784_v52 = vpop.f32.mrb[96].mxu0 }
0x13a0   :  { %v22786_v61 = vpop.f32.mrb[97].mxu0 }
0x13a3   :  { %14342 = vmatmul.mubr.msk.bf16.gmra.mrb[156].mxu1 %vm21115_vm10, %v25022_v20  ;;  %v22791_v8 = vpop.f32.mrb[98].mxu0 }
0x13a4   :  { %v22793_v51 = vpop.f32.mrb[99].mxu0  ;;  %14344 = vmatprep.mubr.msk.bf16.mxu1 %vm25108_vm11, %v25022_v20 }
0x13a7   :  { %v22798_v33 = vpop.f32.mrb[146].mxu0 }
0x13a8   :  { %v22800_v42 = vpop.f32.mrb[147].mxu0 }
0x13ab   :  { %14346 = vmatmul.mubr.msk.bf16.gmra.mrb[160].mxu1 %vm25110_vm9, %v25022_v20  ;;  %v22805_v46 = vpop.f32.mrb[148].mxu0 }
0x13ac   :  { %v22807_v25 = vpop.f32.mrb[149].mxu0  ;;  %14348 = vmatprep.mubr.msk.bf16.mxu1 %vm25112_vm6, %v25022_v20 }
0x13af   :  { %v22812_v12 = vpop.f32.mrb[150].mxu0 }
0x13b0   :  { %v22814_v63 = vpop.f32.mrb[151].mxu0 }
0x13b3   :  { %14350 = vmatmul.mubr.msk.bf16.gmra.mrb[164].mxu1 %vm25114_vm3, %v25022_v20  ;;  %v22819_v54 = vpop.f32.mrb[152].mxu0 }
0x13b4   :  { %v22821_v29 = vpop.f32.mrb[153].mxu0  ;;  %14352 = vmatprep.mubr.msk.bf16.mxu1 %vm25116_vm4, %v25022_v20 }
0x13b7   :  { %v22826_v43 = vpop.f32.mrb[154].mxu0 }
0x13b8   :  { %25117 = vst [vmem:[#allocation98_spill] sm:$0xff] %v22826_v43  ;;  %v22828_v58 = vpop.f32.mrb[155].mxu0 }
0x13bb   :  { %14354 = vmatmul.mubr.msk.bf16.gmra.mrb[168].mxu1 %vm25119_vm8, %v25022_v20  ;;  %v22833_v57 = vpop.f32.mrb[156].mxu0 }
0x13bc   :  { %v22835_v7 = vpop.f32.mrb[157].mxu0  ;;  %14356 = vmatprep.mubr.msk.bf16.mxu1 %vm25121_vm12, %v25022_v20 }
0x13bf   :  { %v22840_v40 = vpop.f32.mrb[158].mxu0 }
0x13c0   :  { %25122 = vst [vmem:[#allocation99_spill] sm:$0xff] %v22840_v40  ;;  %v22842_v23 = vpop.f32.mrb[159].mxu0 }
0x13c1   :  { %25123 = vst [vmem:[#allocation100_spill] sm:$0xff] %v22842_v23 }
0x13c3   :  { %14358 = vmatmul.mubr.msk.bf16.gmra.mrb[172].mxu1 %vm25125_vm13, %v25022_v20  ;;  %v22847_v0 = vpop.f32.mrb[160].mxu0  ;;  %vm25146_vm13 = vmmov %vm25145_vm14 }
0x13c4   :  { %25127 = vst [vmem:[#allocation86_spill] sm:$0xff] %v22847_v0  ;;  %v22849_v34 = vpop.f32.mrb[161].mxu0  ;;  %vm25147_vm12 = vmmov %vm25146_vm13 }
0x13c5   :  { %25128 = vst [vmem:[#allocation119_spill] sm:$0xff] %v22849_v34  ;;  %vm25158_vm8 = vmmov %vm25147_vm12 }
0x13c7   :  { %v22851_v3 = vpop.f32.mrb[162].mxu0 }
0x13c8   :  { %25129 = vst [vmem:[#allocation117_spill] sm:$0xff] %v22851_v3  ;;  %v22853_v56 = vpop.f32.mrb[163].mxu0  ;;  %v533_v3 = vld [vmem:[%s25126_s26 + $0x8] sm:$0xff] }
0x13c9   :  { %25130 = vst [vmem:[#allocation120_spill] sm:$0xff] %v22853_v56 }
0x13cb   :  { %v22855_v5 = vpop.f32.mrb[164].mxu0 }
0x13cc   :  { %25131 = vst [vmem:[#allocation118_spill] sm:$0xff] %v22855_v5  ;;  %v22857_v44 = vpop.f32.mrb[165].mxu0  ;;  %v18202_v5 = vpack.c.bf16 %v533_v3, %v532_v19 }
0x13cd   :  { %25132 = vst [vmem:[#allocation123_spill] sm:$0xff] %v22857_v44  ;;  %v22888_v44 = vld [vmem:[#allocation18] ss:$0 sm:$0xff] }
0x13ce   :  { %18203 = vmatprep.subr.bf16.mxu1 %v18202_v5 }
0x13cf   :  { %v22859_v37 = vpop.f32.mrb[166].mxu0  ;;  %18205 = vmatpush3.bf16.msra.mxu1 %v18202_v5 }
0x13d0   :  { %25133 = vst [vmem:[#allocation121_spill] sm:$0xff] %v22859_v37  ;;  %v22861_v62 = vpop.f32.mrb[167].mxu0 }
0x13d1   :  { %25134 = vst [vmem:[#allocation124_spill] sm:$0xff] %v22861_v62  ;;  %v535_v62 = vld [vmem:[%s25126_s26 + $0x18] sm:$0xff] }
0x13d3   :  { %v22863_v18 = vpop.f32.mrb[168].mxu0 }
0x13d4   :  { %25135 = vst [vmem:[#allocation122_spill] sm:$0xff] %v22863_v18  ;;  %v22865_v22 = vpop.f32.mrb[169].mxu0  ;;  %v534_v18 = vld [vmem:[%s25126_s26 + $0x10] sm:$0xff] }
0x13d5   :  { %25136 = vst [vmem:[#allocation127_spill] sm:$0xff] %v22865_v22  ;;  %v18206_v22 = vpack.c.bf16 %v535_v62, %v534_v18 }
0x13d7   :  { %v22867_v49 = vpop.f32.mrb[170].mxu0  ;;  %18207 = vmatprep.subr.bf16.mxu1 %v18206_v22 }
0x13d8   :  { %25137 = vst [vmem:[#allocation125_spill] sm:$0xff] %v22867_v49  ;;  %v22869_v53 = vpop.f32.mrb[171].mxu0  ;;  %18209 = vmatpush3.bf16.msra.mxu1 %v18206_v22 }
0x13d9   :  { %25138 = vst [vmem:[#allocation128_spill] sm:$0xff] %v22869_v53 }
0x13db   :  { %v22871_v50 = vpop.f32.mrb[172].mxu0 }
0x13dc   :  { %25139 = vst [vmem:[#allocation126_spill] sm:$0xff] %v22871_v50  ;;  %v22873_v15 = vpop.f32.mrb[173].mxu0  ;;  %v536_v50 = vld [vmem:[%s25126_s26 + $0x20] sm:$0xff] }
0x13dd   :  { %25140 = vst [vmem:[#allocation129_spill] sm:$0xff] %v22873_v15  ;;  %17566 = vmatprep.subr.mxu1 %v536_v50 }
0x13de   :  { %17567 = vmatpush3.msra.mxu1 %v536_v50 }
0x13df   :  { %v22877_v37 = vpop.f32.mrb[174].mxu0 }
0x13e0   :  { %25141 = vst [vmem:[#allocation130_spill] sm:$0xff] %v22877_v37  ;;  %v22879_v56 = vpop.f32.mrb[175].mxu0 }
0x13e1   :  { %25142 = vst [vmem:[#allocation132_spill] sm:$0xff] %v22879_v56 }
0x13e3   :  { %v22883_v49 = vpop.f32.mrb[176].mxu0 }
0x13e4   :  { %25143 = vst [vmem:[#allocation131_spill] sm:$0xff] %v22883_v49  ;;  %v22885_v53 = vpop.f32.mrb[177].mxu0 }
0x13e5   :  { %25144 = vst [vmem:[#allocation134_spill] sm:$0xff] %v22885_v53 }
0x145e   :  { %v15685_v15 = vpop.f32.mrb[144].mxu1 }
0x145f   :  { %v15686_v19 = vpop.f32.mrb[145].mxu1 }
0x1460   :  { %v15687_v3 = vadd.f32 %v15686_v19, %v15685_v15  ;;  %v15688_v37 = vpop.f32.mrb[146].mxu1 }
0x1461   :  { %v15689_v56 = vpop.f32.mrb[147].mxu1 }
0x1462   :  { %v9168_v5 = vadd.f32 %v15687_v3, %v22744_v27  ;;  %v15690_v40 = vadd.f32 %v15689_v56, %v15688_v37 }
0x1464   :  { %v9252_v18 = vadd.f32 %v22888_v44, %v9168_v5  ;;  %v9173_v62 = vadd.f32 %v22742_v48, %v15690_v40 }
0x1466   :  { %v9268_v49 = vmax.f32 %v9252_v18, 0.0  ;;  %v9253_v22 = vadd.f32 %v22888_v44, %v9173_v62  ;;  %v15691_v53 = vpop.f32.mrb[148].mxu1 }
0x1467   :  { %v15692_v0 = vpop.f32.mrb[149].mxu1 }
0x1468   :  { %v9269_v50 = vmax.f32 %v9253_v22, 0.0  ;;  %v15693_v23 = vadd.f32 %v15692_v0, %v15691_v53  ;;  %v15694_v34 = vpop.f32.mrb[150].mxu1  ;;  %17568 = vmatprep.mubr.msk.f32.mxu1 %vm25145_vm14, %v9268_v49  ;;  %vm25148_vm14 = vmmov %vm25147_vm12 }
0x1469   :  { %v15695_v15 = vpop.f32.mrb[151].mxu1 }
0x146a   :  { %v9178_v19 = vadd.f32 %v15693_v23, %v22751_v31  ;;  %v15696_v43 = vadd.f32 %v15695_v15, %v15694_v34  ;;  %17569 = vmatmul.mubr.msk.f32.vlgmr.msra.gmra.mrb[126].mxu1 %vm25146_vm13, %v9269_v50  ;;  %vm25149_vm13 = vmmov %vm25147_vm12 }
0x146c   :  { %v9254_v27 = vadd.f32 %v22888_v44, %v9178_v19  ;;  %v9183_v48 = vadd.f32 %v22749_v47, %v15696_v43 }
0x146e   :  { %v9270_v37 = vmax.f32 %v9254_v27, 0.0  ;;  %v9255_v56 = vadd.f32 %v22888_v44, %v9183_v48  ;;  %v15697_v40 = vpop.f32.mrb[152].mxu1 }
0x146f   :  { %v15698_v3 = vpop.f32.mrb[153].mxu1 }
0x1470   :  { %v9271_v5 = vmax.f32 %v9255_v56, 0.0  ;;  %v15699_v53 = vadd.f32 %v15698_v3, %v15697_v40  ;;  %v15700_v0 = vpop.f32.mrb[154].mxu1  ;;  %17571 = vmatprep.mubr.msk.f32.mxu1 %vm25147_vm12, %v9270_v37 }
0x1471   :  { %v15701_v49 = vpop.f32.mrb[155].mxu1 }
0x1472   :  { %v9188_v31 = vadd.f32 %v15699_v53, %v22758_v32  ;;  %v15702_v34 = vadd.f32 %v15701_v49, %v15700_v0  ;;  %17572 = vmatmul.mubr.msk.f32.gmra.mrb[176].mxu1 %vm25148_vm14, %v9271_v5  ;;  %vm25150_vm14 = vmmov %vm25147_vm12 }
0x1474   :  { %v9256_v23 = vadd.f32 %v22888_v44, %v9188_v31  ;;  %v9193_v47 = vadd.f32 %v22756_v35, %v15702_v34 }
0x1476   :  { %v9272_v43 = vmax.f32 %v9256_v23, 0.0  ;;  %v9257_v18 = vadd.f32 %v22888_v44, %v9193_v47  ;;  %v15703_v62 = vpop.f32.mrb[156].mxu1 }
0x1477   :  { %v15704_v22 = vpop.f32.mrb[157].mxu1 }
0x1478   :  { %v9273_v50 = vmax.f32 %v9257_v18, 0.0  ;;  %v15705_v15 = vadd.f32 %v15704_v22, %v15703_v62  ;;  %v15706_v19 = vpop.f32.mrb[158].mxu1  ;;  %17574 = vmatprep.mubr.msk.f32.mxu1 %vm25149_vm13, %v9272_v43  ;;  %vm25151_vm13 = vmmov %vm25147_vm12 }
0x1479   :  { %v15707_v27 = vpop.f32.mrb[159].mxu1 }
0x147a   :  { %v9198_v32 = vadd.f32 %v15705_v15, %v22765_v14  ;;  %v15708_v48 = vadd.f32 %v15707_v27, %v15706_v19  ;;  %17575 = vmatmul.mubr.msk.f32.gmra.mrb[178].mxu1 %vm25147_vm12, %v9273_v50 }
0x147c   :  { %v9258_v37 = vadd.f32 %v22888_v44, %v9198_v32  ;;  %v9203_v35 = vadd.f32 %v22763_v36, %v15708_v48 }
0x147e   :  { %v9274_v56 = vmax.f32 %v9258_v37, 0.0  ;;  %v9259_v40 = vadd.f32 %v22888_v44, %v9203_v35  ;;  %v15709_v3 = vpop.f32.mrb[160].mxu1 }
0x147f   :  { %v15710_v5 = vpop.f32.mrb[161].mxu1 }
0x1480   :  { %v9275_v53 = vmax.f32 %v9259_v40, 0.0  ;;  %v15711_v0 = vadd.f32 %v15710_v5, %v15709_v3  ;;  %v15712_v49 = vpop.f32.mrb[162].mxu1  ;;  %17577 = vmatprep.mubr.msk.f32.mxu1 %vm25150_vm14, %v9274_v56  ;;  %vm25152_vm14 = vmmov %vm25147_vm12 }
0x1481   :  { %v15713_v31 = vpop.f32.mrb[163].mxu1 }
0x1482   :  { %v9208_v14 = vadd.f32 %v15711_v0, %v22772_v38  ;;  %v15714_v34 = vadd.f32 %v15713_v31, %v15712_v49  ;;  %17578 = vmatmul.mubr.msk.f32.gmra.mrb[180].mxu1 %vm25151_vm13, %v9275_v53  ;;  %vm25153_vm13 = vmmov %vm25147_vm12 }
0x1484   :  { %v9260_v23 = vadd.f32 %v22888_v44, %v9208_v14  ;;  %v9213_v36 = vadd.f32 %v22770_v26, %v15714_v34 }
0x1486   :  { %v9276_v47 = vmax.f32 %v9260_v23, 0.0  ;;  %v9261_v43 = vadd.f32 %v22888_v44, %v9213_v36  ;;  %v15715_v18 = vpop.f32.mrb[164].mxu1 }
0x1487   :  { %v15716_v62 = vpop.f32.mrb[165].mxu1 }
0x1488   :  { %v9277_v22 = vmax.f32 %v9261_v43, 0.0  ;;  %v15717_v50 = vadd.f32 %v15716_v62, %v15715_v18  ;;  %v15718_v15 = vpop.f32.mrb[166].mxu1  ;;  %17580 = vmatprep.mubr.msk.f32.mxu1 %vm25147_vm12, %v9276_v47 }
0x1489   :  { %v15719_v19 = vpop.f32.mrb[167].mxu1 }
0x148a   :  { %v9218_v38 = vadd.f32 %v15717_v50, %v22779_v39  ;;  %v15720_v27 = vadd.f32 %v15719_v19, %v15718_v15  ;;  %17581 = vmatmul.mubr.msk.f32.gmra.mrb[182].mxu1 %vm25152_vm14, %v9277_v22  ;;  %vm25155_vm14 = vmmov %vm25147_vm12 }
0x148c   :  { %v9262_v32 = vadd.f32 %v22888_v44, %v9218_v38  ;;  %v9223_v26 = vadd.f32 %v22777_v24, %v15720_v27  ;;  %v463_v38 = vld [vmem:[%s25154_s30] sm:$0x1f]  ;;  %v466_v27 = vld [vmem:[%s25156_s27 + $0x8] sm:$0xff] }
0x148e   :  { %v9278_v48 = vmax.f32 %v9262_v32, 0.0  ;;  %v9263_v37 = vadd.f32 %v22888_v44, %v9223_v26  ;;  %v15721_v35 = vpop.f32.mrb[168].mxu1  ;;  %v22943_v26 = vld [vmem:[#allocation19] ss:$0 sm:$0xff] }
0x148f   :  { %v15722_v56 = vpop.f32.mrb[169].mxu1 }
0x1490   :  { %v9279_v40 = vmax.f32 %v9263_v37, 0.0  ;;  %v15723_v3 = vadd.f32 %v15722_v56, %v15721_v35  ;;  %v15724_v5 = vpop.f32.mrb[170].mxu1  ;;  %17583 = vmatprep.mubr.msk.f32.mxu1 %vm25153_vm13, %v9278_v48  ;;  %vm25157_vm13 = vmmov %vm25147_vm12  ;;  %v9483_v56 = vmul.f32 0.5, %v22066_v2 }
0x1491   :  { %v15725_v53 = vpop.f32.mrb[171].mxu1 }
0x1492   :  { %v9228_v39 = vadd.f32 %v15723_v3, %v22786_v61  ;;  %v15726_v0 = vadd.f32 %v15725_v53, %v15724_v5  ;;  %17584 = vmatmul.mubr.msk.f32.gmra.mrb[184].mxu1 %vm25147_vm12, %v9279_v40  ;;  %v9484_v3 = vmul.f32 0.5, %v22068_v59  ;;  %v9485_v59 = vmul.f32 0.5, %v22084_v4 }
0x1494   :  { %v9264_v49 = vadd.f32 %v22888_v44, %v9228_v39  ;;  %v9233_v24 = vadd.f32 %v22784_v52, %v15726_v0 }
0x1496   :  { %v9280_v31 = vmax.f32 %v9264_v49, 0.0  ;;  %v9265_v14 = vadd.f32 %v22888_v44, %v9233_v24  ;;  %v15727_v34 = vpop.f32.mrb[172].mxu1 }
0x1497   :  { %v15728_v23 = vpop.f32.mrb[173].mxu1 }
0x1498   :  { %v9281_v36 = vmax.f32 %v9265_v14, 0.0  ;;  %v15729_v47 = vadd.f32 %v15728_v23, %v15727_v34  ;;  %v15730_v43 = vpop.f32.mrb[174].mxu1  ;;  %17586 = vmatprep.mubr.msk.f32.mxu1 %vm25155_vm14, %v9280_v31  ;;  %vm25159_vm14 = vcmask 1044480   ;;  %v9486_v14 = vmul.f32 0.5, %v22086_v17 }
0x1499   :  { %v15731_v61 = vpop.f32.mrb[175].mxu1  ;;  %17642 = vmatprep.subr.msk.mxu1 %vm25159_vm14, %v463_v38  ;;  %vm25160_vm4 = vmmov %vm25159_vm14 }
0x149a   :  { %v9238_v18 = vadd.f32 %v15729_v47, %v22793_v51  ;;  %v15732_v62 = vadd.f32 %v15731_v61, %v15730_v43  ;;  %17587 = vmatmul.mubr.msk.f32.gmra.mrb[186].mxu1 %vm25157_vm13, %v9281_v36  ;;  %v465_v51 = vld [vmem:[%s25156_s27] sm:$0xff] }
0x149b   :  { %17643 = vmatpush3.msk.msra.mxu1 %vm25160_vm4, %v463_v38  ;;  %v18210_v32 = vpack.c.bf16 %v466_v27, %v465_v51  ;;  %vm25161_vm4 = vcmask 39936   ;;  %v9489_v51 = vmul.f32 0.5, %v22108_v28  ;;  %v9490_v27 = vmul.f32 0.5, %v22110_v60 }
0x149c   :  { %v9266_v52 = vadd.f32 %v22888_v44, %v9238_v18  ;;  %v9243_v22 = vadd.f32 %v22791_v8, %v15732_v62  ;;  %vm25163_vm13 = vmmov %vm25161_vm4  ;;  %v9487_v18 = vmul.f32 0.5, %v22096_v55  ;;  %v9488_v62 = vmul.f32 0.5, %v22098_v45 }
0x149d   :  { %18211 = vmatprep.subr.bf16.mxu1 %v18210_v32  ;;  %vm25165_vm14 = vmmov %vm25161_vm4 }
0x149e   :  { %v9282_v50 = vmax.f32 %v9266_v52, 0.0  ;;  %v9267_v15 = vadd.f32 %v22888_v44, %v9243_v22 }
0x14a0   :  { %v9283_v19 = vmax.f32 %v9267_v15, 0.0  ;;  %17589 = vmatprep.mubr.msk.f32.mxu1 %vm25147_vm12, %v9282_v50  ;;  %vm25164_vm12 = vmmov %vm25161_vm4 }
0x14a2   :  { %17590 = vmatmul.mubr.msk.f32.gmra.mrb[188].mxu1 %vm25158_vm8, %v9283_v19  ;;  %vm25162_vm8 = vmmov %vm25161_vm4 }
0x153d   :  { %v17570_v8 = vpop.f32.mrb[126].mxu1 }
0x153e   :  { %v9410_v48 = vadd.f32 %v17570_v8, %v22943_v26  ;;  %v9404_v44 = vpop.f32.mrb[127].mxu1 }
0x153f   :  { %v9405_v37 = vadd.f32 %v22943_v26, %v9404_v44 }
0x1540   :  { %v9500_v35 = vmul.f32 0.5, %v9410_v48 }
0x1541   :  { %v9499_v40 = vmul.f32 0.5, %v9405_v37 }
0x1542   :  { %v22951_v53 = vadd.f32 %v9500_v35, %v9484_v3 }
0x1543   :  { %v22949_v5 = vadd.f32 %v9499_v40, %v9483_v56  ;;  %v9491_v56 = vmul.f32 0.5, %v22120_v11  ;;  %v9492_v40 = vmul.f32 0.5, %v22122_v16 }
0x1545   :  { %v17573_v39 = vpop.f32.mrb[176].mxu1  ;;  %17644 = vmatprep.mubr.msk.f32.mxu1 %vm25161_vm4, %v22949_v5 }
0x1546   :  { %v9420_v0 = vadd.f32 %v17573_v39, %v22943_v26  ;;  %v9414_v49 = vpop.f32.mrb[177].mxu1  ;;  %17645 = vmatmul.mubr.msk.f32.vlgmr.msra.gmra.mrb[190].mxu1 %vm25162_vm8, %v22951_v53  ;;  %vm25166_vm8 = vmmov %vm25161_vm4 }
0x1547   :  { %v9415_v24 = vadd.f32 %v22943_v26, %v9414_v49  ;;  %18213 = vmatpush3.bf16.msra.mxu1 %v18210_v32 }
0x1548   :  { %v9502_v2 = vmul.f32 0.5, %v9420_v0 }
0x1549   :  { %v9501_v31 = vmul.f32 0.5, %v9415_v24 }
0x154a   :  { %v22963_v23 = vadd.f32 %v9502_v2, %v9486_v14 }
0x154b   :  { %v22961_v34 = vadd.f32 %v9501_v31, %v9485_v59  ;;  %v9493_v59 = vmul.f32 0.5, %v22132_v6  ;;  %v9494_v31 = vmul.f32 0.5, %v22134_v10 }
0x154d   :  { %v17576_v36 = vpop.f32.mrb[178].mxu1  ;;  %17647 = vmatprep.mubr.msk.f32.mxu1 %vm25163_vm13, %v22961_v34  ;;  %vm25167_vm13 = vmmov %vm25161_vm4 }
0x154e   :  { %v9430_v47 = vadd.f32 %v17576_v36, %v22943_v26  ;;  %v9424_v43 = vpop.f32.mrb[179].mxu1  ;;  %17648 = vmatmul.mubr.msk.f32.gmra.mrb[192].mxu1 %vm25164_vm12, %v22963_v23  ;;  %vm25168_vm12 = vmmov %vm25161_vm4 }
0x154f   :  { %v9425_v61 = vadd.f32 %v22943_v26, %v9424_v43 }
0x1550   :  { %v9504_v4 = vmul.f32 0.5, %v9430_v47 }
0x1551   :  { %v9503_v17 = vmul.f32 0.5, %v9425_v61 }
0x1552   :  { %v22975_v22 = vadd.f32 %v9504_v4, %v9488_v62 }
0x1553   :  { %v22973_v52 = vadd.f32 %v9503_v17, %v9487_v18  ;;  %v9495_v18 = vmul.f32 0.5, %v22144_v9  ;;  %v9496_v17 = vmul.f32 0.5, %v22146_v30 }
0x1555   :  { %v17579_v50 = vpop.f32.mrb[180].mxu1  ;;  %17650 = vmatprep.mubr.msk.f32.mxu1 %vm25165_vm14, %v22973_v52  ;;  %vm25169_vm14 = vmmov %vm25161_vm4 }
0x1556   :  { %v9440_v15 = vadd.f32 %v17579_v50, %v22943_v26  ;;  %v9434_v19 = vpop.f32.mrb[181].mxu1  ;;  %17651 = vmatmul.mubr.msk.f32.gmra.mrb[194].mxu1 %vm25161_vm4, %v22975_v22 }
0x1557   :  { %v9435_v38 = vadd.f32 %v22943_v26, %v9434_v19 }
0x1558   :  { %v9506_v55 = vmul.f32 0.5, %v9440_v15 }
0x1559   :  { %v9505_v45 = vmul.f32 0.5, %v9435_v38 }
0x155a   :  { %v22987_v8 = vadd.f32 %v9506_v55, %v9490_v27  ;;  %v9497_v55 = vmul.f32 0.5, %v22156_v1  ;;  %v469_v1 = vld [vmem:[%s25156_s27 + $0x20] sm:$0xff] }
0x155b   :  { %v22985_v32 = vadd.f32 %v9505_v45, %v9489_v51  ;;  %v9498_v45 = vmul.f32 0.5, %v22158_v41  ;;  %v477_v41 = vld [vmem:[%s25173_s24] sm:$0x1f] }
0x155d   :  { %v17582_v48 = vpop.f32.mrb[182].mxu1  ;;  %17653 = vmatprep.mubr.msk.f32.mxu1 %vm25166_vm8, %v22985_v32  ;;  %vm25170_vm8 = vmmov %vm25161_vm4 }
0x155e   :  { %v9450_v44 = vadd.f32 %v17582_v48, %v22943_v26  ;;  %v9444_v37 = vpop.f32.mrb[183].mxu1  ;;  %17654 = vmatmul.mubr.msk.f32.gmra.mrb[196].mxu1 %vm25167_vm13, %v22987_v8  ;;  %vm25171_vm13 = vmmov %vm25161_vm4 }
0x155f   :  { %v9445_v35 = vadd.f32 %v22943_v26, %v9444_v37 }
0x1560   :  { %v9508_v28 = vmul.f32 0.5, %v9450_v44  ;;  %v468_v44 = vld [vmem:[%s25156_s27 + $0x18] sm:$0xff] }
0x1561   :  { %v9507_v60 = vmul.f32 0.5, %v9445_v35  ;;  %v471_v35 = vld [vmem:[%s25174_s1] sm:$0xff] }
0x1562   :  { %v22999_v39 = vadd.f32 %v9508_v28, %v9492_v40  ;;  %v472_v28 = vld [vmem:[%s25174_s1 + $0x8] sm:$0xff] }
0x1563   :  { %v22997_v3 = vadd.f32 %v9507_v60, %v9491_v56  ;;  %v18218_v56 = vpack.c.bf16 %v472_v28, %v471_v35  ;;  %v14427_v60 = vld [vmem:[%s25176_s16] ss:$0 sm:$0xff] }
0x1565   :  { %v17585_v0 = vpop.f32.mrb[184].mxu1  ;;  %17656 = vmatprep.mubr.msk.f32.mxu1 %vm25168_vm12, %v22997_v3  ;;  %vm25172_vm12 = vmmov %vm25161_vm4  ;;  %18219 = vmatprep.subr.bf16.mxu0 %v18218_v56 }
0x1566   :  { %v9460_v49 = vadd.f32 %v17585_v0, %v22943_v26  ;;  %v9454_v24 = vpop.f32.mrb[185].mxu1  ;;  %17657 = vmatmul.mubr.msk.f32.gmra.mrb[198].mxu1 %vm25169_vm14, %v22999_v39  ;;  %vm25175_vm14 = vmmov %vm25161_vm4  ;;  %18221 = vmatpush3.bf16.msra.mxu0 %v18218_v56 }
0x1567   :  { %v9455_v2 = vadd.f32 %v22943_v26, %v9454_v24 }
0x1568   :  { %v9510_v11 = vmul.f32 0.5, %v9460_v49 }
0x1569   :  { %v9509_v16 = vmul.f32 0.5, %v9455_v2 }
0x156a   :  { %v23011_v36 = vadd.f32 %v9510_v11, %v9494_v31 }
0x156b   :  { %v23009_v14 = vadd.f32 %v9509_v16, %v9493_v59 }
0x156d   :  { %v17588_v47 = vpop.f32.mrb[186].mxu1  ;;  %17659 = vmatprep.mubr.msk.f32.mxu1 %vm25161_vm4, %v23009_v14 }
0x156e   :  { %v9470_v43 = vadd.f32 %v17588_v47, %v22943_v26  ;;  %v9464_v61 = vpop.f32.mrb[187].mxu1  ;;  %17660 = vmatmul.mubr.msk.f32.gmra.mrb[200].mxu1 %vm25170_vm8, %v23011_v36  ;;  %vm25177_vm8 = vcmask 1044480  }
0x156f   :  { %v9465_v4 = vadd.f32 %v22943_v26, %v9464_v61 }
0x1570   :  { %v9512_v6 = vmul.f32 0.5, %v9470_v43 }
0x1571   :  { %v9511_v10 = vmul.f32 0.5, %v9465_v4 }
0x1572   :  { %v23023_v50 = vadd.f32 %v9512_v6, %v9496_v17 }
0x1573   :  { %v23021_v62 = vadd.f32 %v9511_v10, %v9495_v18 }
0x1575   :  { %v17591_v15 = vpop.f32.mrb[188].mxu1  ;;  %17662 = vmatprep.mubr.msk.f32.mxu1 %vm25171_vm13, %v23021_v62  ;;  %vm25178_vm13 = vcmask 326656  }
0x1576   :  { %v9480_v19 = vadd.f32 %v17591_v15, %v22943_v26  ;;  %v9474_v38 = vpop.f32.mrb[189].mxu1  ;;  %17663 = vmatmul.mubr.msk.f32.gmra.mrb[202].mxu1 %vm25172_vm12, %v23023_v50  ;;  %vm25179_vm12 = vmmov %vm25178_vm13 }
0x1577   :  { %v9475_v9 = vadd.f32 %v22943_v26, %v9474_v38  ;;  %v467_v26 = vld [vmem:[%s25156_s27 + $0x10] sm:$0xff] }
0x1578   :  { %v9514_v30 = vmul.f32 0.5, %v9480_v19  ;;  %v18214_v37 = vpack.c.bf16 %v468_v44, %v467_v26 }
0x1579   :  { %v9513_v51 = vmul.f32 0.5, %v9475_v9 }
0x157a   :  { %v23035_v48 = vadd.f32 %v9514_v30, %v9498_v45  ;;  %18215 = vmatprep.subr.bf16.mxu1 %v18214_v37 }
0x157b   :  { %v23033_v27 = vadd.f32 %v9513_v51, %v9497_v55  ;;  %18217 = vmatpush3.bf16.msra.mxu1 %v18214_v37 }
0x157c   :  { %17676 = vmatprep.subr.mxu1 %v469_v1 }
0x157d   :  { %17665 = vmatprep.mubr.msk.f32.mxu1 %vm25175_vm14, %v23033_v27  ;;  %vm25180_vm14 = vmmov %vm25177_vm8 }
0x157e   :  { %17666 = vmatmul.mubr.msk.f32.gmra.mrb[204].mxu1 %vm25161_vm4, %v23035_v48  ;;  %vm25181_vm4 = vmmov %vm25179_vm12 }
0x157f   :  { %17677 = vmatpush3.msra.mxu1 %v469_v1 }
0x1580   :  { %17736 = vmatprep.subr.msk.mxu1 %vm25177_vm8, %v477_v41  ;;  %vm25182_vm8 = vmmov %vm25181_vm4 }
0x1619   :  { %v17646_v40 = vpop.f32.mrb[190].mxu1 }
0x161a   :  { %v9920_v0 = vadd.f32 %v17646_v40, %v14427_v60  ;;  %v9914_v49 = vpop.f32.mrb[191].mxu1 }
0x161b   :  { %v9915_v24 = vadd.f32 %v14427_v60, %v9914_v49 }
0x161c   :  { %v9994_v11 = vmax.f32 %v9920_v0, 0.0 }
0x161d   :  { %v9993_v2 = vmax.f32 %v9915_v24, 0.0 }
0x161f   :  { %17678 = vmatprep.mubr.msk.f32.mxu1 %vm25178_vm13, %v9993_v2  ;;  %vm25183_vm13 = vmmov %vm25181_vm4 }
0x1620   :  { %17679 = vmatmul.mubr.msk.f32.vlgmr.msra.gmra.mrb[208].mxu1 %vm25179_vm12, %v9994_v11  ;;  %vm25184_vm12 = vmmov %vm25181_vm4 }
0x1621   :  { %v17649_v59 = vpop.f32.mrb[192].mxu1  ;;  %17737 = vmatpush3.msk.msra.mxu1 %vm25180_vm14, %v477_v41  ;;  %vm25185_vm14 = vmmov %vm25181_vm4 }
0x1622   :  { %v9930_v16 = vadd.f32 %v17649_v59, %v14427_v60  ;;  %v9924_v31 = vpop.f32.mrb[193].mxu1 }
0x1623   :  { %v9925_v47 = vadd.f32 %v14427_v60, %v9924_v31 }
0x1624   :  { %v9996_v61 = vmax.f32 %v9930_v16, 0.0 }
0x1625   :  { %v9995_v43 = vmax.f32 %v9925_v47, 0.0 }
0x1627   :  { %17681 = vmatprep.mubr.msk.f32.mxu1 %vm25181_vm4, %v9995_v43 }
0x1628   :  { %17682 = vmatmul.mubr.msk.f32.gmra.mrb[210].mxu1 %vm25182_vm8, %v9996_v61  ;;  %vm25186_vm8 = vmmov %vm25181_vm4 }
0x1629   :  { %v17652_v4 = vpop.f32.mrb[194].mxu1 }
0x162a   :  { %v9940_v6 = vadd.f32 %v17652_v4, %v14427_v60  ;;  %v9934_v18 = vpop.f32.mrb[195].mxu1 }
0x162b   :  { %v9935_v10 = vadd.f32 %v14427_v60, %v9934_v18 }
0x162c   :  { %v9998_v15 = vmax.f32 %v9940_v6, 0.0 }
0x162d   :  { %v9997_v17 = vmax.f32 %v9935_v10, 0.0  ;;  %v474_v10 = vld [vmem:[%s25174_s1 + $0x18] sm:$0xff] }
0x162f   :  { %17684 = vmatprep.mubr.msk.f32.mxu1 %vm25183_vm13, %v9997_v17  ;;  %vm25187_vm13 = vmmov %vm25181_vm4 }
0x1630   :  { %17685 = vmatmul.mubr.msk.f32.gmra.mrb[212].mxu1 %vm25184_vm12, %v9998_v15  ;;  %vm25188_vm12 = vmmov %vm25181_vm4  ;;  %v475_v15 = vld [vmem:[%s25174_s1 + $0x20] sm:$0xff] }
0x1631   :  { %v17655_v19 = vpop.f32.mrb[196].mxu1 }
0x1632   :  { %v9950_v38 = vadd.f32 %v17655_v19, %v14427_v60  ;;  %v9944_v9 = vpop.f32.mrb[197].mxu1  ;;  %v479_v19 = vld [vmem:[%s25202_s10] sm:$0xff] }
0x1633   :  { %v9945_v30 = vadd.f32 %v14427_v60, %v9944_v9 }
0x1634   :  { %v10000_v51 = vmax.f32 %v9950_v38, 0.0  ;;  %v480_v38 = vld [vmem:[%s25202_s10 + $0x8] sm:$0xff] }
0x1635   :  { %v9999_v55 = vmax.f32 %v9945_v30, 0.0  ;;  %v18226_v9 = vpack.c.bf16 %v480_v38, %v479_v19  ;;  %v23104_v30 = vld [vmem:[%s25206_s2] ss:$0 sm:$0xff] }
0x1637   :  { %17687 = vmatprep.mubr.msk.f32.mxu1 %vm25185_vm14, %v9999_v55  ;;  %vm25189_vm14 = vmmov %vm25181_vm4 }
0x1638   :  { %17688 = vmatmul.mubr.msk.f32.gmra.mrb[214].mxu1 %vm25181_vm4, %v10000_v51 }
0x1639   :  { %v17658_v45 = vpop.f32.mrb[198].mxu1 }
0x163a   :  { %v9960_v26 = vadd.f32 %v17658_v45, %v14427_v60  ;;  %v9954_v44 = vpop.f32.mrb[199].mxu1 }
0x163b   :  { %v9955_v37 = vadd.f32 %v14427_v60, %v9954_v44  ;;  %v481_v44 = vld [vmem:[%s25202_s10 + $0x10] sm:$0xff] }
0x163c   :  { %v10002_v41 = vmax.f32 %v9960_v26, 0.0 }
0x163d   :  { %v10001_v1 = vmax.f32 %v9955_v37, 0.0  ;;  %v482_v37 = vld [vmem:[%s25202_s10 + $0x18] sm:$0xff] }
0x163f   :  { %17690 = vmatprep.mubr.msk.f32.mxu1 %vm25186_vm8, %v10001_v1  ;;  %vm25190_vm8 = vmmov %vm25181_vm4 }
0x1640   :  { %17691 = vmatmul.mubr.msk.f32.gmra.mrb[216].mxu1 %vm25187_vm13, %v10002_v41  ;;  %vm25191_vm13 = vmmov %vm25181_vm4 }
0x1641   :  { %v17661_v35 = vpop.f32.mrb[200].mxu1 }
0x1642   :  { %v9970_v28 = vadd.f32 %v17661_v35, %v14427_v60  ;;  %v9964_v56 = vpop.f32.mrb[201].mxu1  ;;  %v18230_v35 = vpack.c.bf16 %v482_v37, %v481_v44 }
0x1643   :  { %v9965_v40 = vadd.f32 %v14427_v60, %v9964_v56 }
0x1644   :  { %v10004_v49 = vmax.f32 %v9970_v28, 0.0 }
0x1645   :  { %v10003_v0 = vmax.f32 %v9965_v40, 0.0 }
0x1647   :  { %17693 = vmatprep.mubr.msk.f32.mxu1 %vm25188_vm12, %v10003_v0  ;;  %vm25192_vm12 = vmmov %vm25181_vm4 }
0x1648   :  { %17694 = vmatmul.mubr.msk.f32.gmra.mrb[218].mxu1 %vm25189_vm14, %v10004_v49  ;;  %vm25193_vm14 = vcmask 39936   ;;  %v483_v49 = vld [vmem:[%s25202_s10 + $0x20] sm:$0xff] }
0x1649   :  { %v17664_v24 = vpop.f32.mrb[202].mxu1  ;;  %vm25194_vm3 = vmmov %vm25193_vm14 }
0x164a   :  { %v9980_v2 = vadd.f32 %v17664_v24, %v14427_v60  ;;  %v9974_v11 = vpop.f32.mrb[203].mxu1  ;;  %vm25197_vm6 = vmmov %vm25194_vm3 }
0x164b   :  { %v9975_v59 = vadd.f32 %v14427_v60, %v9974_v11  ;;  %v23117_v11 = vld [vmem:[%s25209_s14] sm:$0x1f] }
0x164c   :  { %v10006_v31 = vmax.f32 %v9980_v2, 0.0 }
0x164d   :  { %v10005_v16 = vmax.f32 %v9975_v59, 0.0 }
0x164f   :  { %17696 = vmatprep.mubr.msk.f32.mxu1 %vm25181_vm4, %v10005_v16  ;;  %vm25195_vm4 = vmmov %vm25194_vm3 }
0x1650   :  { %17697 = vmatmul.mubr.msk.f32.gmra.mrb[220].mxu1 %vm25190_vm8, %v10006_v31  ;;  %vm25196_vm8 = vmmov %vm25194_vm3 }
0x1651   :  { %v17667_v47 = vpop.f32.mrb[204].mxu1 }
0x1652   :  { %v9990_v43 = vadd.f32 %v17667_v47, %v14427_v60  ;;  %v9984_v61 = vpop.f32.mrb[205].mxu1 }
0x1653   :  { %v9985_v4 = vadd.f32 %v14427_v60, %v9984_v61  ;;  %v473_v60 = vld [vmem:[%s25174_s1 + $0x10] sm:$0xff] }
0x1654   :  { %v10008_v18 = vmax.f32 %v9990_v43, 0.0  ;;  %v18222_v17 = vpack.c.bf16 %v474_v10, %v473_v60 }
0x1655   :  { %v10007_v6 = vmax.f32 %v9985_v4, 0.0 }
0x1656   :  { %18223 = vmatprep.subr.bf16.mxu0 %v18222_v17 }
0x1657   :  { %17699 = vmatprep.mubr.msk.f32.mxu1 %vm25191_vm13, %v10007_v6  ;;  %vm25198_vm13 = vmmov %vm25194_vm3  ;;  %18225 = vmatpush3.bf16.msra.mxu0 %v18222_v17 }
0x1658   :  { %17700 = vmatmul.mubr.msk.f32.gmra.mrb[222].mxu1 %vm25192_vm12, %v10008_v18  ;;  %vm25199_vm12 = vmmov %vm25194_vm3  ;;  %17710 = vmatprep.subr.mxu0 %v475_v15 }
0x1659   :  { %17738 = vmatprep.mubr.msk.f32.mxu1 %vm25193_vm14, %v22949_v5  ;;  %vm25200_vm14 = vmmov %vm25194_vm3 }
0x165b   :  { %17711 = vmatpush3.msra.mxu0 %v475_v15 }
0x165c   :  { %17739 = vmatmul.mubr.msk.f32.vlgmr.msra.gmra.mrb[224].mxu1 %vm25194_vm3, %v22951_v53  ;;  %18227 = vmatprep.subr.bf16.mxu0 %v18226_v9 }
0x165d   :  { %17741 = vmatprep.mubr.msk.f32.mxu1 %vm25195_vm4, %v22961_v34  ;;  %vm25201_vm4 = vmmov %vm25194_vm3 }
0x1660   :  { %17742 = vmatmul.mubr.msk.f32.gmra.mrb[226].mxu1 %vm25196_vm8, %v22963_v23  ;;  %vm25203_vm8 = vmmov %vm25194_vm3 }
0x1661   :  { %17744 = vmatprep.mubr.msk.f32.mxu1 %vm25197_vm6, %v22973_v52  ;;  %vm25204_vm6 = vmmov %vm25194_vm3 }
0x1664   :  { %17745 = vmatmul.mubr.msk.f32.gmra.mrb[228].mxu1 %vm25198_vm13, %v22975_v22  ;;  %vm25205_vm13 = vmmov %vm25194_vm3 }
0x1665   :  { %17747 = vmatprep.mubr.msk.f32.mxu1 %vm25199_vm12, %v22985_v32  ;;  %vm25207_vm12 = vmmov %vm25194_vm3 }
0x1668   :  { %17748 = vmatmul.mubr.msk.f32.gmra.mrb[230].mxu1 %vm25200_vm14, %v22987_v8  ;;  %vm25208_vm14 = vmmov %vm25194_vm3 }
0x1669   :  { %17750 = vmatprep.mubr.msk.f32.mxu1 %vm25194_vm3, %v22997_v3 }
0x166c   :  { %17751 = vmatmul.mubr.msk.f32.gmra.mrb[232].mxu1 %vm25201_vm4, %v22999_v39  ;;  %vm25210_vm4 = vcmask 326656  }
0x166d   :  { %17753 = vmatprep.mubr.msk.f32.mxu1 %vm25203_vm8, %v23009_v14  ;;  %vm25211_vm8 = vmmov %vm25210_vm4 }
0x1670   :  { %17754 = vmatmul.mubr.msk.f32.gmra.mrb[234].mxu1 %vm25204_vm6, %v23011_v36  ;;  %vm25212_vm6 = vmmov %vm25210_vm4 }
0x1671   :  { %17756 = vmatprep.mubr.msk.f32.mxu1 %vm25205_vm13, %v23021_v62  ;;  %vm25213_vm13 = vmmov %vm25210_vm4 }
0x1674   :  { %17757 = vmatmul.mubr.msk.f32.gmra.mrb[236].mxu1 %vm25207_vm12, %v23023_v50  ;;  %vm25214_vm12 = vcmask 1044480  }
0x1675   :  { %17759 = vmatprep.mubr.msk.f32.mxu1 %vm25208_vm14, %v23033_v27  ;;  %vm25215_vm14 = vmmov %vm25210_vm4 }
0x1678   :  { %17760 = vmatmul.mubr.msk.f32.gmra.mrb[238].mxu1 %vm25194_vm3, %v23035_v48  ;;  %vm25216_vm3 = vmmov %vm25210_vm4 }
0x16f3   :  { %v17680_v55 = vpop.f32.mrb[208].mxu1 }
0x16f4   :  { %v10135_v51 = vadd.f32 %v17680_v55, %v23104_v30  ;;  %v10129_v45 = vpop.f32.mrb[209].mxu1 }
0x16f5   :  { %v10130_v26 = vadd.f32 %v23104_v30, %v10129_v45 }
0x16f6   :  { %v10209_v41 = vmax.f32 %v10135_v51, 0.0 }
0x16f7   :  { %v10208_v1 = vmax.f32 %v10130_v26, 0.0 }
0x16f9   :  { %17712 = vmatprep.mubr.msk.f32.mxu0 %vm25210_vm4, %v10208_v1  ;;  %vm25217_vm4 = vmmov %vm25216_vm3 }
0x16fa   :  { %17713 = vmatmul.mubr.msk.f32.vlgmr.msra.gmra.mrb[66].mxu0 %vm25211_vm8, %v10209_v41  ;;  %vm25218_vm8 = vmmov %vm25216_vm3 }
0x16fb   :  { %v17683_v28 = vpop.f32.mrb[210].mxu1  ;;  %18229 = vmatpush3.bf16.msra.mxu0 %v18226_v9 }
0x16fc   :  { %v10145_v56 = vadd.f32 %v17683_v28, %v23104_v30  ;;  %v10139_v40 = vpop.f32.mrb[211].mxu1  ;;  %18231 = vmatprep.subr.bf16.mxu0 %v18230_v35 }
0x16fd   :  { %v10140_v0 = vadd.f32 %v23104_v30, %v10139_v40 }
0x16fe   :  { %v10211_v2 = vmax.f32 %v10145_v56, 0.0 }
0x16ff   :  { %v10210_v24 = vmax.f32 %v10140_v0, 0.0  ;;  %18233 = vmatpush3.bf16.msra.mxu0 %v18230_v35 }
0x1700   :  { %17770 = vmatprep.subr.mxu0 %v483_v49 }
0x1701   :  { %17715 = vmatprep.mubr.msk.f32.mxu0 %vm25212_vm6, %v10210_v24  ;;  %vm25219_vm6 = vmmov %vm25216_vm3 }
0x1702   :  { %17716 = vmatmul.mubr.msk.f32.gmra.mrb[100].mxu0 %vm25213_vm13, %v10211_v2  ;;  %vm25220_vm13 = vmmov %vm25216_vm3 }
0x1703   :  { %v17686_v59 = vpop.f32.mrb[212].mxu1  ;;  %17771 = vmatpush3.msra.mxu0 %v483_v49 }
0x1704   :  { %v10155_v16 = vadd.f32 %v17686_v59, %v23104_v30  ;;  %v10149_v31 = vpop.f32.mrb[213].mxu1  ;;  %17830 = vmatprep.subr.msk.mxu0 %vm25214_vm12, %v23117_v11  ;;  %vm25222_vm12 = vmmov %vm25216_vm3 }
0x1705   :  { %v10150_v47 = vadd.f32 %v23104_v30, %v10149_v31  ;;  %v23145_v31 = vld [vmem:[%s25221_s7] ss:$0 sm:$0xff] }
0x1706   :  { %v10213_v61 = vmax.f32 %v10155_v16, 0.0 }
0x1707   :  { %v10212_v43 = vmax.f32 %v10150_v47, 0.0 }
0x1709   :  { %17718 = vmatprep.mubr.msk.f32.mxu0 %vm25215_vm14, %v10212_v43  ;;  %vm25223_vm14 = vmmov %vm25216_vm3 }
0x170a   :  { %17719 = vmatmul.mubr.msk.f32.gmra.mrb[102].mxu0 %vm25216_vm3, %v10213_v61 }
0x170b   :  { %v17689_v4 = vpop.f32.mrb[214].mxu1 }
0x170c   :  { %v10165_v6 = vadd.f32 %v17689_v4, %v23104_v30  ;;  %v10159_v18 = vpop.f32.mrb[215].mxu1 }
0x170d   :  { %v10160_v60 = vadd.f32 %v23104_v30, %v10159_v18 }
0x170e   :  { %v10215_v17 = vmax.f32 %v10165_v6, 0.0 }
0x170f   :  { %v10214_v10 = vmax.f32 %v10160_v60, 0.0 }
0x1711   :  { %17721 = vmatprep.mubr.msk.f32.mxu0 %vm25217_vm4, %v10214_v10  ;;  %vm25224_vm4 = vmmov %vm25216_vm3 }
0x1712   :  { %17722 = vmatmul.mubr.msk.f32.gmra.mrb[104].mxu0 %vm25218_vm8, %v10215_v17  ;;  %vm25225_vm8 = vmmov %vm25216_vm3 }
0x1713   :  { %v17692_v15 = vpop.f32.mrb[216].mxu1 }
0x1714   :  { %v10175_v19 = vadd.f32 %v17692_v15, %v23104_v30  ;;  %v10169_v38 = vpop.f32.mrb[217].mxu1 }
0x1715   :  { %v10170_v9 = vadd.f32 %v23104_v30, %v10169_v38 }
0x1716   :  { %v10217_v51 = vmax.f32 %v10175_v19, 0.0 }
0x1717   :  { %v10216_v55 = vmax.f32 %v10170_v9, 0.0 }
0x1719   :  { %17724 = vmatprep.mubr.msk.f32.mxu0 %vm25219_vm6, %v10216_v55  ;;  %vm25226_vm6 = vmmov %vm25216_vm3 }
0x171a   :  { %17725 = vmatmul.mubr.msk.f32.gmra.mrb[106].mxu0 %vm25220_vm13, %v10217_v51  ;;  %vm25227_vm13 = vmmov %vm25216_vm3 }
0x171b   :  { %v17695_v45 = vpop.f32.mrb[218].mxu1 }
0x171c   :  { %v10185_v26 = vadd.f32 %v17695_v45, %v23104_v30  ;;  %v10179_v44 = vpop.f32.mrb[219].mxu1 }
0x171d   :  { %v10180_v37 = vadd.f32 %v23104_v30, %v10179_v44 }
0x171e   :  { %v10219_v41 = vmax.f32 %v10185_v26, 0.0 }
0x171f   :  { %v10218_v1 = vmax.f32 %v10180_v37, 0.0 }
0x1721   :  { %17727 = vmatprep.mubr.msk.f32.mxu0 %vm25222_vm12, %v10218_v1  ;;  %vm25228_vm12 = vmmov %vm25216_vm3 }
0x1722   :  { %17728 = vmatmul.mubr.msk.f32.gmra.mrb[108].mxu0 %vm25223_vm14, %v10219_v41  ;;  %vm25229_vm14 = vcmask 1044480  }
0x1723   :  { %v17698_v35 = vpop.f32.mrb[220].mxu1 }
0x1724   :  { %v10195_v28 = vadd.f32 %v17698_v35, %v23104_v30  ;;  %v10189_v56 = vpop.f32.mrb[221].mxu1 }
0x1725   :  { %v10190_v40 = vadd.f32 %v23104_v30, %v10189_v56 }
0x1726   :  { %v10221_v49 = vmax.f32 %v10195_v28, 0.0 }
0x1727   :  { %v10220_v0 = vmax.f32 %v10190_v40, 0.0 }
0x1729   :  { %17730 = vmatprep.mubr.msk.f32.mxu0 %vm25216_vm3, %v10220_v0 }
0x172a   :  { %17731 = vmatmul.mubr.msk.f32.gmra.mrb[110].mxu0 %vm25224_vm4, %v10221_v49  ;;  %vm25230_vm4 = vmmov %vm25216_vm3 }
0x172b   :  { %v17701_v24 = vpop.f32.mrb[222].mxu1 }
0x172c   :  { %v10205_v2 = vadd.f32 %v17701_v24, %v23104_v30  ;;  %v10199_v59 = vpop.f32.mrb[223].mxu1 }
0x172d   :  { %v10200_v16 = vadd.f32 %v23104_v30, %v10199_v59 }
0x172e   :  { %v10223_v61 = vmax.f32 %v10205_v2, 0.0 }
0x172f   :  { %v10222_v47 = vmax.f32 %v10200_v16, 0.0  ;;  %v17740_v43 = vpop.f32.mrb[224].mxu1 }
0x1730   :  { %v10616_v4 = vadd.f32 %v17740_v43, %v23145_v31  ;;  %v10610_v6 = vpop.f32.mrb[225].mxu1 }
0x1731   :  { %v10611_v18 = vadd.f32 %v23145_v31, %v10610_v6  ;;  %17733 = vmatprep.mubr.msk.f32.mxu0 %vm25225_vm8, %v10222_v47  ;;  %vm25231_vm8 = vmmov %vm25216_vm3 }
0x1732   :  { %17734 = vmatmul.mubr.msk.f32.gmra.mrb[112].mxu0 %vm25226_vm6, %v10223_v61  ;;  %v10690_v17 = vmax.f32 %v10616_v4, 0.0  ;;  %vm25232_vm6 = vmmov %vm25216_vm3 }
0x1733   :  { %v10689_v60 = vmax.f32 %v10611_v18, 0.0  ;;  %v17743_v10 = vpop.f32.mrb[226].mxu1 }
0x1734   :  { %v10626_v15 = vadd.f32 %v17743_v10, %v23145_v31  ;;  %v10620_v30 = vpop.f32.mrb[227].mxu1 }
0x1735   :  { %v10621_v19 = vadd.f32 %v23145_v31, %v10620_v30  ;;  %17772 = vmatprep.mubr.msk.f32.mxu0 %vm25227_vm13, %v10689_v60  ;;  %vm25233_vm13 = vmmov %vm25216_vm3 }
0x1736   :  { %17773 = vmatmul.mubr.msk.f32.vlgmr.msra.gmra.mrb[114].mxu0 %vm25228_vm12, %v10690_v17  ;;  %v10692_v55 = vmax.f32 %v10626_v15, 0.0  ;;  %vm25234_vm12 = vmmov %vm25216_vm3 }
0x1737   :  { %v10691_v38 = vmax.f32 %v10621_v19, 0.0  ;;  %v17746_v9 = vpop.f32.mrb[228].mxu1  ;;  %17831 = vmatpush3.msk.msra.mxu0 %vm25229_vm14, %v23117_v11  ;;  %vm25235_vm14 = vmmov %vm25216_vm3 }
0x1738   :  { %v10636_v51 = vadd.f32 %v17746_v9, %v23145_v31  ;;  %v10630_v45 = vpop.f32.mrb[229].mxu1 }
0x1739   :  { %v10631_v26 = vadd.f32 %v23145_v31, %v10630_v45  ;;  %17775 = vmatprep.mubr.msk.f32.mxu0 %vm25216_vm3, %v10691_v38 }
0x173a   :  { %17776 = vmatmul.mubr.msk.f32.gmra.mrb[116].mxu0 %vm25230_vm4, %v10692_v55  ;;  %v10694_v1 = vmax.f32 %v10636_v51, 0.0  ;;  %vm25236_vm4 = vmmov %vm25216_vm3 }
0x173b   :  { %v10693_v44 = vmax.f32 %v10631_v26, 0.0  ;;  %v17749_v37 = vpop.f32.mrb[230].mxu1  ;;  %v25259_v26 = vld [vmem:[#allocation104_spill] sm:$0xff] }
0x173c   :  { %v10646_v41 = vadd.f32 %v17749_v37, %v23145_v31  ;;  %v10640_v35 = vpop.f32.mrb[231].mxu1  ;;  %v486_v37 = vld [vmem:[%s25248_s4 + $0x8] sm:$0xff] }
0x173d   :  { %v10641_v28 = vadd.f32 %v23145_v31, %v10640_v35  ;;  %17778 = vmatprep.mubr.msk.f32.mxu0 %vm25231_vm8, %v10693_v44  ;;  %vm25237_vm8 = vmmov %vm25216_vm3  ;;  %v485_v44 = vld [vmem:[%s25248_s4] sm:$0xff]  ;;  %v488_v35 = vld [vmem:[%s25248_s4 + $0x18] sm:$0xff] }
0x173e   :  { %17779 = vmatmul.mubr.msk.f32.gmra.mrb[118].mxu0 %vm25232_vm6, %v10694_v1  ;;  %v10696_v40 = vmax.f32 %v10646_v41, 0.0  ;;  %vm25238_vm6 = vmmov %vm25216_vm3  ;;  %v18234_v1 = vpack.c.bf16 %v486_v37, %v485_v44  ;;  %v487_v41 = vld [vmem:[%s25248_s4 + $0x10] sm:$0xff] }
0x173f   :  { %v10695_v11 = vmax.f32 %v10641_v28, 0.0  ;;  %v17752_v56 = vpop.f32.mrb[232].mxu1  ;;  %v18238_v28 = vpack.c.bf16 %v488_v35, %v487_v41 }
0x1740   :  { %v10656_v0 = vadd.f32 %v17752_v56, %v23145_v31  ;;  %v10650_v49 = vpop.f32.mrb[233].mxu1  ;;  %18235 = vmatprep.subr.bf16.mxu1 %v18234_v1  ;;  %v23224_v56 = vld [vmem:[%s25258_s11] sm:$0x1f] }
0x1741   :  { %v10651_v24 = vadd.f32 %v23145_v31, %v10650_v49  ;;  %17781 = vmatprep.mubr.msk.f32.mxu0 %vm25233_vm13, %v10695_v11  ;;  %vm25239_vm13 = vmmov %vm25216_vm3  ;;  %18237 = vmatpush3.bf16.msra.mxu1 %v18234_v1  ;;  %v489_v11 = vld [vmem:[%s25248_s4 + $0x20] sm:$0xff] }
0x1742   :  { %17782 = vmatmul.mubr.msk.f32.gmra.mrb[120].mxu0 %vm25234_vm12, %v10696_v40  ;;  %v10698_v16 = vmax.f32 %v10656_v0, 0.0  ;;  %vm25240_vm12 = vmmov %vm25216_vm3  ;;  %18239 = vmatprep.subr.bf16.mxu1 %v18238_v28  ;;  %v23228_v40 = vld [vmem:[#allocation2] ss:$0 sm:$0xff] }
0x1743   :  { %v10697_v2 = vmax.f32 %v10651_v24, 0.0  ;;  %v17755_v59 = vpop.f32.mrb[234].mxu1 }
0x1744   :  { %v10666_v47 = vadd.f32 %v17755_v59, %v23145_v31  ;;  %v10660_v43 = vpop.f32.mrb[235].mxu1 }
0x1745   :  { %v10661_v61 = vadd.f32 %v23145_v31, %v10660_v43  ;;  %17784 = vmatprep.mubr.msk.f32.mxu0 %vm25235_vm14, %v10697_v2  ;;  %vm25241_vm14 = vmmov %vm25216_vm3  ;;  %18241 = vmatpush3.bf16.msra.mxu1 %v18238_v28 }
0x1746   :  { %17785 = vmatmul.mubr.msk.f32.gmra.mrb[122].mxu0 %vm25216_vm3, %v10698_v16  ;;  %v10700_v18 = vmax.f32 %v10666_v47, 0.0  ;;  %vm25242_vm3 = vcmask 39936   ;;  %17804 = vmatprep.subr.mxu1 %v489_v11 }
0x1747   :  { %v10699_v4 = vmax.f32 %v10661_v61, 0.0  ;;  %v17758_v6 = vpop.f32.mrb[236].mxu1  ;;  %vm25245_vm9 = vmmov %vm25242_vm3 }
0x1748   :  { %v10676_v60 = vadd.f32 %v17758_v6, %v23145_v31  ;;  %v10670_v10 = vpop.f32.mrb[237].mxu1 }
0x1749   :  { %v10671_v17 = vadd.f32 %v23145_v31, %v10670_v10  ;;  %17787 = vmatprep.mubr.msk.f32.mxu0 %vm25236_vm4, %v10699_v4  ;;  %vm25243_vm4 = vmmov %vm25242_vm3  ;;  %17805 = vmatpush3.msra.mxu1 %v489_v11 }
0x174a   :  { %17788 = vmatmul.mubr.msk.f32.gmra.mrb[124].mxu0 %vm25237_vm8, %v10700_v18  ;;  %v10702_v19 = vmax.f32 %v10676_v60, 0.0  ;;  %vm25244_vm8 = vmmov %vm25242_vm3 }
0x174b   :  { %v10701_v15 = vmax.f32 %v10671_v17, 0.0  ;;  %v17761_v30 = vpop.f32.mrb[238].mxu1 }
0x174c   :  { %v10686_v38 = vadd.f32 %v17761_v30, %v23145_v31  ;;  %v10680_v9 = vpop.f32.mrb[239].mxu1 }
0x174d   :  { %v10681_v55 = vadd.f32 %v23145_v31, %v10680_v9  ;;  %17790 = vmatprep.mubr.msk.f32.mxu0 %vm25238_vm6, %v10701_v15  ;;  %vm25246_vm6 = vmmov %vm25242_vm3  ;;  %v19098_v31 = vmov 0  }
0x174e   :  { %17791 = vmatmul.mubr.msk.f32.gmra.mrb[126].mxu0 %vm25239_vm13, %v10702_v19  ;;  %v10704_v45 = vmax.f32 %v10686_v38, 0.0  ;;  %vm25247_vm13 = vmmov %vm25242_vm3  ;;  %18573 = vset.pattern.permute.xlu1 %v19098_v31 }
0x174f   :  { %v10703_v51 = vmax.f32 %v10681_v55, 0.0  ;;  %18574 = vset.pattern.permute.xlu0 %v19098_v31 }
0x1751   :  { %17793 = vmatprep.mubr.msk.f32.mxu0 %vm25240_vm12, %v10703_v51  ;;  %vm25249_vm12 = vmmov %vm25242_vm3 }
0x1752   :  { %17794 = vmatmul.mubr.msk.f32.gmra.mrb[128].mxu0 %vm25241_vm14, %v10704_v45  ;;  %vm25250_vm14 = vmmov %vm25242_vm3 }
0x1753   :  { %17832 = vmatprep.mubr.msk.f32.mxu0 %vm25242_vm3, %v22949_v5 }
0x1756   :  { %17833 = vmatmul.mubr.msk.f32.vlgmr.msra.gmra.mrb[130].mxu0 %vm25243_vm4, %v22951_v53  ;;  %vm25251_vm4 = vmmov %vm25242_vm3 }
0x1757   :  { %17835 = vmatprep.mubr.msk.f32.mxu0 %vm25244_vm8, %v22961_v34  ;;  %vm25253_vm8 = vmmov %vm25242_vm3 }
0x175a   :  { %17836 = vmatmul.mubr.msk.f32.gmra.mrb[132].mxu0 %vm25245_vm9, %v22963_v23  ;;  %vm25252_vm9 = vmmov %vm25242_vm3 }
0x175b   :  { %17838 = vmatprep.mubr.msk.f32.mxu0 %vm25246_vm6, %v22973_v52  ;;  %vm25254_vm6 = vmmov %vm25242_vm3 }
0x175e   :  { %17839 = vmatmul.mubr.msk.f32.gmra.mrb[134].mxu0 %vm25247_vm13, %v22975_v22  ;;  %vm25255_vm13 = vmmov %vm25242_vm3 }
0x175f   :  { %17841 = vmatprep.mubr.msk.f32.mxu0 %vm25249_vm12, %v22985_v32  ;;  %vm25256_vm12 = vmmov %vm25242_vm3 }
0x1762   :  { %17842 = vmatmul.mubr.msk.f32.gmra.mrb[136].mxu0 %vm25250_vm14, %v22987_v8  ;;  %vm25257_vm14 = vmmov %vm25242_vm3 }
0x1763   :  { %17844 = vmatprep.mubr.msk.f32.mxu0 %vm25242_vm3, %v22997_v3  ;;  %vm25260_vm3 = vcmask 1044480  }
0x1764   :  { %17856 = vmatprep.subr.msk.mxu1 %vm25260_vm3, %v23224_v56 }
0x1766   :  { %17845 = vmatmul.mubr.msk.f32.gmra.mrb[138].mxu0 %vm25251_vm4, %v22999_v39  ;;  %vm25262_vm4 = vcmask 326656  }
0x1767   :  { %17847 = vmatprep.mubr.msk.f32.mxu0 %vm25252_vm9, %v23009_v14  ;;  %vm25263_vm9 = vmmov %vm25262_vm4 }
0x176a   :  { %17848 = vmatmul.mubr.msk.f32.gmra.mrb[140].mxu0 %vm25253_vm8, %v23011_v36  ;;  %vm25264_vm8 = vmmov %vm25260_vm3 }
0x176b   :  { %17850 = vmatprep.mubr.msk.f32.mxu0 %vm25254_vm6, %v23021_v62  ;;  %vm25265_vm6 = vmmov %vm25262_vm4 }
0x176c   :  { %vm25269_vm3 = vmmov %vm25262_vm4 }
0x176e   :  { %17851 = vmatmul.mubr.msk.f32.gmra.mrb[142].mxu0 %vm25255_vm13, %v23023_v50  ;;  %vm25266_vm13 = vmmov %vm25262_vm4 }
0x176f   :  { %17853 = vmatprep.mubr.msk.f32.mxu0 %vm25256_vm12, %v23033_v27  ;;  %vm25267_vm12 = vmmov %vm25262_vm4 }
0x1772   :  { %17854 = vmatmul.mubr.msk.f32.gmra.mrb[144].mxu0 %vm25257_vm14, %v23035_v48  ;;  %vm25268_vm14 = vmmov %vm25262_vm4 }
0x1773   :  { %17898 = vmatprep.mubr.bf16.mxu0 %v25259_v26 }
0x17cd   :  { %v17714_v0 = vpop.f32.mrb[66].mxu0 }
0x17ce   :  { %v10350_v49 = vadd.f32 %v17714_v0, %v23228_v40  ;;  %v10344_v24 = vpop.f32.mrb[67].mxu0 }
0x17cf   :  { %v10345_v2 = vadd.f32 %v23228_v40, %v10344_v24 }
0x17d0   :  { %v10424_v59 = vsub.f32 0.0, %v10350_v49 }
0x17d1   :  { %v10423_v16 = vsub.f32 0.0, %v10345_v2 }
0x17d2   :  { %v10441_v47 = vmul.f32 1.442695, %v10424_v59 }
0x17d3   :  { %v10439_v43 = vmul.f32 1.442695, %v10423_v16 }
0x17d4   :  { %18605 = vpow2.f32 %v10441_v47 }
0x17d5   :  { %18607 = vpow2.f32 %v10439_v43  ;;  %v17717_v61 = vpop.f32.mrb[100].mxu0 }
0x17d6   :  { %v10360_v4 = vadd.f32 %v17717_v61, %v23228_v40  ;;  %v10354_v6 = vpop.f32.mrb[101].mxu0 }
0x17d7   :  { %v10355_v18 = vadd.f32 %v23228_v40, %v10354_v6 }
0x17d8   :  { %v10426_v60 = vsub.f32 0.0, %v10360_v4 }
0x17d9   :  { %v10425_v10 = vsub.f32 0.0, %v10355_v18 }
0x17da   :  { %v10445_v17 = vmul.f32 1.442695, %v10426_v60 }
0x17db   :  { %v10443_v15 = vmul.f32 1.442695, %v10425_v10 }
0x17dc   :  { %18609 = vpow2.f32 %v10445_v17 }
0x17dd   :  { %18611 = vpow2.f32 %v10443_v15  ;;  %v17720_v30 = vpop.f32.mrb[102].mxu0 }
0x17de   :  { %v18606_v19 = vpop.eup %18605  ;;  %v10370_v38 = vadd.f32 %v17720_v30, %v23228_v40  ;;  %v10364_v9 = vpop.f32.mrb[103].mxu0 }
0x17df   :  { %v18608_v55 = vpop.eup %18607  ;;  %v10472_v51 = vadd.f32 1.0, %v18606_v19  ;;  %v10365_v45 = vadd.f32 %v23228_v40, %v10364_v9 }
0x17e0   :  { %v10471_v26 = vadd.f32 1.0, %v18608_v55  ;;  %v10428_v44 = vsub.f32 0.0, %v10370_v38 }
0x17e1   :  { %18613 = vrcp.f32 %v10472_v51  ;;  %v10427_v37 = vsub.f32 0.0, %v10365_v45 }
0x17e2   :  { %18615 = vrcp.f32 %v10471_v26  ;;  %v10449_v1 = vmul.f32 1.442695, %v10428_v44 }
0x17e3   :  { %v10447_v41 = vmul.f32 1.442695, %v10427_v37 }
0x17e4   :  { %18617 = vpow2.f32 %v10449_v1 }
0x17e5   :  { %18619 = vpow2.f32 %v10447_v41  ;;  %v17723_v35 = vpop.f32.mrb[104].mxu0 }
0x17e6   :  { %v18610_v28 = vpop.eup %18609  ;;  %v10380_v11 = vadd.f32 %v17723_v35, %v23228_v40  ;;  %v10374_v0 = vpop.f32.mrb[105].mxu0 }
0x17e7   :  { %v18612_v49 = vpop.eup %18611  ;;  %v10474_v24 = vadd.f32 1.0, %v18610_v28  ;;  %v10375_v2 = vadd.f32 %v23228_v40, %v10374_v0 }
0x17e8   :  { %v10473_v59 = vadd.f32 1.0, %v18612_v49  ;;  %v10430_v16 = vsub.f32 0.0, %v10380_v11 }
0x17e9   :  { %18621 = vrcp.f32 %v10474_v24  ;;  %v10429_v47 = vsub.f32 0.0, %v10375_v2 }
0x17ea   :  { %v10453_v43 = vmul.f32 1.442695, %v10430_v16  ;;  %18623 = vrcp.f32 %v10473_v59 }
0x17eb   :  { %v18614_v61 = vpop.eup %18613  ;;  %v10451_v4 = vmul.f32 1.442695, %v10429_v47 }
0x17ec   :  { %v18616_v6 = vpop.eup %18615  ;;  %18625 = vpow2.f32 %v10453_v43  ;;  %v10520_v18 = vadd.f32 1e-08, %v18614_v61 }
0x17ed   :  { %18627 = vpow2.f32 %v10451_v4  ;;  %v17726_v60 = vpop.f32.mrb[106].mxu0  ;;  %v10519_v10 = vadd.f32 1e-08, %v18616_v6 }
0x17ee   :  { %v18618_v17 = vpop.eup %18617  ;;  %v10390_v15 = vadd.f32 %v17726_v60, %v23228_v40  ;;  %13018 = vperm.xlu1 %18573, %v10520_v18   ;;  %v10384_v30 = vpop.f32.mrb[107].mxu0 }
0x17ef   :  { %v18620_v19 = vpop.eup %18619  ;;  %v10476_v38 = vadd.f32 1.0, %v18618_v17  ;;  %v10385_v9 = vadd.f32 %v23228_v40, %v10384_v30  ;;  %13013 = vperm.xlu0 %18574, %v10519_v10  }
0x17f0   :  { %v10475_v55 = vadd.f32 1.0, %v18620_v19  ;;  %v10432_v51 = vsub.f32 0.0, %v10390_v15 }
0x17f1   :  { %18629 = vrcp.f32 %v10476_v38  ;;  %v10431_v45 = vsub.f32 0.0, %v10385_v9 }
0x17f2   :  { %18631 = vrcp.f32 %v10475_v55  ;;  %v10457_v26 = vmul.f32 1.442695, %v10432_v51 }
0x17f3   :  { %v18622_v44 = vpop.eup %18621  ;;  %v10455_v37 = vmul.f32 1.442695, %v10431_v45 }
0x17f4   :  { %18633 = vpow2.f32 %v10457_v26  ;;  %v10522_v1 = vadd.f32 1e-08, %v18622_v44  ;;  %v18624_v41 = vpop.eup %18623 }
0x17f5   :  { %18635 = vpow2.f32 %v10455_v37  ;;  %v17729_v35 = vpop.f32.mrb[108].mxu0  ;;  %v10521_v47 = vadd.f32 1e-08, %v18624_v41 }
0x17f6   :  { %v18626_v28 = vpop.eup %18625  ;;  %v10400_v11 = vadd.f32 %v17729_v35, %v23228_v40  ;;  %13028 = vperm.xlu1 %18573, %v10522_v1   ;;  %v10394_v0 = vpop.f32.mrb[109].mxu0 }
0x17f7   :  { %v18628_v49 = vpop.eup %18627  ;;  %v10478_v24 = vadd.f32 1.0, %v18626_v28  ;;  %v10395_v2 = vadd.f32 %v23228_v40, %v10394_v0 }
0x17f8   :  { %v10477_v59 = vadd.f32 1.0, %v18628_v49  ;;  %v10434_v16 = vsub.f32 0.0, %v10400_v11 }
0x17f9   :  { %18637 = vrcp.f32 %v10478_v24  ;;  %v10433_v43 = vsub.f32 0.0, %v10395_v2 }
0x17fa   :  { %18639 = vrcp.f32 %v10477_v59  ;;  %v10461_v61 = vmul.f32 1.442695, %v10434_v16  ;;  %13023 = vperm.xlu1 %18573, %v10521_v47   ;;  %v23247_v47 = vld [vmem:[%s25261_s28] ss:$0 sm:$0xff] }
0x17fb   :  { %v18630_v4 = vpop.eup %18629  ;;  %v10459_v6 = vmul.f32 1.442695, %v10433_v43 }
0x17fc   :  { %v18632_v18 = vpop.eup %18631  ;;  %18641 = vpow2.f32 %v10461_v61  ;;  %v10524_v60 = vadd.f32 1e-08, %v18630_v4 }
0x17fd   :  { %18643 = vpow2.f32 %v10459_v6  ;;  %v17732_v10 = vpop.f32.mrb[110].mxu0  ;;  %v10523_v17 = vadd.f32 1e-08, %v18632_v18 }
0x17fe   :  { %v18634_v15 = vpop.eup %18633  ;;  %v10410_v30 = vadd.f32 %v17732_v10, %v23228_v40  ;;  %v10404_v19 = vpop.f32.mrb[111].mxu0  ;;  %13038 = vperm.xlu1 %18573, %v10524_v60  }
0x17ff   :  { %v18636_v38 = vpop.eup %18635  ;;  %v10480_v9 = vadd.f32 1.0, %v18634_v15  ;;  %v10405_v55 = vadd.f32 %v23228_v40, %v10404_v19  ;;  %13033 = vperm.xlu0 %18574, %v10523_v17  }
0x1800   :  { %v10479_v51 = vadd.f32 1.0, %v18636_v38  ;;  %v10436_v45 = vsub.f32 0.0, %v10410_v30 }
0x1801   :  { %18645 = vrcp.f32 %v10480_v9  ;;  %v10435_v26 = vsub.f32 0.0, %v10405_v55 }
0x1802   :  { %18647 = vrcp.f32 %v10479_v51  ;;  %v10465_v44 = vmul.f32 1.442695, %v10436_v45 }
0x1803   :  { %v18638_v37 = vpop.eup %18637  ;;  %v10463_v1 = vmul.f32 1.442695, %v10435_v26 }
0x1804   :  { %v18640_v41 = vpop.eup %18639  ;;  %18649 = vpow2.f32 %v10465_v44  ;;  %v10526_v35 = vadd.f32 1e-08, %v18638_v37 }
0x1805   :  { %18651 = vpow2.f32 %v10463_v1  ;;  %v17735_v28 = vpop.f32.mrb[112].mxu0  ;;  %v10525_v11 = vadd.f32 1e-08, %v18640_v41 }
0x1806   :  { %v18642_v0 = vpop.eup %18641  ;;  %v10420_v49 = vadd.f32 %v17735_v28, %v23228_v40  ;;  %v10414_v24 = vpop.f32.mrb[113].mxu0  ;;  %13048 = vperm.xlu1 %18573, %v10526_v35  }
0x1807   :  { %v18644_v2 = vpop.eup %18643  ;;  %v10482_v59 = vadd.f32 1.0, %v18642_v0  ;;  %v10415_v16 = vadd.f32 %v23228_v40, %v10414_v24  ;;  %13043 = vperm.xlu0 %18574, %v10525_v11  }
0x1808   :  { %v10481_v43 = vadd.f32 1.0, %v18644_v2  ;;  %v10438_v61 = vsub.f32 0.0, %v10420_v49 }
0x1809   :  { %18653 = vrcp.f32 %v10482_v59  ;;  %v10437_v4 = vsub.f32 0.0, %v10415_v16  ;;  %v17774_v6 = vpop.f32.mrb[114].mxu0 }
0x180a   :  { %18655 = vrcp.f32 %v10481_v43  ;;  %v10469_v18 = vmul.f32 1.442695, %v10438_v61  ;;  %v10831_v60 = vadd.f32 %v17774_v6, %v23247_v47  ;;  %v10825_v10 = vpop.f32.mrb[115].mxu0 }
0x180b   :  { %v18646_v17 = vpop.eup %18645  ;;  %v10467_v15 = vmul.f32 1.442695, %v10437_v4  ;;  %v10826_v30 = vadd.f32 %v23247_v47, %v10825_v10 }
0x180c   :  { %v18648_v19 = vpop.eup %18647  ;;  %18657 = vpow2.f32 %v10469_v18  ;;  %v10528_v40 = vadd.f32 1e-08, %v18646_v17  ;;  %v10905_v45 = vmax.f32 %v10831_v60, 0.0 }
0x180d   :  { %18659 = vpow2.f32 %v10467_v15  ;;  %v10904_v38 = vmax.f32 %v10826_v30, 0.0  ;;  %v17777_v9 = vpop.f32.mrb[116].mxu0  ;;  %v10527_v55 = vadd.f32 1e-08, %v18648_v19 }
0x180e   :  { %v18650_v51 = vpop.eup %18649  ;;  %v10841_v26 = vadd.f32 %v17777_v9, %v23247_v47  ;;  %v10835_v44 = vpop.f32.mrb[117].mxu0  ;;  %13058 = vperm.xlu1 %18573, %v10528_v40  }
0x180f   :  { %v18652_v37 = vpop.eup %18651  ;;  %v10484_v1 = vadd.f32 1.0, %v18650_v51  ;;  %v10836_v41 = vadd.f32 %v23247_v47, %v10835_v44  ;;  %17806 = vmatprep.mubr.msk.f32.mxu1 %vm25262_vm4, %v10904_v38  ;;  %13053 = vperm.xlu0 %18574, %v10527_v55   ;;  %vm25270_vm4 = vmmov %vm25269_vm3 }
0x1810   :  { %v10483_v35 = vadd.f32 1.0, %v18652_v37  ;;  %17807 = vmatmul.mubr.msk.f32.vlgmr.msra.gmra.mrb[206].mxu1 %vm25263_vm9, %v10905_v45  ;;  %v10907_v0 = vmax.f32 %v10841_v26, 0.0  ;;  %vm25271_vm9 = vmmov %vm25269_vm3 }
0x1811   :  { %18661 = vrcp.f32 %v10484_v1  ;;  %v10906_v28 = vmax.f32 %v10836_v41, 0.0  ;;  %v17780_v11 = vpop.f32.mrb[118].mxu0  ;;  %17857 = vmatpush3.msk.msra.mxu1 %vm25264_vm8, %v23224_v56  ;;  %vm25272_vm8 = vmmov %vm25269_vm3 }
0x1812   :  { %18663 = vrcp.f32 %v10483_v35  ;;  %v10851_v49 = vadd.f32 %v17780_v11, %v23247_v47  ;;  %v10845_v24 = vpop.f32.mrb[119].mxu0 }
0x1813   :  { %v18654_v2 = vpop.eup %18653  ;;  %v10846_v59 = vadd.f32 %v23247_v47, %v10845_v24  ;;  %17809 = vmatprep.mubr.msk.f32.mxu1 %vm25265_vm6, %v10906_v28  ;;  %vm25273_vm6 = vmmov %vm25269_vm3 }
0x1814   :  { %v18656_v16 = vpop.eup %18655  ;;  %17810 = vmatmul.mubr.msk.f32.gmra.mrb[240].mxu1 %vm25266_vm13, %v10907_v0  ;;  %v10530_v43 = vadd.f32 1e-08, %v18654_v2  ;;  %v10909_v60 = vmax.f32 %v10851_v49, 0.0  ;;  %vm25274_vm13 = vmmov %vm25269_vm3 }
0x1815   :  { %v10908_v61 = vmax.f32 %v10846_v59, 0.0  ;;  %v17783_v4 = vpop.f32.mrb[120].mxu0  ;;  %v10529_v6 = vadd.f32 1e-08, %v18656_v16 }
0x1816   :  { %v18658_v18 = vpop.eup %18657  ;;  %v10861_v56 = vadd.f32 %v17783_v4, %v23247_v47  ;;  %v10855_v10 = vpop.f32.mrb[121].mxu0  ;;  %13068 = vperm.xlu1 %18573, %v10530_v43  }
0x1817   :  { %v18660_v17 = vpop.eup %18659  ;;  %v10486_v15 = vadd.f32 1.0, %v18658_v18  ;;  %v10856_v30 = vadd.f32 %v23247_v47, %v10855_v10  ;;  %17812 = vmatprep.mubr.msk.f32.mxu1 %vm25267_vm12, %v10908_v61  ;;  %13063 = vperm.xlu0 %18574, %v10529_v6   ;;  %vm25275_vm12 = vmmov %vm25269_vm3 }
0x1818   :  { %v10485_v19 = vadd.f32 1.0, %v18660_v17  ;;  %17813 = vmatmul.mubr.msk.f32.gmra.mrb[242].mxu1 %vm25268_vm14, %v10909_v60  ;;  %v10911_v9 = vmax.f32 %v10861_v56, 0.0  ;;  %vm25276_vm14 = vmmov %vm25269_vm3 }
0x1819   :  { %18665 = vrcp.f32 %v10486_v15  ;;  %v10910_v40 = vmax.f32 %v10856_v30, 0.0  ;;  %v17786_v38 = vpop.f32.mrb[122].mxu0 }
0x181a   :  { %18667 = vrcp.f32 %v10485_v19  ;;  %v10871_v55 = vadd.f32 %v17786_v38, %v23247_v47  ;;  %v10865_v51 = vpop.f32.mrb[123].mxu0 }
0x181b   :  { %v18662_v45 = vpop.eup %18661  ;;  %v10866_v26 = vadd.f32 %v23247_v47, %v10865_v51  ;;  %17815 = vmatprep.mubr.msk.f32.mxu1 %vm25269_vm3, %v10910_v40 }
0x181c   :  { %v18664_v44 = vpop.eup %18663  ;;  %17816 = vmatmul.mubr.msk.f32.gmra.mrb[244].mxu1 %vm25270_vm4, %v10911_v9  ;;  %v10532_v37 = vadd.f32 1e-08, %v18662_v45  ;;  %v10913_v28 = vmax.f32 %v10871_v55, 0.0  ;;  %vm25277_vm4 = vmmov %vm25269_vm3 }
0x181d   :  { %v10912_v1 = vmax.f32 %v10866_v26, 0.0  ;;  %v17789_v41 = vpop.f32.mrb[124].mxu0  ;;  %v10531_v35 = vadd.f32 1e-08, %v18664_v44 }
0x181e   :  { %v10881_v11 = vadd.f32 %v17789_v41, %v23247_v47  ;;  %v10875_v0 = vpop.f32.mrb[125].mxu0  ;;  %13078 = vperm.xlu1 %18573, %v10532_v37  }
0x181f   :  { %v10876_v49 = vadd.f32 %v23247_v47, %v10875_v0  ;;  %17818 = vmatprep.mubr.msk.f32.mxu1 %vm25271_vm9, %v10912_v1  ;;  %13073 = vperm.xlu0 %18574, %v10531_v35   ;;  %vm25278_vm9 = vcmask 39936  }
0x1820   :  { %17819 = vmatmul.mubr.msk.f32.gmra.mrb[246].mxu1 %vm25272_vm8, %v10913_v28  ;;  %v10915_v59 = vmax.f32 %v10881_v11, 0.0  ;;  %vm25279_vm8 = vmmov %vm25278_vm9 }
0x1821   :  { %v10914_v24 = vmax.f32 %v10876_v49, 0.0  ;;  %v17792_v2 = vpop.f32.mrb[126].mxu0 }
0x1822   :  { %v10891_v16 = vadd.f32 %v17792_v2, %v23247_v47  ;;  %v10885_v43 = vpop.f32.mrb[127].mxu0 }
0x1823   :  { %v18666_v61 = vpop.eup %18665  ;;  %v10886_v4 = vadd.f32 %v23247_v47, %v10885_v43  ;;  %17821 = vmatprep.mubr.msk.f32.mxu1 %vm25273_vm6, %v10914_v24  ;;  %vm25280_vm6 = vmmov %vm25279_vm8 }
0x1824   :  { %v18668_v6 = vpop.eup %18667  ;;  %17822 = vmatmul.mubr.msk.f32.gmra.mrb[248].mxu1 %vm25274_vm13, %v10915_v59  ;;  %v10534_v18 = vadd.f32 1e-08, %v18666_v61  ;;  %v10917_v17 = vmax.f32 %v10891_v16, 0.0  ;;  %vm25281_vm13 = vmmov %vm25280_vm6 }
0x1825   :  { %v10916_v60 = vmax.f32 %v10886_v4, 0.0  ;;  %v17795_v56 = vpop.f32.mrb[128].mxu0  ;;  %v10533_v10 = vadd.f32 1e-08, %v18668_v6 }
0x1826   :  { %v10901_v15 = vadd.f32 %v17795_v56, %v23247_v47  ;;  %v10895_v30 = vpop.f32.mrb[129].mxu0  ;;  %13088 = vperm.xlu1 %18573, %v10534_v18  }
0x1827   :  { %v10896_v19 = vadd.f32 %v23247_v47, %v10895_v30  ;;  %17824 = vmatprep.mubr.msk.f32.mxu1 %vm25275_vm12, %v10916_v60  ;;  %13083 = vperm.xlu0 %18574, %v10533_v10   ;;  %vm25282_vm12 = vmmov %vm25280_vm6  ;;  %v23332_v60 = vld [vmem:[%s25287_s20] ss:$0 sm:$0xff] }
0x1828   :  { %17825 = vmatmul.mubr.msk.f32.gmra.mrb[250].mxu1 %vm25276_vm14, %v10917_v17  ;;  %v10919_v9 = vmax.f32 %v10901_v15, 0.0  ;;  %vm25283_vm14 = vmmov %vm25280_vm6 }
0x1829   :  { %v10918_v40 = vmax.f32 %v10896_v19, 0.0  ;;  %v17834_v38 = vpop.f32.mrb[130].mxu0 }
0x182a   :  { %v11188_v55 = vpop.f32.mrb[131].mxu0 }
0x182b   :  { %v23281_v51 = vpack.c.bf16 %v17834_v38, %v11188_v55  ;;  %17827 = vmatprep.mubr.msk.f32.mxu1 %vm25269_vm3, %v10918_v40  ;;  %vm25284_vm3 = vmmov %vm25280_vm6  ;;  %v19099_v40 = vmov 1  }
0x182c   :  { %17828 = vmatmul.mubr.msk.f32.gmra.mrb[252].mxu1 %vm25277_vm4, %v10919_v9  ;;  %vm25285_vm4 = vmmov %vm25284_vm3 }
0x182d   :  { %v17837_v45 = vpop.f32.mrb[132].mxu0  ;;  %17858 = vmatprep.mubr.msk.f32.mxu1 %vm25278_vm9, %v22949_v5  ;;  %vm25286_vm9 = vmmov %vm25284_vm3 }
0x182e   :  { %v11198_v47 = vpop.f32.mrb[133].mxu0 }
0x182f   :  { %v23287_v26 = vpack.c.bf16 %v17837_v45, %v11198_v47 }
0x1830   :  { %17859 = vmatmul.mubr.msk.f32.vlgmr.msra.gmra.mrb[254].mxu1 %vm25279_vm8, %v22951_v53  ;;  %vm25288_vm8 = vmmov %vm25284_vm3 }
0x1831   :  { %v17840_v44 = vpop.f32.mrb[134].mxu0  ;;  %17861 = vmatprep.mubr.msk.f32.mxu1 %vm25280_vm6, %v22961_v34  ;;  %vm25289_vm6 = vmmov %vm25284_vm3 }
0x1832   :  { %v11208_v37 = vpop.f32.mrb[135].mxu0 }
0x1833   :  { %v23293_v1 = vpack.c.bf16 %v17840_v44, %v11208_v37 }
0x1834   :  { %17862 = vmatmul.mubr.msk.f32.gmra.mrb[0].mxu1 %vm25281_vm13, %v22963_v23  ;;  %vm25290_vm13 = vmmov %vm25284_vm3 }
0x1835   :  { %v17843_v41 = vpop.f32.mrb[136].mxu0  ;;  %17864 = vmatprep.mubr.msk.f32.mxu1 %vm25282_vm12, %v22973_v52  ;;  %vm25291_vm12 = vmmov %vm25284_vm3 }
0x1836   :  { %v11218_v35 = vpop.f32.mrb[137].mxu0 }
0x1837   :  { %v23299_v28 = vpack.c.bf16 %v17843_v41, %v11218_v35 }
0x1838   :  { %17865 = vmatmul.mubr.msk.f32.gmra.mrb[2].mxu1 %vm25283_vm14, %v22975_v22  ;;  %vm25292_vm14 = vmmov %vm25284_vm3 }
0x1839   :  { %v17846_v11 = vpop.f32.mrb[138].mxu0  ;;  %17867 = vmatprep.mubr.msk.f32.mxu1 %vm25284_vm3, %v22985_v32 }
0x183a   :  { %v11228_v0 = vpop.f32.mrb[139].mxu0 }
0x183b   :  { %v23305_v49 = vpack.c.bf16 %v17846_v11, %v11228_v0 }
0x183c   :  { %17868 = vmatmul.mubr.msk.f32.gmra.mrb[4].mxu1 %vm25285_vm4, %v22987_v8  ;;  %vm25293_vm4 = vmmov %vm25284_vm3 }
0x183d   :  { %v17849_v24 = vpop.f32.mrb[140].mxu0  ;;  %17870 = vmatprep.mubr.msk.f32.mxu1 %vm25286_vm9, %v22997_v3  ;;  %vm25324_vm9 = vnez %v25023_v21  ;;  %v23454_v21 = vld [vmem:[#allocation27] ss:$0 sm:$0xff] }
0x183e   :  { %v11238_v2 = vpop.f32.mrb[141].mxu0 }
0x183f   :  { %v23311_v59 = vpack.c.bf16 %v17849_v24, %v11238_v2 }
0x1840   :  { %17871 = vmatmul.mubr.msk.f32.gmra.mrb[6].mxu1 %vm25288_vm8, %v22999_v39  ;;  %vm12279_vm8 = vcmask 1040384  }
0x1841   :  { %v17852_v16 = vpop.f32.mrb[142].mxu0  ;;  %17873 = vmatprep.mubr.msk.f32.mxu1 %vm25289_vm6, %v23009_v14  ;;  %vm25325_vm6 = vcmask 326656  }
0x1842   :  { %v11248_v43 = vpop.f32.mrb[143].mxu0 }
0x1843   :  { %v23317_v61 = vpack.c.bf16 %v17852_v16, %v11248_v43 }
0x1844   :  { %17874 = vmatmul.mubr.msk.f32.gmra.mrb[8].mxu1 %vm25290_vm13, %v23011_v36  ;;  %vm25326_vm13 = vmmov %vm25325_vm6 }
0x1845   :  { %v17855_v4 = vpop.f32.mrb[144].mxu0  ;;  %17876 = vmatprep.mubr.msk.f32.mxu1 %vm25291_vm12, %v23021_v62  ;;  %vm25327_vm12 = vmmov %vm25325_vm6 }
0x1846   :  { %v11258_v6 = vpop.f32.mrb[145].mxu0 }
0x1847   :  { %v23323_v18 = vpack.c.bf16 %v17855_v4, %v11258_v6 }
0x1848   :  { %17877 = vmatmul.mubr.msk.f32.gmra.mrb[10].mxu1 %vm25292_vm14, %v23023_v50  ;;  %vm25328_vm14 = vmmov %vm25325_vm6 }
0x1849   :  { %17879 = vmatprep.mubr.msk.f32.mxu1 %vm25284_vm3, %v23033_v27  ;;  %vm25329_vm3 = vmmov %vm25325_vm6 }
0x184c   :  { %17880 = vmatmul.mubr.msk.f32.gmra.mrb[12].mxu1 %vm25293_vm4, %v23035_v48  ;;  %vm25330_vm4 = vmmov %vm25329_vm3 }
0x18e3   :  { %v17808_v56 = vpop.f32.mrb[206].mxu1 }
0x18e4   :  { %v11046_v10 = vadd.f32 %v17808_v56, %v23332_v60  ;;  %v11040_v17 = vpop.f32.mrb[207].mxu1 }
0x18e5   :  { %v11041_v15 = vadd.f32 %v23332_v60, %v11040_v17 }
0x18e6   :  { %13117 = vperm.xlu1 %18573, %v11046_v10  }
0x18e7   :  { %v17811_v30 = vpop.f32.mrb[240].mxu1  ;;  %13112 = vperm.xlu0 %18574, %v11041_v15  }
0x18e8   :  { %v11050_v19 = vpop.f32.mrb[241].mxu1  ;;  %v11056_v55 = vadd.f32 %v17811_v30, %v23332_v60 }
0x18e9   :  { %v11051_v44 = vadd.f32 %v23332_v60, %v11050_v19 }
0x18ea   :  { %18575 = vset.pattern.permute.xlu1 %v19099_v40 }
0x18eb   :  { %v17814_v38 = vpop.f32.mrb[242].mxu1  ;;  %13230 = vperm.xlu1 %18575, %v11046_v10   ;;  %18576 = vset.pattern.permute.xlu0 %v19099_v40 }
0x18ec   :  { %v11060_v9 = vpop.f32.mrb[243].mxu1  ;;  %13226 = vperm.xlu0 %18576, %v11041_v15   ;;  %v11066_v11 = vadd.f32 %v17814_v38, %v23332_v60 }
0x18ed   :  { %v11061_v16 = vadd.f32 %v23332_v60, %v11060_v9 }
0x18ef   :  { %v17817_v45 = vpop.f32.mrb[244].mxu1  ;;  %18577 = vset.pattern.permute.xlu1 %v19098_v31 }
0x18f0   :  { %v11070_v47 = vpop.f32.mrb[245].mxu1  ;;  %13127 = vperm.xlu1 %18577, %v11056_v55   ;;  %13238 = vperm.xlu0 %18576, %v11056_v55   ;;  %v11076_v17 = vadd.f32 %v17817_v45, %v23332_v60 }
0x18f1   :  { %v11071_v38 = vadd.f32 %v23332_v60, %v11070_v47 }
0x18f3   :  { %v17820_v37 = vpop.f32.mrb[246].mxu1 }
0x18f4   :  { %v11080_v41 = vpop.f32.mrb[247].mxu1  ;;  %18579 = vset.pattern.permute.xlu1 %v19099_v40  ;;  %18578 = vset.pattern.permute.xlu0 %v19098_v31 }
0x18f5   :  { %13234 = vperm.xlu1 %18579, %v11051_v44   ;;  %13122 = vperm.xlu0 %18578, %v11051_v44  }
0x18f7   :  { %v17823_v35 = vpop.f32.mrb[248].mxu1 }
0x18f8   :  { %v23344_v0 = vpop.f32.mrb[249].mxu1 }
0x18f9   :  { %18580 = vset.pattern.permute.xlu1 %v19098_v31  ;;  %18581 = vset.pattern.permute.xlu0 %v19099_v40 }
0x18fa   :  { %13137 = vperm.xlu1 %18580, %v11066_v11   ;;  %13246 = vperm.xlu0 %18581, %v11066_v11   ;;  %v11086_v11 = vadd.f32 %v17820_v37, %v23332_v60 }
0x18fb   :  { %v23348_v24 = vpop.f32.mrb[250].mxu1 }
0x18fc   :  { %v11100_v2 = vpop.f32.mrb[251].mxu1 }
0x18fd   :  { %v23352_v43 = vadd.f32 %v23332_v60, %v11100_v2 }
0x18fe   :  { %18583 = vset.pattern.permute.xlu1 %v19099_v40  ;;  %18582 = vset.pattern.permute.xlu0 %v19098_v31 }
0x18ff   :  { %v17829_v4 = vpop.f32.mrb[252].mxu1  ;;  %13242 = vperm.xlu1 %18583, %v11061_v16   ;;  %13132 = vperm.xlu0 %18582, %v11061_v16  }
0x1900   :  { %v23357_v6 = vadd.f32 %v17829_v4, %v23332_v60  ;;  %v11110_v56 = vpop.f32.mrb[253].mxu1 }
0x1901   :  { %v23360_v10 = vadd.f32 %v23332_v60, %v11110_v56 }
0x1903   :  { %v17860_v15 = vpop.f32.mrb[254].mxu1  ;;  %18584 = vset.pattern.permute.xlu1 %v19098_v31  ;;  %18585 = vset.pattern.permute.xlu0 %v19099_v40 }
0x1904   :  { %v11336_v30 = vpop.f32.mrb[255].mxu1  ;;  %13147 = vperm.xlu1 %18584, %v11076_v17   ;;  %13254 = vperm.xlu0 %18585, %v11076_v17   ;;  %v11081_v17 = vadd.f32 %v23332_v60, %v11080_v41 }
0x1905   :  { %v11423_v19 = vpack.c.bf16 %v17860_v15, %v11336_v30 }
0x1907   :  { %v17863_v9 = vpop.f32.mrb[0].mxu1  ;;  %17882 = vmatprep.subr.bf16.mxu0 %v11423_v19 }
0x1908   :  { %v11346_v55 = vpop.f32.mrb[1].mxu1  ;;  %17883 = vmatpush3.bf16.msra.mxu0 %v11423_v19  ;;  %18587 = vset.pattern.permute.xlu1 %v19099_v40  ;;  %v11096_v19 = vadd.f32 %v17823_v35, %v23332_v60 }
0x1909   :  { %v11424_v44 = vpack.c.bf16 %v17863_v9, %v11346_v55  ;;  %18586 = vset.pattern.permute.xlu0 %v19098_v31  ;;  %13250 = vperm.xlu1 %18587, %v11071_v38  }
0x190a   :  { %13142 = vperm.xlu0 %18586, %v11071_v38  }
0x190b   :  { %v17866_v45 = vpop.f32.mrb[2].mxu1  ;;  %17884 = vmatprep.subr.bf16.mxu0 %v11424_v44 }
0x190c   :  { %v11356_v2 = vpop.f32.mrb[3].mxu1  ;;  %17885 = vmatpush3.bf16.msra.mxu0 %v11424_v44  ;;  %v11091_v44 = vadd.f32 %v23332_v60, %v23344_v0  ;;  %v25296_v0 = vld [vmem:[#allocation140_spill] sm:$0xff] }
0x190d   :  { %v11425_v16 = vpack.c.bf16 %v17866_v45, %v11356_v2  ;;  %18588 = vset.pattern.permute.xlu1 %v19098_v31 }
0x190e   :  { %18589 = vset.pattern.permute.xlu0 %v19099_v40  ;;  %13157 = vperm.xlu1 %18588, %v11086_v11  }
0x190f   :  { %13262 = vperm.xlu0 %18589, %v11086_v11   ;;  %v17869_v47 = vpop.f32.mrb[4].mxu1  ;;  %17886 = vmatprep.subr.bf16.mxu0 %v11425_v16 }
0x1910   :  { %v11366_v4 = vpop.f32.mrb[5].mxu1  ;;  %17887 = vmatpush3.bf16.msra.mxu0 %v11425_v16  ;;  %v11106_v16 = vadd.f32 %v23348_v24, %v23332_v60  ;;  %v25294_v60 = vld [vmem:[#allocation138_spill] sm:$0xff]  ;;  %v25304_v24 = vld [vmem:[#allocation148_spill] sm:$0xff] }
0x1911   :  { %v11426_v56 = vpack.c.bf16 %v17869_v47, %v11366_v4  ;;  %v25310_v4 = vld [vmem:[#allocation154_spill] sm:$0xff] }
0x1912   :  { %18591 = vset.pattern.permute.xlu1 %v19099_v40 }
0x1913   :  { %18590 = vset.pattern.permute.xlu0 %v19098_v31  ;;  %v17872_v37 = vpop.f32.mrb[6].mxu1  ;;  %17888 = vmatprep.subr.bf16.mxu0 %v11426_v56 }
0x1914   :  { %13258 = vperm.xlu1 %18591, %v11081_v17   ;;  %13152 = vperm.xlu0 %18590, %v11081_v17   ;;  %v11376_v15 = vpop.f32.mrb[7].mxu1  ;;  %v25313_v17 = vld [vmem:[#allocation157_spill] sm:$0xff] }
0x1915   :  { %v11427_v30 = vpack.c.bf16 %v17872_v37, %v11376_v15  ;;  %17889 = vmatpush3.bf16.msra.mxu0 %v11426_v56  ;;  %v25312_v56 = vld [vmem:[#allocation156_spill] sm:$0xff]  ;;  %v25314_v37 = vld [vmem:[#allocation159_spill] sm:$0xff]  ;;  %v25315_v15 = vld [vmem:[#allocation161_spill] sm:$0xff] }
0x1917   :  { %v17875_v38 = vpop.f32.mrb[8].mxu1  ;;  %17890 = vmatprep.subr.bf16.mxu0 %v11427_v30 }
0x1918   :  { %18592 = vset.pattern.permute.xlu1 %v19098_v31  ;;  %18593 = vset.pattern.permute.xlu0 %v19099_v40  ;;  %v11386_v41 = vpop.f32.mrb[9].mxu1 }
0x1919   :  { %v11428_v9 = vpack.c.bf16 %v17875_v38, %v11386_v41  ;;  %17891 = vmatpush3.bf16.msra.mxu0 %v11427_v30  ;;  %13167 = vperm.xlu1 %18592, %v11096_v19   ;;  %v25316_v30 = vld [vmem:[#allocation158_spill] sm:$0xff]  ;;  %v25319_v41 = vld [vmem:[#allocation163_spill] sm:$0xff] }
0x191a   :  { %13270 = vperm.xlu0 %18593, %v11096_v19   ;;  %v25317_v19 = vld [vmem:[#allocation160_spill] sm:$0xff]  ;;  %v25318_v38 = vld [vmem:[#allocation162_spill] sm:$0xff] }
0x191b   :  { %v17878_v55 = vpop.f32.mrb[10].mxu1  ;;  %17892 = vmatprep.subr.bf16.mxu0 %v11428_v9 }
0x191c   :  { %v11396_v45 = vpop.f32.mrb[11].mxu1 }
0x191d   :  { %v11429_v11 = vpack.c.bf16 %v17878_v55, %v11396_v45  ;;  %17893 = vmatpush3.bf16.msra.mxu0 %v11428_v9  ;;  %18595 = vset.pattern.permute.xlu1 %v19099_v40  ;;  %v25320_v9 = vld [vmem:[#allocation164_spill] sm:$0xff]  ;;  %v25321_v55 = vld [vmem:[#allocation165_spill] sm:$0xff]  ;;  %v25323_v45 = vld [vmem:[#allocation167_spill] sm:$0xff] }
0x191e   :  { %18594 = vset.pattern.permute.xlu0 %v19098_v31  ;;  %13266 = vperm.xlu1 %18595, %v11091_v44  }
0x191f   :  { %13162 = vperm.xlu0 %18594, %v11091_v44   ;;  %v17881_v35 = vpop.f32.mrb[12].mxu1  ;;  %17894 = vmatprep.subr.bf16.mxu0 %v11429_v11  ;;  %v25322_v44 = vld [vmem:[#allocation166_spill] sm:$0xff] }
0x1920   :  { %v11406_v2 = vpop.f32.mrb[13].mxu1 }
0x1921   :  { %v11430_v47 = vpack.c.bf16 %v17881_v35, %v11406_v2  ;;  %17895 = vmatpush3.bf16.msra.mxu0 %v11429_v11  ;;  %v564_v11 = vld [vmem:[%s19421_s3] sm:$0xff]  ;;  %v565_v35 = vld [vmem:[%s19421_s3 + $0x8] sm:$0xff] }
0x1922   :  { %18596 = vset.pattern.permute.xlu1 %v19098_v31  ;;  %v18242_v2 = vpack.c.bf16 %v565_v35, %v564_v11 }
0x1923   :  { %18597 = vset.pattern.permute.xlu0 %v19099_v40  ;;  %13177 = vperm.xlu1 %18596, %v11106_v16  }
0x1924   :  { %13278 = vperm.xlu0 %18597, %v11106_v16   ;;  %17896 = vmatprep.subr.bf16.mxu0 %v11430_v47  ;;  %v566_v16 = vld [vmem:[%s19421_s3 + $0x10] sm:$0xff] }
0x1925   :  { %17897 = vmatpush3.bf16.msra.mxu0 %v11430_v47  ;;  %18243 = vmatprep.subr.bf16.mxu1 %v18242_v2  ;;  %v567_v47 = vld [vmem:[%s19421_s3 + $0x18] sm:$0xff] }
0x1926   :  { %17930 = vmatprep.subr.bf16.mxu0 %v23281_v51  ;;  %18245 = vmatpush3.bf16.msra.mxu1 %v18242_v2 }
0x1927   :  { %18599 = vset.pattern.permute.xlu1 %v19099_v40 }
0x1928   :  { %18598 = vset.pattern.permute.xlu0 %v19098_v31  ;;  %17899 = vmatmul.mubr.bf16.vlgmr.msra.gmra.mrb[180].mxu0 %v24957_v13  ;;  %v25295_v13 = vld [vmem:[#allocation139_spill] sm:$0xff] }
0x1929   :  { %13274 = vperm.xlu1 %18599, %v23352_v43   ;;  %13172 = vperm.xlu0 %18598, %v23352_v43   ;;  %v25306_v43 = vld [vmem:[#allocation151_spill] sm:$0xff] }
0x192a   :  { %17902 = vmatprep.mubr.bf16.mxu0 %v25294_v60  ;;  %17931 = vmatpush3.bf16.msra.mxu0 %v23281_v51  ;;  %v25297_v51 = vld [vmem:[#allocation141_spill] sm:$0xff]  ;;  %v18246_v60 = vpack.c.bf16 %v567_v47, %v566_v16 }
0x192b   :  { %17932 = vmatprep.subr.bf16.mxu0 %v23287_v26 }
0x192c   :  { %18247 = vmatprep.subr.bf16.mxu1 %v18246_v60 }
0x192d   :  { %18600 = vset.pattern.permute.xlu1 %v19098_v31  ;;  %18601 = vset.pattern.permute.xlu0 %v19099_v40 }
0x192e   :  { %17933 = vmatpush3.bf16.msra.mxu0 %v23287_v26  ;;  %13187 = vperm.xlu1 %18600, %v23357_v6   ;;  %v25298_v26 = vld [vmem:[#allocation143_spill] sm:$0xff] }
0x192f   :  { %13286 = vperm.xlu0 %18601, %v23357_v6   ;;  %17934 = vmatprep.subr.bf16.mxu0 %v23293_v1  ;;  %v25307_v6 = vld [vmem:[#allocation153_spill] sm:$0xff] }
0x1930   :  { %17903 = vmatmul.mubr.bf16.gmra.mrb[184].mxu0 %v25295_v13  ;;  %18249 = vmatpush3.bf16.msra.mxu1 %v18246_v60  ;;  %v568_v13 = vld [vmem:[%s19421_s3 + $0x20] sm:$0xff]  ;;  %v25332_v60 = vld [vmem:[#allocation98_spill] sm:$0xff]  ;;  %s25370_s3 = sld [smem:[#allocation75_spill]] }
0x1931   :  { %17906 = vmatprep.mubr.bf16.mxu0 %v25296_v0  ;;  %17986 = vmatprep.subr.mxu1 %v568_v13  ;;  %v549_v0 = vld [vmem:[#allocation25] sm:$0x1] }
0x1932   :  { %17935 = vmatpush3.bf16.msra.mxu0 %v23293_v1  ;;  %18603 = vset.pattern.permute.xlu1 %v19099_v40  ;;  %v25299_v1 = vld [vmem:[#allocation145_spill] sm:$0xff]  ;;  %v25300_v40 = vld [vmem:[#allocation142_spill] sm:$0xff] }
0x1933   :  { %18602 = vset.pattern.permute.xlu0 %v19098_v31  ;;  %17936 = vmatprep.subr.bf16.mxu0 %v23299_v28 }
0x1934   :  { %13282 = vperm.xlu1 %18603, %v23360_v10   ;;  %13182 = vperm.xlu0 %18602, %v23360_v10   ;;  %v25308_v10 = vld [vmem:[#allocation150_spill] sm:$0xff] }
0x1935   :  { %17987 = vmatpush3.msra.mxu1 %v568_v13 }
0x1936   :  { %17937 = vmatpush3.bf16.msra.mxu0 %v23299_v28  ;;  %v25302_v28 = vld [vmem:[#allocation146_spill] sm:$0xff]  ;;  %18036 = vmatprep.subr.msk.mxu1 %vm12279_vm8, %v549_v0 }
0x1937   :  { %17938 = vmatprep.subr.bf16.mxu0 %v23305_v49 }
0x1938   :  { %17907 = vmatmul.mubr.bf16.gmra.mrb[188].mxu0 %v25297_v51  ;;  %18604 = vset.pattern.permute.xlu1 %v19098_v31  ;;  %v25301_v31 = vld [vmem:[#allocation144_spill] sm:$0xff] }
0x1939   :  { %17910 = vmatprep.mubr.bf16.mxu0 %v25298_v26 }
0x193a   :  { %17939 = vmatpush3.bf16.msra.mxu0 %v23305_v49  ;;  %v25303_v49 = vld [vmem:[#allocation147_spill] sm:$0xff] }
0x193b   :  { %17940 = vmatprep.subr.bf16.mxu0 %v23311_v59 }
0x193e   :  { %17941 = vmatpush3.bf16.msra.mxu0 %v23311_v59  ;;  %v25305_v59 = vld [vmem:[#allocation149_spill] sm:$0xff] }
0x193f   :  { %17942 = vmatprep.subr.bf16.mxu0 %v23317_v61 }
0x1940   :  { %17911 = vmatmul.mubr.bf16.gmra.mrb[192].mxu0 %v25299_v1 }
0x1941   :  { %17914 = vmatprep.mubr.bf16.mxu0 %v25300_v40 }
0x1942   :  { %17943 = vmatpush3.bf16.msra.mxu0 %v23317_v61  ;;  %v25309_v61 = vld [vmem:[#allocation152_spill] sm:$0xff] }
0x1943   :  { %17944 = vmatprep.subr.bf16.mxu0 %v23323_v18 }
0x1946   :  { %17945 = vmatpush3.bf16.msra.mxu0 %v23323_v18  ;;  %v25311_v18 = vld [vmem:[#allocation155_spill] sm:$0xff] }
0x1948   :  { %17915 = vmatmul.mubr.bf16.gmra.mrb[196].mxu0 %v25301_v31 }
0x1949   :  { %17918 = vmatprep.mubr.bf16.mxu0 %v25302_v28 }
0x1950   :  { %17919 = vmatmul.mubr.bf16.gmra.mrb[200].mxu0 %v25303_v49 }
0x1951   :  { %17922 = vmatprep.mubr.bf16.mxu0 %v25304_v24 }
0x1958   :  { %17923 = vmatmul.mubr.bf16.gmra.mrb[204].mxu0 %v25305_v59 }
0x1959   :  { %17926 = vmatprep.mubr.bf16.mxu0 %v25306_v43 }
0x1960   :  { %17927 = vmatmul.mubr.bf16.gmra.mrb[208].mxu0 %v25307_v6 }
0x1961   :  { %17946 = vmatprep.mubr.bf16.mxu0 %v25308_v10 }
0x1968   :  { %17947 = vmatmul.mubr.bf16.vlgmr.msra.gmra.mrb[180].mxu0 %v25309_v61 }
0x1969   :  { %17950 = vmatprep.mubr.bf16.mxu0 %v25310_v4 }
0x1970   :  { %17951 = vmatmul.mubr.bf16.gmra.mrb[184].mxu0 %v25311_v18 }
0x1971   :  { %17954 = vmatprep.mubr.bf16.mxu0 %v25312_v56 }
0x1978   :  { %17955 = vmatmul.mubr.bf16.gmra.mrb[188].mxu0 %v25313_v17 }
0x1979   :  { %17958 = vmatprep.mubr.bf16.mxu0 %v25314_v37 }
0x1980   :  { %17959 = vmatmul.mubr.bf16.gmra.mrb[192].mxu0 %v25315_v15 }
0x1981   :  { %17962 = vmatprep.mubr.bf16.mxu0 %v25316_v30 }
0x1988   :  { %17963 = vmatmul.mubr.bf16.gmra.mrb[196].mxu0 %v25317_v19 }
0x1989   :  { %17966 = vmatprep.mubr.bf16.mxu0 %v25318_v38 }
0x1990   :  { %17967 = vmatmul.mubr.bf16.gmra.mrb[200].mxu0 %v25319_v41 }
0x1991   :  { %17970 = vmatprep.mubr.bf16.mxu0 %v25320_v9 }
0x1998   :  { %17971 = vmatmul.mubr.bf16.gmra.mrb[204].mxu0 %v25321_v55 }
0x1999   :  { %17974 = vmatprep.mubr.bf16.mxu0 %v25322_v44 }
0x19a0   :  { %17975 = vmatmul.mubr.bf16.gmra.mrb[208].mxu0 %v25323_v45 }
0x19a1   :  { %14633 = vmatprep.mubr.msk.bf16.mxu0 %vm25324_vm9, %v25022_v20  ;;  %vm25331_vm9 = vmmov %vm25329_vm3 }
0x1a3b   :  { %v17948_v51 = vpop.f32.mrb[180].mxu0 }
0x1a3c   :  { %v11755_v26 = vadd.f32 %v17948_v51, %v22807_v25  ;;  %v11626_v1 = vpop.f32.mrb[181].mxu0 }
0x1a3d   :  { %v11753_v40 = vadd.f32 %v11626_v1, %v22800_v42  ;;  %v17949_v31 = vpop.f32.mrb[182].mxu0 }
0x1a3e   :  { %v11756_v28 = vadd.f32 %v17949_v31, %v22805_v46  ;;  %v11629_v49 = vpop.f32.mrb[183].mxu0  ;;  %v11793_v43 = vadd.f32 %v23454_v21, %v11755_v26 }
0x1a3f   :  { %v11791_v24 = vadd.f32 %v23454_v21, %v11753_v40  ;;  %v11754_v59 = vadd.f32 %v22798_v33, %v11629_v49  ;;  %v25335_v40 = vld [vmem:[#allocation119_spill] sm:$0xff]  ;;  %v25336_v49 = vld [vmem:[#allocation100_spill] sm:$0xff] }
0x1a40   :  { %v11794_v61 = vadd.f32 %v23454_v21, %v11756_v28  ;;  %v11825_v42 = vmax.f32 %v11793_v43, 0.0  ;;  %v25338_v43 = vld [vmem:[#allocation86_spill] sm:$0xff] }
0x1a41   :  { %v11823_v6 = vmax.f32 %v11791_v24, 0.0  ;;  %v11792_v10 = vadd.f32 %v23454_v21, %v11754_v59 }
0x1a42   :  { %v11826_v15 = vmax.f32 %v11794_v61, 0.0 }
0x1a43   :  { %v11824_v4 = vmax.f32 %v11792_v10, 0.0  ;;  %v17952_v25 = vpop.f32.mrb[184].mxu0  ;;  %17988 = vmatprep.mubr.msk.f32.mxu1 %vm25325_vm6, %v11823_v6  ;;  %vm25334_vm6 = vmmov %vm25329_vm3 }
0x1a44   :  { %v11759_v18 = vadd.f32 %v17952_v25, %v22821_v29  ;;  %v11642_v46 = vpop.f32.mrb[185].mxu0  ;;  %v25340_v25 = vld [vmem:[#allocation99_spill] sm:$0xff] }
0x1a45   :  { %v11757_v56 = vadd.f32 %v11642_v46, %v22814_v63  ;;  %v17953_v17 = vpop.f32.mrb[186].mxu0  ;;  %17989 = vmatmul.mubr.msk.f32.vlgmr.msra.gmra.mrb[14].mxu1 %vm25326_vm13, %v11824_v4  ;;  %vm25337_vm13 = vmmov %vm25329_vm3 }
0x1a46   :  { %v11760_v33 = vadd.f32 %v17953_v17, %v22819_v54  ;;  %v11645_v37 = vpop.f32.mrb[187].mxu0  ;;  %17991 = vmatprep.mubr.msk.f32.mxu1 %vm25327_vm12, %v11825_v42  ;;  %18037 = vmatpush3.msk.msra.mxu1 %vm12279_vm8, %v549_v0  ;;  %v11797_v29 = vadd.f32 %v23454_v21, %v11759_v18  ;;  %vm25333_vm8 = vmmov %vm25329_vm3 }
0x1a47   :  { %v11795_v30 = vadd.f32 %v23454_v21, %v11757_v56  ;;  %v11758_v19 = vadd.f32 %v22812_v12, %v11645_v37  ;;  %vm25339_vm12 = vmmov %vm25329_vm3 }
0x1a48   :  { %v11798_v41 = vadd.f32 %v23454_v21, %v11760_v33  ;;  %v11829_v55 = vmax.f32 %v11797_v29, 0.0 }
0x1a49   :  { %v11827_v38 = vmax.f32 %v11795_v30, 0.0  ;;  %v11796_v63 = vadd.f32 %v23454_v21, %v11758_v19  ;;  %17992 = vmatmul.mubr.msk.f32.gmra.mrb[16].mxu1 %vm25328_vm14, %v11826_v15  ;;  %vm25341_vm14 = vmmov %vm25329_vm3  ;;  %v25342_v30 = vld [vmem:[#allocation123_spill] sm:$0xff] }
0x1a4a   :  { %v11830_v16 = vmax.f32 %v11798_v41, 0.0 }
0x1a4b   :  { %v11828_v54 = vmax.f32 %v11796_v63, 0.0  ;;  %v17956_v9 = vpop.f32.mrb[188].mxu0  ;;  %17994 = vmatprep.mubr.msk.f32.mxu1 %vm25329_vm3, %v11827_v38  ;;  %v25343_v38 = vld [vmem:[#allocation120_spill] sm:$0xff] }
0x1a4c   :  { %v11763_v44 = vadd.f32 %v17956_v9, %v22835_v7  ;;  %v11658_v45 = vpop.f32.mrb[189].mxu0 }
0x1a4d   :  { %v11761_v11 = vadd.f32 %v11658_v45, %v22828_v58  ;;  %v17957_v12 = vpop.f32.mrb[190].mxu0  ;;  %17995 = vmatmul.mubr.msk.f32.gmra.mrb[18].mxu1 %vm25330_vm4, %v11828_v54  ;;  %vm25344_vm4 = vmmov %vm25329_vm3  ;;  %v25345_v54 = vld [vmem:[#allocation118_spill] sm:$0xff] }
0x1a4e   :  { %v11764_v35 = vadd.f32 %v17957_v12, %v22833_v57  ;;  %v11661_v2 = vpop.f32.mrb[191].mxu0  ;;  %17997 = vmatprep.mubr.msk.f32.mxu1 %vm25331_vm9, %v11829_v55  ;;  %v11801_v0 = vadd.f32 %v23454_v21, %v11763_v44  ;;  %vm25346_vm9 = vmmov %vm25329_vm3 }
0x1a4f   :  { %v11799_v47 = vadd.f32 %v23454_v21, %v11761_v11  ;;  %v11762_v13 = vadd.f32 %v25332_v60, %v11661_v2  ;;  %v25347_v11 = vld [vmem:[#allocation117_spill] sm:$0xff] }
0x1a50   :  { %v11802_v58 = vadd.f32 %v23454_v21, %v11764_v35  ;;  %v11833_v57 = vmax.f32 %v11801_v0, 0.0 }
0x1a51   :  { %v11831_v51 = vmax.f32 %v11799_v47, 0.0  ;;  %v11800_v7 = vadd.f32 %v23454_v21, %v11762_v13  ;;  %17998 = vmatmul.mubr.msk.f32.gmra.mrb[20].mxu1 %vm25333_vm8, %v11830_v16  ;;  %vm25348_vm8 = vmmov %vm25329_vm3 }
0x1a52   :  { %v11834_v61 = vmax.f32 %v11802_v58, 0.0 }
0x1a53   :  { %v11832_v26 = vmax.f32 %v11800_v7, 0.0  ;;  %v17960_v1 = vpop.f32.mrb[192].mxu0  ;;  %18000 = vmatprep.mubr.msk.f32.mxu1 %vm25334_vm6, %v11831_v51  ;;  %vm25349_vm6 = vmmov %vm25329_vm3  ;;  %v25350_v51 = vld [vmem:[#allocation127_spill] sm:$0xff] }
0x1a54   :  { %v11767_v31 = vadd.f32 %v17960_v1, %v25335_v40  ;;  %v11674_v28 = vpop.f32.mrb[193].mxu0  ;;  %v25353_v40 = vld [vmem:[#allocation122_spill] sm:$0xff] }
0x1a55   :  { %v11765_v24 = vadd.f32 %v11674_v28, %v25336_v49  ;;  %v17961_v59 = vpop.f32.mrb[194].mxu0  ;;  %18001 = vmatmul.mubr.msk.f32.gmra.mrb[22].mxu1 %vm25337_vm13, %v11832_v26  ;;  %v25351_v26 = vld [vmem:[#allocation124_spill] sm:$0xff]  ;;  %vm25352_vm13 = vmmov %vm25329_vm3 }
0x1a56   :  { %v11768_v6 = vadd.f32 %v17961_v59, %v25338_v43  ;;  %v11677_v10 = vpop.f32.mrb[195].mxu0  ;;  %18003 = vmatprep.mubr.msk.f32.mxu1 %vm25339_vm12, %v11833_v57  ;;  %v11805_v18 = vadd.f32 %v23454_v21, %v11767_v31  ;;  %vm25354_vm12 = vmmov %vm25329_vm3  ;;  %v25355_v59 = vld [vmem:[#allocation121_spill] sm:$0xff] }
0x1a57   :  { %v11803_v4 = vadd.f32 %v23454_v21, %v11765_v24  ;;  %v11766_v42 = vadd.f32 %v25340_v25, %v11677_v10 }
0x1a58   :  { %v11806_v17 = vadd.f32 %v23454_v21, %v11768_v6  ;;  %v11837_v15 = vmax.f32 %v11805_v18, 0.0 }
0x1a59   :  { %v11835_v46 = vmax.f32 %v11803_v4, 0.0  ;;  %v11804_v56 = vadd.f32 %v23454_v21, %v11766_v42  ;;  %18004 = vmatmul.mubr.msk.f32.gmra.mrb[24].mxu1 %vm25341_vm14, %v11834_v61  ;;  %vm25356_vm14 = vmmov %vm25329_vm3 }
0x1a5a   :  { %v11838_v44 = vmax.f32 %v11806_v17, 0.0 }
0x1a5b   :  { %v11836_v33 = vmax.f32 %v11804_v56, 0.0  ;;  %v17964_v37 = vpop.f32.mrb[196].mxu0  ;;  %18006 = vmatprep.mubr.msk.f32.mxu1 %vm25329_vm3, %v11835_v46  ;;  %v25357_v46 = vld [vmem:[#allocation129_spill] sm:$0xff] }
0x1a5c   :  { %v11771_v19 = vadd.f32 %v17964_v37, %v25342_v30  ;;  %v11690_v29 = vpop.f32.mrb[197].mxu0  ;;  %v25360_v30 = vld [vmem:[#allocation126_spill] sm:$0xff] }
0x1a5d   :  { %v11769_v63 = vadd.f32 %v11690_v29, %v25343_v38  ;;  %v17965_v41 = vpop.f32.mrb[198].mxu0  ;;  %18007 = vmatmul.mubr.msk.f32.gmra.mrb[26].mxu1 %vm25344_vm4, %v11836_v33  ;;  %v25358_v33 = vld [vmem:[#allocation128_spill] sm:$0xff]  ;;  %vm25359_vm4 = vmmov %vm25329_vm3 }
0x1a5e   :  { %v11772_v9 = vadd.f32 %v17965_v41, %v25345_v54  ;;  %v11693_v55 = vpop.f32.mrb[199].mxu0  ;;  %18009 = vmatprep.mubr.msk.f32.mxu1 %vm25346_vm9, %v11837_v15  ;;  %v11809_v35 = vadd.f32 %v23454_v21, %v11771_v19  ;;  %vm25361_vm9 = vmmov %vm25329_vm3  ;;  %v25362_v41 = vld [vmem:[#allocation125_spill] sm:$0xff] }
0x1a5f   :  { %v11807_v45 = vadd.f32 %v23454_v21, %v11769_v63  ;;  %v11770_v12 = vadd.f32 %v25347_v11, %v11693_v55 }
0x1a60   :  { %v11810_v47 = vadd.f32 %v23454_v21, %v11772_v9  ;;  %v11841_v0 = vmax.f32 %v11809_v35, 0.0 }
0x1a61   :  { %v11839_v2 = vmax.f32 %v11807_v45, 0.0  ;;  %v11808_v16 = vadd.f32 %v23454_v21, %v11770_v12  ;;  %18010 = vmatmul.mubr.msk.f32.gmra.mrb[28].mxu1 %vm25348_vm8, %v11838_v44  ;;  %vm25363_vm8 = vmmov %vm25329_vm3 }
0x1a62   :  { %v11842_v49 = vmax.f32 %v11810_v47, 0.0 }
0x1a63   :  { %v11840_v60 = vmax.f32 %v11808_v16, 0.0  ;;  %v17968_v13 = vpop.f32.mrb[200].mxu0  ;;  %18012 = vmatprep.mubr.msk.f32.mxu1 %vm25349_vm6, %v11839_v2  ;;  %vm25364_vm6 = vmmov %vm25329_vm3  ;;  %v25365_v2 = vld [vmem:[#allocation134_spill] sm:$0xff] }
0x1a64   :  { %v11775_v7 = vadd.f32 %v17968_v13, %v25350_v51  ;;  %v11706_v58 = vpop.f32.mrb[201].mxu0  ;;  %v25368_v51 = vld [vmem:[#allocation131_spill] sm:$0xff] }
0x1a65   :  { %v11773_v1 = vadd.f32 %v11706_v58, %v25351_v26  ;;  %v17969_v57 = vpop.f32.mrb[202].mxu0  ;;  %18013 = vmatmul.mubr.msk.f32.gmra.mrb[30].mxu1 %vm25352_vm13, %v11840_v60  ;;  %v25366_v60 = vld [vmem:[#allocation132_spill] sm:$0xff]  ;;  %vm25367_vm13 = vmmov %vm25329_vm3 }
0x1a66   :  { %v11776_v31 = vadd.f32 %v17969_v57, %v25353_v40  ;;  %v11709_v28 = vpop.f32.mrb[203].mxu0  ;;  %18015 = vmatprep.mubr.msk.f32.mxu1 %vm25354_vm12, %v11841_v0  ;;  %v11813_v6 = vadd.f32 %v23454_v21, %v11775_v7  ;;  %vm25369_vm12 = vmmov %vm25329_vm3  ;;  %v25371_v57 = vld [vmem:[#allocation130_spill] sm:$0xff] }
0x1a67   :  { %v11811_v24 = vadd.f32 %v23454_v21, %v11773_v1  ;;  %v11774_v43 = vadd.f32 %v25355_v59, %v11709_v28 }
0x1a68   :  { %v11814_v4 = vadd.f32 %v23454_v21, %v11776_v31  ;;  %v11845_v18 = vmax.f32 %v11813_v6, 0.0 }
0x1a69   :  { %v11843_v10 = vmax.f32 %v11811_v24, 0.0  ;;  %v11812_v61 = vadd.f32 %v23454_v21, %v11774_v43  ;;  %18016 = vmatmul.mubr.msk.f32.gmra.mrb[32].mxu1 %vm25356_vm14, %v11842_v49  ;;  %vm25372_vm14 = vmmov %vm25329_vm3 }
0x1a6a   :  { %v11846_v38 = vmax.f32 %v11814_v4, 0.0 }
0x1a6b   :  { %v11844_v25 = vmax.f32 %v11812_v61, 0.0  ;;  %v17972_v42 = vpop.f32.mrb[204].mxu0  ;;  %18018 = vmatprep.mubr.msk.f32.mxu1 %vm25329_vm3, %v11843_v10  ;;  %v548_v10 = vld [vmem:[%s25370_s3] sm:$0x1f] }
0x1a6c   :  { %v11779_v56 = vadd.f32 %v17972_v42, %v25357_v46  ;;  %v11722_v17 = vpop.f32.mrb[205].mxu0  ;;  %v23555_v61 = vld [vmem:[#allocation4] ss:$0 sm:$0xff] }
0x1a6d   :  { %v11777_v37 = vadd.f32 %v11722_v17, %v25358_v33  ;;  %v17973_v15 = vpop.f32.mrb[206].mxu0  ;;  %18019 = vmatmul.mubr.msk.f32.gmra.mrb[34].mxu1 %vm25359_vm4, %v11844_v25  ;;  %vm25373_vm4 = vmmov %vm25329_vm3 }
0x1a6e   :  { %v11780_v19 = vadd.f32 %v17973_v15, %v25360_v30  ;;  %v11725_v29 = vpop.f32.mrb[207].mxu0  ;;  %18021 = vmatprep.mubr.msk.f32.mxu1 %vm25361_vm9, %v11845_v18  ;;  %v11817_v9 = vadd.f32 %v23454_v21, %v11779_v56  ;;  %vm25374_vm9 = vmmov %vm25329_vm3 }
0x1a6f   :  { %v11815_v63 = vadd.f32 %v23454_v21, %v11777_v37  ;;  %v11778_v54 = vadd.f32 %v25362_v41, %v11725_v29 }
0x1a70   :  { %v11818_v45 = vadd.f32 %v23454_v21, %v11780_v19  ;;  %v11849_v35 = vmax.f32 %v11817_v9, 0.0 }
0x1a71   :  { %v11847_v55 = vmax.f32 %v11815_v63, 0.0  ;;  %v11816_v44 = vadd.f32 %v23454_v21, %v11778_v54  ;;  %18022 = vmatmul.mubr.msk.f32.gmra.mrb[36].mxu1 %vm25363_vm8, %v11846_v38  ;;  %vm25375_vm8 = vmmov %vm25329_vm3 }
0x1a72   :  { %v11850_v26 = vmax.f32 %v11818_v45, 0.0 }
0x1a73   :  { %v11848_v11 = vmax.f32 %v11816_v44, 0.0  ;;  %v17976_v12 = vpop.f32.mrb[208].mxu0  ;;  %18024 = vmatprep.mubr.msk.f32.mxu1 %vm25364_vm6, %v11847_v55  ;;  %vm25376_vm6 = vcmask 1044480  }
0x1a74   :  { %v11783_v16 = vadd.f32 %v17976_v12, %v25365_v2  ;;  %v11738_v47 = vpop.f32.mrb[209].mxu0  ;;  %18086 = vmatprep.subr.msk.mxu1 %vm25376_vm6, %v548_v10 }
0x1a75   :  { %v11781_v13 = vadd.f32 %v11738_v47, %v25366_v60  ;;  %v17977_v0 = vpop.f32.mrb[210].mxu0  ;;  %18025 = vmatmul.mubr.msk.f32.gmra.mrb[38].mxu1 %vm25367_vm13, %v11848_v11  ;;  %vm12182_vm13 = vcmask 7168  }
0x1a76   :  { %v11784_v7 = vadd.f32 %v17977_v0, %v25368_v51  ;;  %v11741_v58 = vpop.f32.mrb[211].mxu0  ;;  %18027 = vmatprep.mubr.msk.f32.mxu1 %vm25369_vm12, %v11849_v35  ;;  %v11821_v31 = vadd.f32 %v23454_v21, %v11783_v16  ;;  %vm25377_vm12 = vmmov %vm25376_vm6 }
0x1a77   :  { %v11819_v1 = vadd.f32 %v23454_v21, %v11781_v13  ;;  %v11782_v40 = vadd.f32 %v25371_v57, %v11741_v58 }
0x1a78   :  { %v11822_v24 = vadd.f32 %v23454_v21, %v11784_v7  ;;  %v11853_v43 = vmax.f32 %v11821_v31, 0.0 }
0x1a79   :  { %v11851_v28 = vmax.f32 %v11819_v1, 0.0  ;;  %v11820_v49 = vadd.f32 %v23454_v21, %v11782_v40  ;;  %18028 = vmatmul.mubr.msk.f32.gmra.mrb[40].mxu1 %vm25372_vm14, %v11850_v26  ;;  %vm25378_vm14 = vcmask 39936  }
0x1a7a   :  { %v11854_v6 = vmax.f32 %v11822_v24, 0.0 }
0x1a7b   :  { %v11852_v59 = vmax.f32 %v11820_v49, 0.0  ;;  %18030 = vmatprep.mubr.msk.f32.mxu1 %vm25329_vm3, %v11851_v28  ;;  %vm25379_vm3 = vmmov %vm25378_vm14 }
0x1a7c   :  { %vm25383_vm6 = vmmov %vm25379_vm3 }
0x1a7d   :  { %18031 = vmatmul.mubr.msk.f32.gmra.mrb[42].mxu1 %vm25373_vm4, %v11852_v59  ;;  %vm25380_vm4 = vmmov %vm25379_vm3 }
0x1a7e   :  { %18033 = vmatprep.mubr.msk.f32.mxu1 %vm25374_vm9, %v11853_v43  ;;  %vm25381_vm9 = vmmov %vm25379_vm3 }
0x1a81   :  { %18034 = vmatmul.mubr.msk.f32.gmra.mrb[44].mxu1 %vm25375_vm8, %v11854_v6  ;;  %vm25382_vm8 = vmmov %vm25379_vm3 }
0x1b18   :  { %v17990_v4 = vpop.f32.mrb[14].mxu1 }
0x1b19   :  { %v12023_v25 = vpop.f32.mrb[15].mxu1  ;;  %v12029_v42 = vadd.f32 %v17990_v4, %v23555_v61 }
0x1b1a   :  { %v12024_v21 = vadd.f32 %v23555_v61, %v12023_v25 }
0x1b1c   :  { %v17993_v18 = vpop.f32.mrb[16].mxu1  ;;  %18038 = vmatprep.mubr.msk.f32.mxu1 %vm12182_vm13, %v12024_v21 }
0x1b1d   :  { %v12033_v46 = vpop.f32.mrb[17].mxu1  ;;  %18039 = vmatmul.mubr.msk.f32.vlgmr.msra.gmra.mrb[46].mxu1 %vm12182_vm13, %v12029_v42  ;;  %v12039_v17 = vadd.f32 %v17993_v18, %v23555_v61 }
0x1b1e   :  { %v12034_v56 = vadd.f32 %v23555_v61, %v12033_v46  ;;  %18087 = vmatpush3.msk.msra.mxu1 %vm25377_vm12, %v548_v10  ;;  %vm25385_vm12 = vmmov %vm25379_vm3 }
0x1b20   :  { %v17996_v33 = vpop.f32.mrb[18].mxu1  ;;  %18041 = vmatprep.mubr.msk.f32.mxu1 %vm12182_vm13, %v12034_v56 }
0x1b21   :  { %v12043_v37 = vpop.f32.mrb[19].mxu1  ;;  %18042 = vmatmul.mubr.msk.f32.gmra.mrb[48].mxu1 %vm12182_vm13, %v12039_v17  ;;  %v12049_v30 = vadd.f32 %v17996_v33, %v23555_v61 }
0x1b22   :  { %v12044_v15 = vadd.f32 %v23555_v61, %v12043_v37 }
0x1b24   :  { %v17999_v19 = vpop.f32.mrb[20].mxu1  ;;  %18044 = vmatprep.mubr.msk.f32.mxu1 %vm12182_vm13, %v12044_v15 }
0x1b25   :  { %v12053_v29 = vpop.f32.mrb[21].mxu1  ;;  %18045 = vmatmul.mubr.msk.f32.gmra.mrb[50].mxu1 %vm12182_vm13, %v12049_v30  ;;  %v12059_v63 = vadd.f32 %v17999_v19, %v23555_v61 }
0x1b26   :  { %v12054_v38 = vadd.f32 %v23555_v61, %v12053_v29 }
0x1b28   :  { %v18002_v41 = vpop.f32.mrb[22].mxu1  ;;  %18047 = vmatprep.mubr.msk.f32.mxu1 %vm12182_vm13, %v12054_v38 }
0x1b29   :  { %v12063_v54 = vpop.f32.mrb[23].mxu1  ;;  %18048 = vmatmul.mubr.msk.f32.gmra.mrb[52].mxu1 %vm12182_vm13, %v12059_v63  ;;  %v12069_v55 = vadd.f32 %v18002_v41, %v23555_v61 }
0x1b2a   :  { %v12064_v9 = vadd.f32 %v23555_v61, %v12063_v54 }
0x1b2c   :  { %v18005_v44 = vpop.f32.mrb[24].mxu1  ;;  %18050 = vmatprep.mubr.msk.f32.mxu1 %vm12182_vm13, %v12064_v9 }
0x1b2d   :  { %v12073_v45 = vpop.f32.mrb[25].mxu1  ;;  %18051 = vmatmul.mubr.msk.f32.gmra.mrb[54].mxu1 %vm12182_vm13, %v12069_v55  ;;  %v12079_v12 = vadd.f32 %v18005_v44, %v23555_v61 }
0x1b2e   :  { %v12074_v11 = vadd.f32 %v23555_v61, %v12073_v45 }
0x1b30   :  { %v18008_v35 = vpop.f32.mrb[26].mxu1  ;;  %18053 = vmatprep.mubr.msk.f32.mxu1 %vm12182_vm13, %v12074_v11 }
0x1b31   :  { %v12083_v2 = vpop.f32.mrb[27].mxu1  ;;  %18054 = vmatmul.mubr.msk.f32.gmra.mrb[56].mxu1 %vm12182_vm13, %v12079_v12  ;;  %v12089_v47 = vadd.f32 %v18008_v35, %v23555_v61 }
0x1b32   :  { %v12084_v16 = vadd.f32 %v23555_v61, %v12083_v2 }
0x1b34   :  { %v18011_v60 = vpop.f32.mrb[28].mxu1  ;;  %18056 = vmatprep.mubr.msk.f32.mxu1 %vm12182_vm13, %v12084_v16 }
0x1b35   :  { %v12093_v13 = vpop.f32.mrb[29].mxu1  ;;  %18057 = vmatmul.mubr.msk.f32.gmra.mrb[58].mxu1 %vm12182_vm13, %v12089_v47  ;;  %v12099_v51 = vadd.f32 %v18011_v60, %v23555_v61 }
0x1b36   :  { %v12094_v0 = vadd.f32 %v23555_v61, %v12093_v13 }
0x1b38   :  { %v18014_v7 = vpop.f32.mrb[30].mxu1  ;;  %18059 = vmatprep.mubr.msk.f32.mxu1 %vm12182_vm13, %v12094_v0 }
0x1b39   :  { %v12103_v58 = vpop.f32.mrb[31].mxu1  ;;  %18060 = vmatmul.mubr.msk.f32.gmra.mrb[60].mxu1 %vm12182_vm13, %v12099_v51  ;;  %v12109_v1 = vadd.f32 %v18014_v7, %v23555_v61 }
0x1b3a   :  { %v12104_v26 = vadd.f32 %v23555_v61, %v12103_v58 }
0x1b3c   :  { %v18017_v57 = vpop.f32.mrb[32].mxu1  ;;  %18062 = vmatprep.mubr.msk.f32.mxu1 %vm12182_vm13, %v12104_v26 }
0x1b3d   :  { %v12113_v40 = vpop.f32.mrb[33].mxu1  ;;  %18063 = vmatmul.mubr.msk.f32.gmra.mrb[62].mxu1 %vm12182_vm13, %v12109_v1  ;;  %v12119_v28 = vadd.f32 %v18017_v57, %v23555_v61 }
0x1b3e   :  { %v12114_v31 = vadd.f32 %v23555_v61, %v12113_v40 }
0x1b40   :  { %v18020_v49 = vpop.f32.mrb[34].mxu1  ;;  %18065 = vmatprep.mubr.msk.f32.mxu1 %vm12182_vm13, %v12114_v31 }
0x1b41   :  { %v12123_v24 = vpop.f32.mrb[35].mxu1  ;;  %18066 = vmatmul.mubr.msk.f32.gmra.mrb[64].mxu1 %vm12182_vm13, %v12119_v28  ;;  %v12129_v43 = vadd.f32 %v18020_v49, %v23555_v61 }
0x1b42   :  { %v12124_v59 = vadd.f32 %v23555_v61, %v12123_v24 }
0x1b44   :  { %v18023_v6 = vpop.f32.mrb[36].mxu1  ;;  %18068 = vmatprep.mubr.msk.f32.mxu1 %vm12182_vm13, %v12124_v59 }
0x1b45   :  { %v12133_v10 = vpop.f32.mrb[37].mxu1  ;;  %18069 = vmatmul.mubr.msk.f32.gmra.mrb[66].mxu1 %vm12182_vm13, %v12129_v43  ;;  %v12139_v25 = vadd.f32 %v18023_v6, %v23555_v61 }
0x1b46   :  { %v12134_v4 = vadd.f32 %v23555_v61, %v12133_v10 }
0x1b48   :  { %v18026_v21 = vpop.f32.mrb[38].mxu1  ;;  %18071 = vmatprep.mubr.msk.f32.mxu1 %vm12182_vm13, %v12134_v4 }
0x1b49   :  { %v12143_v42 = vpop.f32.mrb[39].mxu1  ;;  %18072 = vmatmul.mubr.msk.f32.gmra.mrb[68].mxu1 %vm12182_vm13, %v12139_v25  ;;  %v12149_v46 = vadd.f32 %v18026_v21, %v23555_v61 }
0x1b4a   :  { %v12144_v18 = vadd.f32 %v23555_v61, %v12143_v42 }
0x1b4c   :  { %v18029_v56 = vpop.f32.mrb[40].mxu1  ;;  %18074 = vmatprep.mubr.msk.f32.mxu1 %vm12182_vm13, %v12144_v18 }
0x1b4d   :  { %v12153_v17 = vpop.f32.mrb[41].mxu1  ;;  %18075 = vmatmul.mubr.msk.f32.gmra.mrb[70].mxu1 %vm12182_vm13, %v12149_v46  ;;  %v12159_v37 = vadd.f32 %v18029_v56, %v23555_v61 }
0x1b4e   :  { %v12154_v33 = vadd.f32 %v23555_v61, %v12153_v17 }
0x1b50   :  { %v18032_v15 = vpop.f32.mrb[42].mxu1  ;;  %18077 = vmatprep.mubr.msk.f32.mxu1 %vm12182_vm13, %v12154_v33 }
0x1b51   :  { %v12163_v30 = vpop.f32.mrb[43].mxu1  ;;  %18078 = vmatmul.mubr.msk.f32.gmra.mrb[72].mxu1 %vm12182_vm13, %v12159_v37  ;;  %v12169_v29 = vadd.f32 %v18032_v15, %v23555_v61 }
0x1b52   :  { %v12164_v19 = vadd.f32 %v23555_v61, %v12163_v30 }
0x1b54   :  { %v18035_v38 = vpop.f32.mrb[44].mxu1  ;;  %18080 = vmatprep.mubr.msk.f32.mxu1 %vm12182_vm13, %v12164_v19 }
0x1b55   :  { %v12173_v63 = vpop.f32.mrb[45].mxu1  ;;  %18081 = vmatmul.mubr.msk.f32.gmra.mrb[74].mxu1 %vm12182_vm13, %v12169_v29  ;;  %v12179_v54 = vadd.f32 %v18035_v38, %v23555_v61 }
0x1b56   :  { %v12174_v41 = vadd.f32 %v23555_v61, %v12173_v63 }
0x1b58   :  { %18083 = vmatprep.mubr.msk.f32.mxu1 %vm12182_vm13, %v12174_v41 }
0x1b59   :  { %18084 = vmatmul.mubr.msk.f32.gmra.mrb[76].mxu1 %vm12182_vm13, %v12179_v54  ;;  %vm25384_vm13 = vmmov %vm25379_vm3 }
0x1b5a   :  { %18088 = vmatprep.mubr.msk.f32.mxu1 %vm25378_vm14, %v22949_v5  ;;  %vm25386_vm14 = vmmov %vm25379_vm3 }
0x1b5d   :  { %18089 = vmatmul.mubr.msk.f32.vlgmr.msra.gmra.mrb[78].mxu1 %vm25379_vm3, %v22951_v53 }
0x1b5e   :  { %18091 = vmatprep.mubr.msk.f32.mxu1 %vm25380_vm4, %v22961_v34  ;;  %vm25387_vm4 = vmmov %vm25379_vm3 }
0x1b61   :  { %18092 = vmatmul.mubr.msk.f32.gmra.mrb[80].mxu1 %vm25381_vm9, %v22963_v23  ;;  %vm25388_vm9 = vmmov %vm25379_vm3 }
0x1b62   :  { %18094 = vmatprep.mubr.msk.f32.mxu1 %vm25382_vm8, %v22973_v52  ;;  %vm25389_vm8 = vmmov %vm25379_vm3 }
0x1b65   :  { %18095 = vmatmul.mubr.msk.f32.gmra.mrb[82].mxu1 %vm25383_vm6, %v22975_v22  ;;  %vm25390_vm6 = vmmov %vm25379_vm3 }
0x1b66   :  { %18097 = vmatprep.mubr.msk.f32.mxu1 %vm25384_vm13, %v22985_v32  ;;  %vm25391_vm13 = vmmov %vm25379_vm3 }
0x1b69   :  { %18098 = vmatmul.mubr.msk.f32.gmra.mrb[84].mxu1 %vm25385_vm12, %v22987_v8  ;;  %vm25392_vm12 = vmmov %vm25379_vm3 }
0x1b6a   :  { %18100 = vmatprep.mubr.msk.f32.mxu1 %vm25386_vm14, %v22997_v3 }
0x1b6d   :  { %18101 = vmatmul.mubr.msk.f32.gmra.mrb[86].mxu1 %vm25379_vm3, %v22999_v39 }
0x1b6e   :  { %18103 = vmatprep.mubr.msk.f32.mxu1 %vm25387_vm4, %v23009_v14 }
0x1b71   :  { %18104 = vmatmul.mubr.msk.f32.gmra.mrb[88].mxu1 %vm25388_vm9, %v23011_v36 }
0x1b72   :  { %18106 = vmatprep.mubr.msk.f32.mxu1 %vm25389_vm8, %v23021_v62 }
0x1b75   :  { %18107 = vmatmul.mubr.msk.f32.gmra.mrb[90].mxu1 %vm25390_vm6, %v23023_v50 }
0x1b76   :  { %18109 = vmatprep.mubr.msk.f32.mxu1 %vm25391_vm13, %v23033_v27 }
0x1b79   :  { %18110 = vmatmul.mubr.msk.f32.gmra.mrb[92].mxu1 %vm25392_vm12, %v23035_v48 }
0x1bf0   :  { %v18040_v5 = vpop.f32.mrb[46].mxu1 }
0x1bf1   :  { %v12349_v53 = vpop.f32.mrb[47].mxu1 }
0x1bf2   :  { %v12508_v34 = vpack.c.bf16 %v18040_v5, %v12349_v53 }
0x1bf4   :  { %v18043_v23 = vpop.f32.mrb[48].mxu1 }
0x1bf5   :  { %v12359_v52 = vpop.f32.mrb[49].mxu1 }
0x1bf6   :  { %v12509_v22 = vpack.c.bf16 %v18043_v23, %v12359_v52 }
0x1bf8   :  { %v18046_v32 = vpop.f32.mrb[50].mxu1 }
0x1bf9   :  { %v12369_v8 = vpop.f32.mrb[51].mxu1 }
0x1bfa   :  { %v12510_v3 = vpack.c.bf16 %v18046_v32, %v12369_v8 }
0x1bfc   :  { %v18049_v39 = vpop.f32.mrb[52].mxu1 }
0x1bfd   :  { %v12379_v14 = vpop.f32.mrb[53].mxu1 }
0x1bfe   :  { %v12511_v36 = vpack.c.bf16 %v18049_v39, %v12379_v14  ;;  %v25402_v39 = vld [vmem:[#allocation109_spill] sm:$0xff]  ;;  %v25404_v14 = vld [vmem:[#allocation112_spill] sm:$0xff] }
0x1c00   :  { %v18052_v62 = vpop.f32.mrb[54].mxu1 }
0x1c01   :  { %v12389_v50 = vpop.f32.mrb[55].mxu1 }
0x1c02   :  { %v12512_v61 = vpack.c.bf16 %v18052_v62, %v12389_v50  ;;  %v25408_v62 = vld [vmem:[#allocation114_spill] sm:$0xff]  ;;  %v25410_v50 = vld [vmem:[#allocation113_spill] sm:$0xff] }
0x1c04   :  { %v18055_v9 = vpop.f32.mrb[56].mxu1 }
0x1c05   :  { %v12399_v27 = vpop.f32.mrb[57].mxu1 }
0x1c06   :  { %v12513_v55 = vpack.c.bf16 %v18055_v9, %v12399_v27  ;;  %v25414_v9 = vld [vmem:[#allocation115_spill] sm:$0xff] }
0x1c07   :  { %v551_v27 = vld [vmem:[%s25398_s17] sm:$0xff] }
0x1c08   :  { %v18058_v44 = vpop.f32.mrb[58].mxu1 }
0x1c09   :  { %v12409_v48 = vpop.f32.mrb[59].mxu1 }
0x1c0a   :  { %v12514_v45 = vpack.c.bf16 %v18058_v44, %v12409_v48  ;;  %v553_v48 = vld [vmem:[%s25398_s17 + $0x10] sm:$0xff] }
0x1c0c   :  { %v18061_v11 = vpop.f32.mrb[60].mxu1 }
0x1c0d   :  { %v12419_v12 = vpop.f32.mrb[61].mxu1 }
0x1c0e   :  { %v12515_v35 = vpack.c.bf16 %v18061_v11, %v12419_v12  ;;  %v555_v12 = vld [vmem:[%s25398_s17 + $0x20] sm:$0xff] }
0x1c10   :  { %v18064_v2 = vpop.f32.mrb[62].mxu1 }
0x1c11   :  { %v12429_v16 = vpop.f32.mrb[63].mxu1 }
0x1c12   :  { %v12516_v47 = vpack.c.bf16 %v18064_v2, %v12429_v16 }
0x1c14   :  { %v18067_v60 = vpop.f32.mrb[64].mxu1  ;;  %16074 = vmatprep.subr.bf16.mxu0 %v12516_v47 }
0x1c15   :  { %v12439_v13 = vpop.f32.mrb[65].mxu1  ;;  %16075 = vmatpush3.bf16.msra.mxu0 %v12508_v34 }
0x1c16   :  { %v12517_v0 = vpack.c.bf16 %v18067_v60, %v12439_v13  ;;  %v23730_v60 = vld [vmem:[#allocation24] ss:$0 sm:$0xff] }
0x1c18   :  { %v18070_v51 = vpop.f32.mrb[66].mxu1  ;;  %16076 = vmatprep.subr.bf16.mxu0 %v12517_v0 }
0x1c19   :  { %v12449_v7 = vpop.f32.mrb[67].mxu1  ;;  %16077 = vmatpush3.bf16.msra.mxu0 %v12509_v22 }
0x1c1a   :  { %v12518_v58 = vpack.c.bf16 %v18070_v51, %v12449_v7 }
0x1c1c   :  { %v18073_v26 = vpop.f32.mrb[68].mxu1  ;;  %16078 = vmatprep.subr.bf16.mxu0 %v12518_v58 }
0x1c1d   :  { %v12459_v1 = vpop.f32.mrb[69].mxu1  ;;  %16079 = vmatpush3.bf16.msra.mxu0 %v12510_v3 }
0x1c1e   :  { %v12519_v57 = vpack.c.bf16 %v18073_v26, %v12459_v1 }
0x1c20   :  { %v18076_v40 = vpop.f32.mrb[70].mxu1  ;;  %16080 = vmatprep.subr.bf16.mxu0 %v12519_v57 }
0x1c21   :  { %v12469_v31 = vpop.f32.mrb[71].mxu1  ;;  %16081 = vmatpush3.bf16.msra.mxu0 %v12511_v36  ;;  %v25406_v36 = vld [vmem:[#allocation111_spill] sm:$0xff] }
0x1c22   :  { %v12520_v28 = vpack.c.bf16 %v18076_v40, %v12469_v31 }
0x1c24   :  { %v18079_v49 = vpop.f32.mrb[72].mxu1  ;;  %16082 = vmatprep.subr.bf16.mxu0 %v12520_v28 }
0x1c25   :  { %v12479_v24 = vpop.f32.mrb[73].mxu1  ;;  %16083 = vmatpush3.bf16.msra.mxu0 %v12512_v61  ;;  %v25412_v61 = vld [vmem:[#allocation116_spill] sm:$0xff] }
0x1c26   :  { %v12521_v59 = vpack.c.bf16 %v18079_v49, %v12479_v24 }
0x1c28   :  { %v18082_v43 = vpop.f32.mrb[74].mxu1  ;;  %16084 = vmatprep.subr.bf16.mxu0 %v12521_v59 }
0x1c29   :  { %v12489_v6 = vpop.f32.mrb[75].mxu1  ;;  %16085 = vmatpush3.bf16.msra.mxu0 %v12513_v55  ;;  %v552_v55 = vld [vmem:[%s25398_s17 + $0x8] sm:$0xff] }
0x1c2a   :  { %v12522_v10 = vpack.c.bf16 %v18082_v43, %v12489_v6  ;;  %v18250_v44 = vpack.c.bf16 %v552_v55, %v551_v27 }
0x1c2c   :  { %v18085_v4 = vpop.f32.mrb[76].mxu1  ;;  %16086 = vmatprep.subr.bf16.mxu0 %v12522_v10  ;;  %18251 = vmatprep.subr.bf16.mxu1 %v18250_v44 }
0x1c2d   :  { %v12499_v25 = vpop.f32.mrb[77].mxu1  ;;  %16087 = vmatpush3.bf16.msra.mxu0 %v12514_v45  ;;  %18253 = vmatpush3.bf16.msra.mxu1 %v18250_v44  ;;  %v554_v45 = vld [vmem:[%s25398_s17 + $0x18] sm:$0xff] }
0x1c2e   :  { %v12523_v21 = vpack.c.bf16 %v18085_v4, %v12499_v25  ;;  %v18254_v11 = vpack.c.bf16 %v554_v45, %v553_v48 }
0x1c30   :  { %16088 = vmatprep.subr.bf16.mxu0 %v12523_v21  ;;  %v18090_v42 = vpop.f32.mrb[78].mxu1  ;;  %18255 = vmatprep.subr.bf16.mxu1 %v18254_v11 }
0x1c31   :  { %16089 = vmatpush3.bf16.msra.mxu0 %v12515_v35  ;;  %v12690_v18 = vpop.f32.mrb[79].mxu1  ;;  %18257 = vmatpush3.bf16.msra.mxu1 %v18254_v11 }
0x1c32   :  { %18120 = vmatprep.subr.mxu1 %v555_v12 }
0x1c34   :  { %14635 = vmatmul.mubr.msk.bf16.vlgmr.msra.gmra.mrb[212].mxu0 %vm19909_vm7, %v25022_v20  ;;  %v23657_v56 = vpop.f32.mrb[80].mxu1  ;;  %vm25407_vm7 = vnez %v25406_v36 }
0x1c35   :  { %v12700_v17 = vpop.f32.mrb[81].mxu1  ;;  %14637 = vmatprep.mubr.msk.bf16.mxu0 %vm21017_vm15, %v25022_v20  ;;  %vm25409_vm15 = vnez %v25408_v62  ;;  %18121 = vmatpush3.msra.mxu1 %v555_v12 }
0x1c38   :  { %v23662_v37 = vpop.f32.mrb[82].mxu1 }
0x1c39   :  { %v23664_v15 = vpop.f32.mrb[83].mxu1 }
0x1c3c   :  { %14639 = vmatmul.mubr.msk.bf16.gmra.mrb[216].mxu0 %vm21047_vm0, %v25022_v20  ;;  %v23669_v19 = vpop.f32.mrb[84].mxu1  ;;  %vm25411_vm0 = vnez %v25410_v50 }
0x1c3d   :  { %v23671_v29 = vpop.f32.mrb[85].mxu1  ;;  %14641 = vmatprep.mubr.msk.bf16.mxu0 %vm21057_vm2, %v25022_v20  ;;  %vm25403_vm2 = vnez %v25402_v39 }
0x1c40   :  { %v23676_v63 = vpop.f32.mrb[86].mxu1 }
0x1c41   :  { %v23678_v41 = vpop.f32.mrb[87].mxu1 }
0x1c44   :  { %14643 = vmatmul.mubr.msk.bf16.gmra.mrb[220].mxu0 %vm21081_vm1, %v25022_v20  ;;  %v23683_v5 = vpop.f32.mrb[88].mxu1  ;;  %vm25413_vm1 = vnez %v25412_v61 }
0x1c45   :  { %v23685_v53 = vpop.f32.mrb[89].mxu1  ;;  %14645 = vmatprep.mubr.msk.bf16.mxu0 %vm21091_vm5, %v25022_v20  ;;  %vm25405_vm5 = vnez %v25404_v14 }
0x1c48   :  { %v23690_v23 = vpop.f32.mrb[90].mxu1 }
0x1c49   :  { %v23692_v52 = vpop.f32.mrb[91].mxu1 }
0x1c4c   :  { %14647 = vmatmul.mubr.msk.bf16.gmra.mrb[224].mxu0 %vm21115_vm10, %v25022_v20  ;;  %v23697_v32 = vpop.f32.mrb[92].mxu1  ;;  %vm25415_vm10 = vnez %v25414_v9 }
0x1c4d   :  { %v23699_v8 = vpop.f32.mrb[93].mxu1  ;;  %14649 = vmatprep.mubr.msk.bf16.mxu0 %vm25108_vm11, %v25022_v20  ;;  %vm25416_vm11 = vcmask 326656  }
0x1c4e   :  { %vm25417_vm14 = vmmov %vm25416_vm11 }
0x1c4f   :  { %vm25418_vm3 = vmmov %vm25416_vm11 }
0x1c50   :  { %vm25419_vm4 = vmmov %vm25418_vm3 }
0x1c51   :  { %vm25420_vm9 = vmmov %vm25418_vm3 }
0x1c52   :  { %vm25421_vm8 = vmmov %vm25418_vm3 }
0x1c53   :  { %vm25422_vm6 = vmmov %vm25418_vm3 }
0x1c54   :  { %14651 = vmatmul.mubr.msk.bf16.gmra.mrb[228].mxu0 %vm25403_vm2, %v25022_v20  ;;  %vm25423_vm13 = vmmov %vm25418_vm3 }
0x1c55   :  { %14653 = vmatprep.mubr.msk.bf16.mxu0 %vm25405_vm5, %v25022_v20  ;;  %vm25424_vm12 = vmmov %vm25418_vm3 }
0x1c56   :  { %vm25425_vm2 = vmmov %vm25418_vm3 }
0x1c57   :  { %vm25426_vm5 = vmmov %vm25425_vm2 }
0x1c5c   :  { %14655 = vmatmul.mubr.msk.bf16.gmra.mrb[232].mxu0 %vm25407_vm7, %v25022_v20  ;;  %vm25427_vm7 = vmmov %vm25425_vm2 }
0x1c5d   :  { %14657 = vmatprep.mubr.msk.bf16.mxu0 %vm25409_vm15, %v25022_v20  ;;  %vm25428_vm15 = vmmov %vm25425_vm2 }
0x1c64   :  { %14659 = vmatmul.mubr.msk.bf16.gmra.mrb[236].mxu0 %vm25411_vm0, %v25022_v20  ;;  %vm25429_vm0 = vmmov %vm25425_vm2 }
0x1c65   :  { %14661 = vmatprep.mubr.msk.bf16.mxu0 %vm25413_vm1, %v25022_v20  ;;  %vm25430_vm1 = vmmov %vm25429_vm0 }
0x1c6c   :  { %14663 = vmatmul.mubr.msk.bf16.gmra.mrb[244].mxu0 %vm25415_vm10, %v25022_v20  ;;  %vm25431_vm10 = vmmov %vm25429_vm0 }
0x1d07   :  { %v16090_v35 = vpop.f32.mrb[212].mxu0 }
0x1d08   :  { %v16091_v2 = vpop.f32.mrb[213].mxu0 }
0x1d09   :  { %v16092_v16 = vadd.f32 %v16091_v2, %v16090_v35  ;;  %v16093_v47 = vpop.f32.mrb[214].mxu0 }
0x1d0a   :  { %v16094_v20 = vpop.f32.mrb[215].mxu0 }
0x1d0b   :  { %v12691_v13 = vadd.f32 %v16092_v16, %v12690_v18  ;;  %v16095_v0 = vadd.f32 %v16094_v20, %v16093_v47 }
0x1d0d   :  { %v12775_v51 = vadd.f32 %v23730_v60, %v12691_v13  ;;  %v12696_v7 = vadd.f32 %v18090_v42, %v16095_v0 }
0x1d0f   :  { %v12791_v58 = vmax.f32 %v12775_v51, 0.0  ;;  %v12776_v26 = vadd.f32 %v23730_v60, %v12696_v7  ;;  %v16096_v1 = vpop.f32.mrb[216].mxu0 }
0x1d10   :  { %v16097_v57 = vpop.f32.mrb[217].mxu0 }
0x1d11   :  { %v12792_v40 = vmax.f32 %v12776_v26, 0.0  ;;  %v16098_v31 = vadd.f32 %v16097_v57, %v16096_v1  ;;  %v16099_v28 = vpop.f32.mrb[218].mxu0  ;;  %18122 = vmatprep.mubr.msk.f32.mxu1 %vm25416_vm11, %v12791_v58 }
0x1d12   :  { %v16100_v49 = vpop.f32.mrb[219].mxu0 }
0x1d13   :  { %v12701_v24 = vadd.f32 %v16098_v31, %v12700_v17  ;;  %v16101_v59 = vadd.f32 %v16100_v49, %v16099_v28  ;;  %18123 = vmatmul.mubr.msk.f32.vlgmr.msra.gmra.mrb[94].mxu1 %vm25417_vm14, %v12792_v40 }
0x1d15   :  { %v12777_v43 = vadd.f32 %v23730_v60, %v12701_v24  ;;  %v12706_v6 = vadd.f32 %v23657_v56, %v16101_v59 }
0x1d17   :  { %v12793_v10 = vmax.f32 %v12777_v43, 0.0  ;;  %v12778_v4 = vadd.f32 %v23730_v60, %v12706_v6  ;;  %v16102_v25 = vpop.f32.mrb[220].mxu0 }
0x1d18   :  { %v16103_v21 = vpop.f32.mrb[221].mxu0 }
0x1d19   :  { %v12794_v42 = vmax.f32 %v12778_v4, 0.0  ;;  %v16104_v18 = vadd.f32 %v16103_v21, %v16102_v25  ;;  %v16105_v46 = vpop.f32.mrb[222].mxu0  ;;  %18125 = vmatprep.mubr.msk.f32.mxu1 %vm25418_vm3, %v12793_v10 }
0x1d1a   :  { %v16106_v33 = vpop.f32.mrb[223].mxu0 }
0x1d1b   :  { %v12711_v17 = vadd.f32 %v16104_v18, %v23664_v15  ;;  %v16107_v30 = vadd.f32 %v16106_v33, %v16105_v46  ;;  %18126 = vmatmul.mubr.msk.f32.gmra.mrb[96].mxu1 %vm25419_vm4, %v12794_v42 }
0x1d1d   :  { %v12779_v38 = vadd.f32 %v23730_v60, %v12711_v17  ;;  %v12716_v56 = vadd.f32 %v23662_v37, %v16107_v30 }
0x1d1f   :  { %v12795_v54 = vmax.f32 %v12779_v38, 0.0  ;;  %v12780_v34 = vadd.f32 %v23730_v60, %v12716_v56  ;;  %v16108_v22 = vpop.f32.mrb[224].mxu0 }
0x1d20   :  { %v16109_v3 = vpop.f32.mrb[225].mxu0 }
0x1d21   :  { %v12796_v39 = vmax.f32 %v12780_v34, 0.0  ;;  %v16110_v14 = vadd.f32 %v16109_v3, %v16108_v22  ;;  %v16111_v36 = vpop.f32.mrb[226].mxu0  ;;  %18128 = vmatprep.mubr.msk.f32.mxu1 %vm25420_vm9, %v12795_v54  ;;  %v23777_v22 = vpop.permute.xlu1 %13018  ;;  %v23779_v3 = vld [vmem:[#allocation3] ss:$0 sm:$0xff] }
0x1d22   :  { %v16112_v62 = vpop.f32.mrb[227].mxu0 }
0x1d23   :  { %v12721_v15 = vadd.f32 %v16110_v14, %v23671_v29  ;;  %v16113_v50 = vadd.f32 %v16112_v62, %v16111_v36  ;;  %18129 = vmatmul.mubr.msk.f32.gmra.mrb[98].mxu1 %vm25421_vm8, %v12796_v39  ;;  %v23787_v62 = vpop.permute.xlu0 %13013 }
0x1d25   :  { %v12781_v61 = vadd.f32 %v23730_v60, %v12721_v15  ;;  %v12726_v37 = vadd.f32 %v23669_v19, %v16113_v50  ;;  %v23781_v39 = vpop.permute.xlu1 %13028 }
0x1d27   :  { %v12797_v9 = vmax.f32 %v12781_v61, 0.0  ;;  %v12782_v27 = vadd.f32 %v23730_v60, %v12726_v37  ;;  %v16114_v55 = vpop.f32.mrb[228].mxu0  ;;  %v23790_v37 = vpop.permute.xlu0 %13033 }
0x1d28   :  { %v16115_v44 = vpop.f32.mrb[229].mxu0 }
0x1d29   :  { %v12798_v48 = vmax.f32 %v12782_v27, 0.0  ;;  %v16116_v45 = vadd.f32 %v16115_v44, %v16114_v55  ;;  %v16117_v11 = vpop.f32.mrb[230].mxu0  ;;  %18131 = vmatprep.mubr.msk.f32.mxu1 %vm25422_vm6, %v12797_v9 }
0x1d2a   :  { %v16118_v12 = vpop.f32.mrb[231].mxu0 }
0x1d2b   :  { %v12731_v29 = vadd.f32 %v16116_v45, %v23678_v41  ;;  %v16119_v35 = vadd.f32 %v16118_v12, %v16117_v11  ;;  %18132 = vmatmul.mubr.msk.f32.gmra.mrb[100].mxu1 %vm25423_vm13, %v12798_v48  ;;  %v23795_v55 = vpop.permute.xlu0 %13043 }
0x1d2d   :  { %v12783_v2 = vadd.f32 %v23730_v60, %v12731_v29  ;;  %v12736_v19 = vadd.f32 %v23676_v63, %v16119_v35 }
0x1d2f   :  { %v12799_v16 = vmax.f32 %v12783_v2, 0.0  ;;  %v12784_v47 = vadd.f32 %v23730_v60, %v12736_v19  ;;  %v16120_v20 = vpop.f32.mrb[232].mxu0  ;;  %v23801_v29 = vpop.permute.xlu0 %13053 }
0x1d30   :  { %v16121_v13 = vpop.f32.mrb[233].mxu0 }
0x1d31   :  { %v12800_v0 = vmax.f32 %v12784_v47, 0.0  ;;  %v16122_v51 = vadd.f32 %v16121_v13, %v16120_v20  ;;  %v16123_v7 = vpop.f32.mrb[234].mxu0  ;;  %18134 = vmatprep.mubr.msk.f32.mxu1 %vm25424_vm12, %v12799_v16 }
0x1d32   :  { %v16124_v58 = vpop.f32.mrb[235].mxu0 }
0x1d33   :  { %v12741_v41 = vadd.f32 %v16122_v51, %v23685_v53  ;;  %v16125_v26 = vadd.f32 %v16124_v58, %v16123_v7  ;;  %18135 = vmatmul.mubr.msk.f32.gmra.mrb[102].mxu1 %vm25425_vm2, %v12800_v0  ;;  %v23805_v2 = vpop.permute.xlu0 %13063 }
0x1d35   :  { %v12785_v1 = vadd.f32 %v23730_v60, %v12741_v41  ;;  %v12746_v63 = vadd.f32 %v23683_v5, %v16125_v26 }
0x1d37   :  { %v12801_v57 = vmax.f32 %v12785_v1, 0.0  ;;  %v12786_v40 = vadd.f32 %v23730_v60, %v12746_v63  ;;  %v16126_v31 = vpop.f32.mrb[236].mxu0  ;;  %v23811_v0 = vpop.permute.xlu0 %13073 }
0x1d38   :  { %v16127_v28 = vpop.f32.mrb[237].mxu0 }
0x1d39   :  { %v12802_v49 = vmax.f32 %v12786_v40, 0.0  ;;  %v16128_v24 = vadd.f32 %v16127_v28, %v16126_v31  ;;  %v16129_v59 = vpop.f32.mrb[238].mxu0  ;;  %18137 = vmatprep.mubr.msk.f32.mxu1 %vm25426_vm5, %v12801_v57 }
0x1d3a   :  { %v16130_v43 = vpop.f32.mrb[239].mxu0 }
0x1d3b   :  { %v12751_v53 = vadd.f32 %v16128_v24, %v23692_v52  ;;  %v16131_v6 = vadd.f32 %v16130_v43, %v16129_v59  ;;  %18138 = vmatmul.mubr.msk.f32.gmra.mrb[104].mxu1 %vm25427_vm7, %v12802_v49  ;;  %v23815_v7 = vpop.permute.xlu0 %13083 }
0x1d3d   :  { %v12787_v10 = vadd.f32 %v23730_v60, %v12751_v53  ;;  %v12756_v5 = vadd.f32 %v23690_v23, %v16131_v6 }
0x1d3f   :  { %v12803_v4 = vmax.f32 %v12787_v10, 0.0  ;;  %v12788_v25 = vadd.f32 %v23730_v60, %v12756_v5  ;;  %v16132_v21 = vpop.f32.mrb[244].mxu0  ;;  %v13113_v57 = vpop.permute.xlu0 %13112 }
0x1d40   :  { %v16133_v42 = vpop.f32.mrb[245].mxu0 }
0x1d41   :  { %v12804_v18 = vmax.f32 %v12788_v25, 0.0  ;;  %v16134_v46 = vadd.f32 %v16133_v42, %v16132_v21  ;;  %v16135_v33 = vpop.f32.mrb[246].mxu0  ;;  %18140 = vmatprep.mubr.msk.f32.mxu1 %vm25428_vm15, %v12803_v4 }
0x1d42   :  { %v16136_v17 = vpop.f32.mrb[247].mxu0 }
0x1d43   :  { %v12761_v52 = vadd.f32 %v16134_v46, %v23699_v8  ;;  %v16137_v30 = vadd.f32 %v16136_v17, %v16135_v33  ;;  %18141 = vmatmul.mubr.msk.f32.gmra.mrb[106].mxu1 %vm25429_vm0, %v12804_v18  ;;  %v13227_v24 = vpop.permute.xlu0 %13226 }
0x1d45   :  { %v12789_v38 = vadd.f32 %v23730_v60, %v12761_v52  ;;  %v12766_v23 = vadd.f32 %v23697_v32, %v16137_v30 }
0x1d47   :  { %v12805_v56 = vmax.f32 %v12789_v38, 0.0  ;;  %v12790_v54 = vadd.f32 %v23730_v60, %v12766_v23  ;;  %v23785_v60 = vpop.permute.xlu1 %13023  ;;  %v23823_v53 = vpop.permute.xlu0 %13238 }
0x1d49   :  { %v12806_v34 = vmax.f32 %v12790_v54, 0.0  ;;  %18143 = vmatprep.mubr.msk.f32.mxu1 %vm25430_vm1, %v12805_v56 }
0x1d4b   :  { %18144 = vmatmul.mubr.msk.f32.gmra.mrb[108].mxu1 %vm25431_vm10, %v12806_v34  ;;  %v23792_v9 = vpop.permute.xlu1 %13038  ;;  %v13123_v21 = vpop.permute.xlu0 %13122 }
0x1d4f   :  { %v23797_v48 = vpop.permute.xlu1 %13048  ;;  %v23831_v52 = vpop.permute.xlu0 %13246 }
0x1d53   :  { %v23803_v35 = vpop.permute.xlu1 %13058  ;;  %v13133_v38 = vpop.permute.xlu0 %13132 }
0x1d57   :  { %v23807_v16 = vpop.permute.xlu1 %13068  ;;  %v23835_v56 = vpop.permute.xlu0 %13254 }
0x1d5b   :  { %v23813_v51 = vpop.permute.xlu1 %13078  ;;  %v23839_v34 = vpop.permute.xlu0 %13142 }
0x1d5f   :  { %v23817_v41 = vpop.permute.xlu1 %13088 }
0x1d63   :  { %v13118_v40 = vpop.permute.xlu1 %13117 }
0x1d67   :  { %v13231_v43 = vpop.permute.xlu1 %13230 }
0x1d6b   :  { %v13128_v10 = vpop.permute.xlu1 %13127 }
0x1d6f   :  { %v23827_v42 = vpop.permute.xlu1 %13234 }
0x1d73   :  { %v13138_v30 = vpop.permute.xlu1 %13137 }
0x1d77   :  { %v23833_v23 = vpop.permute.xlu1 %13242 }
0x1d7b   :  { %v23837_v54 = vpop.permute.xlu1 %13147 }
0x1de6   :  { %v18124_v8 = vpop.f32.mrb[94].mxu1 }
0x1de7   :  { %v12933_v14 = vadd.f32 %v18124_v8, %v23779_v3  ;;  %v12927_v36 = vpop.f32.mrb[95].mxu1  ;;  %v23841_v8 = vpop.permute.xlu1 %13250 }
0x1de8   :  { %v12928_v32 = vadd.f32 %v23779_v3, %v12927_v36 }
0x1de9   :  { %13331 = vperm.xlu0 %18602, %v12933_v14   ;;  %v23843_v14 = vpop.permute.xlu0 %13262 }
0x1dea   :  { %13326 = vperm.xlu1 %18604, %v12928_v32  }
0x1deb   :  { %v23845_v36 = vpop.permute.xlu1 %13157 }
0x1dee   :  { %v18127_v15 = vpop.f32.mrb[96].mxu1 }
0x1def   :  { %v12943_v50 = vadd.f32 %v18127_v15, %v23779_v3  ;;  %v12937_v61 = vpop.f32.mrb[97].mxu1  ;;  %v23849_v32 = vpop.permute.xlu1 %13258 }
0x1df0   :  { %v12938_v27 = vadd.f32 %v23779_v3, %v12937_v61 }
0x1df1   :  { %13341 = vperm.xlu1 %18604, %v12943_v50  }
0x1df3   :  { %v23853_v50 = vpop.permute.xlu1 %13167 }
0x1df5   :  { %13336 = vperm.xlu1 %18604, %v12938_v27  }
0x1df6   :  { %v18130_v44 = vpop.f32.mrb[98].mxu1 }
0x1df7   :  { %v12953_v45 = vadd.f32 %v18130_v44, %v23779_v3  ;;  %v12947_v11 = vpop.f32.mrb[99].mxu1  ;;  %v23857_v27 = vpop.permute.xlu1 %13266 }
0x1df8   :  { %v12948_v12 = vadd.f32 %v23779_v3, %v12947_v11 }
0x1df9   :  { %13351 = vperm.xlu1 %18604, %v12953_v45  }
0x1dfa   :  { %13346 = vperm.xlu0 %18602, %v12948_v12  }
0x1dfb   :  { %v23861_v45 = vpop.permute.xlu1 %13177 }
0x1dfe   :  { %v18133_v19 = vpop.f32.mrb[100].mxu1 }
0x1dff   :  { %v12963_v47 = vadd.f32 %v18133_v19, %v23779_v3  ;;  %v12957_v20 = vpop.f32.mrb[101].mxu1  ;;  %v23865_v12 = vpop.permute.xlu1 %13274  ;;  %v25432_v19 = vlaneseq }
0x1e00   :  { %v12958_v13 = vadd.f32 %v23779_v3, %v12957_v20 }
0x1e01   :  { %13361 = vperm.xlu1 %18604, %v12963_v47   ;;  %v13007_v47 = vand.u32 127, %v25432_v19 }
0x1e02   :  { %13356 = vperm.xlu0 %18602, %v12958_v13  }
0x1e03   :  { %vm13107_vm11 = vcmp.eq.s32.totalorder %v13007_v47, 1  ;;  %vm13008_vm14 = vcmp.eq.s32.totalorder %v13007_v47, 0  ;;  %vm13222_vm3 = vcmp.eq.s32.totalorder %v13007_v47, 2  ;;  %v23870_v13 = vpop.permute.xlu1 %13187  ;;  %vm13321_vm4 = vcmp.eq.s32.totalorder %v13007_v47, 3 }
0x1e06   :  { %v18136_v58 = vpop.f32.mrb[102].mxu1 }
0x1e07   :  { %v12973_v26 = vadd.f32 %v18136_v58, %v23779_v3  ;;  %v12967_v1 = vpop.f32.mrb[103].mxu1  ;;  %v25434_v58 = vmov 0.0  }
0x1e08   :  { %v12968_v63 = vadd.f32 %v23779_v3, %v12967_v1  ;;  %v23876_v1 = vsel %vm13008_vm14, 1.0, %v25434_v58 }
0x1e09   :  { %13371 = vperm.xlu1 %18604, %v12973_v26   ;;  %v23873_v26 = vsel %vm13107_vm11, 1.0, %v25434_v58 }
0x1e0a   :  { %13366 = vperm.xlu0 %18602, %v12968_v63   ;;  %v23879_v63 = vsel %vm13222_vm3, 1.0, %v25434_v58 }
0x1e0e   :  { %v18139_v31 = vpop.f32.mrb[104].mxu1 }
0x1e0f   :  { %v12983_v28 = vadd.f32 %v18139_v31, %v23779_v3  ;;  %v12977_v49 = vpop.f32.mrb[105].mxu1  ;;  %v13191_v31 = vmul.f32 %v23873_v26, %v13118_v40  ;;  %v23894_v40 = vsel %vm13321_vm4, 1.0, %v25434_v58 }
0x1e10   :  { %v12978_v59 = vadd.f32 %v23779_v3, %v12977_v49 }
0x1e11   :  { %13381 = vperm.xlu1 %18604, %v12983_v28   ;;  %v13190_v28 = vmul.f32 %v23873_v26, %v13113_v57 }
0x1e12   :  { %13376 = vperm.xlu0 %18602, %v12978_v59   ;;  %v13092_v59 = vmul.f32 %v23876_v1, %v23777_v22  ;;  %v13193_v22 = vmul.f32 %v23873_v26, %v13128_v10  ;;  %v13093_v10 = vmul.f32 %v23876_v1, %v23785_v60 }
0x1e14   :  { %v13207_v57 = vadd.f32 %v13191_v31, %v13092_v59  ;;  %v13292_v31 = vmul.f32 %v23879_v63, %v23823_v53  ;;  %v13095_v53 = vmul.f32 %v23876_v1, %v23790_v37  ;;  %v13197_v37 = vmul.f32 %v23873_v26, %v23837_v54 }
0x1e16   :  { %v18142_v6 = vpop.f32.mrb[106].mxu1 }
0x1e17   :  { %v12993_v5 = vadd.f32 %v18142_v6, %v23779_v3  ;;  %v12987_v4 = vpop.f32.mrb[107].mxu1  ;;  %v13290_v6 = vmul.f32 %v23879_v63, %v13231_v43 }
0x1e18   :  { %v12988_v25 = vadd.f32 %v23779_v3, %v12987_v4  ;;  %v13091_v4 = vmul.f32 %v23876_v1, %v23787_v62  ;;  %v13094_v62 = vmul.f32 %v23876_v1, %v23781_v39 }
0x1e19   :  { %13391 = vperm.xlu1 %18604, %v12993_v5   ;;  %v23888_v5 = vpop.permute.xlu1 %13282 }
0x1e1a   :  { %13386 = vperm.xlu0 %18602, %v12988_v25   ;;  %25435 = vst [vmem:[#allocation136_spill] sm:$0xff] %v23888_v5  ;;  %v13289_v25 = vmul.f32 %v23879_v63, %v13227_v24  ;;  %v13209_v58 = vadd.f32 %v13193_v22, %v13094_v62  ;;  %v13098_v62 = vmul.f32 %v23876_v1, %v23797_v48 }
0x1e1b   :  { %v13199_v48 = vmul.f32 %v23873_v26, %v23845_v36 }
0x1e1c   :  { %v13308_v59 = vadd.f32 %v13292_v31, %v13209_v58  ;;  %v13296_v31 = vmul.f32 %v23879_v63, %v23835_v56  ;;  %v13100_v56 = vmul.f32 %v23876_v1, %v23803_v35  ;;  %v13201_v35 = vmul.f32 %v23873_v26, %v23853_v50 }
0x1e1e   :  { %v18145_v18 = vpop.f32.mrb[108].mxu1 }
0x1e1f   :  { %v13003_v46 = vadd.f32 %v18145_v18, %v23779_v3  ;;  %v12997_v33 = vpop.f32.mrb[109].mxu1  ;;  %v13206_v18 = vadd.f32 %v13190_v28, %v13091_v4  ;;  %v13195_v4 = vmul.f32 %v23873_v26, %v13138_v30 }
0x1e20   :  { %v12998_v17 = vadd.f32 %v23779_v3, %v12997_v33  ;;  %v23847_v3 = vpop.permute.xlu0 %13152  ;;  %v13306_v33 = vadd.f32 %v13290_v6, %v13207_v57 }
0x1e21   :  { %13401 = vperm.xlu1 %18604, %v13003_v46   ;;  %v13305_v19 = vadd.f32 %v13289_v25, %v13206_v18  ;;  %v13194_v25 = vmul.f32 %v23873_v26, %v13133_v38  ;;  %v13294_v38 = vmul.f32 %v23879_v63, %v23831_v52 }
0x1e22   :  { %13396 = vperm.xlu0 %18602, %v12998_v17  }
0x1e24   :  { %v23851_v15 = vpop.permute.xlu0 %13270 }
0x1e28   :  { %v23855_v61 = vpop.permute.xlu0 %13162 }
0x1e2c   :  { %v23859_v44 = vpop.permute.xlu0 %13278 }
0x1e30   :  { %v23863_v11 = vpop.permute.xlu0 %13172 }
0x1e34   :  { %v23868_v20 = vpop.permute.xlu0 %13286 }
0x1e35   :  { %25433 = vst [vmem:[#allocation133_spill] sm:$0xff] %v23868_v20  ;;  %v13192_v20 = vmul.f32 %v23873_v26, %v13123_v21  ;;  %v13096_v21 = vmul.f32 %v23876_v1, %v23792_v9  ;;  %v13293_v9 = vmul.f32 %v23879_v63, %v23833_v23 }
0x1e37   :  { %v13208_v6 = vadd.f32 %v13192_v20, %v13093_v10  ;;  %v13211_v18 = vadd.f32 %v13195_v4, %v13096_v21  ;;  %v13213_v10 = vadd.f32 %v13197_v37, %v13098_v62  ;;  %v13198_v4 = vmul.f32 %v23873_v26, %v23847_v3 }
0x1e38   :  { %v23883_v49 = vpop.permute.xlu0 %13182  ;;  %v13297_v3 = vmul.f32 %v23879_v63, %v23849_v32  ;;  %v13101_v32 = vmul.f32 %v23876_v1, %v23805_v2 }
0x1e39   :  { %v13310_v22 = vadd.f32 %v13294_v38, %v13211_v18 }
0x1e68   :  { %v13332_v46 = vpop.permute.xlu0 %13331 }
0x1e69   :  { %v13405_v43 = vmul.f32 %v23894_v40, %v13332_v46  ;;  %v13327_v17 = vpop.permute.xlu1 %13326  ;;  %v13210_v46 = vadd.f32 %v13194_v25, %v13095_v53  ;;  %v13298_v53 = vmul.f32 %v23879_v63, %v23843_v14  ;;  %v13102_v14 = vmul.f32 %v23876_v1, %v23807_v16 }
0x1e6a   :  { %v13404_v47 = vmul.f32 %v23894_v40, %v13327_v17  ;;  %v13203_v16 = vmul.f32 %v23873_v26, %v23861_v45 }
0x1e6b   :  { %v13421_v24 = vadd.f32 %v13405_v43, %v13306_v33 }
0x1e6c   :  { %v13420_v5 = vadd.f32 %v13404_v47, %v13305_v19  ;;  %v13196_v19 = vmul.f32 %v23873_v26, %v23839_v34  ;;  %v13309_v47 = vadd.f32 %v13293_v9, %v13210_v46  ;;  %v13295_v34 = vmul.f32 %v23879_v63, %v23841_v8 }
0x1e6d   :  { %13437 = vst [vmem:[%s19426_s5 + $0x8] sm:$0xff] %v13421_v24  ;;  %v13097_v24 = vmul.f32 %v23876_v1, %v23795_v55  ;;  %v13099_v8 = vmul.f32 %v23876_v1, %v23801_v29 }
0x1e6e   :  { %13436 = vst [vmem:[%s19426_s5] sm:$0xff] %v13420_v5  ;;  %v13291_v5 = vmul.f32 %v23879_v63, %v23827_v42 }
0x1e6f   :  { %v13212_v54 = vadd.f32 %v13196_v19, %v13097_v24  ;;  %v13214_v36 = vadd.f32 %v13198_v4, %v13099_v8  ;;  %v13202_v19 = vmul.f32 %v23873_v26, %v23863_v11  ;;  %v13301_v11 = vmul.f32 %v23879_v63, %v23865_v12  ;;  %v25436_v4 = vld [vmem:[#allocation133_spill] sm:$0xff] }
0x1e70   :  { %v13342_v28 = vpop.permute.xlu1 %13341  ;;  %v13307_v20 = vadd.f32 %v13291_v5, %v13208_v6  ;;  %v13105_v12 = vmul.f32 %v23876_v1, %v23815_v7 }
0x1e71   :  { %v13407_v39 = vmul.f32 %v23894_v40, %v13342_v28  ;;  %v13313_v46 = vadd.f32 %v13297_v3, %v13214_v36 }
0x1e73   :  { %v13423_v60 = vadd.f32 %v13407_v39, %v13308_v59  ;;  %v13312_v59 = vadd.f32 %v13296_v31, %v13213_v10  ;;  %v13311_v39 = vadd.f32 %v13295_v34, %v13212_v54  ;;  %v13204_v34 = vmul.f32 %v23873_v26, %v23883_v49  ;;  %v25437_v49 = vld [vmem:[#allocation136_spill] sm:$0xff] }
0x1e74   :  { %v13337_v57 = vpop.permute.xlu1 %13336 }
0x1e75   :  { %13439 = vst [vmem:[%s19426_s5 + $0x18] sm:$0xff] %v13423_v60  ;;  %v13406_v30 = vmul.f32 %v23894_v40, %v13337_v57  ;;  %v13215_v60 = vadd.f32 %v13199_v48, %v13100_v56 }
0x1e77   :  { %v13422_v33 = vadd.f32 %v13406_v30, %v13307_v20  ;;  %v13314_v18 = vadd.f32 %v13298_v53, %v13215_v60  ;;  %v13200_v30 = vmul.f32 %v23873_v26, %v23855_v61  ;;  %v13299_v61 = vmul.f32 %v23879_v63, %v23857_v27 }
0x1e78   :  { %v13352_v42 = vpop.permute.xlu1 %13351  ;;  %v13103_v27 = vmul.f32 %v23876_v1, %v23811_v0 }
0x1e79   :  { %13438 = vst [vmem:[%s19426_s5 + $0x10] sm:$0xff] %v13422_v33  ;;  %v13409_v43 = vmul.f32 %v23894_v40, %v13352_v42  ;;  %v13347_v17 = vpop.permute.xlu0 %13346  ;;  %v13217_v42 = vadd.f32 %v13201_v35, %v13102_v14  ;;  %v13216_v50 = vadd.f32 %v13200_v30, %v13101_v32 }
0x1e7a   :  { %v13408_v52 = vmul.f32 %v23894_v40, %v13347_v17  ;;  %v13218_v45 = vadd.f32 %v13202_v19, %v13103_v27 }
0x1e7b   :  { %v13425_v23 = vadd.f32 %v13409_v43, %v13310_v22  ;;  %v13300_v22 = vmul.f32 %v23879_v63, %v23851_v15  ;;  %v13104_v15 = vmul.f32 %v23876_v1, %v23813_v51  ;;  %v13205_v51 = vmul.f32 %v23873_v26, %v23870_v13 }
0x1e7c   :  { %v13424_v58 = vadd.f32 %v13408_v52, %v13309_v47  ;;  %v13315_v47 = vadd.f32 %v13299_v61, %v13216_v50  ;;  %v13304_v26 = vmul.f32 %v23879_v63, %v25436_v4 }
0x1e7d   :  { %13441 = vst [vmem:[%s19426_s5 + $0x28] sm:$0xff] %v13425_v23  ;;  %v13316_v43 = vadd.f32 %v13300_v22, %v13217_v42  ;;  %v13219_v24 = vadd.f32 %v13203_v16, %v13104_v15 }
0x1e7e   :  { %13440 = vst [vmem:[%s19426_s5 + $0x20] sm:$0xff] %v13424_v58  ;;  %v13302_v58 = vmul.f32 %v23879_v63, %v23859_v44  ;;  %v13106_v44 = vmul.f32 %v23876_v1, %v23817_v41 }
0x1e80   :  { %v13362_v28 = vpop.permute.xlu1 %13361  ;;  %v13318_v54 = vadd.f32 %v13302_v58, %v13219_v24  ;;  %v13221_v13 = vadd.f32 %v13205_v51, %v13106_v44 }
0x1e81   :  { %v13411_v55 = vmul.f32 %v23894_v40, %v13362_v28  ;;  %v13357_v6 = vpop.permute.xlu0 %13356  ;;  %v13317_v28 = vadd.f32 %v13301_v11, %v13218_v45 }
0x1e82   :  { %v13410_v25 = vmul.f32 %v23894_v40, %v13357_v6  ;;  %v13220_v6 = vadd.f32 %v13204_v34, %v13105_v12  ;;  %v13320_v56 = vadd.f32 %v13304_v26, %v13221_v13 }
0x1e83   :  { %v13427_v21 = vadd.f32 %v13411_v55, %v13312_v59 }
0x1e84   :  { %v13426_v5 = vadd.f32 %v13410_v25, %v13311_v39  ;;  %v13303_v39 = vmul.f32 %v23879_v63, %v25437_v49 }
0x1e85   :  { %13443 = vst [vmem:[%s19426_s5 + $0x38] sm:$0xff] %v13427_v21 }
0x1e86   :  { %13442 = vst [vmem:[%s19426_s5 + $0x30] sm:$0xff] %v13426_v5  ;;  %v13319_v8 = vadd.f32 %v13303_v39, %v13220_v6 }
0x1e88   :  { %v13372_v57 = vpop.permute.xlu1 %13371 }
0x1e89   :  { %v13413_v29 = vmul.f32 %v23894_v40, %v13372_v57  ;;  %v13367_v20 = vpop.permute.xlu0 %13366 }
0x1e8a   :  { %v13412_v38 = vmul.f32 %v23894_v40, %v13367_v20 }
0x1e8b   :  { %v13429_v33 = vadd.f32 %v13413_v29, %v13314_v18 }
0x1e8c   :  { %v13428_v9 = vadd.f32 %v13412_v38, %v13313_v46 }
0x1e8d   :  { %13445 = vst [vmem:[%s19426_s5 + $0x48] sm:$0xff] %v13429_v33 }
0x1e8e   :  { %13444 = vst [vmem:[%s19426_s5 + $0x40] sm:$0xff] %v13428_v9 }
0x1e90   :  { %v13382_v37 = vpop.permute.xlu1 %13381 }
0x1e91   :  { %v13415_v2 = vmul.f32 %v23894_v40, %v13382_v37  ;;  %v13377_v17 = vpop.permute.xlu0 %13376 }
0x1e92   :  { %v13414_v52 = vmul.f32 %v23894_v40, %v13377_v17 }
0x1e93   :  { %v13431_v62 = vadd.f32 %v13415_v2, %v13316_v43 }
0x1e94   :  { %v13430_v23 = vadd.f32 %v13414_v52, %v13315_v47 }
0x1e95   :  { %13447 = vst [vmem:[%s19426_s5 + $0x58] sm:$0xff] %v13431_v62 }
0x1e96   :  { %13446 = vst [vmem:[%s19426_s5 + $0x50] sm:$0xff] %v13430_v23 }
0x1e98   :  { %v13392_v10 = vpop.permute.xlu1 %13391 }
0x1e99   :  { %v13417_v0 = vmul.f32 %v23894_v40, %v13392_v10  ;;  %v13387_v31 = vpop.permute.xlu0 %13386 }
0x1e9a   :  { %v13416_v59 = vmul.f32 %v23894_v40, %v13387_v31 }
0x1e9b   :  { %v13433_v48 = vadd.f32 %v13417_v0, %v13318_v54 }
0x1e9c   :  { %v13432_v55 = vadd.f32 %v13416_v59, %v13317_v28 }
0x1e9d   :  { %13449 = vst [vmem:[%s19426_s5 + $0x68] sm:$0xff] %v13433_v48 }
0x1e9e   :  { %13448 = vst [vmem:[%s19426_s5 + $0x60] sm:$0xff] %v13432_v55 }
0x1ea0   :  { %v13402_v25 = vpop.permute.xlu1 %13401 }
0x1ea1   :  { %v13419_v41 = vmul.f32 %v23894_v40, %v13402_v25  ;;  %v13397_v21 = vpop.permute.xlu0 %13396 }
0x1ea2   :  { %v13418_v7 = vmul.f32 %v23894_v40, %v13397_v21 }
0x1ea3   :  { %v13435_v1 = vadd.f32 %v13419_v41, %v13320_v56 }
0x1ea4   :  { %v13434_v5 = vadd.f32 %v13418_v7, %v13319_v8 }
0x1ea5   :  { %13451 = vst [vmem:[%s19426_s5 + $0x78] sm:$0xff] %v13435_v1 }
0x1ea6   :  { %13450 = vst [vmem:[%s19426_s5 + $0x70] sm:$0xff] %v13434_v5 }
0x1ea7   :  { %13456 = vsyncpa [#allocation6], 1 }
0x1ea8   :  { %13457 = vsyncpa [#allocation8], 1 }
0x1ea9   :  { %13458 = vsyncpa [#allocation11], 1 }
0x1eaa   :  { %13459 = vsyncpa [#allocation14], 1 }
0x1eab   :  { %13460 = vsyncpa [#allocation17], 1 }
0x1eac   :  { %13461 = vsyncpa [#allocation20], 1 }
0x1ead   :  { %13462 = vsyncpa [#allocation23], 1 }
0x1eae   :  { %13463 = vsyncpa [#allocation26], 1 }

</bundles_post_ra>
